<compile_context>
chip_gen: v5e
topology: v5e:2x2
jax: 0.10.0
libtpu: 0.0.40
codegen_flags: <defaults>
</compile_context>

<pallas_src>
import functools
import numpy as np

import jax
import jax.numpy as jnp
from jax.experimental import pallas as pl
from jax.experimental.pallas import tpu as pltpu


# 48 MiB scoped VMEM: a raise over the 16/32 MiB defaults on v5e/v6e and still
# under v7x's 64 MiB physical per-TensorCore budget.
_VMEM_LIMIT = 48 * 1024 * 1024


# ----------------------------------------------------------------------------
# Pallas kernels
# ----------------------------------------------------------------------------

def _epilogue(acc, bias, mode, scale):
    """Bias + activation epilogue, traced inline inside the matmul kernels."""
    if scale != 1.0:
        acc = acc * scale
    acc = acc + bias
    if mode == "none":
        return acc
    if mode == "tanh":
        return jnp.tanh(acc)
    n = acc.shape[-1] // 2
    feat = acc[:, :n]
    gate = acc[:, n:]
    if mode == "elu":
        feat = jnp.where(feat > 0.0, feat, jnp.exp(feat) - 1.0)
    else:  # relu
        feat = jnp.maximum(feat, 0.0)
    # sigmoid via EUP reciprocal (keeps the divide off the VALU slot)
    return feat * pl.reciprocal(1.0 + jnp.exp(-gate), approx=True)


def _mm1_kernel(mode, scale, p_ref, w_ref, b_ref, o_ref):
    """Single-K fused matmul: grid=(GM,).  No accumulator scratch needed."""
    acc = jnp.dot(p_ref[...], w_ref[...], preferred_element_type=jnp.float32)
    o_ref[...] = _epilogue(acc, b_ref[...], mode, scale).astype(o_ref.dtype)


def _mmk_kernel(mode, scale, p_ref, w_ref, b_ref, o_ref, acc_ref):
    """K-tiled fused matmul: grid=(GM, GK), GK innermost reduction."""
    @pl.when(pl.program_id(1) == 0)
    def _init():
        acc_ref[...] = jnp.zeros_like(acc_ref)

    acc_ref[...] += jnp.dot(p_ref[...], w_ref[...],
                            preferred_element_type=jnp.float32)

    @pl.when(pl.program_id(1) == pl.num_programs(1) - 1)
    def _fin():
        o_ref[...] = _epilogue(acc_ref[...], b_ref[...],
                               mode, scale).astype(o_ref.dtype)


def _ctx_attn_kernel(scale, out_scale, fp_ref, wt_ref, raw_ref, mmb_ref, o_ref,
                     m_sc, l_sc, acc_sc):
    """Flash-style contextual attention + transposed-conv matmul.

    Grid = (B, GF, GL); GL is the (innermost, "arbitrary") softmax axis.
      fp_ref : (TF, K)   bf16 foreground patches
      wt_ref : (K, TL)   bf16 normalized background patches (transposed)
      raw_ref: (TL, Nr)  bf16 raw background patches (deconv filters)
      mmb_ref: (2, TL)   f32  [validity mm row; additive -inf pad-bias row]
      o_ref  : (TF, Nr)  f32  attention output (pre col2im fold)
    Implements out = (softmax(scores*mm*scale) * mm) @ raw * out_scale with a
    running max/sum so only one L tile is resident at a time.
    """
    li = pl.program_id(2)

    @pl.when(li == 0)
    def _init():
        m_sc[...] = jnp.full_like(m_sc, -jnp.inf)
        l_sc[...] = jnp.zeros_like(l_sc)
        acc_sc[...] = jnp.zeros_like(acc_sc)

    s = jnp.dot(fp_ref[...], wt_ref[...], preferred_element_type=jnp.float32)
    mm = mmb_ref[0:1, :]          # (1, TL) validity
    pad_bias = mmb_ref[1:2, :]    # (1, TL) 0 for real cols, -1e30 for padding
    scaled = s * mm * scale + pad_bias

    m_new = jnp.maximum(m_sc[...], jnp.max(scaled, axis=-1, keepdims=True))
    alpha = jnp.exp(m_sc[...] - m_new)
    p = jnp.exp(scaled - m_new)
    l_sc[...] = alpha * l_sc[...] + jnp.sum(p, axis=-1, keepdims=True)
    pm = (p * mm).astype(raw_ref.dtype)
    acc_sc[...] = alpha * acc_sc[...] + jnp.dot(pm, raw_ref[...],
                                                preferred_element_type=jnp.float32)
    m_sc[...] = m_new

    @pl.when(li == pl.num_programs(2) - 1)
    def _fin():
        inv = pl.reciprocal(l_sc[...], approx=True)
        o_ref[...] = (acc_sc[...] * inv * out_scale).astype(o_ref.dtype)


# ----------------------------------------------------------------------------
# Pallas wrappers
# ----------------------------------------------------------------------------

def _choose_tm(M, tm):
    """Pick an M tile: big (amortize per-step overhead) but always >= 2 blocks
    when M allows it, so v7x's two TensorCores both get work."""
    if M <= 16:
        return M, 1
    half = ((M + 1) // 2 + 7) // 8 * 8
    TM = min(tm, half)
    return TM, pl.cdiv(M, TM)


def fused_matmul(p, w, bias, mode, scale=1.0, out_dtype=jnp.bfloat16,
                 tm=1024, tk=1024):
    """Fused matmul: (M, K) @ (K, N) + bias -> (M, nout) in out_dtype."""
    M, K = p.shape
    Kw, N = w.shape
    assert Kw == K
    nout = N if mode in ("none", "tanh") else N // 2

    TM, GM = _choose_tm(M, tm)
    p_bf = p.astype(jnp.bfloat16)
    w_bf = w.astype(jnp.bfloat16)
    b2 = bias.reshape(1, N).astype(jnp.float32)

    if K <= tk:
        kernel = functools.partial(_mm1_kernel, mode, float(scale))
        return pl.pallas_call(
            kernel,
            out_shape=jax.ShapeDtypeStruct((M, nout), out_dtype),
            grid=(GM,),
            in_specs=[
                pl.BlockSpec((TM, K), lambda i: (i, 0)),
                pl.BlockSpec((K, N), lambda i: (0, 0)),
                pl.BlockSpec((1, N), lambda i: (0, 0)),
            ],
            out_specs=pl.BlockSpec((TM, nout), lambda i: (i, 0)),
            compiler_params=pltpu.CompilerParams(
                dimension_semantics=("parallel",),
                vmem_limit_bytes=_VMEM_LIMIT),
        )(p_bf, w_bf, b2)

    # K > tk (not hit by this model's conv layers): tiled reduction.
    TK = tk
    Kp = pl.cdiv(K, TK) * TK
    if Kp != K:                          # zero-pad -> reduction stays exact
        p_bf = jnp.pad(p_bf, ((0, 0), (0, Kp - K)))
        w_bf = jnp.pad(w_bf, ((0, Kp - K), (0, 0)))
    GK = Kp // TK
    kernel = functools.partial(_mmk_kernel, mode, float(scale))
    return pl.pallas_call(
        kernel,
        out_shape=jax.ShapeDtypeStruct((M, nout), out_dtype),
        grid=(GM, GK),
        in_specs=[
            pl.BlockSpec((TM, TK), lambda i, k: (i, k)),
            pl.BlockSpec((TK, N), lambda i, k: (k, 0)),
            pl.BlockSpec((1, N), lambda i, k: (0, 0)),
        ],
        out_specs=pl.BlockSpec((TM, nout), lambda i, k: (i, 0)),
        scratch_shapes=[pltpu.VMEM((TM, N), jnp.float32)],
        compiler_params=pltpu.CompilerParams(
            dimension_semantics=("parallel", "arbitrary"),
            vmem_limit_bytes=_VMEM_LIMIT),
    )(p_bf, w_bf, b2)


def ctx_attn_deconv(f_p, w_t, raw, mm, softmax_scale, out_scale,
                    tf_=256, tl=2048):
    """f_p: (B,F,K), w_t: (B,K,L), raw: (B,L,Nr), mm: (L,) -> (B,F,Nr) f32."""
    B, F_, K = f_p.shape
    L = w_t.shape[2]
    Nr = raw.shape[2]

    if F_ <= tf_:
        TF, GF = F_, 1
    else:
        TF, GF = tf_, pl.cdiv(F_, tf_)

    if L <= tl:
        TL, GL, Lp = L, 1, L
    else:
        TL = tl
        GL = pl.cdiv(L, TL)
        Lp = GL * TL

    # row 0: per-patch validity; row 1: additive bias (-1e30 on padded columns
    # so they contribute nothing to the online-softmax denominator).
    mm_row = jnp.pad(mm.reshape(1, L).astype(jnp.float32), ((0, 0), (0, Lp - L)))
    bias_row = jnp.concatenate(
        [jnp.zeros((1, L), jnp.float32),
         jnp.full((1, Lp - L), -1e30, jnp.float32)], axis=1)
    mmb = jnp.concatenate([mm_row, bias_row], axis=0)

    if Lp != L:
        w_t = jnp.pad(w_t, ((0, 0), (0, 0), (0, Lp - L)))
        raw = jnp.pad(raw, ((0, 0), (0, Lp - L), (0, 0)))

    kernel = functools.partial(_ctx_attn_kernel, float(softmax_scale),
                               float(out_scale))
    return pl.pallas_call(
        kernel,
        out_shape=jax.ShapeDtypeStruct((B, F_, Nr), jnp.float32),
        grid=(B, GF, GL),
        in_specs=[
            pl.BlockSpec((None, TF, K), lambda b, i, l: (b, i, 0)),
            pl.BlockSpec((None, K, TL), lambda b, i, l: (b, 0, l)),
            pl.BlockSpec((None, TL, Nr), lambda b, i, l: (b, l, 0)),
            pl.BlockSpec((2, TL), lambda b, i, l: (0, l)),
        ],
        out_specs=pl.BlockSpec((None, TF, Nr), lambda b, i, l: (b, i, 0)),
        scratch_shapes=[pltpu.VMEM((TF, 1), jnp.float32),
                        pltpu.VMEM((TF, 1), jnp.float32),
                        pltpu.VMEM((TF, Nr), jnp.float32)],
        compiler_params=pltpu.CompilerParams(
            dimension_semantics=("parallel", "parallel", "arbitrary"),
            vmem_limit_bytes=_VMEM_LIMIT),
    )(f_p.astype(jnp.bfloat16), w_t.astype(jnp.bfloat16),
      raw.astype(jnp.bfloat16), mmb)


# ----------------------------------------------------------------------------
# Plain-JAX glue: TF-SAME padding, im2col, TF-style NN downsampling
# ----------------------------------------------------------------------------

def same_pad_nhwc(x, k, stride, rate):
    """TensorFlow 'SAME' zero padding (matches reference same_padding)."""
    H, W = x.shape[1], x.shape[2]
    out_h = -(-H // stride)
    out_w = -(-W // stride)
    eff = (k - 1) * rate + 1
    pad_h = max((out_h - 1) * stride + eff - H, 0)
    pad_w = max((out_w - 1) * stride + eff - W, 0)
    pt, pb = pad_h // 2, pad_h - pad_h // 2
    pleft, pr = pad_w // 2, pad_w - pad_w // 2
    return jnp.pad(x, ((0, 0), (pt, pb), (pleft, pr), (0, 0)))


def extract_patches_nhwc(x, k, stride, rate):
    """Sliding blocks from an (already padded) NHWC tensor.

    Returns (B, OH, OW, k, k, C)."""
    B, H, W, C = x.shape
    OH = (H - (k - 1) * rate - 1) // stride + 1
    OW = (W - (k - 1) * rate - 1) // stride + 1
    rows = []
    for kh in range(k):
        cols = []
        for kw in range(k):
            sl = x[:,
                   kh * rate: kh * rate + (OH - 1) * stride + 1: stride,
                   kw * rate: kw * rate + (OW - 1) * stride + 1: stride, :]
            cols.append(sl)
        rows.append(jnp.stack(cols, axis=3))      # (B, OH, OW, k, C)
    return jnp.stack(rows, axis=3)                # (B, OH, OW, k, k, C)


def downsample_nn_tf(x, n):
    """NN downsampling with TF align_corners=True semantics (NHWC)."""
    H, W = x.shape[1], x.shape[2]
    oh, ow = H // n, W // n
    hi = np.floor(np.linspace(0.0, H - 1.0, oh) + 0.5).astype(np.int32)
    wi = np.floor(np.linspace(0.0, W - 1.0, ow) + 0.5).astype(np.int32)
    return x[:, hi][:, :, wi]


# ----------------------------------------------------------------------------
# GConv / GDeConv
# ----------------------------------------------------------------------------

def make_gconv(key, cin, cout, k, stride=1, rate=1, activation="elu"):
    nconv = cout if (cout == 3 or activation is None) else 2 * cout
    fan_out = nconv * k * k
    bound = float(np.sqrt(6.0 / fan_out))
    w = jax.random.uniform(key, (k, k, cin, nconv), jnp.float32, -bound, bound)
    mode = "none" if (cout == 3 or activation is None) else activation
    # pre-reshape + pre-cast once at init: (k*k*cin, nconv) bf16
    return {"w": w.reshape(k * k * cin, nconv).astype(jnp.bfloat16),
            "b": jnp.zeros((nconv,), jnp.float32),
            "k": k, "stride": stride, "rate": rate, "mode": mode}


def _conv_from_padded(xp, prm, fuse_tanh=False, out_dtype=jnp.bfloat16):
    k, stride, rate = prm["k"], prm["stride"], prm["rate"]
    mode = "tanh" if (fuse_tanh and prm["mode"] == "none") else prm["mode"]
    patches = extract_patches_nhwc(xp, k, stride, rate)
    B, OH, OW = patches.shape[:3]
    p = patches.reshape(B * OH * OW, -1)            # batch folded into M
    out = fused_matmul(p, prm["w"], prm["b"], mode, out_dtype=out_dtype)
    return out.reshape(B, OH, OW, -1)


def gconv_apply(x, prm, fuse_tanh=False, out_dtype=jnp.bfloat16):
    xp = same_pad_nhwc(x, prm["k"], prm["stride"], prm["rate"])
    return _conv_from_padded(xp, prm, fuse_tanh, out_dtype)


def gdeconv_apply(x, prm):
    # x2 NN upsample + SAME(k=3,s=1) pad folded into ONE gather (avoids
    # materializing the 4x repeated activation before the 9x im2col).
    B, H, W, C = x.shape
    xp = jnp.pad(x, ((0, 0), (1, 1), (1, 1), (0, 0)))
    hidx = np.concatenate([[0], np.arange(2 * H) // 2 + 1, [H + 1]]).astype(np.int32)
    widx = np.concatenate([[0], np.arange(2 * W) // 2 + 1, [W + 1]]).astype(np.int32)
    xup = xp[:, hidx][:, :, widx]                   # (B, 2H+2, 2W+2, C), pre-padded
    return _conv_from_padded(xup, prm)


# ----------------------------------------------------------------------------
# Contextual attention (ksize=3, stride=1, rate=2, fuse=False, scale=10)
# ----------------------------------------------------------------------------

def contextual_attention(f, mask, ksize=3, rate=2, softmax_scale=10.0, n_down=2):
    """f is both foreground and background (reference calls it with f, f)."""
    B, H, W, C = f.shape
    kernel = 2 * rate

    # raw background patches (transposed-conv filters): (B, L, kernel*kernel*C)
    b_pad_raw = same_pad_nhwc(f, kernel, rate, 1)
    raw_p = extract_patches_nhwc(b_pad_raw, kernel, rate, 1)
    rh, rw = raw_p.shape[1], raw_p.shape[2]
    L = rh * rw
    raw_mat = raw_p.reshape(B, L, kernel * kernel * C)

    # matching happens at the downsampled resolution
    fd = downsample_nn_tf(f, rate)
    fh, fw = fd.shape[1], fd.shape[2]

    bd_pad = same_pad_nhwc(fd, ksize, 1, 1)
    w_p = extract_patches_nhwc(bd_pad, ksize, 1, 1).reshape(B, L, ksize * ksize * C)

    # mask -> per-patch validity (first batch element, like the reference)
    mask_ds = downsample_nn_tf(mask, (2 ** n_down) * rate)
    m_pad = same_pad_nhwc(mask_ds, ksize, 1, 1)
    m_p = extract_patches_nhwc(m_pad, ksize, 1, 1)[0].reshape(L, -1)
    mm = (jnp.mean(m_p, axis=1) == 0.0).astype(jnp.float32)          # (L,)

    # unit-normalized background patches (f32 norm), transposed to (B, K, L)
    w_p32 = w_p.astype(jnp.float32)
    norm = jnp.maximum(jnp.sqrt(jnp.sum(w_p32 * w_p32, axis=2, keepdims=True)), 1e-4)
    w_normed_t = jnp.transpose(w_p32 / norm, (0, 2, 1))

    # foreground patches (B, F, K)
    fd_pad = same_pad_nhwc(fd, ksize, 1, 1)
    f_p = extract_patches_nhwc(fd_pad, ksize, 1, 1).reshape(
        B, fh * fw, ksize * ksize * C)

    # fused flash-style kernel: (softmax(f_p @ w_t * mm * scale) * mm) @ raw / 4
    z = ctx_attn_deconv(f_p, w_normed_t, raw_mat, mm, softmax_scale, 0.25)

    # col2im overlap-add fold == conv_transpose2d(stride=rate, padding=1)
    z = z.reshape(B, fh, fw, kernel, kernel, C)
    outp = jnp.zeros((B, rate * fh + 2, rate * fw + 2, C), jnp.float32)
    for kh in range(kernel):
        for kw in range(kernel):
            outp = outp.at[:, kh:kh + rate * fh:rate,
                           kw:kw + rate * fw:rate, :].add(z[:, :, :, kh, kw, :])
    y = outp[:, 1:1 + rate * fh, 1:1 + rate * fw, :]
    return y.astype(jnp.bfloat16)                                    # (B, H, W, C)


# ----------------------------------------------------------------------------
# Generator
# ----------------------------------------------------------------------------

def init_generator(key, cnum_in=5, cnum=16):
    keys = iter(jax.random.split(key, 50))
    p = {}
    g = lambda *a, **kw: make_gconv(next(keys), *a, **kw)
    # stage 1
    p["conv1"] = g(cnum_in, cnum // 2, 5, 1)
    p["conv2_downsample"] = g(cnum // 2, cnum, 3, 2)
    p["conv3"] = g(cnum, cnum, 3, 1)
    p["conv4_downsample"] = g(cnum, 2 * cnum, 3, 2)
    p["conv5"] = g(2 * cnum, 2 * cnum, 3, 1)
    p["conv6"] = g(2 * cnum, 2 * cnum, 3, 1)
    p["conv7_atrous"] = g(2 * cnum, 2 * cnum, 3, 1, 2)
    p["conv8_atrous"] = g(2 * cnum, 2 * cnum, 3, 1, 4)
    p["conv9_atrous"] = g(2 * cnum, 2 * cnum, 3, 1, 8)
    p["conv10_atrous"] = g(2 * cnum, 2 * cnum, 3, 1, 16)
    p["conv11"] = g(2 * cnum, 2 * cnum, 3, 1)
    p["conv12"] = g(2 * cnum, 2 * cnum, 3, 1)
    p["conv13_upsample"] = g(2 * cnum, cnum, 3, 1)
    p["conv14"] = g(cnum, cnum, 3, 1)
    p["conv15_upsample"] = g(cnum, cnum // 2, 3, 1)
    p["conv16"] = g(cnum // 2, cnum // 4, 3, 1)
    p["conv17"] = g(cnum // 4, 3, 3, 1, 1, None)
    # stage 2: hallucination branch
    p["xconv1"] = g(3, cnum // 2, 5, 1)
    p["xconv2_downsample"] = g(cnum // 2, cnum // 2, 3, 2)
    p["xconv3"] = g(cnum // 2, cnum, 3, 1)
    p["xconv4_downsample"] = g(cnum, cnum, 3, 2)
    p["xconv5"] = g(cnum, 2 * cnum, 3, 1)
    p["xconv6"] = g(2 * cnum, 2 * cnum, 3, 1)
    p["xconv7_atrous"] = g(2 * cnum, 2 * cnum, 3, 1, 2)
    p["xconv8_atrous"] = g(2 * cnum, 2 * cnum, 3, 1, 4)
    p["xconv9_atrous"] = g(2 * cnum, 2 * cnum, 3, 1, 8)
    p["xconv10_atrous"] = g(2 * cnum, 2 * cnum, 3, 1, 16)
    # stage 2: attention branch
    p["pmconv1"] = g(3, cnum // 2, 5, 1)
    p["pmconv2_downsample"] = g(cnum // 2, cnum // 2, 3, 2)
    p["pmconv3"] = g(cnum // 2, cnum, 3, 1)
    p["pmconv4_downsample"] = g(cnum, 2 * cnum, 3, 2)
    p["pmconv5"] = g(2 * cnum, 2 * cnum, 3, 1)
    p["pmconv6"] = g(2 * cnum, 2 * cnum, 3, 1, 1, "relu")
    p["pmconv9"] = g(2 * cnum, 2 * cnum, 3, 1)
    p["pmconv10"] = g(2 * cnum, 2 * cnum, 3, 1)
    # merge
    p["allconv11"] = g(4 * cnum, 2 * cnum, 3, 1)
    p["allconv12"] = g(2 * cnum, 2 * cnum, 3, 1)
    p["allconv13_upsample"] = g(2 * cnum, cnum, 3, 1)
    p["allconv14"] = g(cnum, cnum, 3, 1)
    p["allconv15_upsample"] = g(cnum, cnum // 2, 3, 1)
    p["allconv16"] = g(cnum // 2, cnum // 4, 3, 1)
    p["allconv17"] = g(cnum // 4, 3, 3, 1, 1, None)
    return p


def generator_forward(params, x_nchw, mask_nchw):
    xin = jnp.transpose(x_nchw, (0, 2, 3, 1)).astype(jnp.float32)        # NHWC
    mask = jnp.transpose(mask_nchw, (0, 2, 3, 1)).astype(jnp.float32)    # NHWC
    x = xin.astype(jnp.bfloat16)

    # ---- stage 1 ----
    h = gconv_apply(x, params["conv1"])
    h = gconv_apply(h, params["conv2_downsample"])
    h = gconv_apply(h, params["conv3"])
    h = gconv_apply(h, params["conv4_downsample"])
    h = gconv_apply(h, params["conv5"])
    h = gconv_apply(h, params["conv6"])
    h = gconv_apply(h, params["conv7_atrous"])
    h = gconv_apply(h, params["conv8_atrous"])
    h = gconv_apply(h, params["conv9_atrous"])
    h = gconv_apply(h, params["conv10_atrous"])
    h = gconv_apply(h, params["conv11"])
    h = gconv_apply(h, params["conv12"])
    h = gdeconv_apply(h, params["conv13_upsample"])
    h = gconv_apply(h, params["conv14"])
    h = gdeconv_apply(h, params["conv15_upsample"])
    h = gconv_apply(h, params["conv16"])
    x_stage1 = gconv_apply(h, params["conv17"], fuse_tanh=True,
                           out_dtype=jnp.float32)                        # tanh fused

    # paste stage-1 result into the hole
    xnow = x_stage1 * mask + xin[..., 0:3] * (1.0 - mask)
    xnow = xnow.astype(jnp.bfloat16)

    # ---- stage 2: hallucination branch ----
    h = gconv_apply(xnow, params["xconv1"])
    h = gconv_apply(h, params["xconv2_downsample"])
    h = gconv_apply(h, params["xconv3"])
    h = gconv_apply(h, params["xconv4_downsample"])
    h = gconv_apply(h, params["xconv5"])
    h = gconv_apply(h, params["xconv6"])
    h = gconv_apply(h, params["xconv7_atrous"])
    h = gconv_apply(h, params["xconv8_atrous"])
    h = gconv_apply(h, params["xconv9_atrous"])
    h = gconv_apply(h, params["xconv10_atrous"])
    x_hallu = h

    # ---- stage 2: contextual-attention branch ----
    h = gconv_apply(xnow, params["pmconv1"])
    h = gconv_apply(h, params["pmconv2_downsample"])
    h = gconv_apply(h, params["pmconv3"])
    h = gconv_apply(h, params["pmconv4_downsample"])
    h = gconv_apply(h, params["pmconv5"])
    h = gconv_apply(h, params["pmconv6"])
    h = contextual_attention(h, mask, ksize=3, rate=2,
                             softmax_scale=10.0, n_down=2)
    h = gconv_apply(h, params["pmconv9"])
    h = gconv_apply(h, params["pmconv10"])
    pm = h

    # ---- merge ----
    h = jnp.concatenate([x_hallu, pm], axis=-1)
    h = gconv_apply(h, params["allconv11"])
    h = gconv_apply(h, params["allconv12"])
    h = gdeconv_apply(h, params["allconv13_upsample"])
    h = gconv_apply(h, params["allconv14"])
    h = gdeconv_apply(h, params["allconv15_upsample"])
    h = gconv_apply(h, params["allconv16"])
    x_stage2 = gconv_apply(h, params["allconv17"], fuse_tanh=True,
                           out_dtype=jnp.float32)                        # tanh fused

    # back to NCHW
    return (jnp.transpose(x_stage1, (0, 3, 1, 2)),
            jnp.transpose(x_stage2, (0, 3, 1, 2)))


# ----------------------------------------------------------------------------

if __name__ == "__main__":
    key = jax.random.PRNGKey(0)
    k_x, k_p = jax.random.split(key)

    B, CNUM_IN, HW = 2, 5, 16
    CNUM = 16

    x = jax.random.uniform(k_x, (B, CNUM_IN, HW, HW), jnp.float32, -1.0, 1.0)
    mask_np = np.zeros((1, 1, HW, HW), np.float32)
    mask_np[:, :, 8:16, 8:16] = 1.0        # binary hole mask
    mask = jnp.asarray(mask_np)

    params = init_generator(k_p, cnum_in=CNUM_IN, cnum=CNUM)

    # jit the whole forward so the im2col glue fuses and all pallas_calls
    # dispatch as one XLA program (weights are closed over as constants).
    fwd = jax.jit(functools.partial(generator_forward, params))

    x_stage1, x_stage2 = fwd(x, mask)
    jax.block_until_ready((x_stage1, x_stage2))

    assert x_stage1.shape == (B, 3, HW, HW), x_stage1.shape
    assert x_stage2.shape == (B, 3, HW, HW), x_stage2.shape
    assert bool(jnp.isfinite(x_stage1).all()) and bool(jnp.isfinite(x_stage2).all())
    print("KERNEL_OK")
</pallas_src>

<mosaic_0001>
module attributes {stable_mosaic.version = 11 : i64} {
  func.func @_mm1_kernel(%arg0: i32, %arg1: memref<256x125xbf16, #tpu.memory_space<vmem>>, %arg2: memref<125x16xbf16, #tpu.memory_space<vmem>>, %arg3: memref<1x16xf32, #tpu.memory_space<vmem>>, %arg4: memref<256x8xbf16, #tpu.memory_space<vmem>>) attributes {dimension_semantics = [#tpu.dimension_semantics<parallel>], iteration_bounds = array<i64: 2>, scalar_prefetch = 0 : i64, scratch_operands = 0 : i64, tpu.core_type = #tpu.core_type<tc>, window_params = [{transform_indices = @transform_0, window_bounds = array<i64: 256, 125>}, {pipeline_mode = #tpu.pipeline_mode<synchronous>, transform_indices = @transform_1, window_bounds = array<i64: 125, 16>}, {pipeline_mode = #tpu.pipeline_mode<synchronous>, transform_indices = @transform_2, window_bounds = array<i64: 1, 16>}, {transform_indices = @transform_3, window_bounds = array<i64: 256, 8>}]} {
    %c0 = arith.constant 0 : index
    %c0_0 = arith.constant 0 : index
    %0 = vector.load %arg1[%c0, %c0_0] : memref<256x125xbf16, #tpu.memory_space<vmem>>, vector<256x125xbf16>
    %c0_1 = arith.constant 0 : index
    %c0_2 = arith.constant 0 : index
    %1 = vector.load %arg2[%c0_1, %c0_2] : memref<125x16xbf16, #tpu.memory_space<vmem>>, vector<125x16xbf16>
    %cst = arith.constant dense<0.000000e+00> : vector<256x16xf32>
    %2 = tpu.matmul %0, %1, %cst {dimension_numbers = #tpu.dot_dimension_numbers<[1], [0], [0], [1], [0, 0, 1, 1], [], []>} : vector<256x125xbf16>, vector<125x16xbf16>, vector<256x16xf32> -> vector<256x16xf32>
    %c0_3 = arith.constant 0 : index
    %c0_4 = arith.constant 0 : index
    %3 = vector.load %arg3[%c0_3, %c0_4] : memref<1x16xf32, #tpu.memory_space<vmem>>, vector<1x16xf32>
    %4 = vector.broadcast %3 : vector<1x16xf32> to vector<256x16xf32>
    %5 = arith.addf %2, %4 : vector<256x16xf32>
    %6 = vector.extract_strided_slice %5 {offsets = [0, 0], sizes = [256, 8], strides = [1, 1]} : vector<256x16xf32> to vector<256x8xf32>
    %7 = vector.extract_strided_slice %5 {offsets = [0, 8], sizes = [256, 8], strides = [1, 1]} : vector<256x16xf32> to vector<256x8xf32>
    %cst_5 = arith.constant 0.000000e+00 : f32
    %8 = vector.broadcast %cst_5 : f32 to vector<256x8xf32>
    %9 = arith.cmpf ogt, %6, %8 : vector<256x8xf32>
    %10 = math.exp %6 : vector<256x8xf32>
    %cst_6 = arith.constant 1.000000e+00 : f32
    %11 = vector.broadcast %cst_6 : f32 to vector<256x8xf32>
    %12 = arith.subf %10, %11 : vector<256x8xf32>
    %13 = arith.select %9, %6, %12 : vector<256x8xi1>, vector<256x8xf32>
    %cst_7 = arith.constant 0.000000e+00 : f32
    %14 = vector.broadcast %cst_7 : f32 to vector<256x8xf32>
    %15 = arith.subf %14, %7 : vector<256x8xf32>
    %16 = math.exp %15 : vector<256x8xf32>
    %cst_8 = arith.constant 1.000000e+00 : f32
    %17 = vector.broadcast %cst_8 : f32 to vector<256x8xf32>
    %18 = arith.addf %17, %16 : vector<256x8xf32>
    %19 = tpu.reciprocal %18 {approx = true} : vector<256x8xf32> -> vector<256x8xf32>
    %20 = arith.mulf %13, %19 : vector<256x8xf32>
    %21 = arith.truncf %20 : vector<256x8xf32> to vector<256x8xbf16>
    %c0_9 = arith.constant 0 : index
    %c0_10 = arith.constant 0 : index
    %22 = vector.load %arg4[%c0_9, %c0_10] : memref<256x8xbf16, #tpu.memory_space<vmem>>, vector<256x8xbf16>
    tpu.vector_store %arg4[%c0_9, %c0_10], %21 {strides = array<i32>} : memref<256x8xbf16, #tpu.memory_space<vmem>>, vector<256x8xbf16>,
    return
  }
  func.func @transform_0(%arg0: i32) -> (i32, i32) {
    %c0_i32 = arith.constant 0 : i32
    %c0_i32_0 = arith.constant 0 : i32
    return %arg0, %c0_i32 : i32, i32
  }
  func.func @transform_1(%arg0: i32) -> (i32, i32) {
    %c0_i32 = arith.constant 0 : i32
    %c0_i32_0 = arith.constant 0 : i32
    %c0_i32_1 = arith.constant 0 : i32
    return %c0_i32, %c0_i32_0 : i32, i32
  }
  func.func @transform_2(%arg0: i32) -> (i32, i32) {
    %c0_i32 = arith.constant 0 : i32
    %c0_i32_0 = arith.constant 0 : i32
    %c0_i32_1 = arith.constant 0 : i32
    return %c0_i32, %c0_i32_0 : i32, i32
  }
  func.func @transform_3(%arg0: i32) -> (i32, i32) {
    %c0_i32 = arith.constant 0 : i32
    %c0_i32_0 = arith.constant 0 : i32
    return %arg0, %c0_i32 : i32, i32
  }
}

module attributes {stable_mosaic.version = 11 : i64} {
  func.func @_mm1_kernel(%arg0: i32, %arg1: memref<64x72xbf16, #tpu.memory_space<vmem>>, %arg2: memref<72x32xbf16, #tpu.memory_space<vmem>>, %arg3: memref<1x32xf32, #tpu.memory_space<vmem>>, %arg4: memref<64x16xbf16, #tpu.memory_space<vmem>>) attributes {dimension_semantics = [#tpu.dimension_semantics<parallel>], iteration_bounds = array<i64: 2>, scalar_prefetch = 0 : i64, scratch_operands = 0 : i64, tpu.core_type = #tpu.core_type<tc>, window_params = [{transform_indices = @transform_0, window_bounds = array<i64: 64, 72>}, {pipeline_mode = #tpu.pipeline_mode<synchronous>, transform_indices = @transform_1, window_bounds = array<i64: 72, 32>}, {pipeline_mode = #tpu.pipeline_mode<synchronous>, transform_indices = @transform_2, window_bounds = array<i64: 1, 32>}, {transform_indices = @transform_3, window_bounds = array<i64: 64, 16>}]} {
    %c0 = arith.constant 0 : index
    %c0_0 = arith.constant 0 : index
    %0 = vector.load %arg1[%c0, %c0_0] : memref<64x72xbf16, #tpu.memory_space<vmem>>, vector<64x72xbf16>
    %c0_1 = arith.constant 0 : index
    %c0_2 = arith.constant 0 : index
    %1 = vector.load %arg2[%c0_1, %c0_2] : memref<72x32xbf16, #tpu.memory_space<vmem>>, vector<72x32xbf16>
    %cst = arith.constant dense<0.000000e+00> : vector<64x32xf32>
    %2 = tpu.matmul %0, %1, %cst {dimension_numbers = #tpu.dot_dimension_numbers<[1], [0], [0], [1], [0, 0, 1, 1], [], []>} : vector<64x72xbf16>, vector<72x32xbf16>, vector<64x32xf32> -> vector<64x32xf32>
    %c0_3 = arith.constant 0 : index
    %c0_4 = arith.constant 0 : index
    %3 = vector.load %arg3[%c0_3, %c0_4] : memref<1x32xf32, #tpu.memory_space<vmem>>, vector<1x32xf32>
    %4 = vector.broadcast %3 : vector<1x32xf32> to vector<64x32xf32>
    %5 = arith.addf %2, %4 : vector<64x32xf32>
    %6 = vector.extract_strided_slice %5 {offsets = [0, 0], sizes = [64, 16], strides = [1, 1]} : vector<64x32xf32> to vector<64x16xf32>
    %7 = vector.extract_strided_slice %5 {offsets = [0, 16], sizes = [64, 16], strides = [1, 1]} : vector<64x32xf32> to vector<64x16xf32>
    %cst_5 = arith.constant 0.000000e+00 : f32
    %8 = vector.broadcast %cst_5 : f32 to vector<64x16xf32>
    %9 = arith.cmpf ogt, %6, %8 : vector<64x16xf32>
    %10 = math.exp %6 : vector<64x16xf32>
    %cst_6 = arith.constant 1.000000e+00 : f32
    %11 = vector.broadcast %cst_6 : f32 to vector<64x16xf32>
    %12 = arith.subf %10, %11 : vector<64x16xf32>
    %13 = arith.select %9, %6, %12 : vector<64x16xi1>, vector<64x16xf32>
    %cst_7 = arith.constant 0.000000e+00 : f32
    %14 = vector.broadcast %cst_7 : f32 to vector<64x16xf32>
    %15 = arith.subf %14, %7 : vector<64x16xf32>
    %16 = math.exp %15 : vector<64x16xf32>
    %cst_8 = arith.constant 1.000000e+00 : f32
    %17 = vector.broadcast %cst_8 : f32 to vector<64x16xf32>
    %18 = arith.addf %17, %16 : vector<64x16xf32>
    %19 = tpu.reciprocal %18 {approx = true} : vector<64x16xf32> -> vector<64x16xf32>
    %20 = arith.mulf %13, %19 : vector<64x16xf32>
    %21 = arith.truncf %20 : vector<64x16xf32> to vector<64x16xbf16>
    %c0_9 = arith.constant 0 : index
    %c0_10 = arith.constant 0 : index
    %22 = vector.load %arg4[%c0_9, %c0_10] : memref<64x16xbf16, #tpu.memory_space<vmem>>, vector<64x16xbf16>
    tpu.vector_store %arg4[%c0_9, %c0_10], %21 {strides = array<i32>} : memref<64x16xbf16, #tpu.memory_space<vmem>>, vector<64x16xbf16>,
    return
  }
  func.func @transform_0(%arg0: i32) -> (i32, i32) {
    %c0_i32 = arith.constant 0 : i32
    %c0_i32_0 = arith.constant 0 : i32
    return %arg0, %c0_i32 : i32, i32
  }
  func.func @transform_1(%arg0: i32) -> (i32, i32) {
    %c0_i32 = arith.constant 0 : i32
    %c0_i32_0 = arith.constant 0 : i32
    %c0_i32_1 = arith.constant 0 : i32
    return %c0_i32, %c0_i32_0 : i32, i32
  }
  func.func @transform_2(%arg0: i32) -> (i32, i32) {
    %c0_i32 = arith.constant 0 : i32
    %c0_i32_0 = arith.constant 0 : i32
    %c0_i32_1 = arith.constant 0 : i32
    return %c0_i32, %c0_i32_0 : i32, i32
  }
  func.func @transform_3(%arg0: i32) -> (i32, i32) {
    %c0_i32 = arith.constant 0 : i32
    %c0_i32_0 = arith.constant 0 : i32
    return %arg0, %c0_i32 : i32, i32
  }
}

module attributes {stable_mosaic.version = 11 : i64} {
  func.func @_mm1_kernel(%arg0: i32, %arg1: memref<64x144xbf16, #tpu.memory_space<vmem>>, %arg2: memref<144x32xbf16, #tpu.memory_space<vmem>>, %arg3: memref<1x32xf32, #tpu.memory_space<vmem>>, %arg4: memref<64x16xbf16, #tpu.memory_space<vmem>>) attributes {dimension_semantics = [#tpu.dimension_semantics<parallel>], iteration_bounds = array<i64: 2>, scalar_prefetch = 0 : i64, scratch_operands = 0 : i64, tpu.core_type = #tpu.core_type<tc>, window_params = [{transform_indices = @transform_0, window_bounds = array<i64: 64, 144>}, {pipeline_mode = #tpu.pipeline_mode<synchronous>, transform_indices = @transform_1, window_bounds = array<i64: 144, 32>}, {pipeline_mode = #tpu.pipeline_mode<synchronous>, transform_indices = @transform_2, window_bounds = array<i64: 1, 32>}, {transform_indices = @transform_3, window_bounds = array<i64: 64, 16>}]} {
    %c0 = arith.constant 0 : index
    %c0_0 = arith.constant 0 : index
    %0 = vector.load %arg1[%c0, %c0_0] : memref<64x144xbf16, #tpu.memory_space<vmem>>, vector<64x144xbf16>
    %c0_1 = arith.constant 0 : index
    %c0_2 = arith.constant 0 : index
    %1 = vector.load %arg2[%c0_1, %c0_2] : memref<144x32xbf16, #tpu.memory_space<vmem>>, vector<144x32xbf16>
    %cst = arith.constant dense<0.000000e+00> : vector<64x32xf32>
    %2 = tpu.matmul %0, %1, %cst {dimension_numbers = #tpu.dot_dimension_numbers<[1], [0], [0], [1], [0, 0, 1, 1], [], []>} : vector<64x144xbf16>, vector<144x32xbf16>, vector<64x32xf32> -> vector<64x32xf32>
    %c0_3 = arith.constant 0 : index
    %c0_4 = arith.constant 0 : index
    %3 = vector.load %arg3[%c0_3, %c0_4] : memref<1x32xf32, #tpu.memory_space<vmem>>, vector<1x32xf32>
    %4 = vector.broadcast %3 : vector<1x32xf32> to vector<64x32xf32>
    %5 = arith.addf %2, %4 : vector<64x32xf32>
    %6 = vector.extract_strided_slice %5 {offsets = [0, 0], sizes = [64, 16], strides = [1, 1]} : vector<64x32xf32> to vector<64x16xf32>
    %7 = vector.extract_strided_slice %5 {offsets = [0, 16], sizes = [64, 16], strides = [1, 1]} : vector<64x32xf32> to vector<64x16xf32>
    %cst_5 = arith.constant 0.000000e+00 : f32
    %8 = vector.broadcast %cst_5 : f32 to vector<64x16xf32>
    %9 = arith.cmpf ogt, %6, %8 : vector<64x16xf32>
    %10 = math.exp %6 : vector<64x16xf32>
    %cst_6 = arith.constant 1.000000e+00 : f32
    %11 = vector.broadcast %cst_6 : f32 to vector<64x16xf32>
    %12 = arith.subf %10, %11 : vector<64x16xf32>
    %13 = arith.select %9, %6, %12 : vector<64x16xi1>, vector<64x16xf32>
    %cst_7 = arith.constant 0.000000e+00 : f32
    %14 = vector.broadcast %cst_7 : f32 to vector<64x16xf32>
    %15 = arith.subf %14, %7 : vector<64x16xf32>
    %16 = math.exp %15 : vector<64x16xf32>
    %cst_8 = arith.constant 1.000000e+00 : f32
    %17 = vector.broadcast %cst_8 : f32 to vector<64x16xf32>
    %18 = arith.addf %17, %16 : vector<64x16xf32>
    %19 = tpu.reciprocal %18 {approx = true} : vector<64x16xf32> -> vector<64x16xf32>
    %20 = arith.mulf %13, %19 : vector<64x16xf32>
    %21 = arith.truncf %20 : vector<64x16xf32> to vector<64x16xbf16>
    %c0_9 = arith.constant 0 : index
    %c0_10 = arith.constant 0 : index
    %22 = vector.load %arg4[%c0_9, %c0_10] : memref<64x16xbf16, #tpu.memory_space<vmem>>, vector<64x16xbf16>
    tpu.vector_store %arg4[%c0_9, %c0_10], %21 {strides = array<i32>} : memref<64x16xbf16, #tpu.memory_space<vmem>>, vector<64x16xbf16>,
    return
  }
  func.func @transform_0(%arg0: i32) -> (i32, i32) {
    %c0_i32 = arith.constant 0 : i32
    %c0_i32_0 = arith.constant 0 : i32
    return %arg0, %c0_i32 : i32, i32
  }
  func.func @transform_1(%arg0: i32) -> (i32, i32) {
    %c0_i32 = arith.constant 0 : i32
    %c0_i32_0 = arith.constant 0 : i32
    %c0_i32_1 = arith.constant 0 : i32
    return %c0_i32, %c0_i32_0 : i32, i32
  }
  func.func @transform_2(%arg0: i32) -> (i32, i32) {
    %c0_i32 = arith.constant 0 : i32
    %c0_i32_0 = arith.constant 0 : i32
    %c0_i32_1 = arith.constant 0 : i32
    return %c0_i32, %c0_i32_0 : i32, i32
  }
  func.func @transform_3(%arg0: i32) -> (i32, i32) {
    %c0_i32 = arith.constant 0 : i32
    %c0_i32_0 = arith.constant 0 : i32
    return %arg0, %c0_i32 : i32, i32
  }
}

module attributes {stable_mosaic.version = 11 : i64} {
  func.func @_mm1_kernel(%arg0: i32, %arg1: memref<16x144xbf16, #tpu.memory_space<vmem>>, %arg2: memref<144x64xbf16, #tpu.memory_space<vmem>>, %arg3: memref<1x64xf32, #tpu.memory_space<vmem>>, %arg4: memref<16x32xbf16, #tpu.memory_space<vmem>>) attributes {dimension_semantics = [#tpu.dimension_semantics<parallel>], iteration_bounds = array<i64: 2>, scalar_prefetch = 0 : i64, scratch_operands = 0 : i64, tpu.core_type = #tpu.core_type<tc>, window_params = [{transform_indices = @transform_0, window_bounds = array<i64: 16, 144>}, {pipeline_mode = #tpu.pipeline_mode<synchronous>, transform_indices = @transform_1, window_bounds = array<i64: 144, 64>}, {pipeline_mode = #tpu.pipeline_mode<synchronous>, transform_indices = @transform_2, window_bounds = array<i64: 1, 64>}, {transform_indices = @transform_3, window_bounds = array<i64: 16, 32>}]} {
    %c0 = arith.constant 0 : index
    %c0_0 = arith.constant 0 : index
    %0 = vector.load %arg1[%c0, %c0_0] : memref<16x144xbf16, #tpu.memory_space<vmem>>, vector<16x144xbf16>
    %c0_1 = arith.constant 0 : index
    %c0_2 = arith.constant 0 : index
    %1 = vector.load %arg2[%c0_1, %c0_2] : memref<144x64xbf16, #tpu.memory_space<vmem>>, vector<144x64xbf16>
    %cst = arith.constant dense<0.000000e+00> : vector<16x64xf32>
    %2 = tpu.matmul %0, %1, %cst {dimension_numbers = #tpu.dot_dimension_numbers<[1], [0], [0], [1], [0, 0, 1, 1], [], []>} : vector<16x144xbf16>, vector<144x64xbf16>, vector<16x64xf32> -> vector<16x64xf32>
    %c0_3 = arith.constant 0 : index
    %c0_4 = arith.constant 0 : index
    %3 = vector.load %arg3[%c0_3, %c0_4] : memref<1x64xf32, #tpu.memory_space<vmem>>, vector<1x64xf32>
    %4 = vector.broadcast %3 : vector<1x64xf32> to vector<16x64xf32>
    %5 = arith.addf %2, %4 : vector<16x64xf32>
    %6 = vector.extract_strided_slice %5 {offsets = [0, 0], sizes = [16, 32], strides = [1, 1]} : vector<16x64xf32> to vector<16x32xf32>
    %7 = vector.extract_strided_slice %5 {offsets = [0, 32], sizes = [16, 32], strides = [1, 1]} : vector<16x64xf32> to vector<16x32xf32>
    %cst_5 = arith.constant 0.000000e+00 : f32
    %8 = vector.broadcast %cst_5 : f32 to vector<16x32xf32>
    %9 = arith.cmpf ogt, %6, %8 : vector<16x32xf32>
    %10 = math.exp %6 : vector<16x32xf32>
    %cst_6 = arith.constant 1.000000e+00 : f32
    %11 = vector.broadcast %cst_6 : f32 to vector<16x32xf32>
    %12 = arith.subf %10, %11 : vector<16x32xf32>
    %13 = arith.select %9, %6, %12 : vector<16x32xi1>, vector<16x32xf32>
    %cst_7 = arith.constant 0.000000e+00 : f32
    %14 = vector.broadcast %cst_7 : f32 to vector<16x32xf32>
    %15 = arith.subf %14, %7 : vector<16x32xf32>
    %16 = math.exp %15 : vector<16x32xf32>
    %cst_8 = arith.constant 1.000000e+00 : f32
    %17 = vector.broadcast %cst_8 : f32 to vector<16x32xf32>
    %18 = arith.addf %17, %16 : vector<16x32xf32>
    %19 = tpu.reciprocal %18 {approx = true} : vector<16x32xf32> -> vector<16x32xf32>
    %20 = arith.mulf %13, %19 : vector<16x32xf32>
    %21 = arith.truncf %20 : vector<16x32xf32> to vector<16x32xbf16>
    %c0_9 = arith.constant 0 : index
    %c0_10 = arith.constant 0 : index
    %22 = vector.load %arg4[%c0_9, %c0_10] : memref<16x32xbf16, #tpu.memory_space<vmem>>, vector<16x32xbf16>
    tpu.vector_store %arg4[%c0_9, %c0_10], %21 {strides = array<i32>} : memref<16x32xbf16, #tpu.memory_space<vmem>>, vector<16x32xbf16>,
    return
  }
  func.func @transform_0(%arg0: i32) -> (i32, i32) {
    %c0_i32 = arith.constant 0 : i32
    %c0_i32_0 = arith.constant 0 : i32
    return %arg0, %c0_i32 : i32, i32
  }
  func.func @transform_1(%arg0: i32) -> (i32, i32) {
    %c0_i32 = arith.constant 0 : i32
    %c0_i32_0 = arith.constant 0 : i32
    %c0_i32_1 = arith.constant 0 : i32
    return %c0_i32, %c0_i32_0 : i32, i32
  }
  func.func @transform_2(%arg0: i32) -> (i32, i32) {
    %c0_i32 = arith.constant 0 : i32
    %c0_i32_0 = arith.constant 0 : i32
    %c0_i32_1 = arith.constant 0 : i32
    return %c0_i32, %c0_i32_0 : i32, i32
  }
  func.func @transform_3(%arg0: i32) -> (i32, i32) {
    %c0_i32 = arith.constant 0 : i32
    %c0_i32_0 = arith.constant 0 : i32
    return %arg0, %c0_i32 : i32, i32
  }
}

module attributes {stable_mosaic.version = 11 : i64} {
  func.func @_mm1_kernel(%arg0: i32, %arg1: memref<16x288xbf16, #tpu.memory_space<vmem>>, %arg2: memref<288x64xbf16, #tpu.memory_space<vmem>>, %arg3: memref<1x64xf32, #tpu.memory_space<vmem>>, %arg4: memref<16x32xbf16, #tpu.memory_space<vmem>>) attributes {dimension_semantics = [#tpu.dimension_semantics<parallel>], iteration_bounds = array<i64: 2>, scalar_prefetch = 0 : i64, scratch_operands = 0 : i64, tpu.core_type = #tpu.core_type<tc>, window_params = [{transform_indices = @transform_0, window_bounds = array<i64: 16, 288>}, {pipeline_mode = #tpu.pipeline_mode<synchronous>, transform_indices = @transform_1, window_bounds = array<i64: 288, 64>}, {pipeline_mode = #tpu.pipeline_mode<synchronous>, transform_indices = @transform_2, window_bounds = array<i64: 1, 64>}, {transform_indices = @transform_3, window_bounds = array<i64: 16, 32>}]} {
    %c0 = arith.constant 0 : index
    %c0_0 = arith.constant 0 : index
    %0 = vector.load %arg1[%c0, %c0_0] : memref<16x288xbf16, #tpu.memory_space<vmem>>, vector<16x288xbf16>
    %c0_1 = arith.constant 0 : index
    %c0_2 = arith.constant 0 : index
    %1 = vector.load %arg2[%c0_1, %c0_2] : memref<288x64xbf16, #tpu.memory_space<vmem>>, vector<288x64xbf16>
    %cst = arith.constant dense<0.000000e+00> : vector<16x64xf32>
    %2 = tpu.matmul %0, %1, %cst {dimension_numbers = #tpu.dot_dimension_numbers<[1], [0], [0], [1], [0, 0, 1, 1], [], []>} : vector<16x288xbf16>, vector<288x64xbf16>, vector<16x64xf32> -> vector<16x64xf32>
    %c0_3 = arith.constant 0 : index
    %c0_4 = arith.constant 0 : index
    %3 = vector.load %arg3[%c0_3, %c0_4] : memref<1x64xf32, #tpu.memory_space<vmem>>, vector<1x64xf32>
    %4 = vector.broadcast %3 : vector<1x64xf32> to vector<16x64xf32>
    %5 = arith.addf %2, %4 : vector<16x64xf32>
    %6 = vector.extract_strided_slice %5 {offsets = [0, 0], sizes = [16, 32], strides = [1, 1]} : vector<16x64xf32> to vector<16x32xf32>
    %7 = vector.extract_strided_slice %5 {offsets = [0, 32], sizes = [16, 32], strides = [1, 1]} : vector<16x64xf32> to vector<16x32xf32>
    %cst_5 = arith.constant 0.000000e+00 : f32
    %8 = vector.broadcast %cst_5 : f32 to vector<16x32xf32>
    %9 = arith.cmpf ogt, %6, %8 : vector<16x32xf32>
    %10 = math.exp %6 : vector<16x32xf32>
    %cst_6 = arith.constant 1.000000e+00 : f32
    %11 = vector.broadcast %cst_6 : f32 to vector<16x32xf32>
    %12 = arith.subf %10, %11 : vector<16x32xf32>
    %13 = arith.select %9, %6, %12 : vector<16x32xi1>, vector<16x32xf32>
    %cst_7 = arith.constant 0.000000e+00 : f32
    %14 = vector.broadcast %cst_7 : f32 to vector<16x32xf32>
    %15 = arith.subf %14, %7 : vector<16x32xf32>
    %16 = math.exp %15 : vector<16x32xf32>
    %cst_8 = arith.constant 1.000000e+00 : f32
    %17 = vector.broadcast %cst_8 : f32 to vector<16x32xf32>
    %18 = arith.addf %17, %16 : vector<16x32xf32>
    %19 = tpu.reciprocal %18 {approx = true} : vector<16x32xf32> -> vector<16x32xf32>
    %20 = arith.mulf %13, %19 : vector<16x32xf32>
    %21 = arith.truncf %20 : vector<16x32xf32> to vector<16x32xbf16>
    %c0_9 = arith.constant 0 : index
    %c0_10 = arith.constant 0 : index
    %22 = vector.load %arg4[%c0_9, %c0_10] : memref<16x32xbf16, #tpu.memory_space<vmem>>, vector<16x32xbf16>
    tpu.vector_store %arg4[%c0_9, %c0_10], %21 {strides = array<i32>} : memref<16x32xbf16, #tpu.memory_space<vmem>>, vector<16x32xbf16>,
    return
  }
  func.func @transform_0(%arg0: i32) -> (i32, i32) {
    %c0_i32 = arith.constant 0 : i32
    %c0_i32_0 = arith.constant 0 : i32
    return %arg0, %c0_i32 : i32, i32
  }
  func.func @transform_1(%arg0: i32) -> (i32, i32) {
    %c0_i32 = arith.constant 0 : i32
    %c0_i32_0 = arith.constant 0 : i32
    %c0_i32_1 = arith.constant 0 : i32
    return %c0_i32, %c0_i32_0 : i32, i32
  }
  func.func @transform_2(%arg0: i32) -> (i32, i32) {
    %c0_i32 = arith.constant 0 : i32
    %c0_i32_0 = arith.constant 0 : i32
    %c0_i32_1 = arith.constant 0 : i32
    return %c0_i32, %c0_i32_0 : i32, i32
  }
  func.func @transform_3(%arg0: i32) -> (i32, i32) {
    %c0_i32 = arith.constant 0 : i32
    %c0_i32_0 = arith.constant 0 : i32
    return %arg0, %c0_i32 : i32, i32
  }
}

module attributes {stable_mosaic.version = 11 : i64} {
  func.func @_mm1_kernel(%arg0: i32, %arg1: memref<64x288xbf16, #tpu.memory_space<vmem>>, %arg2: memref<288x32xbf16, #tpu.memory_space<vmem>>, %arg3: memref<1x32xf32, #tpu.memory_space<vmem>>, %arg4: memref<64x16xbf16, #tpu.memory_space<vmem>>) attributes {dimension_semantics = [#tpu.dimension_semantics<parallel>], iteration_bounds = array<i64: 2>, scalar_prefetch = 0 : i64, scratch_operands = 0 : i64, tpu.core_type = #tpu.core_type<tc>, window_params = [{transform_indices = @transform_0, window_bounds = array<i64: 64, 288>}, {pipeline_mode = #tpu.pipeline_mode<synchronous>, transform_indices = @transform_1, window_bounds = array<i64: 288, 32>}, {pipeline_mode = #tpu.pipeline_mode<synchronous>, transform_indices = @transform_2, window_bounds = array<i64: 1, 32>}, {transform_indices = @transform_3, window_bounds = array<i64: 64, 16>}]} {
    %c0 = arith.constant 0 : index
    %c0_0 = arith.constant 0 : index
    %0 = vector.load %arg1[%c0, %c0_0] : memref<64x288xbf16, #tpu.memory_space<vmem>>, vector<64x288xbf16>
    %c0_1 = arith.constant 0 : index
    %c0_2 = arith.constant 0 : index
    %1 = vector.load %arg2[%c0_1, %c0_2] : memref<288x32xbf16, #tpu.memory_space<vmem>>, vector<288x32xbf16>
    %cst = arith.constant dense<0.000000e+00> : vector<64x32xf32>
    %2 = tpu.matmul %0, %1, %cst {dimension_numbers = #tpu.dot_dimension_numbers<[1], [0], [0], [1], [0, 0, 1, 1], [], []>} : vector<64x288xbf16>, vector<288x32xbf16>, vector<64x32xf32> -> vector<64x32xf32>
    %c0_3 = arith.constant 0 : index
    %c0_4 = arith.constant 0 : index
    %3 = vector.load %arg3[%c0_3, %c0_4] : memref<1x32xf32, #tpu.memory_space<vmem>>, vector<1x32xf32>
    %4 = vector.broadcast %3 : vector<1x32xf32> to vector<64x32xf32>
    %5 = arith.addf %2, %4 : vector<64x32xf32>
    %6 = vector.extract_strided_slice %5 {offsets = [0, 0], sizes = [64, 16], strides = [1, 1]} : vector<64x32xf32> to vector<64x16xf32>
    %7 = vector.extract_strided_slice %5 {offsets = [0, 16], sizes = [64, 16], strides = [1, 1]} : vector<64x32xf32> to vector<64x16xf32>
    %cst_5 = arith.constant 0.000000e+00 : f32
    %8 = vector.broadcast %cst_5 : f32 to vector<64x16xf32>
    %9 = arith.cmpf ogt, %6, %8 : vector<64x16xf32>
    %10 = math.exp %6 : vector<64x16xf32>
    %cst_6 = arith.constant 1.000000e+00 : f32
    %11 = vector.broadcast %cst_6 : f32 to vector<64x16xf32>
    %12 = arith.subf %10, %11 : vector<64x16xf32>
    %13 = arith.select %9, %6, %12 : vector<64x16xi1>, vector<64x16xf32>
    %cst_7 = arith.constant 0.000000e+00 : f32
    %14 = vector.broadcast %cst_7 : f32 to vector<64x16xf32>
    %15 = arith.subf %14, %7 : vector<64x16xf32>
    %16 = math.exp %15 : vector<64x16xf32>
    %cst_8 = arith.constant 1.000000e+00 : f32
    %17 = vector.broadcast %cst_8 : f32 to vector<64x16xf32>
    %18 = arith.addf %17, %16 : vector<64x16xf32>
    %19 = tpu.reciprocal %18 {approx = true} : vector<64x16xf32> -> vector<64x16xf32>
    %20 = arith.mulf %13, %19 : vector<64x16xf32>
    %21 = arith.truncf %20 : vector<64x16xf32> to vector<64x16xbf16>
    %c0_9 = arith.constant 0 : index
    %c0_10 = arith.constant 0 : index
    %22 = vector.load %arg4[%c0_9, %c0_10] : memref<64x16xbf16, #tpu.memory_space<vmem>>, vector<64x16xbf16>
    tpu.vector_store %arg4[%c0_9, %c0_10], %21 {strides = array<i32>} : memref<64x16xbf16, #tpu.memory_space<vmem>>, vector<64x16xbf16>,
    return
  }
  func.func @transform_0(%arg0: i32) -> (i32, i32) {
    %c0_i32 = arith.constant 0 : i32
    %c0_i32_0 = arith.constant 0 : i32
    return %arg0, %c0_i32 : i32, i32
  }
  func.func @transform_1(%arg0: i32) -> (i32, i32) {
    %c0_i32 = arith.constant 0 : i32
    %c0_i32_0 = arith.constant 0 : i32
    %c0_i32_1 = arith.constant 0 : i32
    return %c0_i32, %c0_i32_0 : i32, i32
  }
  func.func @transform_2(%arg0: i32) -> (i32, i32) {
    %c0_i32 = arith.constant 0 : i32
    %c0_i32_0 = arith.constant 0 : i32
    %c0_i32_1 = arith.constant 0 : i32
    return %c0_i32, %c0_i32_0 : i32, i32
  }
  func.func @transform_3(%arg0: i32) -> (i32, i32) {
    %c0_i32 = arith.constant 0 : i32
    %c0_i32_0 = arith.constant 0 : i32
    return %arg0, %c0_i32 : i32, i32
  }
}

module attributes {stable_mosaic.version = 11 : i64} {
  func.func @_mm1_kernel(%arg0: i32, %arg1: memref<256x144xbf16, #tpu.memory_space<vmem>>, %arg2: memref<144x16xbf16, #tpu.memory_space<vmem>>, %arg3: memref<1x16xf32, #tpu.memory_space<vmem>>, %arg4: memref<256x8xbf16, #tpu.memory_space<vmem>>) attributes {dimension_semantics = [#tpu.dimension_semantics<parallel>], iteration_bounds = array<i64: 2>, scalar_prefetch = 0 : i64, scratch_operands = 0 : i64, tpu.core_type = #tpu.core_type<tc>, window_params = [{transform_indices = @transform_0, window_bounds = array<i64: 256, 144>}, {pipeline_mode = #tpu.pipeline_mode<synchronous>, transform_indices = @transform_1, window_bounds = array<i64: 144, 16>}, {pipeline_mode = #tpu.pipeline_mode<synchronous>, transform_indices = @transform_2, window_bounds = array<i64: 1, 16>}, {transform_indices = @transform_3, window_bounds = array<i64: 256, 8>}]} {
    %c0 = arith.constant 0 : index
    %c0_0 = arith.constant 0 : index
    %0 = vector.load %arg1[%c0, %c0_0] : memref<256x144xbf16, #tpu.memory_space<vmem>>, vector<256x144xbf16>
    %c0_1 = arith.constant 0 : index
    %c0_2 = arith.constant 0 : index
    %1 = vector.load %arg2[%c0_1, %c0_2] : memref<144x16xbf16, #tpu.memory_space<vmem>>, vector<144x16xbf16>
    %cst = arith.constant dense<0.000000e+00> : vector<256x16xf32>
    %2 = tpu.matmul %0, %1, %cst {dimension_numbers = #tpu.dot_dimension_numbers<[1], [0], [0], [1], [0, 0, 1, 1], [], []>} : vector<256x144xbf16>, vector<144x16xbf16>, vector<256x16xf32> -> vector<256x16xf32>
    %c0_3 = arith.constant 0 : index
    %c0_4 = arith.constant 0 : index
    %3 = vector.load %arg3[%c0_3, %c0_4] : memref<1x16xf32, #tpu.memory_space<vmem>>, vector<1x16xf32>
    %4 = vector.broadcast %3 : vector<1x16xf32> to vector<256x16xf32>
    %5 = arith.addf %2, %4 : vector<256x16xf32>
    %6 = vector.extract_strided_slice %5 {offsets = [0, 0], sizes = [256, 8], strides = [1, 1]} : vector<256x16xf32> to vector<256x8xf32>
    %7 = vector.extract_strided_slice %5 {offsets = [0, 8], sizes = [256, 8], strides = [1, 1]} : vector<256x16xf32> to vector<256x8xf32>
    %cst_5 = arith.constant 0.000000e+00 : f32
    %8 = vector.broadcast %cst_5 : f32 to vector<256x8xf32>
    %9 = arith.cmpf ogt, %6, %8 : vector<256x8xf32>
    %10 = math.exp %6 : vector<256x8xf32>
    %cst_6 = arith.constant 1.000000e+00 : f32
    %11 = vector.broadcast %cst_6 : f32 to vector<256x8xf32>
    %12 = arith.subf %10, %11 : vector<256x8xf32>
    %13 = arith.select %9, %6, %12 : vector<256x8xi1>, vector<256x8xf32>
    %cst_7 = arith.constant 0.000000e+00 : f32
    %14 = vector.broadcast %cst_7 : f32 to vector<256x8xf32>
    %15 = arith.subf %14, %7 : vector<256x8xf32>
    %16 = math.exp %15 : vector<256x8xf32>
    %cst_8 = arith.constant 1.000000e+00 : f32
    %17 = vector.broadcast %cst_8 : f32 to vector<256x8xf32>
    %18 = arith.addf %17, %16 : vector<256x8xf32>
    %19 = tpu.reciprocal %18 {approx = true} : vector<256x8xf32> -> vector<256x8xf32>
    %20 = arith.mulf %13, %19 : vector<256x8xf32>
    %21 = arith.truncf %20 : vector<256x8xf32> to vector<256x8xbf16>
    %c0_9 = arith.constant 0 : index
    %c0_10 = arith.constant 0 : index
    %22 = vector.load %arg4[%c0_9, %c0_10] : memref<256x8xbf16, #tpu.memory_space<vmem>>, vector<256x8xbf16>
    tpu.vector_store %arg4[%c0_9, %c0_10], %21 {strides = array<i32>} : memref<256x8xbf16, #tpu.memory_space<vmem>>, vector<256x8xbf16>,
    return
  }
  func.func @transform_0(%arg0: i32) -> (i32, i32) {
    %c0_i32 = arith.constant 0 : i32
    %c0_i32_0 = arith.constant 0 : i32
    return %arg0, %c0_i32 : i32, i32
  }
  func.func @transform_1(%arg0: i32) -> (i32, i32) {
    %c0_i32 = arith.constant 0 : i32
    %c0_i32_0 = arith.constant 0 : i32
    %c0_i32_1 = arith.constant 0 : i32
    return %c0_i32, %c0_i32_0 : i32, i32
  }
  func.func @transform_2(%arg0: i32) -> (i32, i32) {
    %c0_i32 = arith.constant 0 : i32
    %c0_i32_0 = arith.constant 0 : i32
    %c0_i32_1 = arith.constant 0 : i32
    return %c0_i32, %c0_i32_0 : i32, i32
  }
  func.func @transform_3(%arg0: i32) -> (i32, i32) {
    %c0_i32 = arith.constant 0 : i32
    %c0_i32_0 = arith.constant 0 : i32
    return %arg0, %c0_i32 : i32, i32
  }
}

module attributes {stable_mosaic.version = 11 : i64} {
  func.func @_mm1_kernel(%arg0: i32, %arg1: memref<256x72xbf16, #tpu.memory_space<vmem>>, %arg2: memref<72x8xbf16, #tpu.memory_space<vmem>>, %arg3: memref<1x8xf32, #tpu.memory_space<vmem>>, %arg4: memref<256x4xbf16, #tpu.memory_space<vmem>>) attributes {dimension_semantics = [#tpu.dimension_semantics<parallel>], iteration_bounds = array<i64: 2>, scalar_prefetch = 0 : i64, scratch_operands = 0 : i64, tpu.core_type = #tpu.core_type<tc>, window_params = [{transform_indices = @transform_0, window_bounds = array<i64: 256, 72>}, {pipeline_mode = #tpu.pipeline_mode<synchronous>, transform_indices = @transform_1, window_bounds = array<i64: 72, 8>}, {pipeline_mode = #tpu.pipeline_mode<synchronous>, transform_indices = @transform_2, window_bounds = array<i64: 1, 8>}, {transform_indices = @transform_3, window_bounds = array<i64: 256, 4>}]} {
    %c0 = arith.constant 0 : index
    %c0_0 = arith.constant 0 : index
    %0 = vector.load %arg1[%c0, %c0_0] : memref<256x72xbf16, #tpu.memory_space<vmem>>, vector<256x72xbf16>
    %c0_1 = arith.constant 0 : index
    %c0_2 = arith.constant 0 : index
    %1 = vector.load %arg2[%c0_1, %c0_2] : memref<72x8xbf16, #tpu.memory_space<vmem>>, vector<72x8xbf16>
    %cst = arith.constant dense<0.000000e+00> : vector<256x8xf32>
    %2 = tpu.matmul %0, %1, %cst {dimension_numbers = #tpu.dot_dimension_numbers<[1], [0], [0], [1], [0, 0, 1, 1], [], []>} : vector<256x72xbf16>, vector<72x8xbf16>, vector<256x8xf32> -> vector<256x8xf32>
    %c0_3 = arith.constant 0 : index
    %c0_4 = arith.constant 0 : index
    %3 = vector.load %arg3[%c0_3, %c0_4] : memref<1x8xf32, #tpu.memory_space<vmem>>, vector<1x8xf32>
    %4 = vector.broadcast %3 : vector<1x8xf32> to vector<256x8xf32>
    %5 = arith.addf %2, %4 : vector<256x8xf32>
    %6 = vector.extract_strided_slice %5 {offsets = [0, 0], sizes = [256, 4], strides = [1, 1]} : vector<256x8xf32> to vector<256x4xf32>
    %7 = vector.extract_strided_slice %5 {offsets = [0, 4], sizes = [256, 4], strides = [1, 1]} : vector<256x8xf32> to vector<256x4xf32>
    %cst_5 = arith.constant 0.000000e+00 : f32
    %8 = vector.broadcast %cst_5 : f32 to vector<256x4xf32>
    %9 = arith.cmpf ogt, %6, %8 : vector<256x4xf32>
    %10 = math.exp %6 : vector<256x4xf32>
    %cst_6 = arith.constant 1.000000e+00 : f32
    %11 = vector.broadcast %cst_6 : f32 to vector<256x4xf32>
    %12 = arith.subf %10, %11 : vector<256x4xf32>
    %13 = arith.select %9, %6, %12 : vector<256x4xi1>, vector<256x4xf32>
    %cst_7 = arith.constant 0.000000e+00 : f32
    %14 = vector.broadcast %cst_7 : f32 to vector<256x4xf32>
    %15 = arith.subf %14, %7 : vector<256x4xf32>
    %16 = math.exp %15 : vector<256x4xf32>
    %cst_8 = arith.constant 1.000000e+00 : f32
    %17 = vector.broadcast %cst_8 : f32 to vector<256x4xf32>
    %18 = arith.addf %17, %16 : vector<256x4xf32>
    %19 = tpu.reciprocal %18 {approx = true} : vector<256x4xf32> -> vector<256x4xf32>
    %20 = arith.mulf %13, %19 : vector<256x4xf32>
    %21 = arith.truncf %20 : vector<256x4xf32> to vector<256x4xbf16>
    %c0_9 = arith.constant 0 : index
    %c0_10 = arith.constant 0 : index
    %22 = vector.load %arg4[%c0_9, %c0_10] : memref<256x4xbf16, #tpu.memory_space<vmem>>, vector<256x4xbf16>
    tpu.vector_store %arg4[%c0_9, %c0_10], %21 {strides = array<i32>} : memref<256x4xbf16, #tpu.memory_space<vmem>>, vector<256x4xbf16>,
    return
  }
  func.func @transform_0(%arg0: i32) -> (i32, i32) {
    %c0_i32 = arith.constant 0 : i32
    %c0_i32_0 = arith.constant 0 : i32
    return %arg0, %c0_i32 : i32, i32
  }
  func.func @transform_1(%arg0: i32) -> (i32, i32) {
    %c0_i32 = arith.constant 0 : i32
    %c0_i32_0 = arith.constant 0 : i32
    %c0_i32_1 = arith.constant 0 : i32
    return %c0_i32, %c0_i32_0 : i32, i32
  }
  func.func @transform_2(%arg0: i32) -> (i32, i32) {
    %c0_i32 = arith.constant 0 : i32
    %c0_i32_0 = arith.constant 0 : i32
    %c0_i32_1 = arith.constant 0 : i32
    return %c0_i32, %c0_i32_0 : i32, i32
  }
  func.func @transform_3(%arg0: i32) -> (i32, i32) {
    %c0_i32 = arith.constant 0 : i32
    %c0_i32_0 = arith.constant 0 : i32
    return %arg0, %c0_i32 : i32, i32
  }
}

module attributes {stable_mosaic.version = 11 : i64} {
  func.func @_mm1_kernel(%arg0: i32, %arg1: memref<256x36xbf16, #tpu.memory_space<vmem>>, %arg2: memref<36x3xbf16, #tpu.memory_space<vmem>>, %arg3: memref<1x3xf32, #tpu.memory_space<vmem>>, %arg4: memref<256x3xf32, #tpu.memory_space<vmem>>) attributes {dimension_semantics = [#tpu.dimension_semantics<parallel>], iteration_bounds = array<i64: 2>, scalar_prefetch = 0 : i64, scratch_operands = 0 : i64, tpu.core_type = #tpu.core_type<tc>, window_params = [{transform_indices = @transform_0, window_bounds = array<i64: 256, 36>}, {pipeline_mode = #tpu.pipeline_mode<synchronous>, transform_indices = @transform_1, window_bounds = array<i64: 36, 3>}, {pipeline_mode = #tpu.pipeline_mode<synchronous>, transform_indices = @transform_2, window_bounds = array<i64: 1, 3>}, {transform_indices = @transform_3, window_bounds = array<i64: 256, 3>}]} {
    %c0 = arith.constant 0 : index
    %c0_0 = arith.constant 0 : index
    %0 = vector.load %arg1[%c0, %c0_0] : memref<256x36xbf16, #tpu.memory_space<vmem>>, vector<256x36xbf16>
    %c0_1 = arith.constant 0 : index
    %c0_2 = arith.constant 0 : index
    %1 = vector.load %arg2[%c0_1, %c0_2] : memref<36x3xbf16, #tpu.memory_space<vmem>>, vector<36x3xbf16>
    %cst = arith.constant dense<0.000000e+00> : vector<256x3xf32>
    %2 = tpu.matmul %0, %1, %cst {dimension_numbers = #tpu.dot_dimension_numbers<[1], [0], [0], [1], [0, 0, 1, 1], [], []>} : vector<256x36xbf16>, vector<36x3xbf16>, vector<256x3xf32> -> vector<256x3xf32>
    %c0_3 = arith.constant 0 : index
    %c0_4 = arith.constant 0 : index
    %3 = vector.load %arg3[%c0_3, %c0_4] : memref<1x3xf32, #tpu.memory_space<vmem>>, vector<1x3xf32>
    %4 = vector.broadcast %3 : vector<1x3xf32> to vector<256x3xf32>
    %5 = arith.addf %2, %4 : vector<256x3xf32>
    %6 = math.tanh %5 : vector<256x3xf32>
    %c0_5 = arith.constant 0 : index
    %c0_6 = arith.constant 0 : index
    %7 = vector.load %arg4[%c0_5, %c0_6] : memref<256x3xf32, #tpu.memory_space<vmem>>, vector<256x3xf32>
    tpu.vector_store %arg4[%c0_5, %c0_6], %6 {strides = array<i32>} : memref<256x3xf32, #tpu.memory_space<vmem>>, vector<256x3xf32>,
    return
  }
  func.func @transform_0(%arg0: i32) -> (i32, i32) {
    %c0_i32 = arith.constant 0 : i32
    %c0_i32_0 = arith.constant 0 : i32
    return %arg0, %c0_i32 : i32, i32
  }
  func.func @transform_1(%arg0: i32) -> (i32, i32) {
    %c0_i32 = arith.constant 0 : i32
    %c0_i32_0 = arith.constant 0 : i32
    %c0_i32_1 = arith.constant 0 : i32
    return %c0_i32, %c0_i32_0 : i32, i32
  }
  func.func @transform_2(%arg0: i32) -> (i32, i32) {
    %c0_i32 = arith.constant 0 : i32
    %c0_i32_0 = arith.constant 0 : i32
    %c0_i32_1 = arith.constant 0 : i32
    return %c0_i32, %c0_i32_0 : i32, i32
  }
  func.func @transform_3(%arg0: i32) -> (i32, i32) {
    %c0_i32 = arith.constant 0 : i32
    %c0_i32_0 = arith.constant 0 : i32
    return %arg0, %c0_i32 : i32, i32
  }
}

module attributes {stable_mosaic.version = 11 : i64} {
  func.func @_mm1_kernel(%arg0: i32, %arg1: memref<256x75xbf16, #tpu.memory_space<vmem>>, %arg2: memref<75x16xbf16, #tpu.memory_space<vmem>>, %arg3: memref<1x16xf32, #tpu.memory_space<vmem>>, %arg4: memref<256x8xbf16, #tpu.memory_space<vmem>>) attributes {dimension_semantics = [#tpu.dimension_semantics<parallel>], iteration_bounds = array<i64: 2>, scalar_prefetch = 0 : i64, scratch_operands = 0 : i64, tpu.core_type = #tpu.core_type<tc>, window_params = [{transform_indices = @transform_0, window_bounds = array<i64: 256, 75>}, {pipeline_mode = #tpu.pipeline_mode<synchronous>, transform_indices = @transform_1, window_bounds = array<i64: 75, 16>}, {pipeline_mode = #tpu.pipeline_mode<synchronous>, transform_indices = @transform_2, window_bounds = array<i64: 1, 16>}, {transform_indices = @transform_3, window_bounds = array<i64: 256, 8>}]} {
    %c0 = arith.constant 0 : index
    %c0_0 = arith.constant 0 : index
    %0 = vector.load %arg1[%c0, %c0_0] : memref<256x75xbf16, #tpu.memory_space<vmem>>, vector<256x75xbf16>
    %c0_1 = arith.constant 0 : index
    %c0_2 = arith.constant 0 : index
    %1 = vector.load %arg2[%c0_1, %c0_2] : memref<75x16xbf16, #tpu.memory_space<vmem>>, vector<75x16xbf16>
    %cst = arith.constant dense<0.000000e+00> : vector<256x16xf32>
    %2 = tpu.matmul %0, %1, %cst {dimension_numbers = #tpu.dot_dimension_numbers<[1], [0], [0], [1], [0, 0, 1, 1], [], []>} : vector<256x75xbf16>, vector<75x16xbf16>, vector<256x16xf32> -> vector<256x16xf32>
    %c0_3 = arith.constant 0 : index
    %c0_4 = arith.constant 0 : index
    %3 = vector.load %arg3[%c0_3, %c0_4] : memref<1x16xf32, #tpu.memory_space<vmem>>, vector<1x16xf32>
    %4 = vector.broadcast %3 : vector<1x16xf32> to vector<256x16xf32>
    %5 = arith.addf %2, %4 : vector<256x16xf32>
    %6 = vector.extract_strided_slice %5 {offsets = [0, 0], sizes = [256, 8], strides = [1, 1]} : vector<256x16xf32> to vector<256x8xf32>
    %7 = vector.extract_strided_slice %5 {offsets = [0, 8], sizes = [256, 8], strides = [1, 1]} : vector<256x16xf32> to vector<256x8xf32>
    %cst_5 = arith.constant 0.000000e+00 : f32
    %8 = vector.broadcast %cst_5 : f32 to vector<256x8xf32>
    %9 = arith.cmpf ogt, %6, %8 : vector<256x8xf32>
    %10 = math.exp %6 : vector<256x8xf32>
    %cst_6 = arith.constant 1.000000e+00 : f32
    %11 = vector.broadcast %cst_6 : f32 to vector<256x8xf32>
    %12 = arith.subf %10, %11 : vector<256x8xf32>
    %13 = arith.select %9, %6, %12 : vector<256x8xi1>, vector<256x8xf32>
    %cst_7 = arith.constant 0.000000e+00 : f32
    %14 = vector.broadcast %cst_7 : f32 to vector<256x8xf32>
    %15 = arith.subf %14, %7 : vector<256x8xf32>
    %16 = math.exp %15 : vector<256x8xf32>
    %cst_8 = arith.constant 1.000000e+00 : f32
    %17 = vector.broadcast %cst_8 : f32 to vector<256x8xf32>
    %18 = arith.addf %17, %16 : vector<256x8xf32>
    %19 = tpu.reciprocal %18 {approx = true} : vector<256x8xf32> -> vector<256x8xf32>
    %20 = arith.mulf %13, %19 : vector<256x8xf32>
    %21 = arith.truncf %20 : vector<256x8xf32> to vector<256x8xbf16>
    %c0_9 = arith.constant 0 : index
    %c0_10 = arith.constant 0 : index
    %22 = vector.load %arg4[%c0_9, %c0_10] : memref<256x8xbf16, #tpu.memory_space<vmem>>, vector<256x8xbf16>
    tpu.vector_store %arg4[%c0_9, %c0_10], %21 {strides = array<i32>} : memref<256x8xbf16, #tpu.memory_space<vmem>>, vector<256x8xbf16>,
    return
  }
  func.func @transform_0(%arg0: i32) -> (i32, i32) {
    %c0_i32 = arith.constant 0 : i32
    %c0_i32_0 = arith.constant 0 : i32
    return %arg0, %c0_i32 : i32, i32
  }
  func.func @transform_1(%arg0: i32) -> (i32, i32) {
    %c0_i32 = arith.constant 0 : i32
    %c0_i32_0 = arith.constant 0 : i32
    %c0_i32_1 = arith.constant 0 : i32
    return %c0_i32, %c0_i32_0 : i32, i32
  }
  func.func @transform_2(%arg0: i32) -> (i32, i32) {
    %c0_i32 = arith.constant 0 : i32
    %c0_i32_0 = arith.constant 0 : i32
    %c0_i32_1 = arith.constant 0 : i32
    return %c0_i32, %c0_i32_0 : i32, i32
  }
  func.func @transform_3(%arg0: i32) -> (i32, i32) {
    %c0_i32 = arith.constant 0 : i32
    %c0_i32_0 = arith.constant 0 : i32
    return %arg0, %c0_i32 : i32, i32
  }
}

module attributes {stable_mosaic.version = 11 : i64} {
  func.func @_mm1_kernel(%arg0: i32, %arg1: memref<64x72xbf16, #tpu.memory_space<vmem>>, %arg2: memref<72x16xbf16, #tpu.memory_space<vmem>>, %arg3: memref<1x16xf32, #tpu.memory_space<vmem>>, %arg4: memref<64x8xbf16, #tpu.memory_space<vmem>>) attributes {dimension_semantics = [#tpu.dimension_semantics<parallel>], iteration_bounds = array<i64: 2>, scalar_prefetch = 0 : i64, scratch_operands = 0 : i64, tpu.core_type = #tpu.core_type<tc>, window_params = [{transform_indices = @transform_0, window_bounds = array<i64: 64, 72>}, {pipeline_mode = #tpu.pipeline_mode<synchronous>, transform_indices = @transform_1, window_bounds = array<i64: 72, 16>}, {pipeline_mode = #tpu.pipeline_mode<synchronous>, transform_indices = @transform_2, window_bounds = array<i64: 1, 16>}, {transform_indices = @transform_3, window_bounds = array<i64: 64, 8>}]} {
    %c0 = arith.constant 0 : index
    %c0_0 = arith.constant 0 : index
    %0 = vector.load %arg1[%c0, %c0_0] : memref<64x72xbf16, #tpu.memory_space<vmem>>, vector<64x72xbf16>
    %c0_1 = arith.constant 0 : index
    %c0_2 = arith.constant 0 : index
    %1 = vector.load %arg2[%c0_1, %c0_2] : memref<72x16xbf16, #tpu.memory_space<vmem>>, vector<72x16xbf16>
    %cst = arith.constant dense<0.000000e+00> : vector<64x16xf32>
    %2 = tpu.matmul %0, %1, %cst {dimension_numbers = #tpu.dot_dimension_numbers<[1], [0], [0], [1], [0, 0, 1, 1], [], []>} : vector<64x72xbf16>, vector<72x16xbf16>, vector<64x16xf32> -> vector<64x16xf32>
    %c0_3 = arith.constant 0 : index
    %c0_4 = arith.constant 0 : index
    %3 = vector.load %arg3[%c0_3, %c0_4] : memref<1x16xf32, #tpu.memory_space<vmem>>, vector<1x16xf32>
    %4 = vector.broadcast %3 : vector<1x16xf32> to vector<64x16xf32>
    %5 = arith.addf %2, %4 : vector<64x16xf32>
    %6 = vector.extract_strided_slice %5 {offsets = [0, 0], sizes = [64, 8], strides = [1, 1]} : vector<64x16xf32> to vector<64x8xf32>
    %7 = vector.extract_strided_slice %5 {offsets = [0, 8], sizes = [64, 8], strides = [1, 1]} : vector<64x16xf32> to vector<64x8xf32>
    %cst_5 = arith.constant 0.000000e+00 : f32
    %8 = vector.broadcast %cst_5 : f32 to vector<64x8xf32>
    %9 = arith.cmpf ogt, %6, %8 : vector<64x8xf32>
    %10 = math.exp %6 : vector<64x8xf32>
    %cst_6 = arith.constant 1.000000e+00 : f32
    %11 = vector.broadcast %cst_6 : f32 to vector<64x8xf32>
    %12 = arith.subf %10, %11 : vector<64x8xf32>
    %13 = arith.select %9, %6, %12 : vector<64x8xi1>, vector<64x8xf32>
    %cst_7 = arith.constant 0.000000e+00 : f32
    %14 = vector.broadcast %cst_7 : f32 to vector<64x8xf32>
    %15 = arith.subf %14, %7 : vector<64x8xf32>
    %16 = math.exp %15 : vector<64x8xf32>
    %cst_8 = arith.constant 1.000000e+00 : f32
    %17 = vector.broadcast %cst_8 : f32 to vector<64x8xf32>
    %18 = arith.addf %17, %16 : vector<64x8xf32>
    %19 = tpu.reciprocal %18 {approx = true} : vector<64x8xf32> -> vector<64x8xf32>
    %20 = arith.mulf %13, %19 : vector<64x8xf32>
    %21 = arith.truncf %20 : vector<64x8xf32> to vector<64x8xbf16>
    %c0_9 = arith.constant 0 : index
    %c0_10 = arith.constant 0 : index
    %22 = vector.load %arg4[%c0_9, %c0_10] : memref<64x8xbf16, #tpu.memory_space<vmem>>, vector<64x8xbf16>
    tpu.vector_store %arg4[%c0_9, %c0_10], %21 {strides = array<i32>} : memref<64x8xbf16, #tpu.memory_space<vmem>>, vector<64x8xbf16>,
    return
  }
  func.func @transform_0(%arg0: i32) -> (i32, i32) {
    %c0_i32 = arith.constant 0 : i32
    %c0_i32_0 = arith.constant 0 : i32
    return %arg0, %c0_i32 : i32, i32
  }
  func.func @transform_1(%arg0: i32) -> (i32, i32) {
    %c0_i32 = arith.constant 0 : i32
    %c0_i32_0 = arith.constant 0 : i32
    %c0_i32_1 = arith.constant 0 : i32
    return %c0_i32, %c0_i32_0 : i32, i32
  }
  func.func @transform_2(%arg0: i32) -> (i32, i32) {
    %c0_i32 = arith.constant 0 : i32
    %c0_i32_0 = arith.constant 0 : i32
    %c0_i32_1 = arith.constant 0 : i32
    return %c0_i32, %c0_i32_0 : i32, i32
  }
  func.func @transform_3(%arg0: i32) -> (i32, i32) {
    %c0_i32 = arith.constant 0 : i32
    %c0_i32_0 = arith.constant 0 : i32
    return %arg0, %c0_i32 : i32, i32
  }
}

module attributes {stable_mosaic.version = 11 : i64} {
  func.func @_mm1_kernel(%arg0: i32, %arg1: memref<16x144xbf16, #tpu.memory_space<vmem>>, %arg2: memref<144x32xbf16, #tpu.memory_space<vmem>>, %arg3: memref<1x32xf32, #tpu.memory_space<vmem>>, %arg4: memref<16x16xbf16, #tpu.memory_space<vmem>>) attributes {dimension_semantics = [#tpu.dimension_semantics<parallel>], iteration_bounds = array<i64: 2>, scalar_prefetch = 0 : i64, scratch_operands = 0 : i64, tpu.core_type = #tpu.core_type<tc>, window_params = [{transform_indices = @transform_0, window_bounds = array<i64: 16, 144>}, {pipeline_mode = #tpu.pipeline_mode<synchronous>, transform_indices = @transform_1, window_bounds = array<i64: 144, 32>}, {pipeline_mode = #tpu.pipeline_mode<synchronous>, transform_indices = @transform_2, window_bounds = array<i64: 1, 32>}, {transform_indices = @transform_3, window_bounds = array<i64: 16, 16>}]} {
    %c0 = arith.constant 0 : index
    %c0_0 = arith.constant 0 : index
    %0 = vector.load %arg1[%c0, %c0_0] : memref<16x144xbf16, #tpu.memory_space<vmem>>, vector<16x144xbf16>
    %c0_1 = arith.constant 0 : index
    %c0_2 = arith.constant 0 : index
    %1 = vector.load %arg2[%c0_1, %c0_2] : memref<144x32xbf16, #tpu.memory_space<vmem>>, vector<144x32xbf16>
    %cst = arith.constant dense<0.000000e+00> : vector<16x32xf32>
    %2 = tpu.matmul %0, %1, %cst {dimension_numbers = #tpu.dot_dimension_numbers<[1], [0], [0], [1], [0, 0, 1, 1], [], []>} : vector<16x144xbf16>, vector<144x32xbf16>, vector<16x32xf32> -> vector<16x32xf32>
    %c0_3 = arith.constant 0 : index
    %c0_4 = arith.constant 0 : index
    %3 = vector.load %arg3[%c0_3, %c0_4] : memref<1x32xf32, #tpu.memory_space<vmem>>, vector<1x32xf32>
    %4 = vector.broadcast %3 : vector<1x32xf32> to vector<16x32xf32>
    %5 = arith.addf %2, %4 : vector<16x32xf32>
    %6 = vector.extract_strided_slice %5 {offsets = [0, 0], sizes = [16, 16], strides = [1, 1]} : vector<16x32xf32> to vector<16x16xf32>
    %7 = vector.extract_strided_slice %5 {offsets = [0, 16], sizes = [16, 16], strides = [1, 1]} : vector<16x32xf32> to vector<16x16xf32>
    %cst_5 = arith.constant 0.000000e+00 : f32
    %8 = vector.broadcast %cst_5 : f32 to vector<16x16xf32>
    %9 = arith.cmpf ogt, %6, %8 : vector<16x16xf32>
    %10 = math.exp %6 : vector<16x16xf32>
    %cst_6 = arith.constant 1.000000e+00 : f32
    %11 = vector.broadcast %cst_6 : f32 to vector<16x16xf32>
    %12 = arith.subf %10, %11 : vector<16x16xf32>
    %13 = arith.select %9, %6, %12 : vector<16x16xi1>, vector<16x16xf32>
    %cst_7 = arith.constant 0.000000e+00 : f32
    %14 = vector.broadcast %cst_7 : f32 to vector<16x16xf32>
    %15 = arith.subf %14, %7 : vector<16x16xf32>
    %16 = math.exp %15 : vector<16x16xf32>
    %cst_8 = arith.constant 1.000000e+00 : f32
    %17 = vector.broadcast %cst_8 : f32 to vector<16x16xf32>
    %18 = arith.addf %17, %16 : vector<16x16xf32>
    %19 = tpu.reciprocal %18 {approx = true} : vector<16x16xf32> -> vector<16x16xf32>
    %20 = arith.mulf %13, %19 : vector<16x16xf32>
    %21 = arith.truncf %20 : vector<16x16xf32> to vector<16x16xbf16>
    %c0_9 = arith.constant 0 : index
    %c0_10 = arith.constant 0 : index
    %22 = vector.load %arg4[%c0_9, %c0_10] : memref<16x16xbf16, #tpu.memory_space<vmem>>, vector<16x16xbf16>
    tpu.vector_store %arg4[%c0_9, %c0_10], %21 {strides = array<i32>} : memref<16x16xbf16, #tpu.memory_space<vmem>>, vector<16x16xbf16>,
    return
  }
  func.func @transform_0(%arg0: i32) -> (i32, i32) {
    %c0_i32 = arith.constant 0 : i32
    %c0_i32_0 = arith.constant 0 : i32
    return %arg0, %c0_i32 : i32, i32
  }
  func.func @transform_1(%arg0: i32) -> (i32, i32) {
    %c0_i32 = arith.constant 0 : i32
    %c0_i32_0 = arith.constant 0 : i32
    %c0_i32_1 = arith.constant 0 : i32
    return %c0_i32, %c0_i32_0 : i32, i32
  }
  func.func @transform_2(%arg0: i32) -> (i32, i32) {
    %c0_i32 = arith.constant 0 : i32
    %c0_i32_0 = arith.constant 0 : i32
    %c0_i32_1 = arith.constant 0 : i32
    return %c0_i32, %c0_i32_0 : i32, i32
  }
  func.func @transform_3(%arg0: i32) -> (i32, i32) {
    %c0_i32 = arith.constant 0 : i32
    %c0_i32_0 = arith.constant 0 : i32
    return %arg0, %c0_i32 : i32, i32
  }
}

module attributes {stable_mosaic.version = 11 : i64} {
  func.func @_mm1_kernel(%arg0: i32, %arg1: memref<16x288xbf16, #tpu.memory_space<vmem>>, %arg2: memref<288x64xbf16, #tpu.memory_space<vmem>>, %arg3: memref<1x64xf32, #tpu.memory_space<vmem>>, %arg4: memref<16x32xbf16, #tpu.memory_space<vmem>>) attributes {dimension_semantics = [#tpu.dimension_semantics<parallel>], iteration_bounds = array<i64: 2>, scalar_prefetch = 0 : i64, scratch_operands = 0 : i64, tpu.core_type = #tpu.core_type<tc>, window_params = [{transform_indices = @transform_0, window_bounds = array<i64: 16, 288>}, {pipeline_mode = #tpu.pipeline_mode<synchronous>, transform_indices = @transform_1, window_bounds = array<i64: 288, 64>}, {pipeline_mode = #tpu.pipeline_mode<synchronous>, transform_indices = @transform_2, window_bounds = array<i64: 1, 64>}, {transform_indices = @transform_3, window_bounds = array<i64: 16, 32>}]} {
    %c0 = arith.constant 0 : index
    %c0_0 = arith.constant 0 : index
    %0 = vector.load %arg1[%c0, %c0_0] : memref<16x288xbf16, #tpu.memory_space<vmem>>, vector<16x288xbf16>
    %c0_1 = arith.constant 0 : index
    %c0_2 = arith.constant 0 : index
    %1 = vector.load %arg2[%c0_1, %c0_2] : memref<288x64xbf16, #tpu.memory_space<vmem>>, vector<288x64xbf16>
    %cst = arith.constant dense<0.000000e+00> : vector<16x64xf32>
    %2 = tpu.matmul %0, %1, %cst {dimension_numbers = #tpu.dot_dimension_numbers<[1], [0], [0], [1], [0, 0, 1, 1], [], []>} : vector<16x288xbf16>, vector<288x64xbf16>, vector<16x64xf32> -> vector<16x64xf32>
    %c0_3 = arith.constant 0 : index
    %c0_4 = arith.constant 0 : index
    %3 = vector.load %arg3[%c0_3, %c0_4] : memref<1x64xf32, #tpu.memory_space<vmem>>, vector<1x64xf32>
    %4 = vector.broadcast %3 : vector<1x64xf32> to vector<16x64xf32>
    %5 = arith.addf %2, %4 : vector<16x64xf32>
    %6 = vector.extract_strided_slice %5 {offsets = [0, 0], sizes = [16, 32], strides = [1, 1]} : vector<16x64xf32> to vector<16x32xf32>
    %7 = vector.extract_strided_slice %5 {offsets = [0, 32], sizes = [16, 32], strides = [1, 1]} : vector<16x64xf32> to vector<16x32xf32>
    %cst_5 = arith.constant 0.000000e+00 : f32
    %8 = vector.broadcast %cst_5 : f32 to vector<16x32xf32>
    %9 = arith.maximumf %6, %8 : vector<16x32xf32>
    %cst_6 = arith.constant 0.000000e+00 : f32
    %10 = vector.broadcast %cst_6 : f32 to vector<16x32xf32>
    %11 = arith.subf %10, %7 : vector<16x32xf32>
    %12 = math.exp %11 : vector<16x32xf32>
    %cst_7 = arith.constant 1.000000e+00 : f32
    %13 = vector.broadcast %cst_7 : f32 to vector<16x32xf32>
    %14 = arith.addf %13, %12 : vector<16x32xf32>
    %15 = tpu.reciprocal %14 {approx = true} : vector<16x32xf32> -> vector<16x32xf32>
    %16 = arith.mulf %9, %15 : vector<16x32xf32>
    %17 = arith.truncf %16 : vector<16x32xf32> to vector<16x32xbf16>
    %c0_8 = arith.constant 0 : index
    %c0_9 = arith.constant 0 : index
    %18 = vector.load %arg4[%c0_8, %c0_9] : memref<16x32xbf16, #tpu.memory_space<vmem>>, vector<16x32xbf16>
    tpu.vector_store %arg4[%c0_8, %c0_9], %17 {strides = array<i32>} : memref<16x32xbf16, #tpu.memory_space<vmem>>, vector<16x32xbf16>,
    return
  }
  func.func @transform_0(%arg0: i32) -> (i32, i32) {
    %c0_i32 = arith.constant 0 : i32
    %c0_i32_0 = arith.constant 0 : i32
    return %arg0, %c0_i32 : i32, i32
  }
  func.func @transform_1(%arg0: i32) -> (i32, i32) {
    %c0_i32 = arith.constant 0 : i32
    %c0_i32_0 = arith.constant 0 : i32
    %c0_i32_1 = arith.constant 0 : i32
    return %c0_i32, %c0_i32_0 : i32, i32
  }
  func.func @transform_2(%arg0: i32) -> (i32, i32) {
    %c0_i32 = arith.constant 0 : i32
    %c0_i32_0 = arith.constant 0 : i32
    %c0_i32_1 = arith.constant 0 : i32
    return %c0_i32, %c0_i32_0 : i32, i32
  }
  func.func @transform_3(%arg0: i32) -> (i32, i32) {
    %c0_i32 = arith.constant 0 : i32
    %c0_i32_0 = arith.constant 0 : i32
    return %arg0, %c0_i32 : i32, i32
  }
}

module attributes {stable_mosaic.version = 11 : i64} {
  func.func @_ctx_attn_kernel(%arg0: i32, %arg1: i32, %arg2: i32, %arg3: memref<1x4x288xbf16, #tpu.memory_space<vmem>>, %arg4: memref<1x288x4xbf16, #tpu.memory_space<vmem>>, %arg5: memref<1x4x512xbf16, #tpu.memory_space<vmem>>, %arg6: memref<2x4xf32, #tpu.memory_space<vmem>>, %arg7: memref<1x4x512xf32, #tpu.memory_space<vmem>>, %arg8: memref<4x1xf32, #tpu.memory_space<vmem>>, %arg9: memref<4x1xf32, #tpu.memory_space<vmem>>, %arg10: memref<4x512xf32, #tpu.memory_space<vmem>>) attributes {dimension_semantics = [#tpu.dimension_semantics<parallel>, #tpu.dimension_semantics<parallel>, #tpu.dimension_semantics<arbitrary>], iteration_bounds = array<i64: 2, 1, 1>, scalar_prefetch = 0 : i64, scratch_operands = 3 : i64, tpu.core_type = #tpu.core_type<tc>, window_params = [{transform_indices = @transform_0, window_bounds = array<i64: 1, 4, 288>}, {transform_indices = @transform_1, window_bounds = array<i64: 1, 288, 4>}, {transform_indices = @transform_2, window_bounds = array<i64: 1, 4, 512>}, {transform_indices = @transform_3, window_bounds = array<i64: 2, 4>}, {transform_indices = @transform_4, window_bounds = array<i64: 1, 4, 512>}]} {
    %c0_i32 = arith.constant 0 : i32
    %0 = arith.cmpi eq, %arg2, %c0_i32 : i32
    %1 = arith.extui %0 : i1 to i32
    %c0_i32_0 = arith.constant 0 : i32
    %2 = arith.cmpi ne, %1, %c0_i32_0 : i32
    scf.if %2 {
      %cst_32 = arith.constant 0xFF800000 : f32
      %47 = vector.broadcast %cst_32 : f32 to vector<4x1xf32>
      %c0_33 = arith.constant 0 : index
      %c0_34 = arith.constant 0 : index
      %48 = vector.load %arg8[%c0_33, %c0_34] : memref<4x1xf32, #tpu.memory_space<vmem>>, vector<4x1xf32>
      tpu.vector_store %arg8[%c0_33, %c0_34], %47 {strides = array<i32>} : memref<4x1xf32, #tpu.memory_space<vmem>>, vector<4x1xf32>,
      %cst_35 = arith.constant 0.000000e+00 : f32
      %49 = vector.broadcast %cst_35 : f32 to vector<4x1xf32>
      %c0_36 = arith.constant 0 : index
      %c0_37 = arith.constant 0 : index
      %50 = vector.load %arg9[%c0_36, %c0_37] : memref<4x1xf32, #tpu.memory_space<vmem>>, vector<4x1xf32>
      tpu.vector_store %arg9[%c0_36, %c0_37], %49 {strides = array<i32>} : memref<4x1xf32, #tpu.memory_space<vmem>>, vector<4x1xf32>,
      %cst_38 = arith.constant 0.000000e+00 : f32
      %51 = vector.broadcast %cst_38 : f32 to vector<4x512xf32>
      %c0_39 = arith.constant 0 : index
      %c0_40 = arith.constant 0 : index
      %52 = vector.load %arg10[%c0_39, %c0_40] : memref<4x512xf32, #tpu.memory_space<vmem>>, vector<4x512xf32>
      tpu.vector_store %arg10[%c0_39, %c0_40], %51 {strides = array<i32>} : memref<4x512xf32, #tpu.memory_space<vmem>>, vector<4x512xf32>,
    } else {
    }
    %c0 = arith.constant 0 : index
    %c0_1 = arith.constant 0 : index
    %c0_2 = arith.constant 0 : index
    %3 = vector.load %arg3[%c0, %c0_1, %c0_2] : memref<1x4x288xbf16, #tpu.memory_space<vmem>>, vector<1x4x288xbf16>
    %4 = vector.shape_cast %3 : vector<1x4x288xbf16> to vector<4x288xbf16>
    %c0_3 = arith.constant 0 : index
    %c0_4 = arith.constant 0 : index
    %c0_5 = arith.constant 0 : index
    %5 = vector.load %arg4[%c0_3, %c0_4, %c0_5] : memref<1x288x4xbf16, #tpu.memory_space<vmem>>, vector<1x288x4xbf16>
    %6 = vector.shape_cast %5 : vector<1x288x4xbf16> to vector<288x4xbf16>
    %cst = arith.constant dense<0.000000e+00> : vector<4x4xf32>
    %7 = tpu.matmul %4, %6, %cst {dimension_numbers = #tpu.dot_dimension_numbers<[1], [0], [0], [1], [0, 0, 1, 1], [], []>} : vector<4x288xbf16>, vector<288x4xbf16>, vector<4x4xf32> -> vector<4x4xf32>
    %c0_6 = arith.constant 0 : index
    %c0_7 = arith.constant 0 : index
    %8 = vector.load %arg6[%c0_6, %c0_7] : memref<2x4xf32, #tpu.memory_space<vmem>>, vector<1x4xf32>
    %c1 = arith.constant 1 : index
    %c0_8 = arith.constant 0 : index
    %9 = vector.load %arg6[%c1, %c0_8] : memref<2x4xf32, #tpu.memory_space<vmem>>, vector<1x4xf32>
    %10 = vector.broadcast %8 : vector<1x4xf32> to vector<4x4xf32>
    %11 = arith.mulf %7, %10 : vector<4x4xf32>
    %cst_9 = arith.constant 1.000000e+01 : f32
    %12 = vector.broadcast %cst_9 : f32 to vector<4x4xf32>
    %13 = arith.mulf %11, %12 : vector<4x4xf32>
    %14 = vector.broadcast %9 : vector<1x4xf32> to vector<4x4xf32>
    %15 = arith.addf %13, %14 : vector<4x4xf32>
    %c0_10 = arith.constant 0 : index
    %c0_11 = arith.constant 0 : index
    %16 = vector.load %arg8[%c0_10, %c0_11] : memref<4x1xf32, #tpu.memory_space<vmem>>, vector<4x1xf32>
    %cst_12 = arith.constant dense<0xFF800000> : vector<4xf32>
    %17 = vector.multi_reduction <maximumf>, %15, %cst_12 [1] : vector<4x4xf32> to vector<4xf32>
    %18 = vector.shape_cast %17 : vector<4xf32> to vector<4x1xf32>
    %19 = arith.maximumf %16, %18 : vector<4x1xf32>
    %c0_13 = arith.constant 0 : index
    %c0_14 = arith.constant 0 : index
    %20 = vector.load %arg8[%c0_13, %c0_14] : memref<4x1xf32, #tpu.memory_space<vmem>>, vector<4x1xf32>
    %21 = arith.subf %20, %19 : vector<4x1xf32>
    %22 = math.exp %21 : vector<4x1xf32>
    %23 = vector.broadcast %19 : vector<4x1xf32> to vector<4x4xf32>
    %24 = arith.subf %15, %23 : vector<4x4xf32>
    %25 = math.exp %24 : vector<4x4xf32>
    %c0_15 = arith.constant 0 : index
    %c0_16 = arith.constant 0 : index
    %26 = vector.load %arg9[%c0_15, %c0_16] : memref<4x1xf32, #tpu.memory_space<vmem>>, vector<4x1xf32>
    %27 = arith.mulf %22, %26 : vector<4x1xf32>
    %cst_17 = arith.constant dense<0.000000e+00> : vector<4xf32>
    %28 = vector.multi_reduction <add>, %25, %cst_17 [1] : vector<4x4xf32> to vector<4xf32>
    %29 = vector.shape_cast %28 : vector<4xf32> to vector<4x1xf32>
    %30 = arith.addf %27, %29 : vector<4x1xf32>
    %c0_18 = arith.constant 0 : index
    %c0_19 = arith.constant 0 : index
    %31 = vector.load %arg9[%c0_18, %c0_19] : memref<4x1xf32, #tpu.memory_space<vmem>>, vector<4x1xf32>
    tpu.vector_store %arg9[%c0_18, %c0_19], %30 {strides = array<i32>} : memref<4x1xf32, #tpu.memory_space<vmem>>, vector<4x1xf32>,
    %32 = vector.broadcast %8 : vector<1x4xf32> to vector<4x4xf32>
    %33 = arith.mulf %25, %32 : vector<4x4xf32>
    %34 = arith.truncf %33 : vector<4x4xf32> to vector<4x4xbf16>
    %c0_20 = arith.constant 0 : index
    %c0_21 = arith.constant 0 : index
    %35 = vector.load %arg10[%c0_20, %c0_21] : memref<4x512xf32, #tpu.memory_space<vmem>>, vector<4x512xf32>
    %36 = vector.broadcast %22 : vector<4x1xf32> to vector<4x512xf32>
    %37 = arith.mulf %36, %35 : vector<4x512xf32>
    %c0_22 = arith.constant 0 : index
    %c0_23 = arith.constant 0 : index
    %c0_24 = arith.constant 0 : index
    %38 = vector.load %arg5[%c0_22, %c0_23, %c0_24] : memref<1x4x512xbf16, #tpu.memory_space<vmem>>, vector<1x4x512xbf16>
    %39 = vector.shape_cast %38 : vector<1x4x512xbf16> to vector<4x512xbf16>
    %cst_25 = arith.constant dense<0.000000e+00> : vector<4x512xf32>
    %40 = tpu.matmul %34, %39, %cst_25 {dimension_numbers = #tpu.dot_dimension_numbers<[1], [0], [0], [1], [0, 0, 1, 1], [], []>} : vector<4x4xbf16>, vector<4x512xbf16>, vector<4x512xf32> -> vector<4x512xf32>
    %41 = arith.addf %37, %40 : vector<4x512xf32>
    %c0_26 = arith.constant 0 : index
    %c0_27 = arith.constant 0 : index
    %42 = vector.load %arg10[%c0_26, %c0_27] : memref<4x512xf32, #tpu.memory_space<vmem>>, vector<4x512xf32>
    tpu.vector_store %arg10[%c0_26, %c0_27], %41 {strides = array<i32>} : memref<4x512xf32, #tpu.memory_space<vmem>>, vector<4x512xf32>,
    %c0_28 = arith.constant 0 : index
    %c0_29 = arith.constant 0 : index
    %43 = vector.load %arg8[%c0_28, %c0_29] : memref<4x1xf32, #tpu.memory_space<vmem>>, vector<4x1xf32>
    tpu.vector_store %arg8[%c0_28, %c0_29], %19 {strides = array<i32>} : memref<4x1xf32, #tpu.memory_space<vmem>>, vector<4x1xf32>,
    %c0_i32_30 = arith.constant 0 : i32
    %44 = arith.cmpi eq, %arg2, %c0_i32_30 : i32
    %45 = arith.extui %44 : i1 to i32
    %c0_i32_31 = arith.constant 0 : i32
    %46 = arith.cmpi ne, %45, %c0_i32_31 : i32
    scf.if %46 {
      %c0_32 = arith.constant 0 : index
      %c0_33 = arith.constant 0 : index
      %47 = vector.load %arg9[%c0_32, %c0_33] : memref<4x1xf32, #tpu.memory_space<vmem>>, vector<4x1xf32>
      %48 = tpu.reciprocal %47 {approx = true} : vector<4x1xf32> -> vector<4x1xf32>
      %c0_34 = arith.constant 0 : index
      %c0_35 = arith.constant 0 : index
      %49 = vector.load %arg10[%c0_34, %c0_35] : memref<4x512xf32, #tpu.memory_space<vmem>>, vector<4x512xf32>
      %50 = vector.broadcast %48 : vector<4x1xf32> to vector<4x512xf32>
      %51 = arith.mulf %49, %50 : vector<4x512xf32>
      %cst_36 = arith.constant 2.500000e-01 : f32
      %52 = vector.broadcast %cst_36 : f32 to vector<4x512xf32>
      %53 = arith.mulf %51, %52 : vector<4x512xf32>
      %c0_37 = arith.constant 0 : index
      %c0_38 = arith.constant 0 : index
      %c0_39 = arith.constant 0 : index
      %54 = vector.load %arg7[%c0_37, %c0_38, %c0_39] : memref<1x4x512xf32, #tpu.memory_space<vmem>>, vector<1x4x512xf32>
      %55 = vector.shape_cast %54 : vector<1x4x512xf32> to vector<4x512xf32>
      %56 = vector.shape_cast %53 : vector<4x512xf32> to vector<1x4x512xf32>
      tpu.vector_store %arg7[%c0_37, %c0_38, %c0_39], %56 {strides = array<i32>} : memref<1x4x512xf32, #tpu.memory_space<vmem>>, vector<1x4x512xf32>,
    } else {
    }
    return
  }
  func.func @transform_0(%arg0: i32, %arg1: i32, %arg2: i32) -> (i32, i32, i32) {
    %c0_i32 = arith.constant 0 : i32
    %c0_i32_0 = arith.constant 0 : i32
    return %arg0, %arg1, %c0_i32 : i32, i32, i32
  }
  func.func @transform_1(%arg0: i32, %arg1: i32, %arg2: i32) -> (i32, i32, i32) {
    %c0_i32 = arith.constant 0 : i32
    %c0_i32_0 = arith.constant 0 : i32
    return %arg0, %c0_i32, %arg2 : i32, i32, i32
  }
  func.func @transform_2(%arg0: i32, %arg1: i32, %arg2: i32) -> (i32, i32, i32) {
    %c0_i32 = arith.constant 0 : i32
    %c0_i32_0 = arith.constant 0 : i32
    return %arg0, %arg2, %c0_i32 : i32, i32, i32
  }
  func.func @transform_3(%arg0: i32, %arg1: i32, %arg2: i32) -> (i32, i32) {
    %c0_i32 = arith.constant 0 : i32
    %c0_i32_0 = arith.constant 0 : i32
    return %c0_i32, %arg2 : i32, i32
  }
  func.func @transform_4(%arg0: i32, %arg1: i32, %arg2: i32) -> (i32, i32, i32) {
    %c0_i32 = arith.constant 0 : i32
    %c0_i32_0 = arith.constant 0 : i32
    return %arg0, %arg1, %c0_i32 : i32, i32, i32
  }
}

module attributes {stable_mosaic.version = 11 : i64} {
  func.func @_mm1_kernel(%arg0: i32, %arg1: memref<16x576xbf16, #tpu.memory_space<vmem>>, %arg2: memref<576x64xbf16, #tpu.memory_space<vmem>>, %arg3: memref<1x64xf32, #tpu.memory_space<vmem>>, %arg4: memref<16x32xbf16, #tpu.memory_space<vmem>>) attributes {dimension_semantics = [#tpu.dimension_semantics<parallel>], iteration_bounds = array<i64: 2>, scalar_prefetch = 0 : i64, scratch_operands = 0 : i64, tpu.core_type = #tpu.core_type<tc>, window_params = [{transform_indices = @transform_0, window_bounds = array<i64: 16, 576>}, {pipeline_mode = #tpu.pipeline_mode<synchronous>, transform_indices = @transform_1, window_bounds = array<i64: 576, 64>}, {pipeline_mode = #tpu.pipeline_mode<synchronous>, transform_indices = @transform_2, window_bounds = array<i64: 1, 64>}, {transform_indices = @transform_3, window_bounds = array<i64: 16, 32>}]} {
    %c0 = arith.constant 0 : index
    %c0_0 = arith.constant 0 : index
    %0 = vector.load %arg1[%c0, %c0_0] : memref<16x576xbf16, #tpu.memory_space<vmem>>, vector<16x576xbf16>
    %c0_1 = arith.constant 0 : index
    %c0_2 = arith.constant 0 : index
    %1 = vector.load %arg2[%c0_1, %c0_2] : memref<576x64xbf16, #tpu.memory_space<vmem>>, vector<576x64xbf16>
    %cst = arith.constant dense<0.000000e+00> : vector<16x64xf32>
    %2 = tpu.matmul %0, %1, %cst {dimension_numbers = #tpu.dot_dimension_numbers<[1], [0], [0], [1], [0, 0, 1, 1], [], []>} : vector<16x576xbf16>, vector<576x64xbf16>, vector<16x64xf32> -> vector<16x64xf32>
    %c0_3 = arith.constant 0 : index
    %c0_4 = arith.constant 0 : index
    %3 = vector.load %arg3[%c0_3, %c0_4] : memref<1x64xf32, #tpu.memory_space<vmem>>, vector<1x64xf32>
    %4 = vector.broadcast %3 : vector<1x64xf32> to vector<16x64xf32>
    %5 = arith.addf %2, %4 : vector<16x64xf32>
    %6 = vector.extract_strided_slice %5 {offsets = [0, 0], sizes = [16, 32], strides = [1, 1]} : vector<16x64xf32> to vector<16x32xf32>
    %7 = vector.extract_strided_slice %5 {offsets = [0, 32], sizes = [16, 32], strides = [1, 1]} : vector<16x64xf32> to vector<16x32xf32>
    %cst_5 = arith.constant 0.000000e+00 : f32
    %8 = vector.broadcast %cst_5 : f32 to vector<16x32xf32>
    %9 = arith.cmpf ogt, %6, %8 : vector<16x32xf32>
    %10 = math.exp %6 : vector<16x32xf32>
    %cst_6 = arith.constant 1.000000e+00 : f32
    %11 = vector.broadcast %cst_6 : f32 to vector<16x32xf32>
    %12 = arith.subf %10, %11 : vector<16x32xf32>
    %13 = arith.select %9, %6, %12 : vector<16x32xi1>, vector<16x32xf32>
    %cst_7 = arith.constant 0.000000e+00 : f32
    %14 = vector.broadcast %cst_7 : f32 to vector<16x32xf32>
    %15 = arith.subf %14, %7 : vector<16x32xf32>
    %16 = math.exp %15 : vector<16x32xf32>
    %cst_8 = arith.constant 1.000000e+00 : f32
    %17 = vector.broadcast %cst_8 : f32 to vector<16x32xf32>
    %18 = arith.addf %17, %16 : vector<16x32xf32>
    %19 = tpu.reciprocal %18 {approx = true} : vector<16x32xf32> -> vector<16x32xf32>
    %20 = arith.mulf %13, %19 : vector<16x32xf32>
    %21 = arith.truncf %20 : vector<16x32xf32> to vector<16x32xbf16>
    %c0_9 = arith.constant 0 : index
    %c0_10 = arith.constant 0 : index
    %22 = vector.load %arg4[%c0_9, %c0_10] : memref<16x32xbf16, #tpu.memory_space<vmem>>, vector<16x32xbf16>
    tpu.vector_store %arg4[%c0_9, %c0_10], %21 {strides = array<i32>} : memref<16x32xbf16, #tpu.memory_space<vmem>>, vector<16x32xbf16>,
    return
  }
  func.func @transform_0(%arg0: i32) -> (i32, i32) {
    %c0_i32 = arith.constant 0 : i32
    %c0_i32_0 = arith.constant 0 : i32
    return %arg0, %c0_i32 : i32, i32
  }
  func.func @transform_1(%arg0: i32) -> (i32, i32) {
    %c0_i32 = arith.constant 0 : i32
    %c0_i32_0 = arith.constant 0 : i32
    %c0_i32_1 = arith.constant 0 : i32
    return %c0_i32, %c0_i32_0 : i32, i32
  }
  func.func @transform_2(%arg0: i32) -> (i32, i32) {
    %c0_i32 = arith.constant 0 : i32
    %c0_i32_0 = arith.constant 0 : i32
    %c0_i32_1 = arith.constant 0 : i32
    return %c0_i32, %c0_i32_0 : i32, i32
  }
  func.func @transform_3(%arg0: i32) -> (i32, i32) {
    %c0_i32 = arith.constant 0 : i32
    %c0_i32_0 = arith.constant 0 : i32
    return %arg0, %c0_i32 : i32, i32
  }
}

</mosaic_0001>

<bundles_post_ra>
// kernel: generator_forward.43
= control target key start
LH: loop header
LB: loop body
LE: loop exit
PB: predicated region body
PF: predicated region fallthrough
CT: control target
= control target key end

     0   :  { %s1535_s12 = smov 0   ;;  %s1947_s0 = inlined_call_operand.vmem [shape: bf16[512,125], index: 0, kind: input, shape index: {}]   ;;  %s1948_s1 = inlined_call_operand.vmem [shape: bf16[125,16], index: 1, kind: input, shape index: {}]   ;;  %s1949_s2 = inlined_call_operand.vmem [shape: f32[1,16], index: 2, kind: input, shape index: {}]   ;;  %s1950_s3 = inlined_call_operand.vmem [shape: bf16[512,8], index: 3, kind: output, shape index: {}]  }
   0x1 LB: > { %s1099_s13 = sadd.s32 4294967295, %s1511_s12   ;;  %p1103_p0 = scmp.ge.s32.totalorder %s1511_s12, 1  ;;  %s1511_s12 = sphi %s1535_s12, %s13_s12  }
   0x2   : > { %p138_p1 = scmp.lt.s32.totalorder %s1511_s12, 3 }
   0x4   : > { %p139_p2 = pnand %p1103_p0, %p138_p1 }
   0x5   : > { %s1104_s24 = sshll.u32 (!%p139_p2), %s1099_s13, 5  ;;  %s1514_s13 = smov (!%p139_p2), 120  }
   0x6   : > { %142 = sbr.rel (%p139_p2) target bundleno = 408 (0x198), region = 32  ;;  %p163_p3 = scmp.lt.s32.totalorder (!%p139_p2), %s1104_s24, 63 }
   0xb   : > { %v1202_v0 = vld [vmem:[%s1948_s1 + $0x38] sm:$0xf]  ;;  %v1277_v1 = vld [vmem:[%s1948_s1 + $0x38] sm:$0x70]  ;;  %vm402_vm0 = vcmask 1045504   ;;  %vm403_vm1 = vcmask 1046528  }
   0xc   : > { %v1203_v2 = vor.u32 %v1277_v1, %v1202_v0  ;;  %v1513_v3 = vmov 65535   ;;  %v1276_v7 = vld [vmem:[%s1948_s1 + $0x30] sm:$0xff]  ;;  %v1275_v8 = vld [vmem:[%s1948_s1 + $0x28] sm:$0xff]  ;;  %v1274_v9 = vld [vmem:[%s1948_s1 + $0x20] sm:$0xff]  ;;  %s1952_s24 = smov (!%p163_p3, %s1104_s24), 63  ;;  %vm353_vm2 = vcmask 1022976  }
   0xd   : > { %v404_v4 = vsel %vm402_vm0, 4294967295, %v1513_v3  ;;  %v1273_v10 = vld [vmem:[%s1948_s1 + $0x18] sm:$0xff]  ;;  %v1272_v11 = vld [vmem:[%s1948_s1 + $0x10] sm:$0xff]  ;;  %v1271_v12 = vld [vmem:[%s1948_s1 + $0x8] sm:$0xff]  ;;  %s1105_s4 = sshll.u32 %s1952_s24, 2  ;;  %vm1010_vm4 = vcmask 60416  }
   0xe   : > { %v405_v5 = vsel %vm403_vm1, %v404_v4, 0  ;;  %v1270_v13 = vld [vmem:[%s1948_s1] sm:$0xff]  ;;  %s1578_s9 = scalar_lea.vmem %s1947_s0, %s1105_s4  ;;  %s1786_s16 = scalar_lea.vmem %s1950_s3, %s1105_s4 }
   0xf   : > { %v407_v6 = vand.u32 %v1203_v2, %v405_v5  ;;  %v1254_v14 = vld [vmem:[%s1578_s9] sm:$0xff]  ;;  %v1255_v18 = vld [vmem:[%s1578_s9 + $0x8] sm:$0xff]  ;;  %v1256_v22 = vld [vmem:[%s1578_s9 + $0x10] sm:$0xff] }
  0x10   : > { %v1258_v15 = vld [vmem:[%s1578_s9 + $0x20] sm:$0xff]  ;;  %v1259_v19 = vld [vmem:[%s1578_s9 + $0x28] sm:$0xff]  ;;  %v1260_v23 = vld [vmem:[%s1578_s9 + $0x30] sm:$0xff] }
  0x11   : > { %409 = vmatpush.bf16.msra.mxu0 %v407_v6  ;;  %1278 = vmatpush.bf16.msra.mxu1 %v407_v6  ;;  %v1262_v16 = vld [vmem:[%s1578_s9 + $0x40] sm:$0xff]  ;;  %v1263_v20 = vld [vmem:[%s1578_s9 + $0x48] sm:$0xff]  ;;  %v1264_v24 = vld [vmem:[%s1578_s9 + $0x50] sm:$0xff] }
  0x12   : > { %1279 = vmatpush.bf16.msra.mxu2 %v407_v6  ;;  %1280 = vmatpush.bf16.msra.mxu3 %v407_v6  ;;  %v1266_v17 = vld [vmem:[%s1578_s9 + $0x60] sm:$0xff]  ;;  %v1267_v21 = vld [vmem:[%s1578_s9 + $0x68] sm:$0xff]  ;;  %v1268_v25 = vld [vmem:[%s1578_s9 + $0x70] sm:$0xff] }
  0x13   : > { %v1257_v26 = vld [vmem:[%s1578_s9 + $0x18] sm:$0xff]  ;;  %v1615_v30 = vld [vmem:[%s1949_s2] ss:$0 sm:$0xff] }
  0x14   : > { %v1261_v27 = vld [vmem:[%s1578_s9 + $0x38] sm:$0xff] }
  0x15   : > { %410 = vmatpush.bf16.msra.mxu0 %v1276_v7  ;;  %1281 = vmatpush.bf16.msra.mxu1 %v1276_v7  ;;  %v1265_v28 = vld [vmem:[%s1578_s9 + $0x58] sm:$0xff] }
  0x16   : > { %1282 = vmatpush.bf16.msra.mxu2 %v1276_v7  ;;  %1283 = vmatpush.bf16.msra.mxu3 %v1276_v7  ;;  %v1269_v29 = vld [vmem:[%s1578_s9 + $0x78] sm:$0xff] }
  0x19   : > { %411 = vmatpush.bf16.msra.mxu0 %v1275_v8  ;;  %1284 = vmatpush.bf16.msra.mxu1 %v1275_v8 }
  0x1a   : > { %1285 = vmatpush.bf16.msra.mxu2 %v1275_v8  ;;  %1286 = vmatpush.bf16.msra.mxu3 %v1275_v8 }
  0x1d   : > { %412 = vmatpush.bf16.msra.mxu0 %v1274_v9  ;;  %1287 = vmatpush.bf16.msra.mxu1 %v1274_v9 }
  0x1e   : > { %1288 = vmatpush.bf16.msra.mxu2 %v1274_v9  ;;  %1289 = vmatpush.bf16.msra.mxu3 %v1274_v9 }
  0x21   : > { %413 = vmatpush.bf16.msra.mxu0 %v1273_v10  ;;  %1290 = vmatpush.bf16.msra.mxu1 %v1273_v10 }
  0x22   : > { %1291 = vmatpush.bf16.msra.mxu2 %v1273_v10  ;;  %1292 = vmatpush.bf16.msra.mxu3 %v1273_v10 }
  0x25   : > { %414 = vmatpush.bf16.msra.mxu0 %v1272_v11  ;;  %1293 = vmatpush.bf16.msra.mxu1 %v1272_v11 }
  0x26   : > { %1294 = vmatpush.bf16.msra.mxu2 %v1272_v11  ;;  %1295 = vmatpush.bf16.msra.mxu3 %v1272_v11 }
  0x29   : > { %415 = vmatpush.bf16.msra.mxu0 %v1271_v12  ;;  %1296 = vmatpush.bf16.msra.mxu1 %v1271_v12 }
  0x2a   : > { %1297 = vmatpush.bf16.msra.mxu2 %v1271_v12  ;;  %1298 = vmatpush.bf16.msra.mxu3 %v1271_v12 }
  0x2d   : > { %416 = vmatpush.bf16.msra.mxu0 %v1270_v13  ;;  %1299 = vmatpush.bf16.msra.mxu1 %v1270_v13 }
  0x2e   : > { %1300 = vmatpush.bf16.msra.mxu2 %v1270_v13  ;;  %1301 = vmatpush.bf16.msra.mxu3 %v1270_v13 }
  0x30   : > { %1204 = vmatmul.msk.bf16.vlgmr.msra.gmra.mxu0 %vm353_vm2, %v1254_v14  ;;  %1208 = vmatmul.msk.bf16.vlgmr.msra.gmra.mxu1 %vm353_vm2, %v1258_v15 }
  0x31   : > { %1212 = vmatmul.msk.bf16.vlgmr.msra.gmra.mxu2 %vm353_vm2, %v1262_v16  ;;  %1216 = vmatmul.msk.bf16.vlgmr.msra.gmra.mxu3 %vm353_vm2, %v1266_v17 }
  0x40   : > { %1205 = vmatmul.msk.bf16.gmra.mxu0 %vm353_vm2, %v1255_v18  ;;  %1209 = vmatmul.msk.bf16.gmra.mxu1 %vm353_vm2, %v1259_v19 }
  0x41   : > { %1213 = vmatmul.msk.bf16.gmra.mxu2 %vm353_vm2, %v1263_v20  ;;  %1217 = vmatmul.msk.bf16.gmra.mxu3 %vm353_vm2, %v1267_v21 }
  0x50   : > { %1206 = vmatmul.msk.bf16.gmra.mxu0 %vm353_vm2, %v1256_v22  ;;  %1210 = vmatmul.msk.bf16.gmra.mxu1 %vm353_vm2, %v1260_v23 }
  0x51   : > { %1214 = vmatmul.msk.bf16.gmra.mxu2 %vm353_vm2, %v1264_v24  ;;  %1218 = vmatmul.msk.bf16.gmra.mxu3 %vm353_vm2, %v1268_v25 }
  0x60   : > { %1207 = vmatmul.msk.bf16.gmra.mxu0 %vm353_vm2, %v1257_v26  ;;  %1211 = vmatmul.msk.bf16.gmra.mxu1 %vm353_vm2, %v1261_v27 }
  0x61   : > { %1215 = vmatmul.msk.bf16.gmra.mxu2 %vm353_vm2, %v1265_v28  ;;  %1219 = vmatmul.msk.bf16.gmra.mxu3 %vm353_vm2, %v1269_v29 }
  0xad   : > { %v418_v31 = vpop.f32.mrf.mxu0  ;;  %v438_v32 = vpop.f32.mrf.mxu1 }
  0xae   : > { %v1618_v33 = vadd.f32 %v1615_v30, %v418_v31  ;;  %v1621_v34 = vadd.f32 %v1615_v30, %v438_v32 }
  0xb0   : > { %v658_v35 = vsub.f32 0.0, %v1618_v33  ;;  %v666_v36 = vsub.f32 0.0, %v1621_v34  ;;  %vm506_vm3 = vcmp.gt.f32.partialorder %v1621_v34, 0.0  ;;  %vm498_vm7 = vcmp.gt.f32.partialorder %v1618_v33, 0.0 }
  0xb2   : > { %v690_v37 = vmul.f32 1.442695, %v658_v35  ;;  %v706_v38 = vmul.f32 1.442695, %v666_v36 }
  0xb4   : > { %v458_v39 = vpop.f32.mrf.mxu2  ;;  %v478_v40 = vpop.f32.mrf.mxu3  ;;  %1313 = vpow2.f32 %v706_v38 }
  0xb5   : > { %v1626_v41 = vadd.f32 %v1615_v30, %v458_v39  ;;  %v1629_v42 = vadd.f32 %v1615_v30, %v478_v40  ;;  %v420_v43 = vpop.f32.mrf.mxu0  ;;  %v440_v44 = vpop.f32.mrf.mxu1  ;;  %1315 = vpow2.f32 %v690_v37 }
  0xb6   : > { %v1632_v45 = vadd.f32 %v1615_v30, %v420_v43  ;;  %v1644_v62 = vadd.f32 %v1615_v30, %v440_v44 }
  0xb7   : > { %v682_v46 = vsub.f32 0.0, %v1629_v42  ;;  %v674_v47 = vsub.f32 0.0, %v1626_v41  ;;  %vm522_vm9 = vcmp.gt.f32.partialorder %v1629_v42, 0.0  ;;  %vm514_vm10 = vcmp.gt.f32.partialorder %v1626_v41, 0.0 }
  0xb8   : > { %v659_v48 = vsub.f32 0.0, %v1632_v45  ;;  %v667_v2 = vsub.f32 0.0, %v1644_v62  ;;  %vm499_vm12 = vcmp.gt.f32.partialorder %v1632_v45, 0.0  ;;  %vm507_vm15 = vcmp.gt.f32.partialorder %v1644_v62, 0.0 }
  0xb9   : > { %v738_v49 = vmul.f32 1.442695, %v682_v46  ;;  %v722_v54 = vmul.f32 1.442695, %v674_v47 }
  0xba   : > { %v1314_v50 = vpop.eup %1313  ;;  %v692_v51 = vmul.f32 1.442695, %v659_v48  ;;  %v708_v10 = vmul.f32 1.442695, %v667_v2 }
  0xbb   : > { %v1316_v52 = vpop.eup %1315  ;;  %1317 = vpow2.f32 %v738_v49  ;;  %v762_v53 = vadd.f32 1.0, %v1314_v50 }
  0xbc   : > { %v460_v55 = vpop.f32.mrf.mxu2  ;;  %v480_v56 = vpop.f32.mrf.mxu3  ;;  %v754_v57 = vadd.f32 1.0, %v1316_v52  ;;  %1319 = vpow2.f32 %v692_v51 }
  0xbd   : > { %v1638_v58 = vadd.f32 %v1615_v30, %v460_v55  ;;  %v1641_v59 = vadd.f32 %v1615_v30, %v480_v56  ;;  %v423_v60 = vpop.f32.mrf.mxu0  ;;  %v443_v61 = vpop.f32.mrf.mxu1  ;;  %1321 = vrcp.f32 %v762_v53 }
  0xbe   : > { %v1649_v1 = vadd.f32 %v1615_v30, %v423_v60  ;;  %1323 = vrcp.f32 %v754_v57  ;;  %v1661_v21 = vadd.f32 %v1615_v30, %v443_v61 }
  0xbf   : > { %v675_v63 = vsub.f32 0.0, %v1638_v58  ;;  %v683_v0 = vsub.f32 0.0, %v1641_v59  ;;  %1325 = vpow2.f32 %v722_v54  ;;  %vm515_vm5 = vcmp.gt.f32.partialorder %v1638_v58, 0.0 }
  0xc0   : > { %v660_v5 = vsub.f32 0.0, %v1649_v1  ;;  %v668_v28 = vsub.f32 0.0, %v1661_v21  ;;  %vm523_vm13 = vcmp.gt.f32.partialorder %v1641_v59, 0.0  ;;  %vm500_vm0 = vcmp.gt.f32.partialorder %v1649_v1, 0.0 }
  0xc1   : > { %v1318_v3 = vpop.eup %1317  ;;  %v724_v4 = vmul.f32 1.442695, %v675_v63  ;;  %v740_v8 = vmul.f32 1.442695, %v683_v0 }
  0xc2   : > { %v778_v6 = vadd.f32 1.0, %v1318_v3  ;;  %v1320_v7 = vpop.eup %1319  ;;  %v694_v14 = vmul.f32 1.442695, %v660_v5  ;;  %v710_v40 = vmul.f32 1.442695, %v668_v28 }
  0xc3   : > { %1327 = vpow2.f32 %v724_v4  ;;  %v1322_v9 = vpop.eup %1321  ;;  %v755_v20 = vadd.f32 1.0, %v1320_v7 }
  0xc4   : > { %v463_v11 = vpop.f32.mrf.mxu2  ;;  %v483_v12 = vpop.f32.mrf.mxu3  ;;  %866 = vrot.lane.b32.xlu2 %v1322_v9, %s1514_s13  ;;  %1329 = vrcp.f32 %v778_v6 }
  0xc5   : > { %v1324_v13 = vpop.eup %1323  ;;  %v1654_v15 = vadd.f32 %v1615_v30, %v463_v11  ;;  %v1657_v16 = vadd.f32 %v1615_v30, %v483_v12  ;;  %v425_v17 = vpop.f32.mrf.mxu0  ;;  %1331 = vpow2.f32 %v740_v8 }
  0xc6   : > { %v445_v18 = vpop.f32.mrf.mxu1  ;;  %v1326_v19 = vpop.eup %1325  ;;  %850 = vrot.lane.b32.xlu0 %v1324_v13, %s1514_s13  ;;  %1333 = vpow2.f32 %v708_v10  ;;  %v1679_v50 = vadd.f32 %v1615_v30, %v425_v17 }
  0xc7   : > { %v1665_v22 = vadd.f32 %v1615_v30, %v445_v18  ;;  %v676_v23 = vsub.f32 0.0, %v1654_v15  ;;  %v684_v24 = vsub.f32 0.0, %v1657_v16  ;;  %v770_v25 = vadd.f32 1.0, %v1326_v19 }
  0xc8   : > { %1335 = vpow2.f32 %v694_v14  ;;  %v661_v63 = vsub.f32 0.0, %v1679_v50  ;;  %vm524_vm6 = vcmp.gt.f32.partialorder %v1657_v16, 0.0  ;;  %vm516_vm2 = vcmp.gt.f32.partialorder %v1654_v15, 0.0 }
  0xc9   : > { %v669_v26 = vsub.f32 0.0, %v1665_v22  ;;  %v1328_v27 = vpop.eup %1327  ;;  %v742_v29 = vmul.f32 1.442695, %v684_v24  ;;  %v726_v32 = vmul.f32 1.442695, %v676_v23  ;;  %1337 = vrcp.f32 %v770_v25 }
  0xca   : > { %v771_v31 = vadd.f32 1.0, %v1328_v27  ;;  %1339 = vrcp.f32 %v755_v20  ;;  %v1330_v36 = vpop.eup %1329  ;;  %v696_v11 = vmul.f32 1.442695, %v661_v63  ;;  %vm509_vm8 = vcmp.gt.f32.partialorder %v1665_v22, 0.0 }
  0xcb   : > { %v712_v35 = vmul.f32 1.442695, %v669_v26  ;;  %v1332_v39 = vpop.eup %1331 }
  0xcc   : > { %1341 = vrcp.f32 %v771_v31  ;;  %v465_v37 = vpop.f32.mrf.mxu2  ;;  %v485_v38 = vpop.f32.mrf.mxu3  ;;  %v779_v46 = vadd.f32 1.0, %v1332_v39 }
  0xcd   : > { %1343 = vpow2.f32 %v742_v29  ;;  %v428_v43 = vpop.f32.mrf.mxu0  ;;  %v1334_v44 = vpop.eup %1333  ;;  %v1672_v47 = vadd.f32 %v1615_v30, %v485_v38  ;;  %v1697_v24 = vadd.f32 %v1615_v30, %v465_v37 }
  0xce   : > { %1345 = vpow2.f32 %v726_v32  ;;  %898 = vrot.lane.b32.xlu0 %v1330_v36, %s1514_s13  ;;  %v1676_v48 = vadd.f32 %v1615_v30, %v428_v43  ;;  %v1336_v49 = vpop.eup %1335  ;;  %v448_v51 = vpop.f32.mrf.mxu1  ;;  %v763_v55 = vadd.f32 1.0, %v1334_v44 }
  0xcf   : > { %1347 = vpow2.f32 %v712_v35  ;;  %v1338_v52 = vpop.eup %1337  ;;  %v685_v53 = vsub.f32 0.0, %v1672_v47  ;;  %v756_v61 = vadd.f32 1.0, %v1336_v49  ;;  %v1690_v9 = vadd.f32 %v1615_v30, %v448_v51 }
  0xd0   : > { %1349 = vrcp.f32 %v779_v46  ;;  %v1340_v54 = vpop.eup %1339  ;;  %882 = vrot.lane.b32.xlu1 %v1338_v52, %s1514_s13  ;;  %v662_v56 = vsub.f32 0.0, %v1676_v48  ;;  %v677_v31 = vsub.f32 0.0, %v1697_v24  ;;  %vm502_vm11 = vcmp.gt.f32.partialorder %v1676_v48, 0.0 }
  0xd1   : > { %1351 = vpow2.f32 %v710_v40  ;;  %v744_v3 = vmul.f32 1.442695, %v685_v53  ;;  %v670_v14 = vsub.f32 0.0, %v1690_v9 }
  0xd2   : > { %v1342_v57 = vpop.eup %1341  ;;  %1353 = vrcp.f32 %v763_v55  ;;  %v698_v6 = vmul.f32 1.442695, %v662_v56  ;;  %v728_v44 = vmul.f32 1.442695, %v677_v31 }
  0xd3   : > { %v1344_v60 = vpop.eup %1343  ;;  %884 = vrot.lane.b32.xlu2 %v1342_v57, %s1514_s13  ;;  %v714_v27 = vmul.f32 1.442695, %v670_v14 }
  0xd4   : > { %v1346_v0 = vpop.eup %1345  ;;  %v780_v2 = vadd.f32 1.0, %v1344_v60  ;;  %v468_v4 = vpop.f32.mrf.mxu2 }
  0xd5   : > { %v1348_v5 = vpop.eup %1347  ;;  %v1687_v7 = vadd.f32 %v1615_v30, %v468_v4  ;;  %v772_v17 = vadd.f32 1.0, %v1346_v0  ;;  %v430_v20 = vpop.f32.mrf.mxu0 }
  0xd6   : > { %v1350_v8 = vpop.eup %1349  ;;  %1355 = vrcp.f32 %v780_v2  ;;  %852 = vrot.lane.b32.xlu0 %v1340_v54, %s1514_s13  ;;  %v765_v13 = vadd.f32 1.0, %v1348_v5  ;;  %v450_v18 = vpop.f32.mrf.mxu1  ;;  %v1701_v32 = vadd.f32 %v1615_v30, %v430_v20 }
  0xd7   : > { %v1352_v10 = vpop.eup %1351  ;;  %1357 = vrcp.f32 %v756_v61  ;;  %v678_v12 = vsub.f32 0.0, %v1687_v7  ;;  %v488_v40 = vpop.f32.mrf.mxu3  ;;  %vm518_vm14 = vcmp.gt.f32.partialorder %v1687_v7, 0.0 }
  0xd8   : > { %1359 = vpow2.f32 %v744_v3  ;;  %900 = vrot.lane.b32.xlu1 %v1350_v8, %s1514_s13  ;;  %v764_v19 = vadd.f32 1.0, %v1352_v10  ;;  %v1354_v23 = vpop.eup %1353  ;;  %v663_v37 = vsub.f32 0.0, %v1701_v32  ;;  %v1710_v46 = vadd.f32 %v1615_v30, %v488_v40 }
  0xd9   : > { %1361 = vpow2.f32 %v698_v6  ;;  %v730_v25 = vmul.f32 1.442695, %v678_v12  ;;  %vm503_vm1 = vcmp.gt.f32.partialorder %v1701_v32, 0.0 }
  0xda   : > { %1363 = vpow2.f32 %v696_v11  ;;  %v686_v54 = vsub.f32 0.0, %v1710_v46  ;;  %v700_v55 = vmul.f32 1.442695, %v663_v37 }
  0xdb   : > { %1365 = vrcp.f32 %v765_v13  ;;  %v1726_v13 = vadd.f32 %v1615_v30, %v450_v18 }
  0xdc   : > { %v1356_v26 = vpop.eup %1355  ;;  %v470_v28 = vpop.f32.mrf.mxu2  ;;  %1367 = vrcp.f32 %v772_v17  ;;  %v746_v6 = vmul.f32 1.442695, %v686_v54 }
  0xdd   : > { %v1358_v29 = vpop.eup %1357  ;;  %902 = vrot.lane.b32.xlu2 %v1356_v26, %s1514_s13  ;;  %1369 = vrcp.f32 %v764_v19  ;;  %v1707_v38 = vadd.f32 %v1615_v30, %v470_v28  ;;  %v433_v0 = vpop.f32.mrf.mxu0  ;;  %v671_v19 = vsub.f32 0.0, %v1726_v13 }
  0xde   : > { %v1360_v35 = vpop.eup %1359  ;;  %868 = vrot.lane.b32.xlu0 %v1354_v23, %s1514_s13  ;;  %1371 = vpow2.f32 %v730_v25  ;;  %v453_v56 = vpop.f32.mrf.mxu1  ;;  %v1720_v5 = vadd.f32 %v1615_v30, %v433_v0 }
  0xdf   : > { %v1362_v36 = vpop.eup %1361  ;;  %1373 = vpow2.f32 %v714_v27  ;;  %v679_v49 = vsub.f32 0.0, %v1707_v38  ;;  %v781_v52 = vadd.f32 1.0, %v1360_v35  ;;  %v1716_v2 = vadd.f32 %v1615_v30, %v453_v56  ;;  %v490_v31 = vpop.f32.mrf.mxu3 }
  0xe0   : > { %v758_v39 = vadd.f32 1.0, %v1362_v36  ;;  %v1364_v43 = vpop.eup %1363  ;;  %854 = vrot.lane.b32.xlu1 %v1358_v29, %s1514_s13  ;;  %v664_v11 = vsub.f32 0.0, %v1720_v5  ;;  %v716_v36 = vmul.f32 1.442695, %v671_v19 }
  0xe1   : > { %v1366_v51 = vpop.eup %1365  ;;  %v732_v63 = vmul.f32 1.442695, %v679_v49  ;;  %v757_v4 = vadd.f32 1.0, %v1364_v43  ;;  %v672_v8 = vsub.f32 0.0, %v1716_v2 }
  0xe2   : > { %v1368_v53 = vpop.eup %1367  ;;  %1375 = vrcp.f32 %v758_v39  ;;  %v702_v25 = vmul.f32 1.442695, %v664_v11 }
  0xe3   : > { %v1370_v57 = vpop.eup %1369  ;;  %1377 = vpow2.f32 %v728_v44  ;;  %v718_v20 = vmul.f32 1.442695, %v672_v8 }
  0xe4   : > { %v473_v60 = vpop.f32.mrf.mxu2  ;;  %v1372_v61 = vpop.eup %1371  ;;  %1379 = vrcp.f32 %v781_v52 }
  0xe5   : > { %872 = vrot.lane.b32.xlu2 %v1366_v51, %s1514_s13  ;;  %v1374_v3 = vpop.eup %1373  ;;  %1381 = vpow2.f32 %v700_v55  ;;  %v774_v10 = vadd.f32 1.0, %v1372_v61  ;;  %v1740_v49 = vadd.f32 %v1615_v30, %v473_v60  ;;  %v1747_v60 = vadd.f32 %v1615_v30, %v490_v31  ;;  %v435_v11 = vpop.f32.mrf.mxu0 }
  0xe6   : > { %886 = vrot.lane.b32.xlu0 %v1368_v53, %s1514_s13  ;;  %v766_v12 = vadd.f32 1.0, %v1374_v3  ;;  %1383 = vpow2.f32 %v732_v63  ;;  %v455_v28 = vpop.f32.mrf.mxu1 }
  0xe7   : > { %1385 = vrcp.f32 %v757_v4  ;;  %v1737_v43 = vadd.f32 %v1615_v30, %v455_v28  ;;  %v680_v55 = vsub.f32 0.0, %v1740_v49  ;;  %v493_v3 = vpop.f32.mrf.mxu3  ;;  %v687_v8 = vsub.f32 0.0, %v1747_v60 }
  0xe8   : > { %870 = vrot.lane.b32.xlu1 %v1370_v57, %s1514_s13  ;;  %v1376_v14 = vpop.eup %1375  ;;  %1387 = vpow2.f32 %v746_v6 }
  0xe9   : > { %v1378_v17 = vpop.eup %1377  ;;  %1389 = vrcp.f32 %v774_v10  ;;  %v673_v53 = vsub.f32 0.0, %v1737_v43  ;;  %v734_v4 = vmul.f32 1.442695, %v680_v55 }
  0xea   : > { %v1380_v23 = vpop.eup %1379  ;;  %1391 = vrcp.f32 %v766_v12  ;;  %v773_v29 = vadd.f32 1.0, %v1378_v17  ;;  %v1752_v12 = vadd.f32 %v1615_v30, %v493_v3 }
  0xeb   : > { %v1382_v27 = vpop.eup %1381  ;;  %1393 = vpow2.f32 %v718_v20  ;;  %v720_v0 = vmul.f32 1.442695, %v673_v53 }
  0xec   : > { %v475_v26 = vpop.f32.mrf.mxu2  ;;  %v1384_v35 = vpop.eup %1383  ;;  %v759_v40 = vadd.f32 1.0, %v1382_v27  ;;  %1395 = vpow2.f32 %v702_v25  ;;  %v688_v20 = vsub.f32 0.0, %v1752_v12 }
  0xed   : > { %858 = vrot.lane.b32.xlu2 %v1376_v14, %s1514_s13  ;;  %v1732_v18 = vadd.f32 %v1615_v30, %v475_v26  ;;  %v1386_v39 = vpop.eup %1385  ;;  %1397 = vrcp.f32 %v773_v29  ;;  %v775_v52 = vadd.f32 1.0, %v1384_v35  ;;  %v748_v26 = vmul.f32 1.442695, %v687_v8 }
  0xee   : > { %904 = vrot.lane.b32.xlu0 %v1380_v23, %s1514_s13  ;;  %v1388_v44 = vpop.eup %1387  ;;  %1399 = vpow2.f32 %v716_v36  ;;  %v1757_v23 = vadd.f32 %v1615_v30, %v435_v11  ;;  %v750_v35 = vmul.f32 1.442695, %v688_v20 }
  0xef   : > { %v681_v37 = vsub.f32 0.0, %v1732_v18  ;;  %v1390_v51 = vpop.eup %1389  ;;  %v782_v57 = vadd.f32 1.0, %v1388_v44  ;;  %1401 = vrcp.f32 %v759_v40 }
  0xf0   : > { %856 = vrot.lane.b32.xlu1 %v1386_v39, %s1514_s13  ;;  %v1392_v54 = vpop.eup %1391  ;;  %1403 = vrcp.f32 %v775_v52  ;;  %v665_v29 = vsub.f32 0.0, %v1757_v23  ;;  %v495_v39 = vpop.f32.mrf.mxu3 }
  0xf1   : > { %v736_v56 = vmul.f32 1.442695, %v681_v37  ;;  %v1394_v61 = vpop.eup %1393 }
  0xf2   : > { %v1396_v63 = vpop.eup %1395  ;;  %v768_v10 = vadd.f32 1.0, %v1394_v61  ;;  %v704_v44 = vmul.f32 1.442695, %v665_v29  ;;  %v564_v29 = vmul.f32 1.442695, %v1638_v58 }
  0xf3   : > { %1405 = vpow2.f32 %v736_v56  ;;  %v1398_v6 = vpop.eup %1397  ;;  %v760_v17 = vadd.f32 1.0, %v1396_v63 }
  0xf4   : > { %1407 = vrcp.f32 %v782_v57  ;;  %v1400_v14 = vpop.eup %1399 }
  0xf5   : > { %890 = vrot.lane.b32.xlu2 %v1390_v51, %s1514_s13  ;;  %v1402_v19 = vpop.eup %1401  ;;  %1409 = vpow2.f32 %v720_v0  ;;  %v767_v28 = vadd.f32 1.0, %v1400_v14 }
  0xf6   : > { %874 = vrot.lane.b32.xlu0 %v1392_v54, %s1514_s13  ;;  %1411 = vpow2.f32 %v734_v4  ;;  %v1404_v25 = vpop.eup %1403  ;;  %v1764_v54 = vadd.f32 %v1615_v30, %v495_v39 }
  0xf7   : > { %1413 = vrcp.f32 %v768_v10  ;;  %v546_v10 = vmul.f32 1.442695, %v1621_v34 }
  0xf8   : > { %888 = vrot.lane.b32.xlu1 %v1398_v6, %s1514_s13  ;;  %1415 = vrcp.f32 %v760_v17  ;;  %v689_v56 = vsub.f32 0.0, %v1764_v54 }
  0xf9   : > { %v1406_v27 = vpop.eup %1405  ;;  %1417 = vpow2.f32 %v748_v26 }
  0xfa   : > { %v1408_v31 = vpop.eup %1407  ;;  %v777_v37 = vadd.f32 1.0, %v1406_v27  ;;  %1419 = vrcp.f32 %v767_v28  ;;  %v752_v0 = vmul.f32 1.442695, %v689_v56  ;;  %v552_v56 = vmul.f32 1.442695, %v1665_v22 }
  0xfb   : > { %v1410_v36 = vpop.eup %1409  ;;  %1421 = vpow2.f32 %v750_v35 }
  0xfc   : > { %v1412_v40 = vpop.eup %1411  ;;  %v769_v53 = vadd.f32 1.0, %v1410_v36  ;;  %1423 = vrcp.f32 %v777_v37 }
  0xfd   : > { %860 = vrot.lane.b32.xlu2 %v1402_v19, %s1514_s13  ;;  %v1414_v51 = vpop.eup %1413  ;;  %v776_v55 = vadd.f32 1.0, %v1412_v40  ;;  %1425 = vpow2.f32 %v704_v44  ;;  %v530_v44 = vmul.f32 1.442695, %v1618_v33 }
  0xfe   : > { %892 = vrot.lane.b32.xlu0 %v1404_v25, %s1514_s13  ;;  %v1416_v52 = vpop.eup %1415  ;;  %1427 = vrcp.f32 %v769_v53 }
  0xff   : > { %v1418_v57 = vpop.eup %1417  ;;  %1429 = vrcp.f32 %v776_v55 }
 0x100   : > { %906 = vrot.lane.b32.xlu1 %v1408_v31, %s1514_s13  ;;  %v1420_v61 = vpop.eup %1419  ;;  %v783_v30 = vadd.f32 1.0, %v1418_v57  ;;  %1431 = vpow2.f32 %v752_v0  ;;  %v578_v57 = vmul.f32 1.442695, %v1629_v42 }
 0x101   : > { %v1422_v63 = vpop.eup %1421 }
 0x102   : > { %v1424_v3 = vpop.eup %1423  ;;  %v784_v6 = vadd.f32 1.0, %v1422_v63  ;;  %1433 = vrcp.f32 %v783_v30 }
 0x103   : > { %v1426_v4 = vpop.eup %1425 }
 0x104   : > { %v1428_v8 = vpop.eup %1427  ;;  %v761_v14 = vadd.f32 1.0, %v1426_v4  ;;  %1435 = vrcp.f32 %v784_v6 }
 0x105   : > { %878 = vrot.lane.b32.xlu2 %v1414_v51, %s1514_s13  ;;  %v1430_v11 = vpop.eup %1429  ;;  %1437 = vpow2.f32 %v546_v10  ;;  %v532_v10 = vmul.f32 1.442695, %v1632_v45 }
 0x106   : > { %862 = vrot.lane.b32.xlu0 %v1416_v52, %s1514_s13  ;;  %1439 = vrcp.f32 %v761_v14  ;;  %v1432_v17 = vpop.eup %1431 }
 0x107   : > { %v785_v25 = vadd.f32 1.0, %v1432_v17 }
 0x108   : > { %876 = vrot.lane.b32.xlu1 %v1420_v61, %s1514_s13  ;;  %v1434_v19 = vpop.eup %1433 }
 0x109   : > { %1441 = vrcp.f32 %v785_v25 }
 0x10a   : > { %v1436_v20 = vpop.eup %1435  ;;  %1443 = vpow2.f32 %v564_v29 }
 0x10b   : > { %v1438_v26 = vpop.eup %1437 }
 0x10c   : > { %v1440_v27 = vpop.eup %1439  ;;  %v1228_v28 = vadd.f32 -1.0, %v1438_v26 }
 0x10d   : > { %896 = vrot.lane.b32.xlu2 %v1424_v3, %s1514_s13  ;;  %v562_v3 = vmul.f32 1.442695, %v1626_v41 }
 0x10e   : > { %880 = vrot.lane.b32.xlu0 %v1428_v8, %s1514_s13  ;;  %v634_v35 = vsel %vm506_vm3, %v1621_v34, %v1228_v28  ;;  %v582_v34 = vmul.f32 1.442695, %v1657_v16  ;;  %vm508_vm3 = vcmp.gt.f32.partialorder %v1661_v21, 0.0 }
 0x10f   : > { %v1442_v36 = vpop.eup %1441 }
 0x110   : > { %894 = vrot.lane.b32.xlu1 %v1430_v11, %s1514_s13  ;;  %v1444_v40 = vpop.eup %1443  ;;  %1445 = vpow2.f32 %v582_v34 }
 0x111   : > { %v1237_v51 = vadd.f32 -1.0, %v1444_v40  ;;  %1447 = vpow2.f32 %v530_v44 }
 0x112   : > { %1449 = vpow2.f32 %v552_v56 }
 0x113   : > { %v643_v52 = vsel %vm515_vm5, %v1638_v58, %v1237_v51  ;;  %1451 = vpow2.f32 %v578_v57  ;;  %v538_v58 = vmul.f32 1.442695, %v1676_v48  ;;  %vm512_vm5 = vcmp.gt.f32.partialorder %v1716_v2, 0.0 }
 0x114   : > { %1453 = vpow2.f32 %v562_v3 }
 0x115   : > { %908 = vrot.lane.b32.xlu2 %v1434_v19, %s1514_s13  ;;  %1455 = vpow2.f32 %v538_v58 }
 0x116   : > { %910 = vrot.lane.b32.xlu0 %v1436_v20, %s1514_s13  ;;  %v1446_v61 = vpop.eup %1445  ;;  %1457 = vpow2.f32 %v532_v10 }
 0x117   : > { %v1448_v0 = vpop.eup %1447  ;;  %v1246_v30 = vadd.f32 -1.0, %v1446_v61 }
 0x118   : > { %864 = vrot.lane.b32.xlu1 %v1440_v27, %s1514_s13  ;;  %v1220_v4 = vadd.f32 -1.0, %v1448_v0  ;;  %v1450_v11 = vpop.eup %1449  ;;  %v580_v27 = vmul.f32 1.442695, %v1641_v59 }
 0x119   : > { %v652_v6 = vsel %vm524_vm6, %v1657_v16, %v1246_v30  ;;  %v1452_v20 = vpop.eup %1451  ;;  %v1231_v16 = vadd.f32 -1.0, %v1450_v11  ;;  %vm525_vm6 = vcmp.gt.f32.partialorder %v1672_v47, 0.0 }
 0x11a   : > { %v626_v19 = vsel %vm498_vm7, %v1618_v33, %v1220_v4  ;;  %v1454_v29 = vpop.eup %1453  ;;  %1459 = vpow2.f32 %v580_v27  ;;  %v570_v33 = vmul.f32 1.442695, %v1687_v7  ;;  %v540_v4 = vmul.f32 1.442695, %v1701_v32 }
 0x11b   : > { %v1456_v40 = vpop.eup %1455  ;;  %vm501_vm7 = vcmp.gt.f32.partialorder %v1679_v50, 0.0 }
 0x11c   : > { %1461 = vpow2.f32 %v570_v33 }
 0x11e   : > { %v867_v31 = vpop.permute.xlu2 %866 }
 0x11f   : > { %v954_v37 = vmul.f32 %v867_v31, %v634_v35  ;;  %v1244_v31 = vadd.f32 -1.0, %v1452_v20  ;;  %v1236_v35 = vadd.f32 -1.0, %v1454_v29 }
 0x120   : > { %912 = vrot.lane.b32.xlu1 %v1442_v36, %s1514_s13  ;;  %v637_v36 = vsel %vm509_vm8, %v1665_v22, %v1231_v16  ;;  %v534_v22 = vmul.f32 1.442695, %v1649_v1  ;;  %vm510_vm8 = vcmp.gt.f32.partialorder %v1690_v9, 0.0 }
 0x121   : > { %v986_v39 = vpack.c.bf16 %v954_v37, %v954_v37  ;;  %v650_v44 = vsel %vm522_vm9, %v1629_v42, %v1244_v31  ;;  %v642_v57 = vsel %vm514_vm10, %v1626_v41, %v1236_v35  ;;  %v558_v35 = vmul.f32 1.442695, %v1716_v2 }
 0x122   : > { %vm521_vm9 = vcmp.gt.f32.partialorder %v1732_v18, 0.0  ;;  %vm517_vm10 = vcmp.gt.f32.partialorder %v1697_v24, 0.0 }
 0x123   : > { %1019 = vst.msk [vmem:[%s1786_s16 + $0x20] sm:$0xf] %vm1010_vm4, %v986_v39  ;;  %v548_v39 = vmul.f32 1.442695, %v1644_v62 }
 0x125   : > { %1463 = vpow2.f32 %v548_v39  ;;  %v584_v39 = vmul.f32 1.442695, %v1672_v47 }
 0x126   : > { %1465 = vpow2.f32 %v534_v22 }
 0x127   : > { %1467 = vpow2.f32 %v540_v4 }
 0x12d   : > { %v885_v53 = vpop.permute.xlu2 %884 }
 0x12e   : > { %v963_v55 = vmul.f32 %v885_v53, %v643_v52  ;;  %v1458_v52 = vpop.eup %1457 }
 0x12f   : > { %v1460_v0 = vpop.eup %1459  ;;  %v1221_v42 = vadd.f32 -1.0, %v1458_v52 }
 0x130   : > { %v995_v63 = vpack.c.bf16 %v963_v55, %v963_v55  ;;  %v1245_v58 = vadd.f32 -1.0, %v1460_v0  ;;  %v1462_v10 = vpop.eup %1461 }
 0x131   : > { %v1240_v16 = vadd.f32 -1.0, %v1462_v10 }
 0x132   : > { %1028 = vst.msk [vmem:[%s1786_s16 + $0x44] sm:$0xf] %vm1010_vm4, %v995_v63  ;;  %v1224_v63 = vadd.f32 -1.0, %v1456_v40 }
 0x134   : > { %v630_v41 = vsel %vm502_vm11, %v1676_v48, %v1224_v63  ;;  %v550_v48 = vmul.f32 1.442695, %v1661_v21  ;;  %vm527_vm11 = vcmp.gt.f32.partialorder %v1747_v60, 0.0 }
 0x137   : > { %v903_v8 = vpop.permute.xlu2 %902 }
 0x138   : > { %v972_v14 = vmul.f32 %v903_v8, %v652_v6  ;;  %v851_v17 = vpop.permute.xlu0 %850  ;;  %v566_v8 = vmul.f32 1.442695, %v1654_v15 }
 0x139   : > { %v946_v25 = vmul.f32 %v851_v17, %v626_v19  ;;  %v1464_v19 = vpop.eup %1463 }
 0x13a   : > { %v1004_v26 = vpack.c.bf16 %v972_v14, %v972_v14  ;;  %v627_v14 = vsel %vm499_vm12, %v1632_v45, %v1221_v42  ;;  %1469 = vpow2.f32 %v566_v8  ;;  %v1466_v29 = vpop.eup %1465  ;;  %v1229_v45 = vadd.f32 -1.0, %v1464_v19 }
 0x13b   : > { %v978_v28 = vpack.c.bf16 %v946_v25, %v946_v25  ;;  %1471 = vpow2.f32 %v550_v48  ;;  %v1468_v40 = vpop.eup %1467  ;;  %v576_v42 = vmul.f32 1.442695, %v1732_v18  ;;  %vm519_vm12 = vcmp.gt.f32.partialorder %v1707_v38, 0.0 }
 0x13c   : > { %1037 = vst.msk [vmem:[%s1786_s16 + $0x68] sm:$0xf] %vm1010_vm4, %v1004_v26  ;;  %v651_v26 = vsel %vm523_vm13, %v1641_v59, %v1245_v58  ;;  %v646_v59 = vsel %vm518_vm14, %v1687_v7, %v1240_v16  ;;  %1473 = vpow2.f32 %v558_v35  ;;  %v536_v7 = vmul.f32 1.442695, %v1679_v50 }
 0x13d   : > { %1011 = vst.msk [vmem:[%s1786_s16] sm:$0xf] %vm1010_vm4, %v978_v28  ;;  %1475 = vpow2.f32 %v584_v39  ;;  %v554_v58 = vmul.f32 1.442695, %v1690_v9  ;;  %v588_v16 = vmul.f32 1.442695, %v1747_v60 }
 0x13e   : > { %1477 = vpow2.f32 %v536_v7  ;;  %vm526_vm13 = vcmp.gt.f32.partialorder %v1710_v46, 0.0  ;;  %vm504_vm14 = vcmp.gt.f32.partialorder %v1720_v5, 0.0 }
 0x13f   : > { %v873_v37 = vpop.permute.xlu2 %872  ;;  %1479 = vpow2.f32 %v576_v42 }
 0x140   : > { %v957_v34 = vmul.f32 %v873_v37, %v637_v36  ;;  %v899_v51 = vpop.permute.xlu0 %898  ;;  %v1222_v37 = vadd.f32 -1.0, %v1466_v29  ;;  %v1470_v52 = vpop.eup %1469  ;;  %1481 = vpow2.f32 %v554_v58 }
 0x141   : > { %v970_v53 = vmul.f32 %v899_v51, %v650_v44  ;;  %v635_v44 = vsel %vm507_vm15, %v1644_v62, %v1229_v45  ;;  %v1472_v63 = vpop.eup %1471  ;;  %v1238_v0 = vadd.f32 -1.0, %v1470_v52  ;;  %v572_v45 = vmul.f32 1.442695, %v1707_v38 }
 0x142   : > { %v989_v55 = vpack.c.bf16 %v957_v34, %v957_v34  ;;  %v883_v56 = vpop.permute.xlu1 %882  ;;  %v1230_v4 = vadd.f32 -1.0, %v1472_v63  ;;  %vm511_vm15 = vcmp.gt.f32.partialorder %v1726_v13, 0.0 }
 0x143   : > { %v1002_v61 = vpack.c.bf16 %v970_v53, %v970_v53  ;;  %v962_v3 = vmul.f32 %v883_v56, %v642_v57  ;;  %v628_v56 = vsel %vm500_vm0, %v1649_v1, %v1222_v37  ;;  %v644_v8 = vsel %vm516_vm2, %v1654_v15, %v1238_v0 }
 0x144   : > { %1022 = vst.msk [vmem:[%s1786_s16 + $0x2c] sm:$0xf] %vm1010_vm4, %v989_v55  ;;  %v636_v19 = vsel %vm508_vm3, %v1661_v21, %v1230_v4  ;;  %vm513_vm0 = vcmp.gt.f32.partialorder %v1737_v43, 0.0  ;;  %vm528_vm2 = vcmp.gt.f32.partialorder %v1752_v12, 0.0  ;;  %vm505_vm3 = vcmp.gt.f32.partialorder %v1757_v23, 0.0 }
 0x145   : > { %1035 = vst.msk [vmem:[%s1786_s16 + $0x60] sm:$0xf] %vm1010_vm4, %v1002_v61  ;;  %v994_v30 = vpack.c.bf16 %v962_v3, %v962_v3  ;;  %v1225_v61 = vadd.f32 -1.0, %v1468_v40 }
 0x147   : > { %v859_v6 = vpop.permute.xlu2 %858  ;;  %1027 = vst.msk [vmem:[%s1786_s16 + $0x40] sm:$0xf] %vm1010_vm4, %v994_v30  ;;  %v631_v1 = vsel %vm503_vm1, %v1701_v32, %v1225_v61  ;;  %v568_v32 = vmul.f32 1.442695, %v1697_v24  ;;  %vm520_vm1 = vcmp.gt.f32.partialorder %v1740_v49, 0.0 }
 0x148   : > { %v950_v11 = vmul.f32 %v859_v6, %v630_v41  ;;  %v853_v17 = vpop.permute.xlu0 %852  ;;  %v1474_v6 = vpop.eup %1473 }
 0x149   : > { %v947_v20 = vmul.f32 %v853_v17, %v627_v14  ;;  %v1234_v48 = vadd.f32 -1.0, %v1474_v6  ;;  %1483 = vpow2.f32 %v568_v32 }
 0x14a   : > { %v982_v25 = vpack.c.bf16 %v950_v11, %v950_v11  ;;  %v901_v27 = vpop.permute.xlu1 %900  ;;  %v1476_v11 = vpop.eup %1475  ;;  %1485 = vpow2.f32 %v588_v16 }
 0x14b   : > { %v979_v28 = vpack.c.bf16 %v947_v20, %v947_v20  ;;  %v971_v31 = vmul.f32 %v901_v27, %v651_v26  ;;  %v1478_v26 = vpop.eup %1477  ;;  %v1247_v15 = vadd.f32 -1.0, %v1476_v11  ;;  %v640_v21 = vsel %vm512_vm5, %v1716_v2, %v1234_v48 }
 0x14c   : > { %1015 = vst.msk [vmem:[%s1786_s16 + $0x10] sm:$0xf] %vm1010_vm4, %v982_v25  ;;  %v586_v2 = vmul.f32 1.442695, %v1710_v46  ;;  %1487 = vpow2.f32 %v572_v45  ;;  %v590_v45 = vmul.f32 1.442695, %v1752_v12 }
 0x14d   : > { %1012 = vst.msk [vmem:[%s1786_s16 + $0x4] sm:$0xf] %vm1010_vm4, %v979_v28  ;;  %v1003_v33 = vpack.c.bf16 %v971_v31, %v971_v31  ;;  %v1223_v31 = vadd.f32 -1.0, %v1478_v26  ;;  %vm529_vm5 = vcmp.gt.f32.partialorder %v1764_v54, 0.0 }
 0x14e   : > { %1489 = vpow2.f32 %v586_v2 }
 0x14f   : > { %v891_v36 = vpop.permute.xlu2 %890  ;;  %1036 = vst.msk [vmem:[%s1786_s16 + $0x64] sm:$0xf] %vm1010_vm4, %v1003_v33  ;;  %v1480_v33 = vpop.eup %1479 }
 0x150   : > { %v966_v34 = vmul.f32 %v891_v36, %v646_v59  ;;  %v869_v51 = vpop.permute.xlu0 %868  ;;  %v653_v59 = vsel %vm525_vm6, %v1672_v47, %v1247_v15  ;;  %v1482_v37 = vpop.eup %1481  ;;  %v1243_v52 = vadd.f32 -1.0, %v1480_v33 }
 0x151   : > { %v955_v53 = vmul.f32 %v869_v51, %v635_v44 }
 0x152   : > { %v998_v55 = vpack.c.bf16 %v966_v34, %v966_v34  ;;  %v855_v22 = vpop.permute.xlu1 %854  ;;  %v629_v34 = vsel %vm501_vm7, %v1679_v50, %v1223_v31  ;;  %v649_v50 = vsel %vm521_vm9, %v1732_v18, %v1243_v52  ;;  %v556_v18 = vmul.f32 1.442695, %v1726_v13 }
 0x153   : > { %v987_v57 = vpack.c.bf16 %v955_v53, %v955_v53  ;;  %v948_v62 = vmul.f32 %v855_v22, %v628_v56  ;;  %v1484_v53 = vpop.eup %1483 }
 0x154   : > { %1031 = vst.msk [vmem:[%s1786_s16 + $0x50] sm:$0xf] %vm1010_vm4, %v998_v55  ;;  %v1232_v55 = vadd.f32 -1.0, %v1482_v37  ;;  %v1239_v56 = vadd.f32 -1.0, %v1484_v53  ;;  %v1486_v61 = vpop.eup %1485 }
 0x155   : > { %1020 = vst.msk [vmem:[%s1786_s16 + $0x24] sm:$0xf] %vm1010_vm4, %v987_v57  ;;  %v980_v3 = vpack.c.bf16 %v948_v62, %v948_v62  ;;  %v542_v57 = vmul.f32 1.442695, %v1720_v5  ;;  %v1249_v6 = vadd.f32 -1.0, %v1486_v61 }
 0x156   : > { %v638_v62 = vsel %vm510_vm8, %v1690_v9, %v1232_v55  ;;  %v592_v55 = vmul.f32 1.442695, %v1764_v54 }
 0x157   : > { %v861_v30 = vpop.permute.xlu2 %860  ;;  %1013 = vst.msk [vmem:[%s1786_s16 + $0x8] sm:$0xf] %vm1010_vm4, %v980_v3  ;;  %v1488_v3 = vpop.eup %1487  ;;  %1491 = vpow2.f32 %v542_v57  ;;  %v655_v11 = vsel %vm527_vm11, %v1747_v60, %v1249_v6  ;;  %v574_v60 = vmul.f32 1.442695, %v1740_v49 }
 0x158   : > { %v951_v41 = vmul.f32 %v861_v30, %v631_v1  ;;  %v887_v10 = vpop.permute.xlu0 %886  ;;  %v645_v30 = vsel %vm517_vm10, %v1697_v24, %v1239_v56  ;;  %1493 = vpow2.f32 %v556_v18 }
 0x159   : > { %v964_v14 = vmul.f32 %v887_v10, %v644_v8  ;;  %v1241_v8 = vadd.f32 -1.0, %v1488_v3 }
 0x15a   : > { %v983_v17 = vpack.c.bf16 %v951_v41, %v951_v41  ;;  %v871_v20 = vpop.permute.xlu1 %870  ;;  %v1490_v41 = vpop.eup %1489 }
 0x15b   : > { %v996_v25 = vpack.c.bf16 %v964_v14, %v964_v14  ;;  %v956_v27 = vmul.f32 %v871_v20, %v636_v19  ;;  %v1248_v24 = vadd.f32 -1.0, %v1490_v41  ;;  %v647_v19 = vsel %vm519_vm12, %v1707_v38, %v1241_v8 }
 0x15c   : > { %1016 = vst.msk [vmem:[%s1786_s16 + $0x14] sm:$0xf] %vm1010_vm4, %v983_v17  ;;  %v560_v17 = vmul.f32 1.442695, %v1737_v43 }
 0x15d   : > { %1029 = vst.msk [vmem:[%s1786_s16 + $0x48] sm:$0xf] %vm1010_vm4, %v996_v25  ;;  %v988_v28 = vpack.c.bf16 %v956_v27, %v956_v27  ;;  %v1492_v25 = vpop.eup %1491  ;;  %v654_v27 = vsel %vm526_vm13, %v1710_v46, %v1248_v24 }
 0x15e   : > { %1495 = vpow2.f32 %v560_v17  ;;  %v1494_v16 = vpop.eup %1493 }
 0x15f   : > { %v879_v29 = vpop.permute.xlu2 %878  ;;  %1021 = vst.msk [vmem:[%s1786_s16 + $0x28] sm:$0xf] %vm1010_vm4, %v988_v28  ;;  %1497 = vpow2.f32 %v574_v60  ;;  %v1233_v31 = vadd.f32 -1.0, %v1494_v16 }
 0x160   : > { %v960_v35 = vmul.f32 %v879_v29, %v640_v21  ;;  %v905_v36 = vpop.permute.xlu0 %904  ;;  %v1226_v29 = vadd.f32 -1.0, %v1492_v25  ;;  %1499 = vpow2.f32 %v590_v45 }
 0x161   : > { %v973_v39 = vmul.f32 %v905_v36, %v653_v59  ;;  %v544_v36 = vmul.f32 1.442695, %v1757_v23  ;;  %v639_v37 = vsel %vm511_vm15, %v1726_v13, %v1233_v31 }
 0x162   : > { %v992_v40 = vpack.c.bf16 %v960_v35, %v960_v35  ;;  %v857_v44 = vpop.permute.xlu1 %856  ;;  %v632_v46 = vsel %vm504_vm14, %v1720_v5, %v1226_v29 }
 0x163   : > { %v1005_v51 = vpack.c.bf16 %v973_v39, %v973_v39  ;;  %v949_v47 = vmul.f32 %v857_v44, %v629_v34  ;;  %1501 = vpow2.f32 %v544_v36 }
 0x164   : > { %1025 = vst.msk [vmem:[%s1786_s16 + $0x38] sm:$0xf] %vm1010_vm4, %v992_v40  ;;  %v1496_v35 = vpop.eup %1495  ;;  %1503 = vpow2.f32 %v592_v55 }
 0x165   : > { %1038 = vst.msk [vmem:[%s1786_s16 + $0x6c] sm:$0xf] %vm1010_vm4, %v1005_v51  ;;  %v981_v7 = vpack.c.bf16 %v949_v47, %v949_v47  ;;  %v1498_v2 = vpop.eup %1497  ;;  %v1235_v44 = vadd.f32 -1.0, %v1496_v35 }
 0x166   : > { %v1242_v5 = vadd.f32 -1.0, %v1498_v2  ;;  %v1500_v53 = vpop.eup %1499 }
 0x167   : > { %v897_v22 = vpop.permute.xlu2 %896  ;;  %1014 = vst.msk [vmem:[%s1786_s16 + $0xc] sm:$0xf] %vm1010_vm4, %v981_v7  ;;  %v641_v13 = vsel %vm513_vm0, %v1737_v43, %v1235_v44  ;;  %v1250_v61 = vadd.f32 -1.0, %v1500_v53 }
 0x168   : > { %v969_v63 = vmul.f32 %v897_v22, %v649_v50  ;;  %v875_v0 = vpop.permute.xlu0 %874  ;;  %v648_v7 = vsel %vm520_vm1, %v1740_v49, %v1242_v5 }
 0x169   : > { %v958_v42 = vmul.f32 %v875_v0, %v638_v62  ;;  %v1502_v56 = vpop.eup %1501  ;;  %v656_v49 = vsel %vm528_vm2, %v1752_v12, %v1250_v61 }
 0x16a   : > { %v1001_v1 = vpack.c.bf16 %v969_v63, %v969_v63  ;;  %v889_v4 = vpop.permute.xlu1 %888  ;;  %v1227_v43 = vadd.f32 -1.0, %v1502_v56  ;;  %v1504_v18 = vpop.eup %1503 }
 0x16b   : > { %v990_v58 = vpack.c.bf16 %v958_v42, %v958_v42  ;;  %v965_v9 = vmul.f32 %v889_v4, %v645_v30 }
 0x16c   : > { %1034 = vst.msk [vmem:[%s1786_s16 + $0x5c] sm:$0xf] %vm1010_vm4, %v1001_v1  ;;  %v633_v3 = vsel %vm505_vm3, %v1757_v23, %v1227_v43 }
 0x16d   : > { %1023 = vst.msk [vmem:[%s1786_s16 + $0x30] sm:$0xf] %vm1010_vm4, %v990_v58  ;;  %v997_v10 = vpack.c.bf16 %v965_v9, %v965_v9  ;;  %v1251_v58 = vadd.f32 -1.0, %v1504_v18 }
 0x16f   : > { %v909_v14 = vpop.permute.xlu2 %908  ;;  %1030 = vst.msk [vmem:[%s1786_s16 + $0x4c] sm:$0xf] %vm1010_vm4, %v997_v10  ;;  %v657_v6 = vsel %vm529_vm5, %v1764_v54, %v1251_v58 }
 0x170   : > { %v975_v32 = vmul.f32 %v909_v14, %v655_v11  ;;  %v893_v20 = vpop.permute.xlu0 %892 }
 0x171   : > { %v967_v48 = vmul.f32 %v893_v20, %v647_v19 }
 0x172   : > { %v1007_v26 = vpack.c.bf16 %v975_v32, %v975_v32  ;;  %v907_v15 = vpop.permute.xlu1 %906 }
 0x173   : > { %v999_v28 = vpack.c.bf16 %v967_v48, %v967_v48  ;;  %v974_v21 = vmul.f32 %v907_v15, %v654_v27 }
 0x174   : > { %1040 = vst.msk [vmem:[%s1786_s16 + $0x74] sm:$0xf] %vm1010_vm4, %v1007_v26 }
 0x175   : > { %1032 = vst.msk [vmem:[%s1786_s16 + $0x54] sm:$0xf] %vm1010_vm4, %v999_v28  ;;  %v1006_v38 = vpack.c.bf16 %v974_v21, %v974_v21 }
 0x177   : > { %1039 = vst.msk [vmem:[%s1786_s16 + $0x70] sm:$0xf] %vm1010_vm4, %v1006_v38 }
 0x178   : > { %v863_v33 = vpop.permute.xlu0 %862 }
 0x179   : > { %v952_v59 = vmul.f32 %v863_v33, %v632_v46 }
 0x17a   : > { %v877_v39 = vpop.permute.xlu1 %876 }
 0x17b   : > { %v984_v40 = vpack.c.bf16 %v952_v59, %v952_v59  ;;  %v959_v34 = vmul.f32 %v877_v39, %v639_v37 }
 0x17d   : > { %1017 = vst.msk [vmem:[%s1786_s16 + $0x18] sm:$0xf] %vm1010_vm4, %v984_v40  ;;  %v991_v51 = vpack.c.bf16 %v959_v34, %v959_v34 }
 0x17f   : > { %1024 = vst.msk [vmem:[%s1786_s16 + $0x34] sm:$0xf] %vm1010_vm4, %v991_v51 }
 0x180   : > { %v881_v52 = vpop.permute.xlu0 %880 }
 0x181   : > { %v961_v47 = vmul.f32 %v881_v52, %v641_v13 }
 0x182   : > { %v895_v50 = vpop.permute.xlu1 %894 }
 0x183   : > { %v993_v22 = vpack.c.bf16 %v961_v47, %v961_v47  ;;  %v968_v57 = vmul.f32 %v895_v50, %v648_v7 }
 0x185   : > { %1026 = vst.msk [vmem:[%s1786_s16 + $0x3c] sm:$0xf] %vm1010_vm4, %v993_v22  ;;  %v1000_v63 = vpack.c.bf16 %v968_v57, %v968_v57 }
 0x187   : > { %1033 = vst.msk [vmem:[%s1786_s16 + $0x58] sm:$0xf] %vm1010_vm4, %v1000_v63 }
 0x188   : > { %v911_v62 = vpop.permute.xlu0 %910 }
 0x189   : > { %v976_v0 = vmul.f32 %v911_v62, %v656_v49 }
 0x18a   : > { %v865_v42 = vpop.permute.xlu1 %864 }
 0x18b   : > { %v1008_v1 = vpack.c.bf16 %v976_v0, %v976_v0  ;;  %v953_v30 = vmul.f32 %v865_v42, %v633_v3 }
 0x18d   : > { %1041 = vst.msk [vmem:[%s1786_s16 + $0x78] sm:$0xf] %vm1010_vm4, %v1008_v1  ;;  %v985_v4 = vpack.c.bf16 %v953_v30, %v953_v30 }
 0x18f   : > { %1018 = vst.msk [vmem:[%s1786_s16 + $0x1c] sm:$0xf] %vm1010_vm4, %v985_v4 }
 0x192   : > { %v913_v12 = vpop.permute.xlu1 %912 }
 0x193   : > { %v977_v41 = vmul.f32 %v913_v12, %v657_v6 }
 0x195   : > { %v1009_v9 = vpack.c.bf16 %v977_v41, %v977_v41 }
 0x197   : > { %1042 = vst.msk [vmem:[%s1786_s16 + $0x7c] sm:$0xf] %vm1010_vm4, %v1009_v9 }
 0x198 PF: > { %s13_s12 = sadd.s32 1, %s1511_s12  }
 0x199   : > { %p10_p4 = scmp.ge.s32.totalorder %s13_s12, 4  }
 0x19b   :  { %12 = sbr.rel (!%p10_p4) target bundleno = 1 (0x1), region = 62 }

// kernel: generator_forward.44
= control target key start
LH: loop header
LB: loop body
LE: loop exit
PB: predicated region body
PF: predicated region fallthrough
CT: control target
= control target key end

     0   :  { %s647_s12 = smov 0   ;;  %s755_s0 = inlined_call_operand.vmem [shape: bf16[128,72], index: 0, kind: input, shape index: {}]   ;;  %s756_s1 = inlined_call_operand.vmem [shape: bf16[72,32], index: 1, kind: input, shape index: {}]   ;;  %s757_s2 = inlined_call_operand.vmem [shape: f32[1,32], index: 2, kind: input, shape index: {}]   ;;  %s758_s3 = inlined_call_operand.vmem [shape: bf16[128,16], index: 3, kind: output, shape index: {}]  }
   0x1 LB: > { %s482_s13 = sadd.s32 4294967295, %s624_s12   ;;  %p486_p0 = scmp.ge.s32.totalorder %s624_s12, 1  ;;  %s624_s12 = sphi %s647_s12, %s13_s12  }
   0x2   : > { %p138_p1 = scmp.lt.s32.totalorder %s624_s12, 3 }
   0x4   : > { %p139_p2 = pnand %p486_p0, %p138_p1 }
   0x5   : > { %s487_s16 = sshll.u32 (!%p139_p2), %s482_s13, 3  ;;  %s626_s4 = smov (!%p139_p2), 112  }
   0x6   : > { %142 = sbr.rel (%p139_p2) target bundleno = 323 (0x143), region = 32  ;;  %p163_p3 = scmp.lt.s32.totalorder (!%p139_p2), %s487_s16, 15 }
   0xb   : > { %v191_v0 = vld [vmem:[%s756_s1 + $0x20] sm:$0xf]  ;;  %vm256_vm0 = vcmask 1043456   ;;  %v544_v4 = vld [vmem:[%s756_s1 + $0x18] sm:$0xff]  ;;  %v543_v5 = vld [vmem:[%s756_s1 + $0x10] sm:$0xff]  ;;  %s760_s16 = smov (!%p163_p3, %s487_s16), 15 }
   0xc   : > { %v233_v1 = vunpack.c.l.b16 %v191_v0  ;;  %v542_v6 = vld [vmem:[%s756_s1 + $0x8] sm:$0xff]  ;;  %s488_s23 = sshll.u32 %s760_s16, 2  ;;  %v541_v7 = vld [vmem:[%s756_s1] sm:$0xff]  ;;  %vm243_vm1 = vcmask 588800   ;;  %vm417_vm3 = vcmask 125952  }
   0xd   : > { %s166_s28 = scalar_lea.vmem %s755_s0, %s488_s23  ;;  %v569_v12 = vld [vmem:[%s757_s2] ss:$0 sm:$0xff]  ;;  %s716_s7 = scalar_lea.vmem %s758_s3, %s488_s23 }
   0xe   : > { %v238_v2 = vpack.c.b16 %v233_v1, %v233_v1  ;;  %v537_v8 = vld [vmem:[%s166_s28] sm:$0xff]  ;;  %v538_v9 = vld [vmem:[%s166_s28 + $0x8] sm:$0xff]  ;;  %v539_v10 = vld [vmem:[%s166_s28 + $0x10] sm:$0xff] }
   0xf   : > { %v540_v11 = vld [vmem:[%s166_s28 + $0x18] sm:$0xff] }
  0x10   : > { %v258_v3 = vsel %vm256_vm0, %v238_v2, 0 }
  0x11   : > { %263 = vmatpush.bf16.msra.mxu0 %v258_v3  ;;  %545 = vmatpush.bf16.msra.mxu1 %v258_v3 }
  0x12   : > { %546 = vmatpush.bf16.msra.mxu2 %v258_v3  ;;  %547 = vmatpush.bf16.msra.mxu3 %v258_v3 }
  0x15   : > { %264 = vmatpush.bf16.msra.mxu0 %v544_v4  ;;  %548 = vmatpush.bf16.msra.mxu1 %v544_v4 }
  0x16   : > { %549 = vmatpush.bf16.msra.mxu2 %v544_v4  ;;  %550 = vmatpush.bf16.msra.mxu3 %v544_v4 }
  0x19   : > { %265 = vmatpush.bf16.msra.mxu0 %v543_v5  ;;  %551 = vmatpush.bf16.msra.mxu1 %v543_v5 }
  0x1a   : > { %552 = vmatpush.bf16.msra.mxu2 %v543_v5  ;;  %553 = vmatpush.bf16.msra.mxu3 %v543_v5 }
  0x1d   : > { %266 = vmatpush.bf16.msra.mxu0 %v542_v6  ;;  %554 = vmatpush.bf16.msra.mxu1 %v542_v6 }
  0x1e   : > { %555 = vmatpush.bf16.msra.mxu2 %v542_v6  ;;  %556 = vmatpush.bf16.msra.mxu3 %v542_v6 }
  0x21   : > { %267 = vmatpush.bf16.msra.mxu0 %v541_v7  ;;  %557 = vmatpush.bf16.msra.mxu1 %v541_v7 }
  0x22   : > { %558 = vmatpush.bf16.msra.mxu2 %v541_v7  ;;  %559 = vmatpush.bf16.msra.mxu3 %v541_v7 }
  0x24   : > { %523 = vmatmul.msk.bf16.vlgmr.msra.gmra.mxu0 %vm243_vm1, %v537_v8  ;;  %524 = vmatmul.msk.bf16.vlgmr.msra.gmra.mxu1 %vm243_vm1, %v538_v9 }
  0x25   : > { %525 = vmatmul.msk.bf16.vlgmr.msra.gmra.mxu2 %vm243_vm1, %v539_v10  ;;  %526 = vmatmul.msk.bf16.vlgmr.msra.gmra.mxu3 %vm243_vm1, %v540_v11 }
  0xa1   : > { %v269_v13 = vpop.f32.mrf.mxu0  ;;  %v274_v14 = vpop.f32.mrf.mxu1 }
  0xa2   : > { %v681_v15 = vadd.f32 %v569_v12, %v269_v13  ;;  %v683_v16 = vadd.f32 %v569_v12, %v274_v14 }
  0xa4   : > { %v329_v17 = vsub.f32 0.0, %v681_v15  ;;  %v331_v18 = vsub.f32 0.0, %v683_v16  ;;  %v301_v9 = vmul.f32 1.442695, %v683_v16  ;;  %v297_v10 = vmul.f32 1.442695, %v681_v15 }
  0xa5   : > { %vm291_vm5 = vcmp.gt.f32.partialorder %v683_v16, 0.0  ;;  %vm289_vm6 = vcmp.gt.f32.partialorder %v681_v15, 0.0 }
  0xa6   : > { %v337_v19 = vmul.f32 1.442695, %v329_v17  ;;  %v341_v20 = vmul.f32 1.442695, %v331_v18 }
  0xa8   : > { %v279_v21 = vpop.f32.mrf.mxu2  ;;  %v284_v22 = vpop.f32.mrf.mxu3  ;;  %570 = vpow2.f32 %v341_v20 }
  0xa9   : > { %v687_v23 = vadd.f32 %v569_v12, %v279_v21  ;;  %v271_v24 = vpop.f32.mrf.mxu0  ;;  %v276_v25 = vpop.f32.mrf.mxu1  ;;  %572 = vpow2.f32 %v337_v19  ;;  %v693_v28 = vadd.f32 %v569_v12, %v284_v22 }
  0xaa   : > { %v689_v26 = vadd.f32 %v569_v12, %v271_v24  ;;  %v691_v27 = vadd.f32 %v569_v12, %v276_v25 }
  0xab   : > { %v333_v29 = vsub.f32 0.0, %v687_v23  ;;  %v335_v32 = vsub.f32 0.0, %v693_v28  ;;  %v305_v5 = vmul.f32 1.442695, %v687_v23  ;;  %vm293_vm2 = vcmp.gt.f32.partialorder %v687_v23, 0.0 }
  0xac   : > { %v330_v30 = vsub.f32 0.0, %v689_v26  ;;  %v332_v31 = vsub.f32 0.0, %v691_v27  ;;  %v303_v19 = vmul.f32 1.442695, %v691_v27  ;;  %v299_v20 = vmul.f32 1.442695, %v689_v26 }
  0xad   : > { %v345_v38 = vmul.f32 1.442695, %v333_v29  ;;  %v349_v42 = vmul.f32 1.442695, %v335_v32  ;;  %vm292_vm7 = vcmp.gt.f32.partialorder %v691_v27, 0.0  ;;  %vm290_vm8 = vcmp.gt.f32.partialorder %v689_v26, 0.0 }
  0xae   : > { %v571_v33 = vpop.eup %570  ;;  %v339_v34 = vmul.f32 1.442695, %v330_v30  ;;  %v343_v35 = vmul.f32 1.442695, %v332_v31  ;;  %vm295_vm9 = vcmp.gt.f32.partialorder %v693_v28, 0.0 }
  0xaf   : > { %v573_v36 = vpop.eup %572  ;;  %v355_v37 = vadd.f32 1.0, %v571_v33 }
  0xb0   : > { %574 = vpow2.f32 %v339_v34  ;;  %v281_v39 = vpop.f32.mrf.mxu2  ;;  %v286_v40 = vpop.f32.mrf.mxu3  ;;  %v353_v41 = vadd.f32 1.0, %v573_v36  ;;  %v309_v34 = vmul.f32 1.442695, %v693_v28 }
  0xb1   : > { %576 = vpow2.f32 %v343_v35  ;;  %v699_v43 = vadd.f32 %v569_v12, %v281_v39  ;;  %v701_v44 = vadd.f32 %v569_v12, %v286_v40 }
  0xb2   : > { %578 = vrcp.f32 %v355_v37 }
  0xb3   : > { %v334_v45 = vsub.f32 0.0, %v699_v43  ;;  %v336_v46 = vsub.f32 0.0, %v701_v44  ;;  %580 = vrcp.f32 %v353_v41  ;;  %v307_v6 = vmul.f32 1.442695, %v699_v43 }
  0xb4   : > { %582 = vpow2.f32 %v345_v38  ;;  %vm294_vm4 = vcmp.gt.f32.partialorder %v699_v43, 0.0  ;;  %v311_v39 = vmul.f32 1.442695, %v701_v44  ;;  %vm296_vm10 = vcmp.gt.f32.partialorder %v701_v44, 0.0 }
  0xb5   : > { %584 = vpow2.f32 %v349_v42  ;;  %v347_v47 = vmul.f32 1.442695, %v334_v45  ;;  %v351_v51 = vmul.f32 1.442695, %v336_v46 }
  0xb6   : > { %v575_v48 = vpop.eup %574 }
  0xb7   : > { %v577_v49 = vpop.eup %576  ;;  %v354_v50 = vadd.f32 1.0, %v575_v48  ;;  %586 = vpow2.f32 %v347_v47 }
  0xb8   : > { %v579_v52 = vpop.eup %578  ;;  %v356_v53 = vadd.f32 1.0, %v577_v49 }
  0xb9   : > { %v581_v54 = vpop.eup %580  ;;  %588 = vrcp.f32 %v354_v50  ;;  %381 = vrot.lane.b32.xlu1 %v579_v52, %s626_s4 }
  0xba   : > { %v583_v55 = vpop.eup %582  ;;  %590 = vrcp.f32 %v356_v53  ;;  %377 = vrot.lane.b32.xlu0 %v581_v54, %s626_s4 }
  0xbb   : > { %v585_v56 = vpop.eup %584  ;;  %592 = vpow2.f32 %v351_v51  ;;  %v357_v57 = vadd.f32 1.0, %v583_v55 }
  0xbc   : > { %v359_v59 = vadd.f32 1.0, %v585_v56 }
  0xbd   : > { %v587_v58 = vpop.eup %586  ;;  %594 = vrcp.f32 %v357_v57 }
  0xbe   : > { %v358_v61 = vadd.f32 1.0, %v587_v58  ;;  %596 = vrcp.f32 %v359_v59 }
  0xbf   : > { %v589_v60 = vpop.eup %588 }
  0xc0   : > { %v591_v62 = vpop.eup %590  ;;  %598 = vrcp.f32 %v358_v61 }
  0xc1   : > { %v593_v63 = vpop.eup %592  ;;  %383 = vrot.lane.b32.xlu1 %v591_v62, %s626_s4 }
  0xc2   : > { %v360_v0 = vadd.f32 1.0, %v593_v63  ;;  %379 = vrot.lane.b32.xlu0 %v589_v60, %s626_s4 }
  0xc3   : > { %v595_v1 = vpop.eup %594 }
  0xc4   : > { %600 = vrcp.f32 %v360_v0  ;;  %385 = vrot.lane.b32.xlu2 %v595_v1, %s626_s4  ;;  %v597_v2 = vpop.eup %596 }
  0xc5   : > { %602 = vpow2.f32 %v305_v5 }
  0xc6   : > { %v599_v3 = vpop.eup %598  ;;  %604 = vpow2.f32 %v307_v6 }
  0xc7   : > { %606 = vpow2.f32 %v301_v9 }
  0xc8   : > { %608 = vpow2.f32 %v297_v10 }
  0xc9   : > { %610 = vpow2.f32 %v303_v19 }
  0xca   : > { %v601_v4 = vpop.eup %600  ;;  %389 = vrot.lane.b32.xlu0 %v597_v2, %s626_s4  ;;  %612 = vpow2.f32 %v299_v20 }
  0xcb   : > { %391 = vrot.lane.b32.xlu1 %v601_v4, %s626_s4  ;;  %v603_v7 = vpop.eup %602  ;;  %614 = vpow2.f32 %v309_v34 }
  0xcc   : > { %387 = vrot.lane.b32.xlu2 %v599_v3, %s626_s4  ;;  %v531_v8 = vadd.f32 -1.0, %v603_v7  ;;  %v605_v13 = vpop.eup %604  ;;  %616 = vpow2.f32 %v311_v39 }
  0xcd   : > { %v532_v18 = vadd.f32 -1.0, %v605_v13  ;;  %v607_v21 = vpop.eup %606 }
  0xce   : > { %v325_v12 = vsel %vm293_vm2, %v687_v23, %v531_v8  ;;  %v609_v22 = vpop.eup %608  ;;  %v529_v29 = vadd.f32 -1.0, %v607_v21 }
  0xcf   : > { %v326_v23 = vsel %vm294_vm4, %v699_v43, %v532_v18  ;;  %v527_v30 = vadd.f32 -1.0, %v609_v22  ;;  %v611_v35 = vpop.eup %610 }
  0xd0   : > { %v323_v33 = vsel %vm291_vm5, %v683_v16, %v529_v29  ;;  %v613_v40 = vpop.eup %612  ;;  %v530_v45 = vadd.f32 -1.0, %v611_v35 }
  0xd1   : > { %v321_v38 = vsel %vm289_vm6, %v681_v15, %v527_v30  ;;  %v528_v16 = vadd.f32 -1.0, %v613_v40  ;;  %v615_v50 = vpop.eup %614 }
  0xd2   : > { %v324_v15 = vsel %vm292_vm7, %v691_v27, %v530_v45  ;;  %v617_v52 = vpop.eup %616  ;;  %v533_v55 = vadd.f32 -1.0, %v615_v50 }
  0xd3   : > { %v322_v48 = vsel %vm290_vm8, %v689_v26, %v528_v16  ;;  %v534_v27 = vadd.f32 -1.0, %v617_v52 }
  0xd4   : > { %v327_v26 = vsel %vm295_vm9, %v693_v28, %v533_v55 }
  0xd5   : > { %v328_v57 = vsel %vm296_vm10, %v701_v44, %v534_v27 }
 0x11e   : > { %v386_v11 = vpop.permute.xlu2 %385 }
 0x11f   : > { %v405_v14 = vmul.f32 %v386_v11, %v325_v12 }
 0x121   : > { %v413_v17 = vpack.c.bf16 %v405_v14, %v405_v14 }
 0x123   : > { %422 = vst.msk [vmem:[%s716_s7 + $0x10] sm:$0xf] %vm417_vm3, %v413_v17 }
 0x126   : > { %v388_v24 = vpop.permute.xlu2 %387 }
 0x127   : > { %v406_v25 = vmul.f32 %v388_v24, %v326_v23 }
 0x129   : > { %v414_v31 = vpack.c.bf16 %v406_v25, %v406_v25 }
 0x12b   : > { %423 = vst.msk [vmem:[%s716_s7 + $0x14] sm:$0xf] %vm417_vm3, %v414_v31  ;;  %v382_v32 = vpop.permute.xlu1 %381 }
 0x12c   : > { %v403_v36 = vmul.f32 %v382_v32, %v323_v33  ;;  %v378_v37 = vpop.permute.xlu0 %377 }
 0x12d   : > { %v401_v41 = vmul.f32 %v378_v37, %v321_v38 }
 0x12e   : > { %v411_v42 = vpack.c.bf16 %v403_v36, %v403_v36 }
 0x12f   : > { %v409_v43 = vpack.c.bf16 %v401_v41, %v401_v41 }
 0x130   : > { %420 = vst.msk [vmem:[%s716_s7 + $0x8] sm:$0xf] %vm417_vm3, %v411_v42 }
 0x131   : > { %418 = vst.msk [vmem:[%s716_s7] sm:$0xf] %vm417_vm3, %v409_v43 }
 0x133   : > { %v384_v46 = vpop.permute.xlu1 %383 }
 0x134   : > { %v404_v47 = vmul.f32 %v384_v46, %v324_v15  ;;  %v380_v49 = vpop.permute.xlu0 %379 }
 0x135   : > { %v402_v51 = vmul.f32 %v380_v49, %v322_v48 }
 0x136   : > { %v412_v53 = vpack.c.bf16 %v404_v47, %v404_v47 }
 0x137   : > { %v410_v54 = vpack.c.bf16 %v402_v51, %v402_v51 }
 0x138   : > { %421 = vst.msk [vmem:[%s716_s7 + $0xc] sm:$0xf] %vm417_vm3, %v412_v53 }
 0x139   : > { %419 = vst.msk [vmem:[%s716_s7 + $0x4] sm:$0xf] %vm417_vm3, %v410_v54 }
 0x13c   : > { %v390_v56 = vpop.permute.xlu0 %389 }
 0x13d   : > { %v392_v58 = vpop.permute.xlu1 %391  ;;  %v407_v59 = vmul.f32 %v390_v56, %v327_v26 }
 0x13e   : > { %v408_v60 = vmul.f32 %v392_v58, %v328_v57 }
 0x13f   : > { %v415_v61 = vpack.c.bf16 %v407_v59, %v407_v59 }
 0x140   : > { %v416_v62 = vpack.c.bf16 %v408_v60, %v408_v60 }
 0x141   : > { %424 = vst.msk [vmem:[%s716_s7 + $0x18] sm:$0xf] %vm417_vm3, %v415_v61 }
 0x142   : > { %425 = vst.msk [vmem:[%s716_s7 + $0x1c] sm:$0xf] %vm417_vm3, %v416_v62 }
 0x143 PF: > { %s13_s12 = sadd.s32 1, %s624_s12  }
 0x144   : > { %p10_p4 = scmp.ge.s32.totalorder %s13_s12, 4  }
 0x146   :  { %12 = sbr.rel (!%p10_p4) target bundleno = 1 (0x1), region = 62 }

// kernel: generator_forward.45
= control target key start
LH: loop header
LB: loop body
LE: loop exit
PB: predicated region body
PF: predicated region fallthrough
CT: control target
= control target key end

     0   :  { %s768_s12 = smov 0   ;;  %s925_s0 = inlined_call_operand.vmem [shape: bf16[128,144], index: 0, kind: input, shape index: {}]   ;;  %s926_s1 = inlined_call_operand.vmem [shape: bf16[144,32], index: 1, kind: input, shape index: {}]   ;;  %s927_s2 = inlined_call_operand.vmem [shape: f32[1,32], index: 2, kind: input, shape index: {}]   ;;  %s928_s3 = inlined_call_operand.vmem [shape: bf16[128,16], index: 3, kind: output, shape index: {}]  }
   0x1 LB: > { %s562_s13 = sadd.s32 4294967295, %s745_s12   ;;  %p566_p0 = scmp.ge.s32.totalorder %s745_s12, 1  ;;  %s745_s12 = sphi %s768_s12, %s13_s12  }
   0x2   : > { %p139_p1 = scmp.lt.s32.totalorder %s745_s12, 3 }
   0x4   : > { %p140_p2 = pnand %p566_p0, %p139_p1 }
   0x5   : > { %s567_s16 = sshll.u32 (!%p140_p2), %s562_s13, 3  ;;  %s747_s13 = smov (!%p140_p2), 112  }
   0x6   : > { %143 = sbr.rel (%p140_p2) target bundleno = 345 (0x159), region = 32  ;;  %p165_p3 = scmp.lt.s32.totalorder (!%p140_p2), %s567_s16, 15 }
   0xb   : > { %v670_v0 = vld [vmem:[%s926_s1 + $0x38] sm:$0xff]  ;;  %v671_v1 = vld [vmem:[%s926_s1 + $0x40] sm:$0xff]  ;;  %v669_v2 = vld [vmem:[%s926_s1 + $0x30] sm:$0xff]  ;;  %s930_s16 = smov (!%p165_p3, %s567_s16), 15  ;;  %vm298_vm0 = vcmask 130048   ;;  %vm497_vm2 = vcmask 125952  }
   0xc   : > { %311 = vmatpush.bf16.msra.mxu0 %v670_v0  ;;  %672 = vmatpush.bf16.msra.mxu2 %v670_v0  ;;  %s654_s21 = sshll.u32 %s930_s16, 3  ;;  %v668_v3 = vld [vmem:[%s926_s1 + $0x28] sm:$0xff]  ;;  %v667_v8 = vld [vmem:[%s926_s1 + $0x20] sm:$0xff]  ;;  %v666_v11 = vld [vmem:[%s926_s1 + $0x18] sm:$0xff]  ;;  %s571_s14 = sshll.u32 %s930_s16, 2 }
   0xd   : > { %680 = vmatpush.bf16.msra.mxu3 %v671_v1  ;;  %347 = vmatpush.bf16.msra.mxu1 %v671_v1  ;;  %s794_s26 = scalar_lea.vmem %s925_s0, %s654_s21  ;;  %v665_v12 = vld [vmem:[%s926_s1 + $0x10] sm:$0xff]  ;;  %v664_v15 = vld [vmem:[%s926_s1 + $0x8] sm:$0xff]  ;;  %v663_v17 = vld [vmem:[%s926_s1] sm:$0xff]  ;;  %s885_s18 = scalar_lea.vmem %s928_s3, %s571_s14 }
   0xe   : > { %v657_v4 = vld [vmem:[%s794_s26 + $0x14] sm:$0xf]  ;;  %v584_v5 = vld [vmem:[%s794_s26 + $0x18] sm:$0xf0]  ;;  %v655_v7 = vld [vmem:[%s794_s26 + $0x4] sm:$0xf] }
   0xf   : > { %v587_v6 = vor.u32 %v657_v4, %v584_v5  ;;  %v576_v9 = vld [vmem:[%s794_s26 + $0x8] sm:$0xf0]  ;;  %v659_v13 = vld [vmem:[%s794_s26 + $0x24] sm:$0xf]  ;;  %v574_v18 = vld [vmem:[%s794_s26] sm:$0xf] }
  0x10   : > { %312 = vmatpush.bf16.msra.mxu0 %v669_v2  ;;  %673 = vmatpush.bf16.msra.mxu2 %v669_v2  ;;  %v579_v10 = vor.u32 %v655_v7, %v576_v9  ;;  %v592_v14 = vld [vmem:[%s794_s26 + $0x28] sm:$0xf0]  ;;  %v656_v19 = vld [vmem:[%s794_s26 + $0x4] sm:$0xf0]  ;;  %v590_v20 = vld [vmem:[%s794_s26 + $0x20] sm:$0xf] }
  0x11   : > { %641 = vmatmul.msk.bf16.vlgmr.msra.gmra.mxu3 %vm298_vm0, %v587_v6  ;;  %v595_v16 = vor.u32 %v659_v13, %v592_v14  ;;  %v660_v21 = vld [vmem:[%s794_s26 + $0x24] sm:$0xf0]  ;;  %v575_v22 = vor.u32 %v656_v19, %v574_v18  ;;  %v661_v24 = vld [vmem:[%s794_s26 + $0x34] sm:$0xf]  ;;  %v600_v25 = vld [vmem:[%s794_s26 + $0x38] sm:$0xf0] }
  0x12   : > { %640 = vmatmul.msk.bf16.vlgmr.msra.gmra.mxu1 %vm298_vm0, %v579_v10  ;;  %v591_v23 = vor.u32 %v660_v21, %v590_v20  ;;  %v603_v26 = vor.u32 %v661_v24, %v600_v25  ;;  %v582_v27 = vld [vmem:[%s794_s26 + $0x10] sm:$0xf]  ;;  %v658_v28 = vld [vmem:[%s794_s26 + $0x14] sm:$0xf0]  ;;  %v834_v35 = vld [vmem:[%s927_s2] ss:$0 sm:$0xff] }
  0x13   : > { %v598_v29 = vld [vmem:[%s794_s26 + $0x30] sm:$0xf]  ;;  %v662_v30 = vld [vmem:[%s794_s26 + $0x34] sm:$0xf0]  ;;  %v583_v31 = vor.u32 %v658_v28, %v582_v27 }
  0x14   : > { %313 = vmatpush.bf16.msra.mxu0 %v668_v3  ;;  %674 = vmatpush.bf16.msra.mxu2 %v668_v3  ;;  %v599_v32 = vor.u32 %v662_v30, %v598_v29 }
  0x18   : > { %314 = vmatpush.bf16.msra.mxu0 %v667_v8  ;;  %675 = vmatpush.bf16.msra.mxu2 %v667_v8 }
  0x1c   : > { %315 = vmatpush.bf16.msra.mxu0 %v666_v11  ;;  %676 = vmatpush.bf16.msra.mxu2 %v666_v11 }
  0x20   : > { %316 = vmatpush.bf16.msra.mxu0 %v665_v12  ;;  %677 = vmatpush.bf16.msra.mxu2 %v665_v12 }
  0x21   : > { %642 = vmatmul.msk.bf16.gmra.mxu3 %vm298_vm0, %v595_v16 }
  0x24   : > { %317 = vmatpush.bf16.msra.mxu0 %v664_v15  ;;  %678 = vmatpush.bf16.msra.mxu2 %v664_v15 }
  0x28   : > { %318 = vmatpush.bf16.msra.mxu0 %v663_v17  ;;  %679 = vmatpush.bf16.msra.mxu2 %v663_v17 }
  0x2b   : > { %319 = vmatmul.bf16.vlgmr.msra.gmra.mxu0 %v575_v22  ;;  %329 = vmatmul.bf16.vlgmr.msra.gmra.mxu2 %v591_v23 }
  0x31   : > { %643 = vmatmul.msk.bf16.gmra.mxu3 %vm298_vm0, %v603_v26 }
  0x3b   : > { %324 = vmatmul.bf16.gmra.mxu0 %v583_v31  ;;  %334 = vmatmul.bf16.gmra.mxu2 %v599_v32 }
  0x8f   : > { %v349_v36 = vpop.f32.mrf.mxu1 }
  0x94   : > { %v354_v33 = vpop.f32.mrf.mxu3 }
  0x97   : > { %v351_v46 = vpop.f32.mrf.mxu1 }
  0x9c   : > { %v356_v34 = vpop.f32.mrf.mxu3 }
  0xa4   : > { %v359_v39 = vpop.f32.mrf.mxu3 }
  0xa8   : > { %v320_v37 = vpop.f32.mrf.mxu0 }
  0xa9   : > { %v321_v38 = vadd.f32 %v834_v35, %v320_v37 }
  0xab   : > { %v837_v40 = vadd.f32 %v349_v36, %v321_v38 }
  0xac   : > { %v361_v51 = vpop.f32.mrf.mxu3 }
  0xad   : > { %v409_v41 = vsub.f32 0.0, %v837_v40  ;;  %vm369_vm4 = vcmp.gt.f32.partialorder %v837_v40, 0.0 }
  0xae   : > { %v330_v42 = vpop.f32.mrf.mxu2 }
  0xaf   : > { %v417_v43 = vmul.f32 1.442695, %v409_v41  ;;  %v331_v44 = vadd.f32 %v834_v35, %v330_v42 }
  0xb0   : > { %v322_v45 = vpop.f32.mrf.mxu0 }
  0xb1   : > { %v841_v47 = vadd.f32 %v359_v39, %v331_v44  ;;  %v323_v48 = vadd.f32 %v834_v35, %v322_v45  ;;  %691 = vpow2.f32 %v417_v43 }
  0xb3   : > { %v844_v49 = vadd.f32 %v351_v46, %v323_v48  ;;  %v413_v50 = vsub.f32 0.0, %v841_v47  ;;  %v385_v43 = vmul.f32 1.442695, %v841_v47  ;;  %vm373_vm1 = vcmp.gt.f32.partialorder %v841_v47, 0.0 }
  0xb4   : > { %v364_v3 = vpop.f32.mrf.mxu3 }
  0xb5   : > { %v410_v52 = vsub.f32 0.0, %v844_v49  ;;  %v425_v53 = vmul.f32 1.442695, %v413_v50  ;;  %vm370_vm5 = vcmp.gt.f32.partialorder %v844_v49, 0.0 }
  0xb6   : > { %v332_v54 = vpop.f32.mrf.mxu2 }
  0xb7   : > { %v692_v55 = vpop.eup %691  ;;  %v419_v56 = vmul.f32 1.442695, %v410_v52  ;;  %v333_v57 = vadd.f32 %v834_v35, %v332_v54  ;;  %693 = vpow2.f32 %v425_v53  ;;  %v377_v53 = vmul.f32 1.442695, %v837_v40 }
  0xb8   : > { %v325_v58 = vpop.f32.mrf.mxu0  ;;  %v433_v59 = vadd.f32 1.0, %v692_v55 }
  0xb9   : > { %695 = vpow2.f32 %v419_v56  ;;  %v849_v60 = vadd.f32 %v361_v51, %v333_v57  ;;  %v326_v61 = vadd.f32 %v834_v35, %v325_v58  ;;  %v379_v58 = vmul.f32 1.442695, %v844_v49 }
  0xba   : > { %697 = vrcp.f32 %v433_v59 }
  0xbb   : > { %v414_v62 = vsub.f32 0.0, %v849_v60  ;;  %v853_v63 = vadd.f32 %v354_v33, %v326_v61  ;;  %v387_v44 = vmul.f32 1.442695, %v849_v60  ;;  %vm374_vm3 = vcmp.gt.f32.partialorder %v849_v60, 0.0 }
  0xbc   : > { %v366_v26 = vpop.f32.mrf.mxu3 }
  0xbd   : > { %v694_v0 = vpop.eup %693  ;;  %v427_v1 = vmul.f32 1.442695, %v414_v62  ;;  %v411_v2 = vsub.f32 0.0, %v853_v63  ;;  %vm371_vm6 = vcmp.gt.f32.partialorder %v853_v63, 0.0 }
  0xbe   : > { %v335_v4 = vpop.f32.mrf.mxu2  ;;  %v437_v5 = vadd.f32 1.0, %v694_v0  ;;  %v381_v0 = vmul.f32 1.442695, %v853_v63 }
  0xbf   : > { %v696_v6 = vpop.eup %695  ;;  %699 = vpow2.f32 %v427_v1  ;;  %v336_v7 = vadd.f32 %v834_v35, %v335_v4  ;;  %v421_v8 = vmul.f32 1.442695, %v411_v2 }
  0xc0   : > { %v698_v9 = vpop.eup %697  ;;  %v434_v10 = vadd.f32 1.0, %v696_v6  ;;  %v327_v11 = vpop.f32.mrf.mxu0  ;;  %701 = vrcp.f32 %v437_v5 }
  0xc1   : > { %v857_v12 = vadd.f32 %v364_v3, %v336_v7  ;;  %v328_v13 = vadd.f32 %v834_v35, %v327_v11  ;;  %457 = vrot.lane.b32.xlu0 %v698_v9, %s747_s13  ;;  %703 = vpow2.f32 %v421_v8 }
  0xc2   : > { %705 = vrcp.f32 %v434_v10 }
  0xc3   : > { %v415_v14 = vsub.f32 0.0, %v857_v12  ;;  %v862_v15 = vadd.f32 %v356_v34, %v328_v13  ;;  %v389_v6 = vmul.f32 1.442695, %v857_v12  ;;  %vm375_vm7 = vcmp.gt.f32.partialorder %v857_v12, 0.0 }
  0xc5   : > { %v700_v16 = vpop.eup %699  ;;  %v429_v17 = vmul.f32 1.442695, %v415_v14  ;;  %v412_v18 = vsub.f32 0.0, %v862_v15  ;;  %v383_v7 = vmul.f32 1.442695, %v862_v15  ;;  %vm372_vm8 = vcmp.gt.f32.partialorder %v862_v15, 0.0 }
  0xc6   : > { %v702_v19 = vpop.eup %701  ;;  %v438_v20 = vadd.f32 1.0, %v700_v16  ;;  %v337_v21 = vpop.f32.mrf.mxu2 }
  0xc7   : > { %v704_v22 = vpop.eup %703  ;;  %707 = vpow2.f32 %v429_v17  ;;  %v423_v23 = vmul.f32 1.442695, %v412_v18  ;;  %v338_v24 = vadd.f32 %v834_v35, %v337_v21  ;;  %465 = vrot.lane.b32.xlu2 %v702_v19, %s747_s13 }
  0xc8   : > { %v706_v25 = vpop.eup %705  ;;  %709 = vrcp.f32 %v438_v20  ;;  %v435_v27 = vadd.f32 1.0, %v704_v22 }
  0xc9   : > { %711 = vpow2.f32 %v423_v23  ;;  %v867_v28 = vadd.f32 %v366_v26, %v338_v24  ;;  %459 = vrot.lane.b32.xlu0 %v706_v25, %s747_s13 }
  0xca   : > { %713 = vrcp.f32 %v435_v27 }
  0xcb   : > { %v416_v29 = vsub.f32 0.0, %v867_v28  ;;  %v391_v16 = vmul.f32 1.442695, %v867_v28  ;;  %vm376_vm9 = vcmp.gt.f32.partialorder %v867_v28, 0.0 }
  0xcd   : > { %v708_v30 = vpop.eup %707  ;;  %v431_v31 = vmul.f32 1.442695, %v416_v29 }
  0xce   : > { %v710_v32 = vpop.eup %709  ;;  %v439_v33 = vadd.f32 1.0, %v708_v30 }
  0xcf   : > { %v712_v34 = vpop.eup %711  ;;  %715 = vpow2.f32 %v431_v31  ;;  %467 = vrot.lane.b32.xlu2 %v710_v32, %s747_s13 }
  0xd0   : > { %v714_v35 = vpop.eup %713  ;;  %717 = vrcp.f32 %v439_v33  ;;  %v436_v36 = vadd.f32 1.0, %v712_v34 }
  0xd1   : > { %461 = vrot.lane.b32.xlu1 %v714_v35, %s747_s13 }
  0xd2   : > { %719 = vrcp.f32 %v436_v36 }
  0xd5   : > { %v716_v37 = vpop.eup %715 }
  0xd6   : > { %v718_v38 = vpop.eup %717  ;;  %v440_v39 = vadd.f32 1.0, %v716_v37 }
  0xd7   : > { %469 = vrot.lane.b32.xlu0 %v718_v38, %s747_s13 }
  0xd8   : > { %v720_v41 = vpop.eup %719  ;;  %721 = vrcp.f32 %v440_v39 }
  0xd9   : > { %463 = vrot.lane.b32.xlu1 %v720_v41, %s747_s13  ;;  %723 = vpow2.f32 %v385_v43 }
  0xda   : > { %725 = vpow2.f32 %v387_v44 }
  0xdb   : > { %727 = vpow2.f32 %v377_v53 }
  0xdc   : > { %729 = vpow2.f32 %v379_v58 }
  0xdd   : > { %731 = vpow2.f32 %v381_v0 }
  0xde   : > { %v722_v42 = vpop.eup %721  ;;  %733 = vpow2.f32 %v389_v6 }
  0xdf   : > { %v724_v45 = vpop.eup %723  ;;  %735 = vpow2.f32 %v383_v7 }
  0xe0   : > { %v648_v46 = vadd.f32 -1.0, %v724_v45  ;;  %v726_v51 = vpop.eup %725  ;;  %737 = vpow2.f32 %v391_v16 }
  0xe1   : > { %471 = vrot.lane.b32.xlu1 %v722_v42, %s747_s13  ;;  %v649_v55 = vadd.f32 -1.0, %v726_v51  ;;  %v728_v59 = vpop.eup %727 }
  0xe2   : > { %v405_v50 = vsel %vm373_vm1, %v841_v47, %v648_v46  ;;  %v644_v62 = vadd.f32 -1.0, %v728_v59  ;;  %v730_v3 = vpop.eup %729 }
  0xe3   : > { %v406_v47 = vsel %vm374_vm3, %v849_v60, %v649_v55  ;;  %v645_v5 = vadd.f32 -1.0, %v730_v3  ;;  %v732_v10 = vpop.eup %731 }
  0xe4   : > { %v401_v2 = vsel %vm369_vm4, %v837_v40, %v644_v62  ;;  %v646_v13 = vadd.f32 -1.0, %v732_v10  ;;  %v734_v14 = vpop.eup %733 }
  0xe5   : > { %v402_v8 = vsel %vm370_vm5, %v844_v49, %v645_v5  ;;  %v736_v19 = vpop.eup %735  ;;  %v650_v20 = vadd.f32 -1.0, %v734_v14 }
  0xe6   : > { %v403_v18 = vsel %vm371_vm6, %v853_v63, %v646_v13  ;;  %v647_v22 = vadd.f32 -1.0, %v736_v19  ;;  %v738_v27 = vpop.eup %737 }
  0xe7   : > { %v407_v23 = vsel %vm375_vm7, %v857_v12, %v650_v20  ;;  %v651_v32 = vadd.f32 -1.0, %v738_v27 }
  0xe8   : > { %v404_v63 = vsel %vm372_vm8, %v862_v15, %v647_v22 }
  0xe9   : > { %v408_v12 = vsel %vm376_vm9, %v867_v28, %v651_v32 }
 0x121   : > { %v466_v48 = vpop.permute.xlu2 %465 }
 0x122   : > { %v485_v52 = vmul.f32 %v466_v48, %v405_v50 }
 0x124   : > { %v493_v54 = vpack.c.bf16 %v485_v52, %v485_v52 }
 0x126   : > { %502 = vst.msk [vmem:[%s885_s18 + $0x10] sm:$0xf] %vm497_vm2, %v493_v54 }
 0x129   : > { %v468_v56 = vpop.permute.xlu2 %467 }
 0x12a   : > { %v486_v57 = vmul.f32 %v468_v56, %v406_v47 }
 0x12c   : > { %v494_v61 = vpack.c.bf16 %v486_v57, %v486_v57 }
 0x12e   : > { %503 = vst.msk [vmem:[%s885_s18 + $0x14] sm:$0xf] %vm497_vm2, %v494_v61 }
 0x133   : > { %v458_v1 = vpop.permute.xlu0 %457 }
 0x134   : > { %v481_v60 = vmul.f32 %v458_v1, %v401_v2 }
 0x136   : > { %v489_v4 = vpack.c.bf16 %v481_v60, %v481_v60 }
 0x138   : > { %498 = vst.msk [vmem:[%s885_s18] sm:$0xf] %vm497_vm2, %v489_v4 }
 0x13b   : > { %v460_v9 = vpop.permute.xlu0 %459 }
 0x13c   : > { %v482_v11 = vmul.f32 %v460_v9, %v402_v8 }
 0x13e   : > { %v490_v40 = vpack.c.bf16 %v482_v11, %v482_v11 }
 0x140   : > { %499 = vst.msk [vmem:[%s885_s18 + $0x4] sm:$0xf] %vm497_vm2, %v490_v40 }
 0x143   : > { %v462_v17 = vpop.permute.xlu1 %461 }
 0x144   : > { %v483_v49 = vmul.f32 %v462_v17, %v403_v18 }
 0x146   : > { %v491_v21 = vpack.c.bf16 %v483_v49, %v483_v49 }
 0x148   : > { %500 = vst.msk [vmem:[%s885_s18 + $0x8] sm:$0xf] %vm497_vm2, %v491_v21 }
 0x149   : > { %v470_v24 = vpop.permute.xlu0 %469 }
 0x14a   : > { %v487_v25 = vmul.f32 %v470_v24, %v407_v23 }
 0x14b   : > { %v464_v26 = vpop.permute.xlu1 %463 }
 0x14c   : > { %v495_v29 = vpack.c.bf16 %v487_v25, %v487_v25  ;;  %v484_v30 = vmul.f32 %v464_v26, %v404_v63 }
 0x14e   : > { %504 = vst.msk [vmem:[%s885_s18 + $0x18] sm:$0xf] %vm497_vm2, %v495_v29  ;;  %v492_v31 = vpack.c.bf16 %v484_v30, %v484_v30 }
 0x150   : > { %501 = vst.msk [vmem:[%s885_s18 + $0xc] sm:$0xf] %vm497_vm2, %v492_v31 }
 0x153   : > { %v472_v33 = vpop.permute.xlu1 %471 }
 0x154   : > { %v488_v34 = vmul.f32 %v472_v33, %v408_v12 }
 0x156   : > { %v496_v35 = vpack.c.bf16 %v488_v34, %v488_v34 }
 0x158   : > { %505 = vst.msk [vmem:[%s885_s18 + $0x1c] sm:$0xf] %vm497_vm2, %v496_v35 }
 0x159 PF: > { %s13_s12 = sadd.s32 1, %s745_s12  }
 0x15a   : > { %p10_p4 = scmp.ge.s32.totalorder %s13_s12, 4  }
 0x15c   :  { %12 = sbr.rel (!%p10_p4) target bundleno = 1 (0x1), region = 62 }

// kernel: generator_forward.46
= control target key start
LH: loop header
LB: loop body
LE: loop exit
PB: predicated region body
PF: predicated region fallthrough
CT: control target
= control target key end

     0   :  { %s510_s12 = smov 0   ;;  %s561_s0 = inlined_call_operand.vmem [shape: bf16[32,144], index: 0, kind: input, shape index: {}]   ;;  %s562_s1 = inlined_call_operand.vmem [shape: bf16[144,64], index: 1, kind: input, shape index: {}]   ;;  %s563_s2 = inlined_call_operand.vmem [shape: f32[1,64], index: 2, kind: input, shape index: {}]   ;;  %s564_s3 = inlined_call_operand.vmem [shape: bf16[32,32], index: 3, kind: output, shape index: {}]  }
   0x1 LB: > { %s388_s13 = sadd.s32 4294967295, %s487_s12   ;;  %p392_p0 = scmp.ge.s32.totalorder %s487_s12, 1  ;;  %s487_s12 = sphi %s510_s12, %s13_s12  }
   0x2   : > { %p139_p1 = scmp.lt.s32.totalorder %s487_s12, 3 }
   0x4   : > { %p140_p2 = pnand %p392_p0, %p139_p1 }
   0x5   : > { %s393_s16 = sshll.u32 (!%p140_p2), %s388_s13, 1  ;;  %s489_s13 = smov (!%p140_p2), 96  }
   0x6   : > { %143 = sbr.rel (%p140_p2) target bundleno = 321 (0x141), region = 32  ;;  %p165_p3 = scmp.lt.s32.totalorder (!%p140_p2), %s393_s16, 3 }
   0xb   : > { %v457_v0 = vld [vmem:[%s562_s1 + $0x38] sm:$0xff]  ;;  %v456_v1 = vld [vmem:[%s562_s1 + $0x30] sm:$0xff]  ;;  %v458_v2 = vld [vmem:[%s562_s1 + $0x40] sm:$0xff]  ;;  %s566_s16 = smov (!%p165_p3, %s393_s16), 3  ;;  %vm265_vm0 = vcmask 130048   ;;  %vm329_vm2 = vcmask 257024  }
   0xc   : > { %269 = vmatpush.bf16.msra.mxu0 %v457_v0  ;;  %290 = vmatpush.bf16.msra.mxu1 %v458_v2  ;;  %s447_s21 = sshll.u32 %s566_s16, 3  ;;  %v455_v3 = vld [vmem:[%s562_s1 + $0x28] sm:$0xff]  ;;  %v454_v7 = vld [vmem:[%s562_s1 + $0x20] sm:$0xff]  ;;  %v453_v8 = vld [vmem:[%s562_s1 + $0x18] sm:$0xff]  ;;  %s397_s14 = sshll.u32 %s566_s16, 2 }
   0xd   : > { %s169_s26 = scalar_lea.vmem %s561_s0, %s447_s21  ;;  %v452_v9 = vld [vmem:[%s562_s1 + $0x10] sm:$0xff]  ;;  %v451_v10 = vld [vmem:[%s562_s1 + $0x8] sm:$0xff]  ;;  %v450_v11 = vld [vmem:[%s562_s1] sm:$0xff]  ;;  %s175_s18 = scalar_lea.vmem %s564_s3, %s397_s14 }
   0xe   : > { %v448_v4 = vld [vmem:[%s169_s26 + $0x4] sm:$0xf]  ;;  %v402_v5 = vld [vmem:[%s169_s26 + $0x8] sm:$0xf0]  ;;  %v400_v12 = vld [vmem:[%s169_s26] sm:$0xf] }
   0xf   : > { %v405_v6 = vor.u32 %v448_v4, %v402_v5  ;;  %v449_v13 = vld [vmem:[%s169_s26 + $0x4] sm:$0xf0]  ;;  %v468_v15 = vld [vmem:[%s563_s2] ss:$0 sm:$0xff] }
  0x10   : > { %270 = vmatpush.bf16.msra.mxu0 %v456_v1  ;;  %v401_v14 = vor.u32 %v449_v13, %v400_v12 }
  0x11   : > { %442 = vmatmul.msk.bf16.vlgmr.msra.gmra.mxu1 %vm265_vm0, %v405_v6 }
  0x14   : > { %271 = vmatpush.bf16.msra.mxu0 %v455_v3 }
  0x18   : > { %272 = vmatpush.bf16.msra.mxu0 %v454_v7 }
  0x1c   : > { %273 = vmatpush.bf16.msra.mxu0 %v453_v8 }
  0x20   : > { %274 = vmatpush.bf16.msra.mxu0 %v452_v9 }
  0x24   : > { %275 = vmatpush.bf16.msra.mxu0 %v451_v10 }
  0x28   : > { %276 = vmatpush.bf16.msra.mxu0 %v450_v11 }
  0x2b   : > { %277 = vmatmul.bf16.vlgmr.msra.gmra.mxu0 %v401_v14 }
  0x8e   : > { %v292_v16 = vpop.f32.mrf.mxu1 }
  0x96   : > { %v294_v24 = vpop.f32.mrf.mxu1 }
  0xa8   : > { %v278_v17 = vpop.f32.mrf.mxu0 }
  0xa9   : > { %v279_v18 = vadd.f32 %v468_v15, %v278_v17 }
  0xab   : > { %v293_v19 = vadd.f32 %v292_v16, %v279_v18 }
  0xad   : > { %v307_v20 = vsub.f32 0.0, %v293_v19  ;;  %v299_v34 = vmul.f32 1.442695, %v293_v19  ;;  %vm297_vm1 = vcmp.gt.f32.partialorder %v293_v19, 0.0 }
  0xaf   : > { %v309_v21 = vmul.f32 1.442695, %v307_v20 }
  0xb0   : > { %v280_v22 = vpop.f32.mrf.mxu0 }
  0xb1   : > { %v281_v23 = vadd.f32 %v468_v15, %v280_v22  ;;  %469 = vpow2.f32 %v309_v21 }
  0xb3   : > { %v295_v25 = vadd.f32 %v294_v24, %v281_v23 }
  0xb5   : > { %v308_v26 = vsub.f32 0.0, %v295_v25  ;;  %v301_v35 = vmul.f32 1.442695, %v295_v25  ;;  %vm298_vm3 = vcmp.gt.f32.partialorder %v295_v25, 0.0 }
  0xb7   : > { %v470_v27 = vpop.eup %469  ;;  %v311_v28 = vmul.f32 1.442695, %v308_v26 }
  0xb8   : > { %v313_v29 = vadd.f32 1.0, %v470_v27 }
  0xb9   : > { %471 = vpow2.f32 %v311_v28 }
  0xba   : > { %473 = vrcp.f32 %v313_v29 }
  0xbf   : > { %v472_v30 = vpop.eup %471 }
  0xc0   : > { %v474_v31 = vpop.eup %473  ;;  %v314_v32 = vadd.f32 1.0, %v472_v30 }
  0xc1   : > { %319 = vrot.lane.b32.xlu0 %v474_v31, %s489_s13 }
  0xc2   : > { %475 = vrcp.f32 %v314_v32 }
  0xc3   : > { %477 = vpow2.f32 %v299_v34 }
  0xc4   : > { %479 = vpow2.f32 %v301_v35 }
  0xc8   : > { %v476_v33 = vpop.eup %475 }
  0xc9   : > { %321 = vrot.lane.b32.xlu0 %v476_v33, %s489_s13  ;;  %v478_v36 = vpop.eup %477 }
  0xca   : > { %v443_v37 = vadd.f32 -1.0, %v478_v36  ;;  %v480_v40 = vpop.eup %479 }
  0xcb   : > { %v444_v43 = vadd.f32 -1.0, %v480_v40 }
  0xcc   : > { %v305_v39 = vsel %vm297_vm1, %v293_v19, %v443_v37 }
  0xcd   : > { %v306_v44 = vsel %vm298_vm3, %v295_v25, %v444_v43 }
 0x133   : > { %v320_v38 = vpop.permute.xlu0 %319 }
 0x134   : > { %v325_v41 = vmul.f32 %v320_v38, %v305_v39 }
 0x136   : > { %v327_v42 = vpack.c.bf16 %v325_v41, %v325_v41 }
 0x138   : > { %330 = vst.msk [vmem:[%s175_s18] sm:$0xf] %vm329_vm2, %v327_v42 }
 0x13b   : > { %v322_v45 = vpop.permute.xlu0 %321 }
 0x13c   : > { %v326_v46 = vmul.f32 %v322_v45, %v306_v44 }
 0x13e   : > { %v328_v47 = vpack.c.bf16 %v326_v46, %v326_v46 }
 0x140   : > { %331 = vst.msk [vmem:[%s175_s18 + $0x4] sm:$0xf] %vm329_vm2, %v328_v47 }
 0x141 PF: > { %s13_s12 = sadd.s32 1, %s487_s12  }
 0x142   : > { %p10_p4 = scmp.ge.s32.totalorder %s13_s12, 4  }
 0x144   :  { %12 = sbr.rel (!%p10_p4) target bundleno = 1 (0x1), region = 62 }

// kernel: generator_forward.47
= control target key start
LH: loop header
LB: loop body
LE: loop exit
PB: predicated region body
PF: predicated region fallthrough
CT: control target
= control target key end

     0   :  { %s653_s12 = smov 0   ;;  %s731_s0 = inlined_call_operand.vmem [shape: bf16[32,288], index: 0, kind: input, shape index: {}]   ;;  %s732_s1 = inlined_call_operand.vmem [shape: bf16[288,64], index: 1, kind: input, shape index: {}]   ;;  %s733_s2 = inlined_call_operand.vmem [shape: f32[1,64], index: 2, kind: input, shape index: {}]   ;;  %s734_s3 = inlined_call_operand.vmem [shape: bf16[32,32], index: 3, kind: output, shape index: {}]  }
   0x1 LB: > { %s482_s13 = sadd.s32 4294967295, %s630_s12   ;;  %p486_p0 = scmp.ge.s32.totalorder %s630_s12, 1  ;;  %s630_s12 = sphi %s653_s12, %s13_s12  }
   0x2   : > { %p139_p1 = scmp.lt.s32.totalorder %s630_s12, 3 }
   0x4   : > { %p140_p2 = pnand %p486_p0, %p139_p1 }
   0x5   : > { %s487_s18 = sshll.u32 (!%p140_p2), %s482_s13, 1  ;;  %s632_s5 = smov (!%p140_p2), 96  }
   0x6   : > { %143 = sbr.rel (%p140_p2) target bundleno = 323 (0x143), region = 32  ;;  %p165_p3 = scmp.lt.s32.totalorder (!%p140_p2), %s487_s18, 3 }
   0xb   : > { %v590_v0 = vld [vmem:[%s732_s1 + $0x38] sm:$0xff]  ;;  %v589_v2 = vld [vmem:[%s732_s1 + $0x30] sm:$0xff]  ;;  %v600_v4 = vld [vmem:[%s732_s1 + $0x88] sm:$0xff]  ;;  %s736_s18 = smov (!%p165_p3, %s487_s18), 3  ;;  %vm345_vm0 = vcmask 261120   ;;  %vm423_vm2 = vcmask 257024  }
   0xc   : > { %v598_v1 = vld [vmem:[%s732_s1 + $0x78] sm:$0xff]  ;;  %349 = vmatpush.bf16.msra.mxu0 %v590_v0  ;;  %v597_v3 = vld [vmem:[%s732_s1 + $0x70] sm:$0xff]  ;;  %383 = vmatpush.bf16.msra.mxu2 %v600_v4  ;;  %v599_v5 = vld [vmem:[%s732_s1 + $0x80] sm:$0xff]  ;;  %s601_s27 = smul.u32 12, %s736_s18  ;;  %s490_s6 = sshll.u32 %s736_s18, 2 }
   0xd   : > { %363 = vmatpush.bf16.msra.mxu1 %v598_v1  ;;  %v588_v6 = vld [vmem:[%s732_s1 + $0x28] sm:$0xff]  ;;  %v587_v11 = vld [vmem:[%s732_s1 + $0x20] sm:$0xff]  ;;  %v586_v13 = vld [vmem:[%s732_s1 + $0x18] sm:$0xff]  ;;  %s175_s9 = scalar_lea.vmem %s734_s3, %s490_s6 }
   0xe   : > { %v596_v7 = vld [vmem:[%s732_s1 + $0x68] sm:$0xff]  ;;  %s169_s7 = scalar_lea.vmem %s731_s0, %s601_s27  ;;  %v595_v12 = vld [vmem:[%s732_s1 + $0x60] sm:$0xff]  ;;  %v594_v14 = vld [vmem:[%s732_s1 + $0x58] sm:$0xff] }
   0xf   : > { %v501_v8 = vld [vmem:[%s169_s7 + $0x8] sm:$0xf]  ;;  %v582_v9 = vld [vmem:[%s169_s7 + $0x10] sm:$0xf0]  ;;  %v583_v19 = vld [vmem:[%s732_s1] sm:$0xff] }
  0x10   : > { %350 = vmatpush.bf16.msra.mxu0 %v589_v2  ;;  %384 = vmatpush.bf16.msra.mxu2 %v599_v5  ;;  %v502_v10 = vor.u32 %v582_v9, %v501_v8  ;;  %v585_v15 = vld [vmem:[%s732_s1 + $0x10] sm:$0xff]  ;;  %v584_v17 = vld [vmem:[%s732_s1 + $0x8] sm:$0xff]  ;;  %v591_v20 = vld [vmem:[%s732_s1 + $0x40] sm:$0xff] }
  0x11   : > { %364 = vmatpush.bf16.msra.mxu1 %v597_v3  ;;  %v593_v16 = vld [vmem:[%s732_s1 + $0x50] sm:$0xff]  ;;  %v592_v18 = vld [vmem:[%s732_s1 + $0x48] sm:$0xff]  ;;  %v493_v21 = vld [vmem:[%s169_s7] sm:$0xf] }
  0x12   : > { %v581_v22 = vld [vmem:[%s169_s7 + $0x8] sm:$0xf0]  ;;  %v580_v23 = vld [vmem:[%s169_s7 + $0x4] sm:$0xf]  ;;  %v495_v24 = vld [vmem:[%s169_s7 + $0xc] sm:$0xf0] }
  0x13   : > { %575 = vmatmul.msk.bf16.vlgmr.msra.gmra.mxu2 %vm345_vm0, %v502_v10  ;;  %v494_v25 = vor.u32 %v581_v22, %v493_v21  ;;  %v498_v26 = vor.u32 %v580_v23, %v495_v24  ;;  %v611_v27 = vld [vmem:[%s733_s2] ss:$0 sm:$0xff] }
  0x14   : > { %351 = vmatpush.bf16.msra.mxu0 %v588_v6 }
  0x15   : > { %365 = vmatpush.bf16.msra.mxu1 %v596_v7 }
  0x18   : > { %352 = vmatpush.bf16.msra.mxu0 %v587_v11 }
  0x19   : > { %366 = vmatpush.bf16.msra.mxu1 %v595_v12 }
  0x1c   : > { %353 = vmatpush.bf16.msra.mxu0 %v586_v13 }
  0x1d   : > { %367 = vmatpush.bf16.msra.mxu1 %v594_v14 }
  0x20   : > { %354 = vmatpush.bf16.msra.mxu0 %v585_v15 }
  0x21   : > { %368 = vmatpush.bf16.msra.mxu1 %v593_v16 }
  0x24   : > { %355 = vmatpush.bf16.msra.mxu0 %v584_v17 }
  0x25   : > { %369 = vmatpush.bf16.msra.mxu1 %v592_v18 }
  0x28   : > { %356 = vmatpush.bf16.msra.mxu0 %v583_v19 }
  0x29   : > { %370 = vmatpush.bf16.msra.mxu1 %v591_v20 }
  0x2b   : > { %357 = vmatmul.bf16.vlgmr.msra.gmra.mxu0 %v494_v25 }
  0x2c   : > { %371 = vmatmul.bf16.vlgmr.msra.gmra.mxu1 %v498_v26 }
  0x96   : > { %v386_v31 = vpop.f32.mrf.mxu2 }
  0x9e   : > { %v388_v40 = vpop.f32.mrf.mxu2 }
  0xa8   : > { %v358_v28 = vpop.f32.mrf.mxu0 }
  0xa9   : > { %v372_v29 = vpop.f32.mrf.mxu1  ;;  %v359_v30 = vadd.f32 %v611_v27, %v358_v28 }
  0xab   : > { %v373_v32 = vadd.f32 %v372_v29, %v359_v30 }
  0xad   : > { %v387_v33 = vadd.f32 %v386_v31, %v373_v32 }
  0xaf   : > { %v401_v34 = vsub.f32 0.0, %v387_v33  ;;  %v393_v50 = vmul.f32 1.442695, %v387_v33  ;;  %vm391_vm1 = vcmp.gt.f32.partialorder %v387_v33, 0.0 }
  0xb0   : > { %v360_v35 = vpop.f32.mrf.mxu0 }
  0xb1   : > { %v361_v36 = vadd.f32 %v611_v27, %v360_v35  ;;  %v403_v37 = vmul.f32 1.442695, %v401_v34  ;;  %v374_v38 = vpop.f32.mrf.mxu1 }
  0xb3   : > { %v375_v39 = vadd.f32 %v374_v38, %v361_v36  ;;  %612 = vpow2.f32 %v403_v37 }
  0xb5   : > { %v389_v41 = vadd.f32 %v388_v40, %v375_v39 }
  0xb7   : > { %v402_v42 = vsub.f32 0.0, %v389_v41  ;;  %v395_v51 = vmul.f32 1.442695, %v389_v41  ;;  %vm392_vm3 = vcmp.gt.f32.partialorder %v389_v41, 0.0 }
  0xb9   : > { %v613_v43 = vpop.eup %612  ;;  %v405_v44 = vmul.f32 1.442695, %v402_v42 }
  0xba   : > { %v407_v45 = vadd.f32 1.0, %v613_v43 }
  0xbb   : > { %614 = vpow2.f32 %v405_v44 }
  0xbc   : > { %616 = vrcp.f32 %v407_v45 }
  0xc1   : > { %v615_v46 = vpop.eup %614 }
  0xc2   : > { %v617_v47 = vpop.eup %616  ;;  %v408_v48 = vadd.f32 1.0, %v615_v46 }
  0xc3   : > { %413 = vrot.lane.b32.xlu0 %v617_v47, %s632_s5 }
  0xc4   : > { %618 = vrcp.f32 %v408_v48 }
  0xc5   : > { %620 = vpow2.f32 %v393_v50 }
  0xc6   : > { %622 = vpow2.f32 %v395_v51 }
  0xca   : > { %v619_v49 = vpop.eup %618 }
  0xcb   : > { %415 = vrot.lane.b32.xlu0 %v619_v49, %s632_s5  ;;  %v621_v52 = vpop.eup %620 }
  0xcc   : > { %v576_v53 = vadd.f32 -1.0, %v621_v52  ;;  %v623_v56 = vpop.eup %622 }
  0xcd   : > { %v577_v59 = vadd.f32 -1.0, %v623_v56 }
  0xce   : > { %v399_v55 = vsel %vm391_vm1, %v387_v33, %v576_v53 }
  0xcf   : > { %v400_v60 = vsel %vm392_vm3, %v389_v41, %v577_v59 }
 0x135   : > { %v414_v54 = vpop.permute.xlu0 %413 }
 0x136   : > { %v419_v57 = vmul.f32 %v414_v54, %v399_v55 }
 0x138   : > { %v421_v58 = vpack.c.bf16 %v419_v57, %v419_v57 }
 0x13a   : > { %424 = vst.msk [vmem:[%s175_s9] sm:$0xf] %vm423_vm2, %v421_v58 }
 0x13d   : > { %v416_v61 = vpop.permute.xlu0 %415 }
 0x13e   : > { %v420_v62 = vmul.f32 %v416_v61, %v400_v60 }
 0x140   : > { %v422_v63 = vpack.c.bf16 %v420_v62, %v420_v62 }
 0x142   : > { %425 = vst.msk [vmem:[%s175_s9 + $0x4] sm:$0xf] %vm423_vm2, %v422_v63 }
 0x143 PF: > { %s13_s12 = sadd.s32 1, %s630_s12  }
 0x144   : > { %p10_p4 = scmp.ge.s32.totalorder %s13_s12, 4  }
 0x146   :  { %12 = sbr.rel (!%p10_p4) target bundleno = 1 (0x1), region = 62 }

// kernel: generator_forward.55
= control target key start
LH: loop header
LB: loop body
LE: loop exit
PB: predicated region body
PF: predicated region fallthrough
CT: control target
= control target key end

     0   :  { %s972_s12 = smov 0   ;;  %s1171_s0 = inlined_call_operand.vmem [shape: bf16[128,288], index: 0, kind: input, shape index: {}]   ;;  %s1172_s1 = inlined_call_operand.vmem [shape: bf16[288,32], index: 1, kind: input, shape index: {}]   ;;  %s1173_s2 = inlined_call_operand.vmem [shape: f32[1,32], index: 2, kind: input, shape index: {}]   ;;  %s1174_s3 = inlined_call_operand.vmem [shape: bf16[128,16], index: 3, kind: output, shape index: {}]  }
   0x1 LB: > { %s695_s13 = sadd.s32 4294967295, %s949_s12   ;;  %p699_p0 = scmp.ge.s32.totalorder %s949_s12, 1  ;;  %s949_s12 = sphi %s972_s12, %s13_s12  }
   0x2   : > { %p139_p1 = scmp.lt.s32.totalorder %s949_s12, 3 }
   0x4   : > { %p140_p2 = pnand %p699_p0, %p139_p1 }
   0x5   : > { %s700_s18 = sshll.u32 (!%p140_p2), %s695_s13, 3  ;;  %s951_s5 = smov (!%p140_p2), 112  }
   0x6   : > { %143 = sbr.rel (%p140_p2) target bundleno = 363 (0x16b), region = 32  ;;  %p165_p3 = scmp.lt.s32.totalorder (!%p140_p2), %s700_s18, 15 }
   0xb   : > { %v857_v0 = vld [vmem:[%s1172_s1 + $0x38] sm:$0xff]  ;;  %v867_v2 = vld [vmem:[%s1172_s1 + $0x88] sm:$0xff]  ;;  %v856_v3 = vld [vmem:[%s1172_s1 + $0x30] sm:$0xff]  ;;  %s1176_s18 = smov (!%p165_p3, %s700_s18), 15  ;;  %vm402_vm0 = vcmask 261120   ;;  %vm630_vm2 = vcmask 125952  }
   0xc   : > { %v986_v1 = vld [vmem:[%s1172_s1 + $0x78] sm:$0xff]  ;;  %415 = vmatpush.bf16.msra.mxu0 %v857_v0  ;;  %868 = vmatpush.bf16.msra.mxu3 %v857_v0  ;;  %v864_v4 = vld [vmem:[%s1172_s1 + $0x70] sm:$0xff]  ;;  %v866_v5 = vld [vmem:[%s1172_s1 + $0x80] sm:$0xff]  ;;  %s884_s27 = smul.u32 12, %s1176_s18  ;;  %s703_s6 = sshll.u32 %s1176_s18, 2 }
   0xd   : > { %876 = vmatpush.bf16.msra.mxu1 %v986_v1  ;;  %479 = vmatpush.bf16.msra.mxu2 %v867_v2  ;;  %v855_v6 = vld [vmem:[%s1172_s1 + $0x28] sm:$0xff]  ;;  %v854_v11 = vld [vmem:[%s1172_s1 + $0x20] sm:$0xff]  ;;  %v853_v13 = vld [vmem:[%s1172_s1 + $0x18] sm:$0xff]  ;;  %s1132_s9 = scalar_lea.vmem %s1174_s3, %s703_s6 }
   0xe   : > { %v863_v7 = vld [vmem:[%s1172_s1 + $0x68] sm:$0xff]  ;;  %s1013_s7 = scalar_lea.vmem %s1171_s0, %s884_s27  ;;  %v862_v12 = vld [vmem:[%s1172_s1 + $0x60] sm:$0xff]  ;;  %v861_v14 = vld [vmem:[%s1172_s1 + $0x58] sm:$0xff] }
   0xf   : > { %v714_v8 = vld [vmem:[%s1013_s7 + $0x8] sm:$0xf]  ;;  %v840_v9 = vld [vmem:[%s1013_s7 + $0x10] sm:$0xf0]  ;;  %v726_v17 = vld [vmem:[%s1013_s7 + $0x20] sm:$0xf] }
  0x10   : > { %416 = vmatpush.bf16.msra.mxu0 %v856_v3  ;;  %869 = vmatpush.bf16.msra.mxu3 %v856_v3  ;;  %v715_v10 = vor.u32 %v840_v9, %v714_v8  ;;  %v852_v15 = vld [vmem:[%s1172_s1 + $0x10] sm:$0xff]  ;;  %v843_v18 = vld [vmem:[%s1013_s7 + $0x28] sm:$0xf0]  ;;  %v850_v22 = vld [vmem:[%s1172_s1] sm:$0xff] }
  0x11   : > { %877 = vmatpush.bf16.msra.mxu1 %v864_v4  ;;  %480 = vmatpush.bf16.msra.mxu2 %v866_v5  ;;  %v860_v16 = vld [vmem:[%s1172_s1 + $0x50] sm:$0xff]  ;;  %v851_v19 = vld [vmem:[%s1172_s1 + $0x8] sm:$0xff]  ;;  %v727_v21 = vor.u32 %v843_v18, %v726_v17  ;;  %v718_v23 = vld [vmem:[%s1013_s7 + $0x18] sm:$0xf] }
  0x12   : > { %v859_v20 = vld [vmem:[%s1172_s1 + $0x48] sm:$0xff]  ;;  %v842_v24 = vld [vmem:[%s1013_s7 + $0x20] sm:$0xf0]  ;;  %v706_v25 = vld [vmem:[%s1013_s7] sm:$0xf] }
  0x13   : > { %v839_v26 = vld [vmem:[%s1013_s7 + $0x8] sm:$0xf0]  ;;  %v858_v27 = vld [vmem:[%s1172_s1 + $0x40] sm:$0xff]  ;;  %v841_v28 = vld [vmem:[%s1013_s7 + $0x1c] sm:$0xf]  ;;  %v719_v30 = vor.u32 %v842_v24, %v718_v23 }
  0x14   : > { %417 = vmatpush.bf16.msra.mxu0 %v855_v6  ;;  %870 = vmatpush.bf16.msra.mxu3 %v855_v6  ;;  %v720_v29 = vld [vmem:[%s1013_s7 + $0x24] sm:$0xf0]  ;;  %v707_v31 = vor.u32 %v839_v26, %v706_v25  ;;  %v738_v33 = vld [vmem:[%s1013_s7 + $0x38] sm:$0xf]  ;;  %v846_v34 = vld [vmem:[%s1013_s7 + $0x40] sm:$0xf0] }
  0x15   : > { %878 = vmatpush.bf16.msra.mxu1 %v863_v7  ;;  %824 = vmatmul.msk.bf16.vlgmr.msra.gmra.mxu2 %vm402_vm0, %v715_v10  ;;  %v723_v32 = vor.u32 %v841_v28, %v720_v29  ;;  %v739_v35 = vor.u32 %v846_v34, %v738_v33  ;;  %v730_v36 = vld [vmem:[%s1013_s7 + $0x30] sm:$0xf]  ;;  %v845_v37 = vld [vmem:[%s1013_s7 + $0x38] sm:$0xf0]  ;;  %v844_v38 = vld [vmem:[%s1013_s7 + $0x34] sm:$0xf] }
  0x16   : > { %v732_v39 = vld [vmem:[%s1013_s7 + $0x3c] sm:$0xf0]  ;;  %v731_v40 = vor.u32 %v845_v37, %v730_v36  ;;  %v750_v42 = vld [vmem:[%s1013_s7 + $0x50] sm:$0xf]  ;;  %v849_v43 = vld [vmem:[%s1013_s7 + $0x58] sm:$0xf0] }
  0x17   : > { %v735_v41 = vor.u32 %v844_v38, %v732_v39  ;;  %v751_v44 = vor.u32 %v849_v43, %v750_v42  ;;  %v838_v45 = vld [vmem:[%s1013_s7 + $0x4] sm:$0xf]  ;;  %v708_v46 = vld [vmem:[%s1013_s7 + $0xc] sm:$0xf0]  ;;  %v742_v48 = vld [vmem:[%s1013_s7 + $0x48] sm:$0xf] }
  0x18   : > { %418 = vmatpush.bf16.msra.mxu0 %v854_v11  ;;  %871 = vmatpush.bf16.msra.mxu3 %v854_v11  ;;  %v711_v47 = vor.u32 %v838_v45, %v708_v46  ;;  %v848_v49 = vld [vmem:[%s1013_s7 + $0x50] sm:$0xf0]  ;;  %v847_v50 = vld [vmem:[%s1013_s7 + $0x4c] sm:$0xf]  ;;  %v744_v51 = vld [vmem:[%s1013_s7 + $0x54] sm:$0xf0] }
  0x19   : > { %879 = vmatpush.bf16.msra.mxu1 %v862_v12  ;;  %v743_v52 = vor.u32 %v848_v49, %v742_v48  ;;  %v747_v53 = vor.u32 %v847_v50, %v744_v51  ;;  %v1079_v58 = vld [vmem:[%s1173_s2] ss:$0 sm:$0xff] }
  0x1c   : > { %419 = vmatpush.bf16.msra.mxu0 %v853_v13  ;;  %872 = vmatpush.bf16.msra.mxu3 %v853_v13 }
  0x1d   : > { %880 = vmatpush.bf16.msra.mxu1 %v861_v14 }
  0x20   : > { %420 = vmatpush.bf16.msra.mxu0 %v852_v15  ;;  %873 = vmatpush.bf16.msra.mxu3 %v852_v15 }
  0x21   : > { %881 = vmatpush.bf16.msra.mxu1 %v860_v16 }
  0x24   : > { %421 = vmatpush.bf16.msra.mxu0 %v851_v19  ;;  %874 = vmatpush.bf16.msra.mxu3 %v851_v19 }
  0x25   : > { %882 = vmatpush.bf16.msra.mxu1 %v859_v20  ;;  %825 = vmatmul.msk.bf16.gmra.mxu2 %vm402_vm0, %v727_v21 }
  0x28   : > { %422 = vmatpush.bf16.msra.mxu0 %v850_v22  ;;  %875 = vmatpush.bf16.msra.mxu3 %v850_v22 }
  0x29   : > { %883 = vmatpush.bf16.msra.mxu1 %v858_v27 }
  0x2b   : > { %428 = vmatmul.bf16.vlgmr.msra.gmra.mxu3 %v719_v30  ;;  %423 = vmatmul.bf16.vlgmr.msra.gmra.mxu0 %v707_v31 }
  0x2c   : > { %444 = vmatpush.bf16.msrb.mxu0 %v986_v1  ;;  %457 = vmatmul.bf16.vlgmr.msra.gmra.mxu1 %v723_v32 }
  0x30   : > { %445 = vmatpush.bf16.msrb.mxu0 %v864_v4 }
  0x34   : > { %446 = vmatpush.bf16.msrb.mxu0 %v863_v7 }
  0x35   : > { %826 = vmatmul.msk.bf16.gmra.mxu2 %vm402_vm0, %v739_v35 }
  0x38   : > { %447 = vmatpush.bf16.msrb.mxu0 %v862_v12 }
  0x3b   : > { %433 = vmatmul.bf16.gmra.mxu3 %v731_v40 }
  0x3c   : > { %448 = vmatpush.bf16.msrb.mxu0 %v861_v14  ;;  %462 = vmatmul.bf16.gmra.mxu1 %v735_v41 }
  0x40   : > { %449 = vmatpush.bf16.msrb.mxu0 %v860_v16 }
  0x44   : > { %450 = vmatpush.bf16.msrb.mxu0 %v859_v20 }
  0x45   : > { %827 = vmatmul.msk.bf16.gmra.mxu2 %vm402_vm0, %v751_v44 }
  0x48   : > { %451 = vmatpush.bf16.msrb.mxu0 %v858_v27 }
  0x4b   : > { %452 = vmatmul.bf16.vlgmr.msrb.gmra.mxu0 %v711_v47  ;;  %438 = vmatmul.bf16.gmra.mxu3 %v743_v52 }
  0x4c   : > { %467 = vmatmul.bf16.gmra.mxu1 %v747_v53 }
  0x98   : > { %v482_v54 = vpop.f32.mrf.mxu2 }
  0xa0   : > { %v1074_v55 = vpop.f32.mrf.mxu2 }
  0xa8   : > { %v487_v56 = vpop.f32.mrf.mxu2  ;;  %v424_v1 = vpop.f32.mrf.mxu0 }
  0xa9   : > { %v458_v57 = vpop.f32.mrf.mxu1  ;;  %v425_v19 = vadd.f32 %v1079_v58, %v424_v1 }
  0xae   : > { %v429_v59 = vpop.f32.mrf.mxu3 }
  0xaf   : > { %v430_v60 = vadd.f32 %v1079_v58, %v429_v59 }
  0xb0   : > { %v489_v63 = vpop.f32.mrf.mxu2  ;;  %v426_v11 = vpop.f32.mrf.mxu0 }
  0xb1   : > { %v459_v61 = vadd.f32 %v458_v57, %v430_v60  ;;  %v460_v62 = vpop.f32.mrf.mxu1  ;;  %v427_v35 = vadd.f32 %v1079_v58, %v426_v11 }
  0xb3   : > { %v1082_v0 = vadd.f32 %v487_v56, %v459_v61 }
  0xb5   : > { %v544_v2 = vsub.f32 0.0, %v1082_v0  ;;  %vm504_vm4 = vcmp.gt.f32.partialorder %v1082_v0, 0.0 }
  0xb6   : > { %v431_v3 = vpop.f32.mrf.mxu3 }
  0xb7   : > { %v432_v4 = vadd.f32 %v1079_v58, %v431_v3  ;;  %v554_v5 = vmul.f32 1.442695, %v544_v2 }
  0xb8   : > { %v492_v9 = vpop.f32.mrf.mxu2 }
  0xb9   : > { %v461_v6 = vadd.f32 %v460_v62, %v432_v4  ;;  %895 = vpow2.f32 %v554_v5  ;;  %v463_v7 = vpop.f32.mrf.mxu1 }
  0xbb   : > { %v1086_v8 = vadd.f32 %v489_v63, %v461_v6 }
  0xbd   : > { %v545_v10 = vsub.f32 0.0, %v1086_v8  ;;  %vm505_vm5 = vcmp.gt.f32.partialorder %v1086_v8, 0.0 }
  0xbe   : > { %v434_v12 = vpop.f32.mrf.mxu3 }
  0xbf   : > { %v896_v13 = vpop.eup %895  ;;  %v556_v14 = vmul.f32 1.442695, %v545_v10  ;;  %v435_v15 = vadd.f32 %v1079_v58, %v434_v12 }
  0xc0   : > { %v568_v16 = vadd.f32 1.0, %v896_v13  ;;  %v494_v23 = vpop.f32.mrf.mxu2 }
  0xc1   : > { %897 = vpow2.f32 %v556_v14  ;;  %v464_v17 = vadd.f32 %v463_v7, %v435_v15  ;;  %v465_v20 = vpop.f32.mrf.mxu1 }
  0xc2   : > { %899 = vrcp.f32 %v568_v16 }
  0xc3   : > { %v1090_v18 = vadd.f32 %v492_v9, %v464_v17 }
  0xc5   : > { %v546_v22 = vsub.f32 0.0, %v1090_v18  ;;  %v518_v17 = vmul.f32 1.442695, %v1090_v18  ;;  %vm506_vm1 = vcmp.gt.f32.partialorder %v1090_v18, 0.0 }
  0xc6   : > { %v436_v25 = vpop.f32.mrf.mxu3 }
  0xc7   : > { %v898_v26 = vpop.eup %897  ;;  %v437_v27 = vadd.f32 %v1079_v58, %v436_v25  ;;  %v558_v28 = vmul.f32 1.442695, %v546_v22 }
  0xc8   : > { %v453_v21 = vpop.f32.mrf.mxu0  ;;  %v900_v29 = vpop.eup %899  ;;  %v569_v30 = vadd.f32 1.0, %v898_v26 }
  0xc9   : > { %v454_v24 = vadd.f32 %v453_v21, %v425_v19  ;;  %v466_v32 = vadd.f32 %v465_v20, %v437_v27  ;;  %594 = vrot.lane.b32.xlu1 %v900_v29, %s951_s5  ;;  %901 = vpow2.f32 %v558_v28  ;;  %v468_v39 = vpop.f32.mrf.mxu1  ;;  %v497_v46 = vpop.f32.mrf.mxu2  ;;  %v514_v19 = vmul.f32 1.442695, %v1082_v0 }
  0xca   : > { %903 = vrcp.f32 %v569_v30 }
  0xcb   : > { %v1095_v31 = vadd.f32 %v482_v54, %v454_v24  ;;  %v1099_v34 = vadd.f32 %v494_v23, %v466_v32  ;;  %v516_v23 = vmul.f32 1.442695, %v1086_v8 }
  0xcd   : > { %v542_v33 = vsub.f32 0.0, %v1095_v31  ;;  %v547_v37 = vsub.f32 0.0, %v1099_v34  ;;  %v520_v20 = vmul.f32 1.442695, %v1099_v34  ;;  %vm507_vm3 = vcmp.gt.f32.partialorder %v1099_v34, 0.0 }
  0xce   : > { %v439_v41 = vpop.f32.mrf.mxu3  ;;  %vm502_vm6 = vcmp.gt.f32.partialorder %v1095_v31, 0.0 }
  0xcf   : > { %v550_v36 = vmul.f32 1.442695, %v542_v33  ;;  %v902_v42 = vpop.eup %901  ;;  %v560_v43 = vmul.f32 1.442695, %v547_v37  ;;  %v440_v44 = vadd.f32 %v1079_v58, %v439_v41 }
  0xd0   : > { %v455_v38 = vpop.f32.mrf.mxu0  ;;  %v904_v45 = vpop.eup %903  ;;  %v570_v48 = vadd.f32 1.0, %v902_v42 }
  0xd1   : > { %v456_v40 = vadd.f32 %v455_v38, %v427_v35  ;;  %905 = vpow2.f32 %v550_v36  ;;  %v469_v49 = vadd.f32 %v468_v39, %v440_v44  ;;  %596 = vrot.lane.b32.xlu1 %v904_v45, %s951_s5  ;;  %v470_v63 = vpop.f32.mrf.mxu1  ;;  %v499_v2 = vpop.f32.mrf.mxu2 }
  0xd2   : > { %907 = vpow2.f32 %v560_v43  ;;  %v510_v43 = vmul.f32 1.442695, %v1095_v31 }
  0xd3   : > { %v1105_v47 = vadd.f32 %v1074_v55, %v456_v40  ;;  %909 = vrcp.f32 %v570_v48  ;;  %v1109_v51 = vadd.f32 %v497_v46, %v469_v49 }
  0xd5   : > { %v543_v50 = vsub.f32 0.0, %v1105_v47  ;;  %v548_v54 = vsub.f32 0.0, %v1109_v51  ;;  %v512_v46 = vmul.f32 1.442695, %v1105_v47  ;;  %vm503_vm7 = vcmp.gt.f32.partialorder %v1105_v47, 0.0 }
  0xd6   : > { %v441_v57 = vpop.f32.mrf.mxu3  ;;  %vm508_vm8 = vcmp.gt.f32.partialorder %v1109_v51, 0.0 }
  0xd7   : > { %v906_v52 = vpop.eup %905  ;;  %v552_v53 = vmul.f32 1.442695, %v543_v50  ;;  %v562_v55 = vmul.f32 1.442695, %v548_v54  ;;  %v442_v60 = vadd.f32 %v1079_v58, %v441_v57  ;;  %v522_v50 = vmul.f32 1.442695, %v1109_v51 }
  0xd8   : > { %v566_v56 = vadd.f32 1.0, %v906_v52  ;;  %v908_v59 = vpop.eup %907 }
  0xd9   : > { %911 = vpow2.f32 %v552_v53  ;;  %v910_v61 = vpop.eup %909  ;;  %v571_v62 = vadd.f32 1.0, %v908_v59  ;;  %v471_v1 = vadd.f32 %v470_v63, %v442_v60 }
  0xda   : > { %913 = vrcp.f32 %v566_v56  ;;  %598 = vrot.lane.b32.xlu2 %v910_v61, %s951_s5 }
  0xdb   : > { %915 = vpow2.f32 %v562_v55  ;;  %v1114_v3 = vadd.f32 %v499_v2, %v471_v1 }
  0xdc   : > { %917 = vrcp.f32 %v571_v62 }
  0xdd   : > { %v549_v7 = vsub.f32 0.0, %v1114_v3  ;;  %v524_v56 = vmul.f32 1.442695, %v1114_v3  ;;  %vm509_vm9 = vcmp.gt.f32.partialorder %v1114_v3, 0.0 }
  0xdf   : > { %v912_v4 = vpop.eup %911  ;;  %v564_v9 = vmul.f32 1.442695, %v549_v7 }
  0xe0   : > { %v914_v5 = vpop.eup %913  ;;  %v567_v6 = vadd.f32 1.0, %v912_v4 }
  0xe1   : > { %590 = vrot.lane.b32.xlu0 %v914_v5, %s951_s5  ;;  %v916_v58 = vpop.eup %915 }
  0xe2   : > { %919 = vrcp.f32 %v567_v6  ;;  %v918_v10 = vpop.eup %917  ;;  %v572_v11 = vadd.f32 1.0, %v916_v58 }
  0xe3   : > { %921 = vpow2.f32 %v564_v9  ;;  %600 = vrot.lane.b32.xlu2 %v918_v10, %s951_s5 }
  0xe4   : > { %923 = vrcp.f32 %v572_v11 }
  0xe8   : > { %v920_v12 = vpop.eup %919 }
  0xe9   : > { %592 = vrot.lane.b32.xlu0 %v920_v12, %s951_s5  ;;  %v922_v13 = vpop.eup %921 }
  0xea   : > { %v573_v14 = vadd.f32 1.0, %v922_v13  ;;  %v924_v15 = vpop.eup %923 }
  0xec   : > { %925 = vrcp.f32 %v573_v14 }
  0xed   : > { %927 = vpow2.f32 %v518_v17 }
  0xee   : > { %929 = vpow2.f32 %v514_v19 }
  0xef   : > { %931 = vpow2.f32 %v520_v20 }
  0xf0   : > { %933 = vpow2.f32 %v516_v23 }
  0xf1   : > { %602 = vrot.lane.b32.xlu0 %v924_v15, %s951_s5  ;;  %935 = vpow2.f32 %v510_v43 }
  0xf2   : > { %v926_v16 = vpop.eup %925  ;;  %937 = vpow2.f32 %v512_v46 }
  0xf3   : > { %604 = vrot.lane.b32.xlu1 %v926_v16, %s951_s5  ;;  %v928_v21 = vpop.eup %927  ;;  %939 = vpow2.f32 %v522_v50 }
  0xf4   : > { %v832_v22 = vadd.f32 -1.0, %v928_v21  ;;  %v930_v24 = vpop.eup %929  ;;  %941 = vpow2.f32 %v524_v56 }
  0xf5   : > { %v932_v27 = vpop.eup %931  ;;  %v830_v32 = vadd.f32 -1.0, %v930_v24 }
  0xf6   : > { %v538_v26 = vsel %vm506_vm1, %v1090_v18, %v832_v22  ;;  %v833_v30 = vadd.f32 -1.0, %v932_v27  ;;  %v934_v37 = vpop.eup %933 }
  0xf7   : > { %v536_v36 = vsel %vm504_vm4, %v1082_v0, %v830_v32  ;;  %v831_v42 = vadd.f32 -1.0, %v934_v37  ;;  %v936_v48 = vpop.eup %935 }
  0xf8   : > { %v539_v18 = vsel %vm507_vm3, %v1099_v34, %v833_v30  ;;  %v828_v49 = vadd.f32 -1.0, %v936_v48 }
  0xf9   : > { %v537_v34 = vsel %vm505_vm5, %v1086_v8, %v831_v42  ;;  %v938_v8 = vpop.eup %937 }
  0xfa   : > { %v534_v53 = vsel %vm502_vm6, %v1095_v31, %v828_v49  ;;  %v829_v59 = vadd.f32 -1.0, %v938_v8  ;;  %v940_v61 = vpop.eup %939 }
  0xfb   : > { %v942_v63 = vpop.eup %941  ;;  %v834_v1 = vadd.f32 -1.0, %v940_v61 }
  0xfc   : > { %v535_v55 = vsel %vm503_vm7, %v1105_v47, %v829_v59  ;;  %v835_v2 = vadd.f32 -1.0, %v942_v63 }
  0xfd   : > { %v540_v4 = vsel %vm508_vm8, %v1109_v51, %v834_v1 }
  0xfe   : > { %v541_v7 = vsel %vm509_vm9, %v1114_v3, %v835_v2 }
 0x134   : > { %v599_v25 = vpop.permute.xlu2 %598 }
 0x135   : > { %v618_v28 = vmul.f32 %v599_v25, %v538_v26 }
 0x137   : > { %v626_v29 = vpack.c.bf16 %v618_v28, %v618_v28 }
 0x139   : > { %635 = vst.msk [vmem:[%s1132_s9 + $0x10] sm:$0xf] %vm630_vm2, %v626_v29 }
 0x13b   : > { %v595_v35 = vpop.permute.xlu1 %594 }
 0x13c   : > { %v616_v39 = vmul.f32 %v595_v35, %v536_v36 }
 0x13d   : > { %v601_v33 = vpop.permute.xlu2 %600 }
 0x13e   : > { %v619_v38 = vmul.f32 %v601_v33, %v539_v18  ;;  %v624_v41 = vpack.c.bf16 %v616_v39, %v616_v39 }
 0x140   : > { %v627_v40 = vpack.c.bf16 %v619_v38, %v619_v38  ;;  %633 = vst.msk [vmem:[%s1132_s9 + $0x8] sm:$0xf] %vm630_vm2, %v624_v41 }
 0x142   : > { %636 = vst.msk [vmem:[%s1132_s9 + $0x14] sm:$0xf] %vm630_vm2, %v627_v40 }
 0x143   : > { %v597_v44 = vpop.permute.xlu1 %596 }
 0x144   : > { %v617_v0 = vmul.f32 %v597_v44, %v537_v34 }
 0x146   : > { %v625_v45 = vpack.c.bf16 %v617_v0, %v617_v0 }
 0x148   : > { %634 = vst.msk [vmem:[%s1132_s9 + $0xc] sm:$0xf] %vm630_vm2, %v625_v45 }
 0x153   : > { %v591_v52 = vpop.permute.xlu0 %590 }
 0x154   : > { %v614_v54 = vmul.f32 %v591_v52, %v534_v53 }
 0x156   : > { %v622_v57 = vpack.c.bf16 %v614_v54, %v614_v54 }
 0x158   : > { %631 = vst.msk [vmem:[%s1132_s9] sm:$0xf] %vm630_vm2, %v622_v57 }
 0x15b   : > { %v593_v60 = vpop.permute.xlu0 %592 }
 0x15c   : > { %v615_v62 = vmul.f32 %v593_v60, %v535_v55 }
 0x15e   : > { %v623_v31 = vpack.c.bf16 %v615_v62, %v615_v62 }
 0x160   : > { %632 = vst.msk [vmem:[%s1132_s9 + $0x4] sm:$0xf] %vm630_vm2, %v623_v31 }
 0x163   : > { %v603_v5 = vpop.permute.xlu0 %602 }
 0x164   : > { %v620_v6 = vmul.f32 %v603_v5, %v540_v4 }
 0x165   : > { %v605_v58 = vpop.permute.xlu1 %604 }
 0x166   : > { %v628_v47 = vpack.c.bf16 %v620_v6, %v620_v6  ;;  %v621_v9 = vmul.f32 %v605_v58, %v541_v7 }
 0x168   : > { %637 = vst.msk [vmem:[%s1132_s9 + $0x18] sm:$0xf] %vm630_vm2, %v628_v47  ;;  %v629_v10 = vpack.c.bf16 %v621_v9, %v621_v9 }
 0x16a   : > { %638 = vst.msk [vmem:[%s1132_s9 + $0x1c] sm:$0xf] %vm630_vm2, %v629_v10 }
 0x16b PF: > { %s13_s12 = sadd.s32 1, %s949_s12  }
 0x16c   : > { %p10_p4 = scmp.ge.s32.totalorder %s13_s12, 4  }
 0x16e   :  { %12 = sbr.rel (!%p10_p4) target bundleno = 1 (0x1), region = 62 }

// kernel: generator_forward.57
= control target key start
LH: loop header
LB: loop body
LE: loop exit
PB: predicated region body
PF: predicated region fallthrough
CT: control target
= control target key end

     0   :  { %s1764_s12 = smov 0   ;;  %s2257_s0 = inlined_call_operand.vmem [shape: bf16[512,144], index: 0, kind: input, shape index: {}]   ;;  %s2258_s1 = inlined_call_operand.vmem [shape: bf16[144,16], index: 1, kind: input, shape index: {}]   ;;  %s2259_s2 = inlined_call_operand.vmem [shape: f32[1,16], index: 2, kind: input, shape index: {}]   ;;  %s2260_s3 = inlined_call_operand.vmem [shape: bf16[512,8], index: 3, kind: output, shape index: {}]  }
   0x1 LB: > { %s1258_s13 = sadd.s32 4294967295, %s1741_s12   ;;  %p1262_p0 = scmp.ge.s32.totalorder %s1741_s12, 1  ;;  %s1741_s12 = sphi %s1764_s12, %s13_s12  }
   0x2   : > { %p139_p1 = scmp.lt.s32.totalorder %s1741_s12, 3 }
   0x4   : > { %p140_p2 = pnand %p1262_p0, %p139_p1 }
   0x5   : > { %s1263_s18 = sshll.u32 (!%p140_p2), %s1258_s13, 5  ;;  %s1743_s13 = smov (!%p140_p2), 120  }
   0x6   : > { %143 = sbr.rel (%p140_p2) target bundleno = 442 (0x1ba), region = 32  ;;  %p165_p3 = scmp.lt.s32.totalorder (!%p140_p2), %s1263_s18, 63 }
   0xb   : > { %v1522_v0 = vld [vmem:[%s2258_s1 + $0x38] sm:$0xff]  ;;  %v1523_v1 = vld [vmem:[%s2258_s1 + $0x40] sm:$0xff]  ;;  %v1521_v2 = vld [vmem:[%s2258_s1 + $0x30] sm:$0xff]  ;;  %s2262_s18 = smov (!%p165_p3, %s1263_s18), 63  ;;  %vm430_vm0 = vcmask 130048   ;;  %vm1169_vm2 = vcmask 60416  }
   0xc   : > { %479 = vmatpush.bf16.msra.mxu0 %v1522_v0  ;;  %1524 = vmatpush.bf16.msra.mxu2 %v1522_v0  ;;  %s1482_s21 = sshll.u32 %s2262_s18, 3  ;;  %v1520_v3 = vld [vmem:[%s2258_s1 + $0x28] sm:$0xff]  ;;  %v1519_v7 = vld [vmem:[%s2258_s1 + $0x20] sm:$0xff]  ;;  %v1518_v11 = vld [vmem:[%s2258_s1 + $0x18] sm:$0xff]  ;;  %s1267_s14 = sshll.u32 %s2262_s18, 2 }
   0xd   : > { %575 = vmatpush.bf16.msra.mxu1 %v1523_v1  ;;  %1532 = vmatpush.bf16.msra.mxu3 %v1523_v1  ;;  %s1787_s24 = scalar_lea.vmem %s2257_s0, %s1482_s21  ;;  %v1517_v12 = vld [vmem:[%s2258_s1 + $0x10] sm:$0xff]  ;;  %v1516_v16 = vld [vmem:[%s2258_s1 + $0x8] sm:$0xff]  ;;  %v1515_v17 = vld [vmem:[%s2258_s1] sm:$0xff]  ;;  %s2093_s17 = scalar_lea.vmem %s2260_s3, %s1267_s14 }
   0xe   : > { %v1483_v4 = vld [vmem:[%s1787_s24 + $0x4] sm:$0xf]  ;;  %v1272_v5 = vld [vmem:[%s1787_s24 + $0x8] sm:$0xf0]  ;;  %v1501_v8 = vld [vmem:[%s1787_s24 + $0x94] sm:$0xf] }
   0xf   : > { %v1275_v6 = vor.u32 %v1483_v4, %v1272_v5  ;;  %v1344_v9 = vld [vmem:[%s1787_s24 + $0x98] sm:$0xf0]  ;;  %v1485_v13 = vld [vmem:[%s1787_s24 + $0x14] sm:$0xf]  ;;  %v1270_v18 = vld [vmem:[%s1787_s24] sm:$0xf] }
  0x10   : > { %480 = vmatpush.bf16.msra.mxu0 %v1521_v2  ;;  %1525 = vmatpush.bf16.msra.mxu2 %v1521_v2  ;;  %v1347_v10 = vor.u32 %v1501_v8, %v1344_v9  ;;  %v1280_v14 = vld [vmem:[%s1787_s24 + $0x18] sm:$0xf0]  ;;  %v1484_v19 = vld [vmem:[%s1787_s24 + $0x4] sm:$0xf0]  ;;  %v1503_v20 = vld [vmem:[%s1787_s24 + $0xa4] sm:$0xf] }
  0x11   : > { %1432 = vmatmul.msk.bf16.vlgmr.msra.gmra.mxu1 %vm430_vm0, %v1275_v6  ;;  %v1283_v15 = vor.u32 %v1485_v13, %v1280_v14  ;;  %v1352_v21 = vld [vmem:[%s1787_s24 + $0xa8] sm:$0xf0]  ;;  %v1334_v22 = vld [vmem:[%s1787_s24 + $0x80] sm:$0xf]  ;;  %v1500_v23 = vld [vmem:[%s1787_s24 + $0x84] sm:$0xf0]  ;;  %v1271_v25 = vor.u32 %v1484_v19, %v1270_v18 }
  0x12   : > { %1441 = vmatmul.msk.bf16.vlgmr.msra.gmra.mxu3 %vm430_vm0, %v1347_v10  ;;  %v1355_v24 = vor.u32 %v1503_v20, %v1352_v21  ;;  %v1335_v26 = vor.u32 %v1500_v23, %v1334_v22  ;;  %v1487_v27 = vld [vmem:[%s1787_s24 + $0x24] sm:$0xf]  ;;  %v1288_v28 = vld [vmem:[%s1787_s24 + $0x28] sm:$0xf0]  ;;  %v1278_v30 = vld [vmem:[%s1787_s24 + $0x10] sm:$0xf] }
  0x13   : > { %v1291_v29 = vor.u32 %v1487_v27, %v1288_v28  ;;  %v1486_v31 = vld [vmem:[%s1787_s24 + $0x14] sm:$0xf0]  ;;  %v1505_v32 = vld [vmem:[%s1787_s24 + $0xb4] sm:$0xf]  ;;  %v1360_v33 = vld [vmem:[%s1787_s24 + $0xb8] sm:$0xf0] }
  0x14   : > { %481 = vmatpush.bf16.msra.mxu0 %v1520_v3  ;;  %1526 = vmatpush.bf16.msra.mxu2 %v1520_v3  ;;  %v1342_v34 = vld [vmem:[%s1787_s24 + $0x90] sm:$0xf]  ;;  %v1502_v35 = vld [vmem:[%s1787_s24 + $0x94] sm:$0xf0]  ;;  %v1363_v36 = vor.u32 %v1505_v32, %v1360_v33  ;;  %v1279_v37 = vor.u32 %v1486_v31, %v1278_v30  ;;  %v1489_v39 = vld [vmem:[%s1787_s24 + $0x34] sm:$0xf] }
  0x15   : > { %v1343_v38 = vor.u32 %v1502_v35, %v1342_v34  ;;  %v1296_v40 = vld [vmem:[%s1787_s24 + $0x38] sm:$0xf0]  ;;  %v1286_v42 = vld [vmem:[%s1787_s24 + $0x20] sm:$0xf]  ;;  %v1488_v43 = vld [vmem:[%s1787_s24 + $0x24] sm:$0xf0] }
  0x16   : > { %v1299_v41 = vor.u32 %v1489_v39, %v1296_v40  ;;  %v1507_v44 = vld [vmem:[%s1787_s24 + $0xc4] sm:$0xf]  ;;  %v1368_v45 = vld [vmem:[%s1787_s24 + $0xc8] sm:$0xf0]  ;;  %v1350_v46 = vld [vmem:[%s1787_s24 + $0xa0] sm:$0xf]  ;;  %v1287_v49 = vor.u32 %v1488_v43, %v1286_v42 }
  0x17   : > { %v1504_v47 = vld [vmem:[%s1787_s24 + $0xa4] sm:$0xf0]  ;;  %v1371_v48 = vor.u32 %v1507_v44, %v1368_v45  ;;  %v1491_v51 = vld [vmem:[%s1787_s24 + $0x44] sm:$0xf]  ;;  %v1304_v52 = vld [vmem:[%s1787_s24 + $0x48] sm:$0xf0] }
  0x18   : > { %482 = vmatpush.bf16.msra.mxu0 %v1519_v7  ;;  %1527 = vmatpush.bf16.msra.mxu2 %v1519_v7  ;;  %v1351_v50 = vor.u32 %v1504_v47, %v1350_v46  ;;  %v1307_v53 = vor.u32 %v1491_v51, %v1304_v52  ;;  %v1294_v54 = vld [vmem:[%s1787_s24 + $0x30] sm:$0xf]  ;;  %v1490_v55 = vld [vmem:[%s1787_s24 + $0x34] sm:$0xf0]  ;;  %v1509_v56 = vld [vmem:[%s1787_s24 + $0xd4] sm:$0xf] }
  0x19   : > { %v1376_v57 = vld [vmem:[%s1787_s24 + $0xd8] sm:$0xf0]  ;;  %v1358_v58 = vld [vmem:[%s1787_s24 + $0xb0] sm:$0xf]  ;;  %v1506_v59 = vld [vmem:[%s1787_s24 + $0xb4] sm:$0xf0]  ;;  %v1295_v61 = vor.u32 %v1490_v55, %v1294_v54 }
  0x1a   : > { %v1379_v60 = vor.u32 %v1509_v56, %v1376_v57  ;;  %v1359_v62 = vor.u32 %v1506_v59, %v1358_v58  ;;  %v1493_v63 = vld [vmem:[%s1787_s24 + $0x54] sm:$0xf]  ;;  %v1312_v0 = vld [vmem:[%s1787_s24 + $0x58] sm:$0xf0]  ;;  %v1302_v2 = vld [vmem:[%s1787_s24 + $0x40] sm:$0xf] }
  0x1b   : > { %v1315_v1 = vor.u32 %v1493_v63, %v1312_v0  ;;  %v1492_v3 = vld [vmem:[%s1787_s24 + $0x44] sm:$0xf0]  ;;  %v1511_v4 = vld [vmem:[%s1787_s24 + $0xe4] sm:$0xf]  ;;  %v1384_v5 = vld [vmem:[%s1787_s24 + $0xe8] sm:$0xf0] }
  0x1c   : > { %483 = vmatpush.bf16.msra.mxu0 %v1518_v11  ;;  %1528 = vmatpush.bf16.msra.mxu2 %v1518_v11  ;;  %v1366_v6 = vld [vmem:[%s1787_s24 + $0xc0] sm:$0xf]  ;;  %v1508_v7 = vld [vmem:[%s1787_s24 + $0xc4] sm:$0xf0]  ;;  %v1387_v8 = vor.u32 %v1511_v4, %v1384_v5  ;;  %v1303_v9 = vor.u32 %v1492_v3, %v1302_v2  ;;  %v1495_v11 = vld [vmem:[%s1787_s24 + $0x64] sm:$0xf] }
  0x1d   : > { %v1367_v10 = vor.u32 %v1508_v7, %v1366_v6  ;;  %v1310_v14 = vld [vmem:[%s1787_s24 + $0x50] sm:$0xf]  ;;  %v1510_v19 = vld [vmem:[%s1787_s24 + $0xd4] sm:$0xf0]  ;;  %v1497_v23 = vld [vmem:[%s1787_s24 + $0x74] sm:$0xf] }
  0x1e   : > { %v1374_v18 = vld [vmem:[%s1787_s24 + $0xd0] sm:$0xf]  ;;  %v1496_v27 = vld [vmem:[%s1787_s24 + $0x64] sm:$0xf0]  ;;  %v1382_v28 = vld [vmem:[%s1787_s24 + $0xe0] sm:$0xf] }
  0x1f   : > { %v1375_v22 = vor.u32 %v1510_v19, %v1374_v18  ;;  %v1499_v32 = vld [vmem:[%s1787_s24 + $0x84] sm:$0xf]  ;;  %v1336_v33 = vld [vmem:[%s1787_s24 + $0x88] sm:$0xf0]  ;;  %v1514_v39 = vld [vmem:[%s1787_s24 + $0xf4] sm:$0xf0] }
  0x20   : > { %484 = vmatpush.bf16.msra.mxu0 %v1517_v12  ;;  %1529 = vmatpush.bf16.msra.mxu2 %v1517_v12  ;;  %v1320_v12 = vld [vmem:[%s1787_s24 + $0x68] sm:$0xf0]  ;;  %v1339_v34 = vor.u32 %v1499_v32, %v1336_v33  ;;  %v1890_v44 = vld [vmem:[%s2259_s2] ss:$0 sm:$0xff] }
  0x21   : > { %1433 = vmatmul.msk.bf16.gmra.mxu1 %vm430_vm0, %v1283_v15  ;;  %v1323_v13 = vor.u32 %v1495_v11, %v1320_v12  ;;  %v1494_v15 = vld [vmem:[%s1787_s24 + $0x54] sm:$0xf0] }
  0x22   : > { %1442 = vmatmul.msk.bf16.gmra.mxu3 %vm430_vm0, %v1355_v24  ;;  %v1311_v21 = vor.u32 %v1494_v15, %v1310_v14  ;;  %v1328_v24 = vld [vmem:[%s1787_s24 + $0x78] sm:$0xf0] }
  0x24   : > { %485 = vmatpush.bf16.msra.mxu0 %v1516_v16  ;;  %1530 = vmatpush.bf16.msra.mxu2 %v1516_v16  ;;  %v1513_v16 = vld [vmem:[%s1787_s24 + $0xf4] sm:$0xf] }
  0x28   : > { %486 = vmatpush.bf16.msra.mxu0 %v1515_v17  ;;  %1531 = vmatpush.bf16.msra.mxu2 %v1515_v17  ;;  %v1392_v17 = vld [vmem:[%s1787_s24 + $0xf8] sm:$0xf0] }
  0x29   : > { %v1395_v20 = vor.u32 %v1513_v16, %v1392_v17 }
  0x2b   : > { %487 = vmatmul.bf16.vlgmr.msra.gmra.mxu0 %v1271_v25  ;;  %527 = vmatmul.bf16.vlgmr.msra.gmra.mxu2 %v1335_v26  ;;  %v1331_v25 = vor.u32 %v1497_v23, %v1328_v24  ;;  %v1318_v26 = vld [vmem:[%s1787_s24 + $0x60] sm:$0xf] }
  0x2c   : > { %v1319_v30 = vor.u32 %v1496_v27, %v1318_v26 }
  0x31   : > { %1434 = vmatmul.msk.bf16.gmra.mxu1 %vm430_vm0, %v1291_v29  ;;  %v1512_v29 = vld [vmem:[%s1787_s24 + $0xe4] sm:$0xf0] }
  0x32   : > { %1443 = vmatmul.msk.bf16.gmra.mxu3 %vm430_vm0, %v1363_v36  ;;  %v1383_v31 = vor.u32 %v1512_v29, %v1382_v28  ;;  %v1326_v36 = vld [vmem:[%s1787_s24 + $0x70] sm:$0xf] }
  0x3b   : > { %492 = vmatmul.bf16.gmra.mxu0 %v1279_v37  ;;  %532 = vmatmul.bf16.gmra.mxu2 %v1343_v38  ;;  %v1498_v37 = vld [vmem:[%s1787_s24 + $0x74] sm:$0xf0]  ;;  %v1390_v38 = vld [vmem:[%s1787_s24 + $0xf0] sm:$0xf] }
  0x3c   : > { %v1327_v40 = vor.u32 %v1498_v37, %v1326_v36 }
  0x41   : > { %1435 = vmatmul.msk.bf16.gmra.mxu1 %vm430_vm0, %v1299_v41  ;;  %v1391_v41 = vor.u32 %v1514_v39, %v1390_v38 }
  0x42   : > { %1444 = vmatmul.msk.bf16.gmra.mxu3 %vm430_vm0, %v1371_v48 }
  0x4b   : > { %497 = vmatmul.bf16.gmra.mxu0 %v1287_v49  ;;  %537 = vmatmul.bf16.gmra.mxu2 %v1351_v50 }
  0x51   : > { %1436 = vmatmul.msk.bf16.gmra.mxu1 %vm430_vm0, %v1307_v53 }
  0x52   : > { %1445 = vmatmul.msk.bf16.gmra.mxu3 %vm430_vm0, %v1379_v60 }
  0x5b   : > { %502 = vmatmul.bf16.gmra.mxu0 %v1295_v61  ;;  %542 = vmatmul.bf16.gmra.mxu2 %v1359_v62 }
  0x61   : > { %1437 = vmatmul.msk.bf16.gmra.mxu1 %vm430_vm0, %v1315_v1 }
  0x62   : > { %1446 = vmatmul.msk.bf16.gmra.mxu3 %vm430_vm0, %v1387_v8 }
  0x6b   : > { %507 = vmatmul.bf16.gmra.mxu0 %v1303_v9  ;;  %547 = vmatmul.bf16.gmra.mxu2 %v1367_v10 }
  0x71   : > { %1438 = vmatmul.msk.bf16.gmra.mxu1 %vm430_vm0, %v1323_v13 }
  0x72   : > { %1447 = vmatmul.msk.bf16.gmra.mxu3 %vm430_vm0, %v1395_v20 }
  0x7b   : > { %512 = vmatmul.bf16.gmra.mxu0 %v1311_v21  ;;  %552 = vmatmul.bf16.gmra.mxu2 %v1375_v22 }
  0x81   : > { %1439 = vmatmul.msk.bf16.gmra.mxu1 %vm430_vm0, %v1331_v25 }
  0x8b   : > { %517 = vmatmul.bf16.gmra.mxu0 %v1319_v30  ;;  %557 = vmatmul.bf16.gmra.mxu2 %v1383_v31 }
  0x8e   : > { %v577_v35 = vpop.f32.mrf.mxu1 }
  0x91   : > { %1440 = vmatmul.msk.bf16.gmra.mxu1 %vm430_vm0, %v1339_v34 }
  0x95   : > { %v622_v45 = vpop.f32.mrf.mxu3 }
  0x96   : > { %v579_v42 = vpop.f32.mrf.mxu1 }
  0x9b   : > { %522 = vmatmul.bf16.gmra.mxu0 %v1327_v40  ;;  %562 = vmatmul.bf16.gmra.mxu2 %v1391_v41 }
  0x9d   : > { %v624_v56 = vpop.f32.mrf.mxu3 }
  0x9e   : > { %v582_v43 = vpop.f32.mrf.mxu1 }
  0xa5   : > { %v627_v3 = vpop.f32.mrf.mxu3 }
  0xa6   : > { %v584_v48 = vpop.f32.mrf.mxu1 }
  0xa8   : > { %v488_v46 = vpop.f32.mrf.mxu0 }
  0xa9   : > { %v489_v47 = vadd.f32 %v1890_v44, %v488_v46 }
  0xab   : > { %v1893_v49 = vadd.f32 %v577_v35, %v489_v47 }
  0xad   : > { %v817_v50 = vsub.f32 0.0, %v1893_v49  ;;  %v629_v18 = vpop.f32.mrf.mxu3  ;;  %vm657_vm1 = vcmp.gt.f32.partialorder %v1893_v49, 0.0 }
  0xae   : > { %v1896_v51 = vpop.f32.mrf.mxu2  ;;  %v587_v55 = vpop.f32.mrf.mxu1 }
  0xaf   : > { %v849_v52 = vmul.f32 1.442695, %v817_v50 }
  0xb0   : > { %v490_v53 = vpop.f32.mrf.mxu0 }
  0xb1   : > { %v491_v54 = vadd.f32 %v1890_v44, %v490_v53  ;;  %1543 = vpow2.f32 %v849_v52 }
  0xb3   : > { %v1899_v57 = vadd.f32 %v579_v42, %v491_v54 }
  0xb5   : > { %v818_v58 = vsub.f32 0.0, %v1899_v57  ;;  %v632_v38 = vpop.f32.mrf.mxu3  ;;  %vm658_vm3 = vcmp.gt.f32.partialorder %v1899_v57, 0.0 }
  0xb6   : > { %v1902_v61 = vpop.f32.mrf.mxu2  ;;  %v589_v1 = vpop.f32.mrf.mxu1 }
  0xb7   : > { %v1544_v59 = vpop.eup %1543  ;;  %v851_v60 = vmul.f32 1.442695, %v818_v58 }
  0xb8   : > { %v493_v62 = vpop.f32.mrf.mxu0  ;;  %v913_v63 = vadd.f32 1.0, %v1544_v59 }
  0xb9   : > { %1545 = vpow2.f32 %v851_v60  ;;  %v494_v0 = vadd.f32 %v1890_v44, %v493_v62 }
  0xba   : > { %1547 = vrcp.f32 %v913_v63 }
  0xbb   : > { %v1905_v2 = vadd.f32 %v582_v43, %v494_v0 }
  0xbd   : > { %v819_v4 = vsub.f32 0.0, %v1905_v2  ;;  %vm659_vm5 = vcmp.gt.f32.partialorder %v1905_v2, 0.0 }
  0xbe   : > { %v533_v6 = vpop.f32.mrf.mxu2  ;;  %v1910_v13 = vpop.f32.mrf.mxu1 }
  0xbf   : > { %v1546_v5 = vpop.eup %1545  ;;  %v853_v7 = vmul.f32 1.442695, %v819_v4  ;;  %v534_v10 = vadd.f32 %v1890_v44, %v533_v6 }
  0xc0   : > { %v1548_v8 = vpop.eup %1547  ;;  %v914_v9 = vadd.f32 1.0, %v1546_v5  ;;  %v495_v11 = vpop.f32.mrf.mxu0 }
  0xc1   : > { %v496_v12 = vadd.f32 %v1890_v44, %v495_v11  ;;  %1009 = vrot.lane.b32.xlu0 %v1548_v8, %s1743_s13  ;;  %1549 = vpow2.f32 %v853_v7  ;;  %v1913_v14 = vadd.f32 %v622_v45, %v534_v10 }
  0xc2   : > { %1551 = vrcp.f32 %v914_v9 }
  0xc3   : > { %v1915_v15 = vadd.f32 %v584_v48, %v496_v12  ;;  %v835_v16 = vsub.f32 0.0, %v1913_v14  ;;  %vm675_vm7 = vcmp.gt.f32.partialorder %v1913_v14, 0.0 }
  0xc5   : > { %v820_v17 = vsub.f32 0.0, %v1915_v15  ;;  %v885_v19 = vmul.f32 1.442695, %v835_v16  ;;  %vm660_vm8 = vcmp.gt.f32.partialorder %v1915_v15, 0.0 }
  0xc6   : > { %v535_v22 = vpop.f32.mrf.mxu2  ;;  %v1921_v28 = vpop.f32.mrf.mxu1 }
  0xc7   : > { %v1550_v20 = vpop.eup %1549  ;;  %v855_v21 = vmul.f32 1.442695, %v820_v17  ;;  %1553 = vpow2.f32 %v885_v19  ;;  %v536_v24 = vadd.f32 %v1890_v44, %v535_v22 }
  0xc8   : > { %v1552_v23 = vpop.eup %1551  ;;  %v498_v25 = vpop.f32.mrf.mxu0  ;;  %v915_v26 = vadd.f32 1.0, %v1550_v20 }
  0xc9   : > { %1555 = vpow2.f32 %v855_v21  ;;  %v499_v27 = vadd.f32 %v1890_v44, %v498_v25  ;;  %1011 = vrot.lane.b32.xlu0 %v1552_v23, %s1743_s13  ;;  %v1924_v29 = vadd.f32 %v624_v56, %v536_v24 }
  0xca   : > { %1557 = vrcp.f32 %v915_v26 }
  0xcb   : > { %v1926_v30 = vadd.f32 %v587_v55, %v499_v27  ;;  %v836_v31 = vsub.f32 0.0, %v1924_v29  ;;  %vm676_vm10 = vcmp.gt.f32.partialorder %v1924_v29, 0.0 }
  0xcd   : > { %v821_v32 = vsub.f32 0.0, %v1926_v30  ;;  %v1554_v33 = vpop.eup %1553  ;;  %v887_v34 = vmul.f32 1.442695, %v836_v31  ;;  %vm661_vm4 = vcmp.gt.f32.partialorder %v1926_v30, 0.0 }
  0xce   : > { %v931_v36 = vadd.f32 1.0, %v1554_v33  ;;  %v538_v37 = vpop.f32.mrf.mxu2  ;;  %v1932_v46 = vpop.f32.mrf.mxu1 }
  0xcf   : > { %v1556_v35 = vpop.eup %1555  ;;  %v857_v39 = vmul.f32 1.442695, %v821_v32  ;;  %1559 = vpow2.f32 %v887_v34  ;;  %v539_v42 = vadd.f32 %v1890_v44, %v538_v37 }
  0xd0   : > { %v1558_v40 = vpop.eup %1557  ;;  %v916_v41 = vadd.f32 1.0, %v1556_v35  ;;  %v500_v43 = vpop.f32.mrf.mxu0  ;;  %1561 = vrcp.f32 %v931_v36 }
  0xd1   : > { %v501_v45 = vadd.f32 %v1890_v44, %v500_v43  ;;  %1013 = vrot.lane.b32.xlu1 %v1558_v40, %s1743_s13  ;;  %v1935_v47 = vadd.f32 %v627_v3, %v539_v42  ;;  %v634_v3 = vpop.f32.mrf.mxu3 }
  0xd2   : > { %1563 = vrcp.f32 %v916_v41 }
  0xd3   : > { %v1937_v48 = vadd.f32 %v589_v1, %v501_v45  ;;  %1565 = vpow2.f32 %v857_v39  ;;  %v837_v50 = vsub.f32 0.0, %v1935_v47  ;;  %vm677_vm6 = vcmp.gt.f32.partialorder %v1935_v47, 0.0 }
  0xd5   : > { %v1560_v52 = vpop.eup %1559  ;;  %v889_v53 = vmul.f32 1.442695, %v837_v50  ;;  %v822_v56 = vsub.f32 0.0, %v1937_v48  ;;  %vm662_vm9 = vcmp.gt.f32.partialorder %v1937_v48, 0.0 }
  0xd6   : > { %v1562_v54 = vpop.eup %1561  ;;  %v932_v55 = vadd.f32 1.0, %v1560_v52  ;;  %v540_v58 = vpop.f32.mrf.mxu2 }
  0xd7   : > { %1567 = vpow2.f32 %v889_v53  ;;  %v541_v60 = vadd.f32 %v1890_v44, %v540_v58  ;;  %1045 = vrot.lane.b32.xlu0 %v1562_v54, %s1743_s13  ;;  %v1944_v1 = vpop.f32.mrf.mxu1  ;;  %v859_v6 = vmul.f32 1.442695, %v822_v56 }
  0xd8   : > { %v1564_v59 = vpop.eup %1563  ;;  %v503_v62 = vpop.f32.mrf.mxu0  ;;  %1569 = vrcp.f32 %v932_v55 }
  0xd9   : > { %v1566_v63 = vpop.eup %1565  ;;  %v504_v0 = vadd.f32 %v1890_v44, %v503_v62  ;;  %1015 = vrot.lane.b32.xlu1 %v1564_v59, %s1743_s13  ;;  %v1947_v4 = vadd.f32 %v629_v18, %v541_v60  ;;  %v637_v25 = vpop.f32.mrf.mxu3 }
  0xda   : > { %v917_v5 = vadd.f32 1.0, %v1566_v63 }
  0xdb   : > { %v1950_v7 = vadd.f32 %v1910_v13, %v504_v0  ;;  %v838_v8 = vsub.f32 0.0, %v1947_v4  ;;  %vm678_vm13 = vcmp.gt.f32.partialorder %v1947_v4, 0.0 }
  0xdc   : > { %1571 = vrcp.f32 %v917_v5 }
  0xdd   : > { %v823_v9 = vsub.f32 0.0, %v1950_v7  ;;  %v1568_v10 = vpop.eup %1567  ;;  %v891_v11 = vmul.f32 1.442695, %v838_v8  ;;  %1573 = vpow2.f32 %v859_v6  ;;  %vm663_vm15 = vcmp.gt.f32.partialorder %v1950_v7, 0.0 }
  0xde   : > { %v933_v12 = vadd.f32 1.0, %v1568_v10  ;;  %v543_v17 = vpop.f32.mrf.mxu2  ;;  %v1570_v19 = vpop.eup %1569 }
  0xdf   : > { %v861_v16 = vmul.f32 1.442695, %v823_v9  ;;  %1575 = vpow2.f32 %v891_v11  ;;  %v544_v18 = vadd.f32 %v1890_v44, %v543_v17  ;;  %v1956_v21 = vpop.f32.mrf.mxu1 }
  0xe0   : > { %v505_v20 = vpop.f32.mrf.mxu0  ;;  %1577 = vrcp.f32 %v933_v12 }
  0xe1   : > { %v506_v13 = vadd.f32 %v1890_v44, %v505_v20  ;;  %1047 = vrot.lane.b32.xlu1 %v1570_v19, %s1743_s13  ;;  %1579 = vpow2.f32 %v861_v16  ;;  %v1959_v23 = vadd.f32 %v632_v38, %v544_v18  ;;  %v639_v54 = vpop.f32.mrf.mxu3 }
  0xe2   : > { %v1572_v22 = vpop.eup %1571 }
  0xe3   : > { %v1962_v24 = vadd.f32 %v1921_v28, %v506_v13  ;;  %1017 = vrot.lane.b32.xlu2 %v1572_v22, %s1743_s13  ;;  %v839_v26 = vsub.f32 0.0, %v1959_v23  ;;  %v1574_v27 = vpop.eup %1573  ;;  %vm679_vm14 = vcmp.gt.f32.partialorder %v1959_v23, 0.0 }
  0xe4   : > { %v918_v38 = vadd.f32 1.0, %v1574_v27 }
  0xe5   : > { %v824_v31 = vsub.f32 0.0, %v1962_v24  ;;  %v1576_v32 = vpop.eup %1575  ;;  %v893_v33 = vmul.f32 1.442695, %v839_v26 }
  0xe6   : > { %v1578_v34 = vpop.eup %1577  ;;  %v934_v35 = vadd.f32 1.0, %v1576_v32  ;;  %v545_v37 = vpop.f32.mrf.mxu2 }
  0xe7   : > { %v863_v36 = vmul.f32 1.442695, %v824_v31  ;;  %v1580_v39 = vpop.eup %1579  ;;  %1581 = vpow2.f32 %v893_v33  ;;  %v546_v28 = vadd.f32 %v1890_v44, %v545_v37  ;;  %v1969_v42 = vpop.f32.mrf.mxu1 }
  0xe8   : > { %v508_v40 = vpop.f32.mrf.mxu0  ;;  %1583 = vrcp.f32 %v934_v35  ;;  %v919_v45 = vadd.f32 1.0, %v1580_v39 }
  0xe9   : > { %v509_v41 = vadd.f32 %v1890_v44, %v508_v40  ;;  %1585 = vpow2.f32 %v863_v36  ;;  %v1971_v43 = vadd.f32 %v634_v3, %v546_v28 }
  0xea   : > { %1587 = vrcp.f32 %v918_v38 }
  0xeb   : > { %v1974_v50 = vadd.f32 %v1932_v46, %v509_v41  ;;  %1049 = vrot.lane.b32.xlu2 %v1578_v34, %s1743_s13  ;;  %v840_v52 = vsub.f32 0.0, %v1971_v43  ;;  %1589 = vrcp.f32 %v919_v45  ;;  %vm680_vm11 = vcmp.gt.f32.partialorder %v1971_v43, 0.0 }
  0xed   : > { %v825_v53 = vsub.f32 0.0, %v1974_v50  ;;  %v1582_v55 = vpop.eup %1581  ;;  %v895_v56 = vmul.f32 1.442695, %v840_v52  ;;  %vm665_vm12 = vcmp.gt.f32.partialorder %v1974_v50, 0.0 }
  0xee   : > { %v1584_v58 = vpop.eup %1583  ;;  %v935_v59 = vadd.f32 1.0, %v1582_v55  ;;  %v548_v62 = vpop.f32.mrf.mxu2 }
  0xef   : > { %v865_v60 = vmul.f32 1.442695, %v825_v53  ;;  %v1586_v63 = vpop.eup %1585  ;;  %1591 = vpow2.f32 %v895_v56  ;;  %v549_v46 = vadd.f32 %v1890_v44, %v548_v62  ;;  %1051 = vrot.lane.b32.xlu0 %v1584_v58, %s1743_s13  ;;  %v1982_v5 = vpop.f32.mrf.mxu1 }
  0xf0   : > { %v510_v0 = vpop.f32.mrf.mxu0  ;;  %1593 = vrcp.f32 %v935_v59  ;;  %v1588_v6 = vpop.eup %1587  ;;  %v920_v9 = vadd.f32 1.0, %v1586_v63 }
  0xf1   : > { %v511_v3 = vadd.f32 %v1890_v44, %v510_v0  ;;  %1595 = vpow2.f32 %v865_v60  ;;  %v1984_v8 = vadd.f32 %v637_v25, %v549_v46  ;;  %v1590_v12 = vpop.eup %1589  ;;  %v642_v25 = vpop.f32.mrf.mxu3 }
  0xf2   : > { %1597 = vrcp.f32 %v920_v9 }
  0xf3   : > { %v1987_v10 = vadd.f32 %v1944_v1, %v511_v3  ;;  %1019 = vrot.lane.b32.xlu2 %v1588_v6, %s1743_s13  ;;  %v841_v11 = vsub.f32 0.0, %v1984_v8 }
  0xf5   : > { %v826_v16 = vsub.f32 0.0, %v1987_v10  ;;  %v1592_v17 = vpop.eup %1591  ;;  %v897_v19 = vmul.f32 1.442695, %v841_v11 }
  0xf6   : > { %v1594_v18 = vpop.eup %1593  ;;  %v936_v20 = vadd.f32 1.0, %v1592_v17  ;;  %v550_v22 = vpop.f32.mrf.mxu2 }
  0xf7   : > { %v867_v13 = vmul.f32 1.442695, %v826_v16  ;;  %v1596_v26 = vpop.eup %1595  ;;  %1599 = vpow2.f32 %v897_v19  ;;  %v551_v1 = vadd.f32 %v1890_v44, %v550_v22  ;;  %1053 = vrot.lane.b32.xlu1 %v1594_v18, %s1743_s13  ;;  %1021 = vrot.lane.b32.xlu0 %v1590_v12, %s1743_s13  ;;  %v1996_v32 = vpop.f32.mrf.mxu1 }
  0xf8   : > { %v513_v27 = vpop.f32.mrf.mxu0  ;;  %1601 = vrcp.f32 %v936_v20  ;;  %v921_v34 = vadd.f32 1.0, %v1596_v26  ;;  %v1598_v37 = vpop.eup %1597 }
  0xf9   : > { %v514_v31 = vadd.f32 %v1890_v44, %v513_v27  ;;  %1603 = vpow2.f32 %v867_v13  ;;  %v1998_v33 = vadd.f32 %v639_v54, %v551_v1  ;;  %v644_v58 = vpop.f32.mrf.mxu3 }
  0xfa   : > { %1605 = vrcp.f32 %v921_v34 }
  0xfb   : > { %v2001_v35 = vadd.f32 %v1956_v21, %v514_v31  ;;  %v842_v36 = vsub.f32 0.0, %v1998_v33 }
  0xfd   : > { %v827_v39 = vsub.f32 0.0, %v2001_v35  ;;  %v1600_v38 = vpop.eup %1599  ;;  %v899_v28 = vmul.f32 1.442695, %v842_v36 }
  0xfe   : > { %v1602_v40 = vpop.eup %1601  ;;  %v937_v41 = vadd.f32 1.0, %v1600_v38  ;;  %v553_v52 = vpop.f32.mrf.mxu2 }
  0xff   : > { %v869_v45 = vmul.f32 1.442695, %v827_v39  ;;  %v1604_v53 = vpop.eup %1603  ;;  %1607 = vpow2.f32 %v899_v28  ;;  %v554_v54 = vadd.f32 %v1890_v44, %v553_v52  ;;  %1055 = vrot.lane.b32.xlu2 %v1602_v40, %s1743_s13  ;;  %1023 = vrot.lane.b32.xlu1 %v1598_v37, %s1743_s13  ;;  %v2009_v56 = vpop.f32.mrf.mxu1  ;;  %v529_v28 = vadd.f32 %v1890_v44, %v1896_v51 }
 0x100   : > { %v515_v21 = vpop.f32.mrf.mxu0  ;;  %1609 = vrcp.f32 %v937_v41  ;;  %v922_v60 = vadd.f32 1.0, %v1604_v53  ;;  %v1606_v46 = vpop.eup %1605 }
 0x101   : > { %v516_v55 = vadd.f32 %v1890_v44, %v515_v21  ;;  %1611 = vpow2.f32 %v869_v45  ;;  %v2011_v59 = vadd.f32 %v642_v25, %v554_v54  ;;  %v647_v26 = vpop.f32.mrf.mxu3 }
 0x102   : > { %1613 = vrcp.f32 %v922_v60 }
 0x103   : > { %v2014_v62 = vadd.f32 %v1969_v42, %v516_v55  ;;  %v843_v63 = vsub.f32 0.0, %v2011_v59  ;;  %vm683_vm0 = vcmp.gt.f32.partialorder %v2011_v59, 0.0 }
 0x105   : > { %v828_v0 = vsub.f32 0.0, %v2014_v62  ;;  %v1608_v3 = vpop.eup %1607  ;;  %v901_v6 = vmul.f32 1.442695, %v843_v63 }
 0x106   : > { %v1610_v9 = vpop.eup %1609  ;;  %v938_v11 = vadd.f32 1.0, %v1608_v3  ;;  %v555_v16 = vpop.f32.mrf.mxu2 }
 0x107   : > { %v871_v12 = vmul.f32 1.442695, %v828_v0  ;;  %v1612_v17 = vpop.eup %1611  ;;  %1615 = vpow2.f32 %v901_v6  ;;  %v556_v19 = vadd.f32 %v1890_v44, %v555_v16  ;;  %1025 = vrot.lane.b32.xlu2 %v1606_v46, %s1743_s13  ;;  %1057 = vrot.lane.b32.xlu0 %v1610_v9, %s1743_s13  ;;  %v2022_v20 = vpop.f32.mrf.mxu1  ;;  %v531_v9 = vadd.f32 %v1890_v44, %v1902_v61 }
 0x108   : > { %v518_v42 = vpop.f32.mrf.mxu0  ;;  %1617 = vrcp.f32 %v938_v11  ;;  %v923_v22 = vadd.f32 1.0, %v1612_v17  ;;  %v1614_v27 = vpop.eup %1613 }
 0x109   : > { %v519_v18 = vadd.f32 %v1890_v44, %v518_v42  ;;  %v2024_v13 = vadd.f32 %v644_v58, %v556_v19  ;;  %1619 = vpow2.f32 %v871_v12  ;;  %v649_v58 = vpop.f32.mrf.mxu3 }
 0x10a   : > { %1621 = vrcp.f32 %v923_v22 }
 0x10b   : > { %v2027_v25 = vadd.f32 %v1982_v5, %v519_v18  ;;  %v844_v1 = vsub.f32 0.0, %v2024_v13 }
 0x10d   : > { %v829_v31 = vsub.f32 0.0, %v2027_v25  ;;  %v1616_v34 = vpop.eup %1615  ;;  %v903_v36 = vmul.f32 1.442695, %v844_v1 }
 0x10e   : > { %v1618_v37 = vpop.eup %1617  ;;  %v939_v39 = vadd.f32 1.0, %v1616_v34  ;;  %v558_v38 = vpop.f32.mrf.mxu2 }
 0x10f   : > { %1623 = vpow2.f32 %v903_v36  ;;  %v873_v40 = vmul.f32 1.442695, %v829_v31  ;;  %v559_v5 = vadd.f32 %v1890_v44, %v558_v38  ;;  %1059 = vrot.lane.b32.xlu1 %v1618_v37, %s1743_s13  ;;  %1027 = vrot.lane.b32.xlu0 %v1614_v27, %s1743_s13  ;;  %v1620_v45 = vpop.eup %1619  ;;  %v617_v52 = vpop.f32.mrf.mxu1 }
 0x110   : > { %v520_v41 = vpop.f32.mrf.mxu0  ;;  %1625 = vrcp.f32 %v939_v39  ;;  %v2036_v53 = vadd.f32 %v617_v52, %v529_v28  ;;  %v924_v54 = vadd.f32 1.0, %v1620_v45  ;;  %v1622_v55 = vpop.eup %1621  ;;  %v689_v45 = vmul.f32 1.442695, %v1893_v49 }
 0x111   : > { %1627 = vpow2.f32 %v873_v40  ;;  %v2038_v21 = vadd.f32 %v647_v26, %v559_v5  ;;  %v521_v3 = vadd.f32 %v1890_v44, %v520_v41  ;;  %v652_v37 = vpop.f32.mrf.mxu3 }
 0x112   : > { %v833_v51 = vsub.f32 0.0, %v2036_v53  ;;  %1629 = vrcp.f32 %v924_v54 }
 0x113   : > { %v845_v63 = vsub.f32 0.0, %v2038_v21  ;;  %v2051_v22 = vadd.f32 %v1996_v32, %v521_v3  ;;  %v691_v3 = vmul.f32 1.442695, %v1899_v57 }
 0x114   : > { %v881_v11 = vmul.f32 1.442695, %v833_v51 }
 0x115   : > { %v1624_v60 = vpop.eup %1623  ;;  %v905_v42 = vmul.f32 1.442695, %v845_v63  ;;  %v830_v34 = vsub.f32 0.0, %v2051_v22 }
 0x116   : > { %v1626_v46 = vpop.eup %1625  ;;  %v940_v0 = vadd.f32 1.0, %v1624_v60  ;;  %v560_v6 = vpop.f32.mrf.mxu2 }
 0x117   : > { %1061 = vrot.lane.b32.xlu2 %v1626_v46, %s1743_s13  ;;  %1029 = vrot.lane.b32.xlu1 %v1622_v55, %s1743_s13  ;;  %v619_v17 = vpop.f32.mrf.mxu1  ;;  %v1628_v19 = vpop.eup %1627  ;;  %v561_v36 = vadd.f32 %v1890_v44, %v560_v6  ;;  %v875_v52 = vmul.f32 1.442695, %v830_v34 }
 0x118   : > { %v523_v12 = vpop.f32.mrf.mxu0  ;;  %1631 = vrcp.f32 %v940_v0  ;;  %v2048_v18 = vadd.f32 %v619_v17, %v531_v9  ;;  %v925_v1 = vadd.f32 1.0, %v1628_v19  ;;  %v1630_v27 = vpop.eup %1629 }
 0x119   : > { %v524_v16 = vadd.f32 %v1890_v44, %v523_v12  ;;  %1633 = vpow2.f32 %v881_v11  ;;  %v2067_v51 = vadd.f32 %v649_v58, %v561_v36  ;;  %v654_v17 = vpop.f32.mrf.mxu3 }
 0x11a   : > { %v834_v26 = vsub.f32 0.0, %v2048_v18  ;;  %1635 = vpow2.f32 %v905_v42 }
 0x11b   : > { %v2054_v61 = vadd.f32 %v2009_v56, %v524_v16  ;;  %1637 = vrcp.f32 %v925_v1  ;;  %v846_v58 = vsub.f32 0.0, %v2067_v51 }
 0x11c   : > { %v883_v32 = vmul.f32 1.442695, %v834_v26  ;;  %v697_v26 = vmul.f32 1.442695, %v1926_v30 }
 0x11d   : > { %v831_v38 = vsub.f32 0.0, %v2054_v61 }
 0x11e   : > { %v1632_v31 = vpop.eup %1631  ;;  %v563_v39 = vpop.f32.mrf.mxu2  ;;  %1639 = vpow2.f32 %v883_v32 }
 0x11f   : > { %v564_v28 = vadd.f32 %v1890_v44, %v563_v39  ;;  %1031 = vrot.lane.b32.xlu2 %v1630_v27, %s1743_s13  ;;  %1063 = vrot.lane.b32.xlu0 %v1632_v31, %s1743_s13  ;;  %v1634_v5 = vpop.eup %1633  ;;  %v877_v63 = vmul.f32 1.442695, %v831_v38  ;;  %v907_v27 = vmul.f32 1.442695, %v846_v58 }
 0x120   : > { %v525_v56 = vpop.f32.mrf.mxu0  ;;  %v929_v54 = vadd.f32 1.0, %v1634_v5  ;;  %v1636_v60 = vpop.eup %1635 }
 0x121   : > { %v526_v40 = vadd.f32 %v1890_v44, %v525_v56  ;;  %v2064_v41 = vadd.f32 %v652_v37, %v564_v28  ;;  %v1638_v6 = vpop.eup %1637  ;;  %v941_v9 = vadd.f32 1.0, %v1636_v60 }
 0x122   : > { %1641 = vrcp.f32 %v929_v54  ;;  %v693_v54 = vmul.f32 1.442695, %v1905_v2 }
 0x123   : > { %v2070_v55 = vadd.f32 %v2022_v20, %v526_v40  ;;  %v847_v46 = vsub.f32 0.0, %v2064_v41  ;;  %1643 = vpow2.f32 %v689_v45 }
 0x124   : > { %1645 = vpow2.f32 %v875_v52  ;;  %v1640_v19 = vpop.eup %1639 }
 0x125   : > { %v832_v0 = vsub.f32 0.0, %v2070_v55  ;;  %1647 = vpow2.f32 %v877_v63  ;;  %v909_v20 = vmul.f32 1.442695, %v847_v46  ;;  %v930_v31 = vadd.f32 1.0, %v1640_v19 }
 0x126   : > { %v565_v12 = vpop.f32.mrf.mxu2  ;;  %1649 = vpow2.f32 %v691_v3 }
 0x127   : > { %v879_v11 = vmul.f32 1.442695, %v832_v0  ;;  %v566_v16 = vadd.f32 %v1890_v44, %v565_v12  ;;  %1033 = vrot.lane.b32.xlu0 %v1638_v6, %s1743_s13  ;;  %v729_v6 = vmul.f32 1.442695, %v1935_v47 }
 0x128   : > { %v1642_v1 = vpop.eup %1641 }
 0x129   : > { %1651 = vpow2.f32 %v879_v11  ;;  %v2078_v42 = vadd.f32 %v654_v17, %v566_v16  ;;  %v1644_v34 = vpop.eup %1643  ;;  %1041 = vrot.lane.b32.xlu1 %v1642_v1, %s1743_s13  ;;  %v725_v16 = vmul.f32 1.442695, %v1913_v14 }
 0x12a   : > { %1653 = vrcp.f32 %v941_v9  ;;  %v1646_v44 = vpop.eup %1645  ;;  %v1448_v32 = vadd.f32 -1.0, %v1644_v34 }
 0x12b   : > { %1655 = vpow2.f32 %v909_v20  ;;  %v848_v36 = vsub.f32 0.0, %v2078_v42  ;;  %v1648_v37 = vpop.eup %1647  ;;  %v926_v56 = vadd.f32 1.0, %v1646_v44 }
 0x12c   : > { %1657 = vrcp.f32 %v930_v31  ;;  %v1650_v38 = vpop.eup %1649  ;;  %v927_v5 = vadd.f32 1.0, %v1648_v37  ;;  %v785_v46 = vsel %vm657_vm1, %v1893_v49, %v1448_v32  ;;  %vm664_vm1 = vcmp.gt.f32.partialorder %v1962_v24, 0.0 }
 0x12d   : > { %v911_v39 = vmul.f32 1.442695, %v848_v36  ;;  %1659 = vpow2.f32 %v697_v26  ;;  %v1449_v20 = vadd.f32 -1.0, %v1650_v38 }
 0x12e   : > { %1661 = vpow2.f32 %v907_v27  ;;  %v695_v27 = vmul.f32 1.442695, %v1915_v15 }
 0x12f   : > { %v1652_v28 = vpop.eup %1651  ;;  %1663 = vpow2.f32 %v911_v39  ;;  %v786_v34 = vsel %vm658_vm3, %v1899_v57, %v1449_v20  ;;  %v699_v39 = vmul.f32 1.442695, %v1937_v48  ;;  %vm668_vm3 = vcmp.gt.f32.partialorder %v2014_v62, 0.0 }
 0x130   : > { %v1654_v40 = vpop.eup %1653  ;;  %v928_v45 = vadd.f32 1.0, %v1652_v28 }
 0x131   : > { %v1656_v52 = vpop.eup %1655  ;;  %1065 = vrot.lane.b32.xlu1 %v1654_v40, %s1743_s13 }
 0x132   : > { %v1658_v60 = vpop.eup %1657  ;;  %1665 = vrcp.f32 %v928_v45  ;;  %v943_v49 = vadd.f32 1.0, %v1656_v52 }
 0x133   : > { %v1010_v63 = vpop.permute.xlu0 %1009  ;;  %v1660_v0 = vpop.eup %1659  ;;  %1667 = vrcp.f32 %v926_v56  ;;  %1043 = vrot.lane.b32.xlu2 %v1658_v60, %s1743_s13 }
 0x134   : > { %v1105_v3 = vmul.f32 %v1010_v63, %v785_v46  ;;  %v1662_v9 = vpop.eup %1661  ;;  %1669 = vrcp.f32 %v927_v5  ;;  %v1452_v26 = vadd.f32 -1.0, %v1660_v0 }
 0x135   : > { %v1664_v58 = vpop.eup %1663  ;;  %1671 = vpow2.f32 %v693_v54  ;;  %v942_v19 = vadd.f32 1.0, %v1662_v9 }
 0x136   : > { %v1137_v11 = vpack.c.bf16 %v1105_v3, %v1105_v3  ;;  %v944_v12 = vadd.f32 1.0, %v1664_v58  ;;  %1673 = vpow2.f32 %v729_v6  ;;  %v789_v32 = vsel %vm661_vm4, %v1926_v30, %v1452_v26 }
 0x137   : > { %1675 = vrcp.f32 %v943_v49  ;;  %v727_v30 = vmul.f32 1.442695, %v1924_v29  ;;  %vm681_vm4 = vcmp.gt.f32.partialorder %v1984_v8, 0.0 }
 0x138   : > { %1170 = vst.msk [vmem:[%s2093_s17] sm:$0xf] %vm1169_vm2, %v1137_v11  ;;  %v1666_v17 = vpop.eup %1665  ;;  %1677 = vrcp.f32 %v944_v12 }
 0x139   : > { %v1668_v1 = vpop.eup %1667  ;;  %1039 = vrot.lane.b32.xlu0 %v1666_v17, %s1743_s13  ;;  %1679 = vpow2.f32 %v725_v16 }
 0x13a   : > { %v1670_v31 = vpop.eup %1669  ;;  %1035 = vrot.lane.b32.xlu1 %v1668_v1, %s1743_s13  ;;  %1681 = vrcp.f32 %v942_v19  ;;  %v735_v19 = vmul.f32 1.442695, %v1971_v43 }
 0x13b   : > { %v1012_v36 = vpop.permute.xlu0 %1011  ;;  %v1672_v44 = vpop.eup %1671  ;;  %1037 = vrot.lane.b32.xlu2 %v1670_v31, %s1743_s13  ;;  %1683 = vpow2.f32 %v695_v27 }
 0x13c   : > { %v1106_v37 = vmul.f32 %v1012_v36, %v786_v34  ;;  %v1674_v28 = vpop.eup %1673  ;;  %v1450_v40 = vadd.f32 -1.0, %v1672_v44  ;;  %1685 = vpow2.f32 %v699_v39 }
 0x13d   : > { %v1018_v38 = vpop.permute.xlu2 %1017  ;;  %v1676_v5 = vpop.eup %1675  ;;  %v1468_v54 = vadd.f32 -1.0, %v1674_v28  ;;  %1687 = vpow2.f32 %v727_v30 }
 0x13e   : > { %v1109_v57 = vmul.f32 %v1018_v38, %v789_v32  ;;  %v1138_v56 = vpack.c.bf16 %v1106_v37, %v1106_v37  ;;  %v1678_v52 = vpop.eup %1677  ;;  %v787_v0 = vsel %vm659_vm5, %v1905_v2, %v1450_v40  ;;  %1689 = vpow2.f32 %v735_v19 }
 0x13f   : > { %v1680_v60 = vpop.eup %1679  ;;  %v805_v9 = vsel %vm677_vm6, %v1935_v47, %v1468_v54  ;;  %v701_v54 = vmul.f32 1.442695, %v1950_v7  ;;  %vm682_vm5 = vcmp.gt.f32.partialorder %v1998_v33, 0.0  ;;  %vm666_vm6 = vcmp.gt.f32.partialorder %v1987_v10, 0.0 }
 0x140   : > { %v1141_v45 = vpack.c.bf16 %v1109_v57, %v1109_v57  ;;  %1171 = vst.msk [vmem:[%s2093_s17 + $0x4] sm:$0xf] %vm1169_vm2, %v1138_v56  ;;  %v1682_v63 = vpop.eup %1681  ;;  %v1466_v20 = vadd.f32 -1.0, %v1680_v60  ;;  %v705_v57 = vmul.f32 1.442695, %v1974_v50 }
 0x141   : > { %1069 = vrot.lane.b32.xlu0 %v1676_v5, %s1743_s13  ;;  %v1684_v3 = vpop.eup %1683  ;;  %v733_v60 = vmul.f32 1.442695, %v1959_v23 }
 0x142   : > { %1174 = vst.msk [vmem:[%s2093_s17 + $0x10] sm:$0xf] %vm1169_vm2, %v1141_v45  ;;  %1071 = vrot.lane.b32.xlu1 %v1678_v52, %s1743_s13  ;;  %v1686_v49 = vpop.eup %1685  ;;  %v1451_v16 = vadd.f32 -1.0, %v1684_v3  ;;  %v803_v47 = vsel %vm675_vm7, %v1913_v14, %v1466_v20  ;;  %vm667_vm7 = vcmp.gt.f32.partialorder %v2001_v35, 0.0 }
 0x143   : > { %v1014_v46 = vpop.permute.xlu1 %1013  ;;  %1067 = vrot.lane.b32.xlu2 %v1682_v63, %s1743_s13  ;;  %v1453_v2 = vadd.f32 -1.0, %v1686_v49  ;;  %v1688_v34 = vpop.eup %1687  ;;  %v741_v49 = vmul.f32 1.442695, %v2011_v59 }
 0x144   : > { %v1107_v6 = vmul.f32 %v1014_v46, %v787_v0  ;;  %v788_v27 = vsel %vm660_vm8, %v1915_v15, %v1451_v16  ;;  %v1467_v32 = vadd.f32 -1.0, %v1688_v34  ;;  %v731_v15 = vmul.f32 1.442695, %v1947_v4 }
 0x145   : > { %v1050_v58 = vpop.permute.xlu2 %1049  ;;  %v790_v37 = vsel %vm662_vm9, %v1937_v48, %v1453_v2  ;;  %v1690_v48 = vpop.eup %1689  ;;  %vm674_vm8 = vcmp.gt.f32.partialorder %v2048_v18, 0.0  ;;  %vm684_vm9 = vcmp.gt.f32.partialorder %v2024_v13, 0.0 }
 0x146   : > { %v1125_v11 = vmul.f32 %v1050_v58, %v805_v9  ;;  %v1139_v12 = vpack.c.bf16 %v1107_v6, %v1107_v6  ;;  %v804_v56 = vsel %vm676_vm10, %v1924_v29, %v1467_v32  ;;  %1691 = vpow2.f32 %v731_v15 }
 0x147   : > { %1693 = vpow2.f32 %v705_v57  ;;  %v1471_v52 = vadd.f32 -1.0, %v1690_v48  ;;  %v703_v58 = vmul.f32 1.442695, %v1962_v24  ;;  %v707_v48 = vmul.f32 1.442695, %v1987_v10 }
 0x148   : > { %v1157_v17 = vpack.c.bf16 %v1125_v11, %v1125_v11  ;;  %1172 = vst.msk [vmem:[%s2093_s17 + $0x8] sm:$0xf] %vm1169_vm2, %v1139_v12  ;;  %1695 = vpow2.f32 %v701_v54  ;;  %vm671_vm10 = vcmp.gt.f32.partialorder %v2054_v61, 0.0 }
 0x149   : > { %v1046_v26 = vpop.permute.xlu0 %1045  ;;  %v808_v63 = vsel %vm680_vm11, %v1971_v43, %v1471_v52  ;;  %1697 = vpow2.f32 %v733_v60  ;;  %vm669_vm11 = vcmp.gt.f32.partialorder %v2027_v25, 0.0 }
 0x14a   : > { %1190 = vst.msk [vmem:[%s2093_s17 + $0x50] sm:$0xf] %vm1169_vm2, %v1157_v17  ;;  %v1123_v1 = vmul.f32 %v1046_v26, %v803_v47  ;;  %1699 = vpow2.f32 %v703_v58 }
 0x14b   : > { %v1016_v31 = vpop.permute.xlu1 %1015  ;;  %1701 = vpow2.f32 %v741_v49 }
 0x14c   : > { %v1108_v36 = vmul.f32 %v1016_v31, %v788_v27  ;;  %v1155_v44 = vpack.c.bf16 %v1123_v1, %v1123_v1  ;;  %v1692_v30 = vpop.eup %1691  ;;  %v737_v31 = vmul.f32 1.442695, %v1984_v8 }
 0x14d   : > { %v1020_v39 = vpop.permute.xlu2 %1019  ;;  %v1694_v29 = vpop.eup %1693  ;;  %v1469_v9 = vadd.f32 -1.0, %v1692_v30 }
 0x14e   : > { %v1110_v38 = vmul.f32 %v1020_v39, %v790_v37  ;;  %v1140_v14 = vpack.c.bf16 %v1108_v36, %v1108_v36  ;;  %1188 = vst.msk [vmem:[%s2093_s17 + $0x48] sm:$0xf] %vm1169_vm2, %v1155_v44  ;;  %v1456_v6 = vadd.f32 -1.0, %v1694_v29  ;;  %v1696_v43 = vpop.eup %1695  ;;  %1703 = vpow2.f32 %v737_v31 }
 0x14f   : > { %v806_v20 = vsel %vm678_vm13, %v1947_v4, %v1469_v9  ;;  %v1698_v17 = vpop.eup %1697  ;;  %v1454_v27 = vadd.f32 -1.0, %v1696_v43  ;;  %v711_v4 = vmul.f32 1.442695, %v2014_v62  ;;  %vm673_vm13 = vcmp.gt.f32.partialorder %v2036_v53, 0.0 }
 0x150   : > { %v1142_v28 = vpack.c.bf16 %v1110_v38, %v1110_v38  ;;  %1173 = vst.msk [vmem:[%s2093_s17 + $0xc] sm:$0xf] %vm1169_vm2, %v1140_v14  ;;  %v793_v11 = vsel %vm665_vm12, %v1974_v50, %v1456_v6  ;;  %v1470_v1 = vadd.f32 -1.0, %v1698_v17  ;;  %v1700_v50 = vpop.eup %1699  ;;  %vm686_vm12 = vcmp.gt.f32.partialorder %v2067_v51, 0.0 }
 0x151   : > { %v791_v44 = vsel %vm663_vm15, %v1950_v7, %v1454_v27  ;;  %v1702_v39 = vpop.eup %1701  ;;  %1705 = vpow2.f32 %v711_v4  ;;  %v1455_v57 = vadd.f32 -1.0, %v1700_v50  ;;  %v739_v7 = vmul.f32 1.442695, %v1998_v33 }
 0x152   : > { %1175 = vst.msk [vmem:[%s2093_s17 + $0x14] sm:$0xf] %vm1169_vm2, %v1142_v28  ;;  %v807_v34 = vsel %vm679_vm14, %v1959_v23, %v1470_v1  ;;  %v1474_v15 = vadd.f32 -1.0, %v1702_v39  ;;  %1707 = vpow2.f32 %v707_v48  ;;  %v717_v50 = vmul.f32 1.442695, %v2054_v61 }
 0x153   : > { %v1048_v40 = vpop.permute.xlu1 %1047  ;;  %1709 = vpow2.f32 %v739_v7  ;;  %vm685_vm14 = vcmp.gt.f32.partialorder %v2038_v21, 0.0  ;;  %vm672_vm15 = vcmp.gt.f32.partialorder %v2070_v55, 0.0 }
 0x154   : > { %v1124_v5 = vmul.f32 %v1048_v40, %v804_v56  ;;  %v1704_v23 = vpop.eup %1703  ;;  %v811_v56 = vsel %vm683_vm0, %v2011_v59, %v1474_v15  ;;  %vm670_vm0 = vcmp.gt.f32.partialorder %v2051_v22, 0.0 }
 0x155   : > { %v1472_v29 = vadd.f32 -1.0, %v1704_v23 }
 0x156   : > { %v1156_v45 = vpack.c.bf16 %v1124_v5, %v1124_v5  ;;  %v792_v5 = vsel %vm664_vm1, %v1962_v24, %v1455_v57  ;;  %v709_v24 = vmul.f32 1.442695, %v2001_v35  ;;  %vm687_vm1 = vcmp.gt.f32.partialorder %v2064_v41, 0.0 }
 0x157   : > { %v1706_v52 = vpop.eup %1705  ;;  %v809_v6 = vsel %vm681_vm4, %v1984_v8, %v1472_v29  ;;  %v743_v8 = vmul.f32 1.442695, %v2024_v13 }
 0x158   : > { %1189 = vst.msk [vmem:[%s2093_s17 + $0x4c] sm:$0xf] %vm1169_vm2, %v1156_v45  ;;  %v1708_v59 = vpop.eup %1707  ;;  %1711 = vpow2.f32 %v709_v24 }
 0x159   : > { %v1056_v46 = vpop.permute.xlu2 %1055  ;;  %v1710_v58 = vpop.eup %1709  ;;  %v1457_v17 = vadd.f32 -1.0, %v1708_v59 }
 0x15a   : > { %v1128_v0 = vmul.f32 %v1056_v46, %v808_v63  ;;  %v1459_v46 = vadd.f32 -1.0, %v1706_v52 }
 0x15c   : > { %v1160_v3 = vpack.c.bf16 %v1128_v0, %v1128_v0  ;;  %v796_v0 = vsel %vm668_vm3, %v2014_v62, %v1459_v46  ;;  %vm688_vm3 = vcmp.gt.f32.partialorder %v2078_v42, 0.0 }
 0x15e   : > { %1193 = vst.msk [vmem:[%s2093_s17 + $0x5c] sm:$0xf] %vm1169_vm2, %v1160_v3 }
 0x161   : > { %v1026_v12 = vpop.permute.xlu2 %1025  ;;  %v1052_v16 = vpop.permute.xlu0 %1051 }
 0x162   : > { %v1113_v2 = vmul.f32 %v1026_v12, %v793_v11  ;;  %v1126_v19 = vmul.f32 %v1052_v16, %v806_v20  ;;  %v723_v20 = vmul.f32 1.442695, %v2048_v18  ;;  %v1473_v16 = vadd.f32 -1.0, %v1710_v58 }
 0x164   : > { %v1145_v47 = vpack.c.bf16 %v1113_v2, %v1113_v2  ;;  %v1158_v26 = vpack.c.bf16 %v1126_v19, %v1126_v19  ;;  %1713 = vpow2.f32 %v723_v20  ;;  %v810_v62 = vsel %vm682_vm5, %v1998_v33, %v1473_v16 }
 0x165   : > { %v794_v19 = vsel %vm666_vm6, %v1987_v10, %v1457_v17  ;;  %1715 = vpow2.f32 %v743_v8  ;;  %v713_v10 = vmul.f32 1.442695, %v2027_v25 }
 0x166   : > { %1178 = vst.msk [vmem:[%s2093_s17 + $0x20] sm:$0xf] %vm1169_vm2, %v1145_v47  ;;  %1717 = vpow2.f32 %v717_v50 }
 0x167   : > { %1191 = vst.msk [vmem:[%s2093_s17 + $0x54] sm:$0xf] %vm1169_vm2, %v1158_v26  ;;  %v1712_v26 = vpop.eup %1711  ;;  %1719 = vpow2.f32 %v713_v10 }
 0x169   : > { %v1054_v36 = vpop.permute.xlu1 %1053  ;;  %v1022_v37 = vpop.permute.xlu0 %1021 }
 0x16a   : > { %v1127_v38 = vmul.f32 %v1054_v36, %v807_v34  ;;  %v1111_v14 = vmul.f32 %v1022_v37, %v791_v44  ;;  %v1458_v34 = vadd.f32 -1.0, %v1712_v26  ;;  %v1714_v36 = vpop.eup %1713 }
 0x16b   : > { %v1465_v33 = vadd.f32 -1.0, %v1714_v36  ;;  %v1716_v39 = vpop.eup %1715 }
 0x16c   : > { %v1159_v32 = vpack.c.bf16 %v1127_v38, %v1127_v38  ;;  %v1143_v28 = vpack.c.bf16 %v1111_v14, %v1111_v14  ;;  %v795_v44 = vsel %vm667_vm7, %v2001_v35, %v1458_v34  ;;  %v721_v14 = vmul.f32 1.442695, %v2036_v53  ;;  %v1718_v7 = vpop.eup %1717 }
 0x16d   : > { %v802_v15 = vsel %vm674_vm8, %v2048_v18, %v1465_v33  ;;  %v1475_v48 = vadd.f32 -1.0, %v1716_v39 }
 0x16e   : > { %1192 = vst.msk [vmem:[%s2093_s17 + $0x58] sm:$0xf] %vm1169_vm2, %v1159_v32  ;;  %1721 = vpow2.f32 %v721_v14 }
 0x16f   : > { %1176 = vst.msk [vmem:[%s2093_s17 + $0x18] sm:$0xf] %vm1169_vm2, %v1143_v28  ;;  %v747_v28 = vmul.f32 1.442695, %v2067_v51 }
 0x171   : > { %v1062_v40 = vpop.permute.xlu2 %1061  ;;  %v1024_v45 = vpop.permute.xlu1 %1023  ;;  %1723 = vpow2.f32 %v747_v28 }
 0x172   : > { %v1131_v54 = vmul.f32 %v1062_v40, %v811_v56  ;;  %v1112_v60 = vmul.f32 %v1024_v45, %v792_v5  ;;  %v1462_v56 = vadd.f32 -1.0, %v1718_v7  ;;  %v812_v40 = vsel %vm684_vm9, %v2024_v13, %v1475_v48  ;;  %v1720_v45 = vpop.eup %1719 }
 0x173   : > { %v1460_v46 = vadd.f32 -1.0, %v1720_v45 }
 0x174   : > { %v1163_v30 = vpack.c.bf16 %v1131_v54, %v1131_v54  ;;  %v1144_v63 = vpack.c.bf16 %v1112_v60, %v1112_v60  ;;  %v745_v54 = vmul.f32 1.442695, %v2038_v21  ;;  %v1722_v60 = vpop.eup %1721 }
 0x176   : > { %1196 = vst.msk [vmem:[%s2093_s17 + $0x68] sm:$0xf] %vm1169_vm2, %v1163_v30  ;;  %v799_v30 = vsel %vm671_vm10, %v2054_v61, %v1462_v56  ;;  %1725 = vpow2.f32 %v745_v54  ;;  %v719_v61 = vmul.f32 1.442695, %v2070_v55 }
 0x177   : > { %1177 = vst.msk [vmem:[%s2093_s17 + $0x1c] sm:$0xf] %vm1169_vm2, %v1144_v63  ;;  %v1724_v29 = vpop.eup %1723 }
 0x178   : > { %v1477_v59 = vadd.f32 -1.0, %v1724_v29  ;;  %1727 = vpow2.f32 %v719_v61 }
 0x179   : > { %v1032_v3 = vpop.permute.xlu2 %1031  ;;  %v1058_v9 = vpop.permute.xlu0 %1057 }
 0x17a   : > { %v1116_v49 = vmul.f32 %v1032_v3, %v796_v0  ;;  %v1129_v43 = vmul.f32 %v1058_v9, %v809_v6  ;;  %v1464_v0 = vadd.f32 -1.0, %v1722_v60  ;;  %v797_v3 = vsel %vm669_vm11, %v2027_v25, %v1460_v46 }
 0x17c   : > { %v1148_v11 = vpack.c.bf16 %v1116_v49, %v1116_v49  ;;  %v1161_v12 = vpack.c.bf16 %v1129_v43, %v1129_v43  ;;  %v715_v49 = vmul.f32 1.442695, %v2051_v22  ;;  %v814_v43 = vsel %vm686_vm12, %v2067_v51, %v1477_v59  ;;  %v1726_v20 = vpop.eup %1725 }
 0x17d   : > { %v801_v25 = vsel %vm673_vm13, %v2036_v53, %v1464_v0  ;;  %v751_v53 = vmul.f32 1.442695, %v2078_v42 }
 0x17e   : > { %1181 = vst.msk [vmem:[%s2093_s17 + $0x2c] sm:$0xf] %vm1169_vm2, %v1148_v11  ;;  %1729 = vpow2.f32 %v715_v49  ;;  %v1728_v51 = vpop.eup %1727 }
 0x17f   : > { %1194 = vst.msk [vmem:[%s2093_s17 + $0x60] sm:$0xf] %vm1169_vm2, %v1161_v12 }
 0x181   : > { %v1060_v2 = vpop.permute.xlu1 %1059  ;;  %v1028_v47 = vpop.permute.xlu0 %1027 }
 0x182   : > { %v1130_v1 = vmul.f32 %v1060_v2, %v810_v62  ;;  %v1114_v27 = vmul.f32 %v1028_v47, %v794_v19  ;;  %v1476_v2 = vadd.f32 -1.0, %v1726_v20  ;;  %v749_v19 = vmul.f32 1.442695, %v2064_v41 }
 0x184   : > { %v1162_v31 = vpack.c.bf16 %v1130_v1, %v1130_v1  ;;  %v1146_v4 = vpack.c.bf16 %v1114_v27, %v1114_v27  ;;  %v813_v47 = vsel %vm685_vm14, %v2038_v21, %v1476_v2  ;;  %v1730_v1 = vpop.eup %1729  ;;  %1731 = vpow2.f32 %v749_v19 }
 0x185   : > { %1733 = vpow2.f32 %v751_v53  ;;  %v1461_v50 = vadd.f32 -1.0, %v1730_v1 }
 0x186   : > { %1195 = vst.msk [vmem:[%s2093_s17 + $0x64] sm:$0xf] %vm1169_vm2, %v1162_v31  ;;  %v1463_v31 = vadd.f32 -1.0, %v1728_v51 }
 0x187   : > { %1179 = vst.msk [vmem:[%s2093_s17 + $0x24] sm:$0xf] %vm1169_vm2, %v1146_v4  ;;  %v798_v33 = vsel %vm670_vm0, %v2051_v22, %v1461_v50 }
 0x188   : > { %v800_v34 = vsel %vm672_vm15, %v2070_v55, %v1463_v31 }
 0x189   : > { %v1030_v37 = vpop.permute.xlu1 %1029 }
 0x18a   : > { %v1115_v38 = vmul.f32 %v1030_v37, %v795_v44  ;;  %v1732_v10 = vpop.eup %1731 }
 0x18b   : > { %v1734_v37 = vpop.eup %1733  ;;  %v1478_v14 = vadd.f32 -1.0, %v1732_v10 }
 0x18c   : > { %v1147_v32 = vpack.c.bf16 %v1115_v38, %v1115_v38  ;;  %v1479_v28 = vadd.f32 -1.0, %v1734_v37 }
 0x18d   : > { %v1044_v57 = vpop.permute.xlu2 %1043  ;;  %v815_v55 = vsel %vm687_vm1, %v2064_v41, %v1478_v14 }
 0x18e   : > { %v1122_v23 = vmul.f32 %v1044_v57, %v802_v15  ;;  %1180 = vst.msk [vmem:[%s2093_s17 + $0x28] sm:$0xf] %vm1169_vm2, %v1147_v32  ;;  %v816_v57 = vsel %vm688_vm3, %v2078_v42, %v1479_v28 }
 0x190   : > { %v1154_v35 = vpack.c.bf16 %v1122_v23, %v1122_v23 }
 0x191   : > { %v1064_v5 = vpop.permute.xlu0 %1063 }
 0x192   : > { %1187 = vst.msk [vmem:[%s2093_s17 + $0x44] sm:$0xf] %vm1169_vm2, %v1154_v35  ;;  %v1132_v18 = vmul.f32 %v1064_v5, %v812_v40 }
 0x194   : > { %v1164_v52 = vpack.c.bf16 %v1132_v18, %v1132_v18 }
 0x195   : > { %v1038_v63 = vpop.permute.xlu2 %1037 }
 0x196   : > { %v1119_v24 = vmul.f32 %v1038_v63, %v799_v30  ;;  %1197 = vst.msk [vmem:[%s2093_s17 + $0x6c] sm:$0xf] %vm1169_vm2, %v1164_v52 }
 0x198   : > { %v1151_v13 = vpack.c.bf16 %v1119_v24, %v1119_v24 }
 0x199   : > { %v1034_v6 = vpop.permute.xlu0 %1033 }
 0x19a   : > { %1184 = vst.msk [vmem:[%s2093_s17 + $0x38] sm:$0xf] %vm1169_vm2, %v1151_v13  ;;  %v1117_v9 = vmul.f32 %v1034_v6, %v797_v3 }
 0x19b   : > { %v1042_v12 = vpop.permute.xlu1 %1041 }
 0x19c   : > { %v1149_v58 = vpack.c.bf16 %v1117_v9, %v1117_v9  ;;  %v1121_v17 = vmul.f32 %v1042_v12, %v801_v25 }
 0x19d   : > { %v1068_v11 = vpop.permute.xlu2 %1067 }
 0x19e   : > { %v1134_v16 = vmul.f32 %v1068_v11, %v814_v43  ;;  %1182 = vst.msk [vmem:[%s2093_s17 + $0x30] sm:$0xf] %vm1169_vm2, %v1149_v58  ;;  %v1153_v62 = vpack.c.bf16 %v1121_v17, %v1121_v17 }
 0x1a0   : > { %v1166_v8 = vpack.c.bf16 %v1134_v16, %v1134_v16  ;;  %1186 = vst.msk [vmem:[%s2093_s17 + $0x40] sm:$0xf] %vm1169_vm2, %v1153_v62 }
 0x1a2   : > { %1199 = vst.msk [vmem:[%s2093_s17 + $0x74] sm:$0xf] %vm1169_vm2, %v1166_v8 }
 0x1a3   : > { %v1066_v26 = vpop.permute.xlu1 %1065 }
 0x1a4   : > { %v1133_v27 = vmul.f32 %v1066_v26, %v813_v47 }
 0x1a6   : > { %v1165_v4 = vpack.c.bf16 %v1133_v27, %v1133_v27 }
 0x1a8   : > { %1198 = vst.msk [vmem:[%s2093_s17 + $0x70] sm:$0xf] %vm1169_vm2, %v1165_v4 }
 0x1ab   : > { %v1040_v36 = vpop.permute.xlu0 %1039 }
 0x1ac   : > { %v1120_v21 = vmul.f32 %v1040_v36, %v800_v34  ;;  %v1036_v44 = vpop.permute.xlu1 %1035 }
 0x1ad   : > { %v1118_v39 = vmul.f32 %v1036_v44, %v798_v33 }
 0x1ae   : > { %v1152_v38 = vpack.c.bf16 %v1120_v21, %v1120_v21 }
 0x1af   : > { %v1150_v32 = vpack.c.bf16 %v1118_v39, %v1118_v39 }
 0x1b0   : > { %1185 = vst.msk [vmem:[%s2093_s17 + $0x3c] sm:$0xf] %vm1169_vm2, %v1152_v38 }
 0x1b1   : > { %1183 = vst.msk [vmem:[%s2093_s17 + $0x34] sm:$0xf] %vm1169_vm2, %v1150_v32 }
 0x1b3   : > { %v1070_v15 = vpop.permute.xlu0 %1069 }
 0x1b4   : > { %v1135_v22 = vmul.f32 %v1070_v15, %v815_v55  ;;  %v1072_v48 = vpop.permute.xlu1 %1071 }
 0x1b5   : > { %v1136_v7 = vmul.f32 %v1072_v48, %v816_v57 }
 0x1b6   : > { %v1167_v23 = vpack.c.bf16 %v1135_v22, %v1135_v22 }
 0x1b7   : > { %v1168_v35 = vpack.c.bf16 %v1136_v7, %v1136_v7 }
 0x1b8   : > { %1200 = vst.msk [vmem:[%s2093_s17 + $0x78] sm:$0xf] %vm1169_vm2, %v1167_v23 }
 0x1b9   : > { %1201 = vst.msk [vmem:[%s2093_s17 + $0x7c] sm:$0xf] %vm1169_vm2, %v1168_v35 }
 0x1ba PF: > { %s13_s12 = sadd.s32 1, %s1741_s12  }
 0x1bb   : > { %p10_p4 = scmp.ge.s32.totalorder %s13_s12, 4  }
 0x1bd   :  { %12 = sbr.rel (!%p10_p4) target bundleno = 1 (0x1), region = 62 }

// kernel: generator_forward.58
= control target key start
LH: loop header
LB: loop body
LE: loop exit
PB: predicated region body
PF: predicated region fallthrough
CT: control target
= control target key end

     0   :  { %s1475_s12 = smov 0   ;;  %s1875_s0 = inlined_call_operand.vmem [shape: bf16[512,72], index: 0, kind: input, shape index: {}]   ;;  %s1876_s1 = inlined_call_operand.vmem [shape: bf16[72,8], index: 1, kind: input, shape index: {}]   ;;  %s1877_s2 = inlined_call_operand.vmem [shape: f32[1,8], index: 2, kind: input, shape index: {}]   ;;  %s1878_s3 = inlined_call_operand.vmem [shape: bf16[512,4], index: 3, kind: output, shape index: {}]  }
   0x1 LB: > { %s1070_s13 = sadd.s32 4294967295, %s1452_s12   ;;  %p1074_p0 = scmp.ge.s32.totalorder %s1452_s12, 1  ;;  %s1452_s12 = sphi %s1475_s12, %s13_s12  }
   0x2   : > { %p138_p1 = scmp.lt.s32.totalorder %s1452_s12, 3 }
   0x4   : > { %p139_p2 = pnand %p1074_p0, %p138_p1 }
   0x5   : > { %s1075_s16 = sshll.u32 (!%p139_p2), %s1070_s13, 5  ;;  %s1454_s4 = smov (!%p139_p2), 124  }
   0x6   : > { %142 = sbr.rel (%p139_p2) target bundleno = 396 (0x18c), region = 32  ;;  %p163_p3 = scmp.lt.s32.totalorder (!%p139_p2), %s1075_s16, 63 }
   0xb   : > { %v215_v0 = vld [vmem:[%s1876_s1 + $0x20] sm:$0xf]  ;;  %vm376_vm0 = vcmask 1043456   ;;  %v1228_v4 = vld [vmem:[%s1876_s1 + $0x18] sm:$0xff]  ;;  %v1227_v5 = vld [vmem:[%s1876_s1 + $0x10] sm:$0xff]  ;;  %s1880_s16 = smov (!%p163_p3, %s1075_s16), 63 }
   0xc   : > { %v317_v1 = vunpack.c.l.b16 %v215_v0  ;;  %v1226_v6 = vld [vmem:[%s1876_s1 + $0x8] sm:$0xff]  ;;  %s1076_s23 = sshll.u32 %s1880_s16, 2  ;;  %v1225_v7 = vld [vmem:[%s1876_s1] sm:$0xff]  ;;  %vm327_vm1 = vcmask 588800   ;;  %vm981_vm3 = vcmask 27648  }
   0xd   : > { %s1506_s28 = scalar_lea.vmem %s1875_s0, %s1076_s23  ;;  %v1543_v24 = vld [vmem:[%s1877_s2] ss:$0 sm:$0xff]  ;;  %s1714_s7 = scalar_lea.vmem %s1878_s3, %s1076_s23 }
   0xe   : > { %v322_v2 = vpack.c.b16 %v317_v1, %v317_v1  ;;  %v1209_v8 = vld [vmem:[%s1506_s28] sm:$0xff]  ;;  %v1210_v12 = vld [vmem:[%s1506_s28 + $0x8] sm:$0xff]  ;;  %v1211_v16 = vld [vmem:[%s1506_s28 + $0x10] sm:$0xff] }
   0xf   : > { %v1213_v9 = vld [vmem:[%s1506_s28 + $0x20] sm:$0xff]  ;;  %v1214_v13 = vld [vmem:[%s1506_s28 + $0x28] sm:$0xff]  ;;  %v1215_v17 = vld [vmem:[%s1506_s28 + $0x30] sm:$0xff] }
  0x10   : > { %v378_v3 = vsel %vm376_vm0, %v322_v2, 0  ;;  %v1217_v10 = vld [vmem:[%s1506_s28 + $0x40] sm:$0xff]  ;;  %v1218_v14 = vld [vmem:[%s1506_s28 + $0x48] sm:$0xff]  ;;  %v1219_v18 = vld [vmem:[%s1506_s28 + $0x50] sm:$0xff] }
  0x11   : > { %383 = vmatpush.bf16.msra.mxu0 %v378_v3  ;;  %1229 = vmatpush.bf16.msra.mxu1 %v378_v3  ;;  %v1221_v11 = vld [vmem:[%s1506_s28 + $0x60] sm:$0xff]  ;;  %v1222_v15 = vld [vmem:[%s1506_s28 + $0x68] sm:$0xff]  ;;  %v1223_v19 = vld [vmem:[%s1506_s28 + $0x70] sm:$0xff] }
  0x12   : > { %1230 = vmatpush.bf16.msra.mxu2 %v378_v3  ;;  %1231 = vmatpush.bf16.msra.mxu3 %v378_v3  ;;  %v1212_v20 = vld [vmem:[%s1506_s28 + $0x18] sm:$0xff] }
  0x13   : > { %v1216_v21 = vld [vmem:[%s1506_s28 + $0x38] sm:$0xff] }
  0x14   : > { %v1220_v22 = vld [vmem:[%s1506_s28 + $0x58] sm:$0xff] }
  0x15   : > { %384 = vmatpush.bf16.msra.mxu0 %v1228_v4  ;;  %1232 = vmatpush.bf16.msra.mxu1 %v1228_v4  ;;  %v1224_v23 = vld [vmem:[%s1506_s28 + $0x78] sm:$0xff] }
  0x16   : > { %1233 = vmatpush.bf16.msra.mxu2 %v1228_v4  ;;  %1234 = vmatpush.bf16.msra.mxu3 %v1228_v4 }
  0x19   : > { %385 = vmatpush.bf16.msra.mxu0 %v1227_v5  ;;  %1235 = vmatpush.bf16.msra.mxu1 %v1227_v5 }
  0x1a   : > { %1236 = vmatpush.bf16.msra.mxu2 %v1227_v5  ;;  %1237 = vmatpush.bf16.msra.mxu3 %v1227_v5 }
  0x1d   : > { %386 = vmatpush.bf16.msra.mxu0 %v1226_v6  ;;  %1238 = vmatpush.bf16.msra.mxu1 %v1226_v6 }
  0x1e   : > { %1239 = vmatpush.bf16.msra.mxu2 %v1226_v6  ;;  %1240 = vmatpush.bf16.msra.mxu3 %v1226_v6 }
  0x21   : > { %387 = vmatpush.bf16.msra.mxu0 %v1225_v7  ;;  %1241 = vmatpush.bf16.msra.mxu1 %v1225_v7 }
  0x22   : > { %1242 = vmatpush.bf16.msra.mxu2 %v1225_v7  ;;  %1243 = vmatpush.bf16.msra.mxu3 %v1225_v7 }
  0x24   : > { %1159 = vmatmul.msk.bf16.vlgmr.msra.gmra.mxu0 %vm327_vm1, %v1209_v8  ;;  %1163 = vmatmul.msk.bf16.vlgmr.msra.gmra.mxu1 %vm327_vm1, %v1213_v9 }
  0x25   : > { %1167 = vmatmul.msk.bf16.vlgmr.msra.gmra.mxu2 %vm327_vm1, %v1217_v10  ;;  %1171 = vmatmul.msk.bf16.vlgmr.msra.gmra.mxu3 %vm327_vm1, %v1221_v11 }
  0x34   : > { %1160 = vmatmul.msk.bf16.gmra.mxu0 %vm327_vm1, %v1210_v12  ;;  %1164 = vmatmul.msk.bf16.gmra.mxu1 %vm327_vm1, %v1214_v13 }
  0x35   : > { %1168 = vmatmul.msk.bf16.gmra.mxu2 %vm327_vm1, %v1218_v14  ;;  %1172 = vmatmul.msk.bf16.gmra.mxu3 %vm327_vm1, %v1222_v15 }
  0x44   : > { %1161 = vmatmul.msk.bf16.gmra.mxu0 %vm327_vm1, %v1211_v16  ;;  %1165 = vmatmul.msk.bf16.gmra.mxu1 %vm327_vm1, %v1215_v17 }
  0x45   : > { %1169 = vmatmul.msk.bf16.gmra.mxu2 %vm327_vm1, %v1219_v18  ;;  %1173 = vmatmul.msk.bf16.gmra.mxu3 %vm327_vm1, %v1223_v19 }
  0x54   : > { %1162 = vmatmul.msk.bf16.gmra.mxu0 %vm327_vm1, %v1212_v20  ;;  %1166 = vmatmul.msk.bf16.gmra.mxu1 %vm327_vm1, %v1216_v21 }
  0x55   : > { %1170 = vmatmul.msk.bf16.gmra.mxu2 %vm327_vm1, %v1220_v22  ;;  %1174 = vmatmul.msk.bf16.gmra.mxu3 %vm327_vm1, %v1224_v23 }
  0xa1   : > { %v389_v25 = vpop.f32.mrf.mxu0  ;;  %v409_v26 = vpop.f32.mrf.mxu1 }
  0xa2   : > { %v1546_v27 = vadd.f32 %v1543_v24, %v389_v25  ;;  %v1549_v28 = vadd.f32 %v1543_v24, %v409_v26 }
  0xa4   : > { %v629_v29 = vsub.f32 0.0, %v1546_v27  ;;  %v637_v30 = vsub.f32 0.0, %v1549_v28  ;;  %vm477_vm2 = vcmp.gt.f32.partialorder %v1549_v28, 0.0  ;;  %vm469_vm6 = vcmp.gt.f32.partialorder %v1546_v27, 0.0 }
  0xa6   : > { %v661_v31 = vmul.f32 1.442695, %v629_v29  ;;  %v677_v32 = vmul.f32 1.442695, %v637_v30 }
  0xa8   : > { %v429_v33 = vpop.f32.mrf.mxu2  ;;  %v449_v34 = vpop.f32.mrf.mxu3  ;;  %1254 = vpow2.f32 %v677_v32 }
  0xa9   : > { %v1554_v35 = vadd.f32 %v1543_v24, %v429_v33  ;;  %v1557_v36 = vadd.f32 %v1543_v24, %v449_v34  ;;  %v391_v37 = vpop.f32.mrf.mxu0  ;;  %v411_v38 = vpop.f32.mrf.mxu1  ;;  %1256 = vpow2.f32 %v661_v31 }
  0xaa   : > { %v1560_v39 = vadd.f32 %v1543_v24, %v391_v37  ;;  %v1572_v56 = vadd.f32 %v1543_v24, %v411_v38 }
  0xab   : > { %v653_v40 = vsub.f32 0.0, %v1557_v36  ;;  %v645_v41 = vsub.f32 0.0, %v1554_v35  ;;  %vm493_vm8 = vcmp.gt.f32.partialorder %v1557_v36, 0.0  ;;  %vm485_vm9 = vcmp.gt.f32.partialorder %v1554_v35, 0.0 }
  0xac   : > { %v630_v42 = vsub.f32 0.0, %v1560_v39  ;;  %v638_v60 = vsub.f32 0.0, %v1572_v56  ;;  %vm470_vm11 = vcmp.gt.f32.partialorder %v1560_v39, 0.0  ;;  %vm478_vm14 = vcmp.gt.f32.partialorder %v1572_v56, 0.0 }
  0xad   : > { %v709_v43 = vmul.f32 1.442695, %v653_v40  ;;  %v693_v48 = vmul.f32 1.442695, %v645_v41 }
  0xae   : > { %v1255_v44 = vpop.eup %1254  ;;  %v663_v45 = vmul.f32 1.442695, %v630_v42  ;;  %v679_v4 = vmul.f32 1.442695, %v638_v60 }
  0xaf   : > { %v1257_v46 = vpop.eup %1256  ;;  %1258 = vpow2.f32 %v709_v43  ;;  %v733_v47 = vadd.f32 1.0, %v1255_v44 }
  0xb0   : > { %v431_v49 = vpop.f32.mrf.mxu2  ;;  %v451_v50 = vpop.f32.mrf.mxu3  ;;  %v725_v51 = vadd.f32 1.0, %v1257_v46  ;;  %1260 = vpow2.f32 %v663_v45 }
  0xb1   : > { %v1566_v52 = vadd.f32 %v1543_v24, %v431_v49  ;;  %v1569_v53 = vadd.f32 %v1543_v24, %v451_v50  ;;  %v394_v54 = vpop.f32.mrf.mxu0  ;;  %v414_v55 = vpop.f32.mrf.mxu1  ;;  %1262 = vrcp.f32 %v733_v47 }
  0xb2   : > { %v1577_v59 = vadd.f32 %v1543_v24, %v394_v54  ;;  %1264 = vrcp.f32 %v725_v51  ;;  %v1589_v15 = vadd.f32 %v1543_v24, %v414_v55 }
  0xb3   : > { %v646_v57 = vsub.f32 0.0, %v1566_v52  ;;  %v654_v58 = vsub.f32 0.0, %v1569_v53  ;;  %1266 = vpow2.f32 %v693_v48  ;;  %vm486_vm4 = vcmp.gt.f32.partialorder %v1566_v52, 0.0 }
  0xb4   : > { %v631_v63 = vsub.f32 0.0, %v1577_v59  ;;  %v639_v22 = vsub.f32 0.0, %v1589_v15  ;;  %vm494_vm12 = vcmp.gt.f32.partialorder %v1569_v53, 0.0  ;;  %vm471_vm15 = vcmp.gt.f32.partialorder %v1577_v59, 0.0 }
  0xb5   : > { %v1259_v61 = vpop.eup %1258  ;;  %v695_v62 = vmul.f32 1.442695, %v646_v57  ;;  %v711_v2 = vmul.f32 1.442695, %v654_v58 }
  0xb6   : > { %v749_v0 = vadd.f32 1.0, %v1259_v61  ;;  %v1261_v1 = vpop.eup %1260  ;;  %v665_v8 = vmul.f32 1.442695, %v631_v63  ;;  %v681_v34 = vmul.f32 1.442695, %v639_v22 }
  0xb7   : > { %1268 = vpow2.f32 %v695_v62  ;;  %v1263_v3 = vpop.eup %1262  ;;  %v726_v14 = vadd.f32 1.0, %v1261_v1 }
  0xb8   : > { %v434_v5 = vpop.f32.mrf.mxu2  ;;  %v454_v6 = vpop.f32.mrf.mxu3  ;;  %837 = vrot.lane.b32.xlu2 %v1263_v3, %s1454_s4  ;;  %1270 = vrcp.f32 %v749_v0 }
  0xb9   : > { %v1265_v7 = vpop.eup %1264  ;;  %v1582_v9 = vadd.f32 %v1543_v24, %v434_v5  ;;  %v1585_v10 = vadd.f32 %v1543_v24, %v454_v6  ;;  %v396_v11 = vpop.f32.mrf.mxu0  ;;  %1272 = vpow2.f32 %v711_v2 }
  0xba   : > { %v416_v12 = vpop.f32.mrf.mxu1  ;;  %v1267_v13 = vpop.eup %1266  ;;  %821 = vrot.lane.b32.xlu0 %v1265_v7, %s1454_s4  ;;  %1274 = vpow2.f32 %v679_v4  ;;  %v1607_v44 = vadd.f32 %v1543_v24, %v396_v11 }
  0xbb   : > { %v1593_v16 = vadd.f32 %v1543_v24, %v416_v12  ;;  %v647_v17 = vsub.f32 0.0, %v1582_v9  ;;  %v655_v18 = vsub.f32 0.0, %v1585_v10  ;;  %v741_v19 = vadd.f32 1.0, %v1267_v13 }
  0xbc   : > { %1276 = vpow2.f32 %v665_v8  ;;  %v632_v57 = vsub.f32 0.0, %v1607_v44  ;;  %vm495_vm5 = vcmp.gt.f32.partialorder %v1585_v10, 0.0  ;;  %vm487_vm1 = vcmp.gt.f32.partialorder %v1582_v9, 0.0 }
  0xbd   : > { %v640_v20 = vsub.f32 0.0, %v1593_v16  ;;  %v1269_v21 = vpop.eup %1268  ;;  %v713_v23 = vmul.f32 1.442695, %v655_v18  ;;  %v697_v26 = vmul.f32 1.442695, %v647_v17  ;;  %1278 = vrcp.f32 %v741_v19 }
  0xbe   : > { %v742_v25 = vadd.f32 1.0, %v1269_v21  ;;  %1280 = vrcp.f32 %v726_v14  ;;  %v1271_v30 = vpop.eup %1270  ;;  %v667_v5 = vmul.f32 1.442695, %v632_v57  ;;  %vm480_vm7 = vcmp.gt.f32.partialorder %v1593_v16, 0.0 }
  0xbf   : > { %v683_v29 = vmul.f32 1.442695, %v640_v20  ;;  %v1273_v33 = vpop.eup %1272 }
  0xc0   : > { %1282 = vrcp.f32 %v742_v25  ;;  %v436_v31 = vpop.f32.mrf.mxu2  ;;  %v456_v32 = vpop.f32.mrf.mxu3  ;;  %v750_v40 = vadd.f32 1.0, %v1273_v33 }
  0xc1   : > { %1284 = vpow2.f32 %v713_v23  ;;  %v399_v37 = vpop.f32.mrf.mxu0  ;;  %v1275_v38 = vpop.eup %1274  ;;  %v1600_v41 = vadd.f32 %v1543_v24, %v456_v32  ;;  %v1625_v18 = vadd.f32 %v1543_v24, %v436_v31 }
  0xc2   : > { %1286 = vpow2.f32 %v697_v26  ;;  %869 = vrot.lane.b32.xlu0 %v1271_v30, %s1454_s4  ;;  %v1604_v42 = vadd.f32 %v1543_v24, %v399_v37  ;;  %v1277_v43 = vpop.eup %1276  ;;  %v419_v45 = vpop.f32.mrf.mxu1  ;;  %v734_v49 = vadd.f32 1.0, %v1275_v38 }
  0xc3   : > { %1288 = vpow2.f32 %v683_v29  ;;  %v1279_v46 = vpop.eup %1278  ;;  %v656_v47 = vsub.f32 0.0, %v1600_v41  ;;  %v727_v55 = vadd.f32 1.0, %v1277_v43  ;;  %v1618_v3 = vadd.f32 %v1543_v24, %v419_v45 }
  0xc4   : > { %1290 = vrcp.f32 %v750_v40  ;;  %v1281_v48 = vpop.eup %1280  ;;  %853 = vrot.lane.b32.xlu1 %v1279_v46, %s1454_s4  ;;  %v633_v50 = vsub.f32 0.0, %v1604_v42  ;;  %v648_v25 = vsub.f32 0.0, %v1625_v18  ;;  %vm473_vm10 = vcmp.gt.f32.partialorder %v1604_v42, 0.0 }
  0xc5   : > { %1292 = vpow2.f32 %v681_v34  ;;  %v715_v61 = vmul.f32 1.442695, %v656_v47  ;;  %v641_v8 = vsub.f32 0.0, %v1618_v3 }
  0xc6   : > { %v1283_v51 = vpop.eup %1282  ;;  %1294 = vrcp.f32 %v734_v49  ;;  %v669_v0 = vmul.f32 1.442695, %v633_v50  ;;  %v699_v38 = vmul.f32 1.442695, %v648_v25 }
  0xc7   : > { %v1285_v54 = vpop.eup %1284  ;;  %855 = vrot.lane.b32.xlu2 %v1283_v51, %s1454_s4  ;;  %v685_v21 = vmul.f32 1.442695, %v641_v8 }
  0xc8   : > { %v1287_v58 = vpop.eup %1286  ;;  %v751_v60 = vadd.f32 1.0, %v1285_v54  ;;  %v439_v62 = vpop.f32.mrf.mxu2 }
  0xc9   : > { %v1289_v63 = vpop.eup %1288  ;;  %v1615_v1 = vadd.f32 %v1543_v24, %v439_v62  ;;  %v743_v11 = vadd.f32 1.0, %v1287_v58  ;;  %v401_v14 = vpop.f32.mrf.mxu0 }
  0xca   : > { %v1291_v2 = vpop.eup %1290  ;;  %1296 = vrcp.f32 %v751_v60  ;;  %823 = vrot.lane.b32.xlu0 %v1281_v48, %s1454_s4  ;;  %v736_v7 = vadd.f32 1.0, %v1289_v63  ;;  %v421_v12 = vpop.f32.mrf.mxu1  ;;  %v1629_v26 = vadd.f32 %v1543_v24, %v401_v14 }
  0xcb   : > { %v1293_v4 = vpop.eup %1292  ;;  %1298 = vrcp.f32 %v727_v55  ;;  %v649_v6 = vsub.f32 0.0, %v1615_v1  ;;  %v459_v34 = vpop.f32.mrf.mxu3  ;;  %vm489_vm13 = vcmp.gt.f32.partialorder %v1615_v1, 0.0 }
  0xcc   : > { %1300 = vpow2.f32 %v715_v61  ;;  %871 = vrot.lane.b32.xlu1 %v1291_v2, %s1454_s4  ;;  %v735_v13 = vadd.f32 1.0, %v1293_v4  ;;  %v1295_v17 = vpop.eup %1294  ;;  %v634_v31 = vsub.f32 0.0, %v1629_v26  ;;  %v1638_v40 = vadd.f32 %v1543_v24, %v459_v34 }
  0xcd   : > { %1302 = vpow2.f32 %v669_v0  ;;  %v701_v19 = vmul.f32 1.442695, %v649_v6  ;;  %vm474_vm0 = vcmp.gt.f32.partialorder %v1629_v26, 0.0 }
  0xce   : > { %1304 = vpow2.f32 %v667_v5  ;;  %v657_v48 = vsub.f32 0.0, %v1638_v40  ;;  %v671_v49 = vmul.f32 1.442695, %v634_v31 }
  0xcf   : > { %1306 = vrcp.f32 %v736_v7  ;;  %v1654_v7 = vadd.f32 %v1543_v24, %v421_v12 }
  0xd0   : > { %v1297_v20 = vpop.eup %1296  ;;  %v441_v22 = vpop.f32.mrf.mxu2  ;;  %1308 = vrcp.f32 %v743_v11  ;;  %v717_v0 = vmul.f32 1.442695, %v657_v48 }
  0xd1   : > { %v1299_v23 = vpop.eup %1298  ;;  %873 = vrot.lane.b32.xlu2 %v1297_v20, %s1454_s4  ;;  %1310 = vrcp.f32 %v735_v13  ;;  %v1635_v32 = vadd.f32 %v1543_v24, %v441_v22  ;;  %v404_v58 = vpop.f32.mrf.mxu0  ;;  %v642_v13 = vsub.f32 0.0, %v1654_v7 }
  0xd2   : > { %v1301_v29 = vpop.eup %1300  ;;  %839 = vrot.lane.b32.xlu0 %v1295_v17, %s1454_s4  ;;  %1312 = vpow2.f32 %v701_v19  ;;  %v424_v50 = vpop.f32.mrf.mxu1  ;;  %v1648_v63 = vadd.f32 %v1543_v24, %v404_v58 }
  0xd3   : > { %v1303_v30 = vpop.eup %1302  ;;  %1314 = vpow2.f32 %v685_v21  ;;  %v650_v43 = vsub.f32 0.0, %v1635_v32  ;;  %v752_v46 = vadd.f32 1.0, %v1301_v29  ;;  %v1644_v60 = vadd.f32 %v1543_v24, %v424_v50  ;;  %v461_v25 = vpop.f32.mrf.mxu3 }
  0xd4   : > { %v729_v33 = vadd.f32 1.0, %v1303_v30  ;;  %v1305_v37 = vpop.eup %1304  ;;  %825 = vrot.lane.b32.xlu1 %v1299_v23, %s1454_s4  ;;  %v635_v5 = vsub.f32 0.0, %v1648_v63  ;;  %v687_v30 = vmul.f32 1.442695, %v642_v13 }
  0xd5   : > { %v1307_v45 = vpop.eup %1306  ;;  %v703_v57 = vmul.f32 1.442695, %v650_v43  ;;  %v728_v62 = vadd.f32 1.0, %v1305_v37  ;;  %v643_v2 = vsub.f32 0.0, %v1644_v60 }
  0xd6   : > { %v1309_v47 = vpop.eup %1308  ;;  %1316 = vrcp.f32 %v729_v33  ;;  %v673_v19 = vmul.f32 1.442695, %v635_v5 }
  0xd7   : > { %v1311_v51 = vpop.eup %1310  ;;  %1318 = vpow2.f32 %v699_v38  ;;  %v689_v14 = vmul.f32 1.442695, %v643_v2 }
  0xd8   : > { %v444_v54 = vpop.f32.mrf.mxu2  ;;  %v1313_v55 = vpop.eup %1312  ;;  %1320 = vrcp.f32 %v752_v46 }
  0xd9   : > { %843 = vrot.lane.b32.xlu2 %v1307_v45, %s1454_s4  ;;  %v1315_v61 = vpop.eup %1314  ;;  %1322 = vpow2.f32 %v671_v49  ;;  %v745_v4 = vadd.f32 1.0, %v1313_v55  ;;  %v1668_v43 = vadd.f32 %v1543_v24, %v444_v54  ;;  %v1675_v54 = vadd.f32 %v1543_v24, %v461_v25  ;;  %v406_v5 = vpop.f32.mrf.mxu0 }
  0xda   : > { %857 = vrot.lane.b32.xlu0 %v1309_v47, %s1454_s4  ;;  %v737_v6 = vadd.f32 1.0, %v1315_v61  ;;  %1324 = vpow2.f32 %v703_v57  ;;  %v426_v22 = vpop.f32.mrf.mxu1 }
  0xdb   : > { %1326 = vrcp.f32 %v728_v62  ;;  %v1665_v37 = vadd.f32 %v1543_v24, %v426_v22  ;;  %v651_v49 = vsub.f32 0.0, %v1668_v43  ;;  %v464_v61 = vpop.f32.mrf.mxu3  ;;  %v658_v2 = vsub.f32 0.0, %v1675_v54 }
  0xdc   : > { %841 = vrot.lane.b32.xlu1 %v1311_v51, %s1454_s4  ;;  %v1317_v8 = vpop.eup %1316  ;;  %1328 = vpow2.f32 %v717_v0 }
  0xdd   : > { %v1319_v11 = vpop.eup %1318  ;;  %1330 = vrcp.f32 %v745_v4  ;;  %v644_v47 = vsub.f32 0.0, %v1665_v37  ;;  %v705_v62 = vmul.f32 1.442695, %v651_v49 }
  0xde   : > { %v1321_v17 = vpop.eup %1320  ;;  %1332 = vrcp.f32 %v737_v6  ;;  %v744_v23 = vadd.f32 1.0, %v1319_v11  ;;  %v1680_v6 = vadd.f32 %v1543_v24, %v464_v61 }
  0xdf   : > { %v1323_v21 = vpop.eup %1322  ;;  %1334 = vpow2.f32 %v689_v14  ;;  %v691_v58 = vmul.f32 1.442695, %v644_v47 }
  0xe0   : > { %v446_v20 = vpop.f32.mrf.mxu2  ;;  %v1325_v29 = vpop.eup %1324  ;;  %v730_v34 = vadd.f32 1.0, %v1323_v21  ;;  %1336 = vpow2.f32 %v673_v19  ;;  %v659_v14 = vsub.f32 0.0, %v1680_v6 }
  0xe1   : > { %829 = vrot.lane.b32.xlu2 %v1317_v8, %s1454_s4  ;;  %v1660_v12 = vadd.f32 %v1543_v24, %v446_v20  ;;  %v1327_v33 = vpop.eup %1326  ;;  %1338 = vrcp.f32 %v744_v23  ;;  %v746_v46 = vadd.f32 1.0, %v1325_v29  ;;  %v719_v20 = vmul.f32 1.442695, %v658_v2 }
  0xe2   : > { %875 = vrot.lane.b32.xlu0 %v1321_v17, %s1454_s4  ;;  %v1329_v38 = vpop.eup %1328  ;;  %1340 = vpow2.f32 %v687_v30  ;;  %v1685_v17 = vadd.f32 %v1543_v24, %v406_v5  ;;  %v721_v29 = vmul.f32 1.442695, %v659_v14 }
  0xe3   : > { %v652_v31 = vsub.f32 0.0, %v1660_v12  ;;  %v1331_v45 = vpop.eup %1330  ;;  %v753_v51 = vadd.f32 1.0, %v1329_v38  ;;  %1342 = vrcp.f32 %v730_v34 }
  0xe4   : > { %827 = vrot.lane.b32.xlu1 %v1327_v33, %s1454_s4  ;;  %v1333_v48 = vpop.eup %1332  ;;  %1344 = vrcp.f32 %v746_v46  ;;  %v636_v23 = vsub.f32 0.0, %v1685_v17  ;;  %v466_v33 = vpop.f32.mrf.mxu3 }
  0xe5   : > { %v707_v50 = vmul.f32 1.442695, %v652_v31  ;;  %v1335_v55 = vpop.eup %1334 }
  0xe6   : > { %v1337_v57 = vpop.eup %1336  ;;  %v739_v4 = vadd.f32 1.0, %v1335_v55  ;;  %v675_v38 = vmul.f32 1.442695, %v636_v23  ;;  %v535_v23 = vmul.f32 1.442695, %v1566_v52 }
  0xe7   : > { %1346 = vpow2.f32 %v707_v50  ;;  %v1339_v0 = vpop.eup %1338  ;;  %v731_v11 = vadd.f32 1.0, %v1337_v57 }
  0xe8   : > { %1348 = vrcp.f32 %v753_v51  ;;  %v1341_v8 = vpop.eup %1340 }
  0xe9   : > { %861 = vrot.lane.b32.xlu2 %v1331_v45, %s1454_s4  ;;  %v1343_v13 = vpop.eup %1342  ;;  %1350 = vpow2.f32 %v691_v58  ;;  %v738_v22 = vadd.f32 1.0, %v1341_v8 }
  0xea   : > { %845 = vrot.lane.b32.xlu0 %v1333_v48, %s1454_s4  ;;  %1352 = vpow2.f32 %v705_v62  ;;  %v1345_v19 = vpop.eup %1344  ;;  %v1692_v48 = vadd.f32 %v1543_v24, %v466_v33 }
  0xeb   : > { %1354 = vrcp.f32 %v739_v4  ;;  %v517_v4 = vmul.f32 1.442695, %v1549_v28 }
  0xec   : > { %859 = vrot.lane.b32.xlu1 %v1339_v0, %s1454_s4  ;;  %1356 = vrcp.f32 %v731_v11  ;;  %v660_v50 = vsub.f32 0.0, %v1692_v48 }
  0xed   : > { %v1347_v21 = vpop.eup %1346  ;;  %1358 = vpow2.f32 %v719_v20 }
  0xee   : > { %v1349_v25 = vpop.eup %1348  ;;  %v748_v31 = vadd.f32 1.0, %v1347_v21  ;;  %1360 = vrcp.f32 %v738_v22  ;;  %v723_v58 = vmul.f32 1.442695, %v660_v50  ;;  %v523_v50 = vmul.f32 1.442695, %v1593_v16 }
  0xef   : > { %v1351_v30 = vpop.eup %1350  ;;  %1362 = vpow2.f32 %v721_v29 }
  0xf0   : > { %v1353_v34 = vpop.eup %1352  ;;  %v740_v47 = vadd.f32 1.0, %v1351_v30  ;;  %1364 = vrcp.f32 %v748_v31 }
  0xf1   : > { %831 = vrot.lane.b32.xlu2 %v1343_v13, %s1454_s4  ;;  %v1355_v45 = vpop.eup %1354  ;;  %v747_v49 = vadd.f32 1.0, %v1353_v34  ;;  %1366 = vpow2.f32 %v675_v38  ;;  %v501_v38 = vmul.f32 1.442695, %v1546_v27 }
  0xf2   : > { %863 = vrot.lane.b32.xlu0 %v1345_v19, %s1454_s4  ;;  %v1357_v46 = vpop.eup %1356  ;;  %1368 = vrcp.f32 %v740_v47 }
  0xf3   : > { %v1359_v51 = vpop.eup %1358  ;;  %1370 = vrcp.f32 %v747_v49 }
  0xf4   : > { %877 = vrot.lane.b32.xlu1 %v1349_v25, %s1454_s4  ;;  %v1361_v55 = vpop.eup %1360  ;;  %v754_v24 = vadd.f32 1.0, %v1359_v51  ;;  %1372 = vpow2.f32 %v723_v58  ;;  %v549_v51 = vmul.f32 1.442695, %v1557_v36 }
  0xf5   : > { %v1363_v57 = vpop.eup %1362 }
  0xf6   : > { %v1365_v61 = vpop.eup %1364  ;;  %v755_v0 = vadd.f32 1.0, %v1363_v57  ;;  %1374 = vrcp.f32 %v754_v24 }
  0xf7   : > { %v1367_v62 = vpop.eup %1366 }
  0xf8   : > { %v1369_v2 = vpop.eup %1368  ;;  %v732_v8 = vadd.f32 1.0, %v1367_v62  ;;  %1376 = vrcp.f32 %v755_v0 }
  0xf9   : > { %849 = vrot.lane.b32.xlu2 %v1355_v45, %s1454_s4  ;;  %v1371_v5 = vpop.eup %1370  ;;  %1378 = vpow2.f32 %v517_v4  ;;  %v503_v4 = vmul.f32 1.442695, %v1560_v39 }
  0xfa   : > { %833 = vrot.lane.b32.xlu0 %v1357_v46, %s1454_s4  ;;  %1380 = vrcp.f32 %v732_v8  ;;  %v1373_v11 = vpop.eup %1372 }
  0xfb   : > { %v756_v19 = vadd.f32 1.0, %v1373_v11 }
  0xfc   : > { %847 = vrot.lane.b32.xlu1 %v1361_v55, %s1454_s4  ;;  %v1375_v13 = vpop.eup %1374 }
  0xfd   : > { %1382 = vrcp.f32 %v756_v19 }
  0xfe   : > { %v1377_v14 = vpop.eup %1376  ;;  %1384 = vpow2.f32 %v535_v23 }
  0xff   : > { %v1379_v20 = vpop.eup %1378 }
 0x100   : > { %v1381_v21 = vpop.eup %1380  ;;  %v1183_v22 = vadd.f32 -1.0, %v1379_v20 }
 0x101   : > { %867 = vrot.lane.b32.xlu2 %v1365_v61, %s1454_s4  ;;  %v533_v61 = vmul.f32 1.442695, %v1554_v35 }
 0x102   : > { %851 = vrot.lane.b32.xlu0 %v1369_v2, %s1454_s4  ;;  %v605_v29 = vsel %vm477_vm2, %v1549_v28, %v1183_v22  ;;  %v553_v28 = vmul.f32 1.442695, %v1585_v10  ;;  %vm479_vm2 = vcmp.gt.f32.partialorder %v1589_v15, 0.0 }
 0x103   : > { %v1383_v30 = vpop.eup %1382 }
 0x104   : > { %865 = vrot.lane.b32.xlu1 %v1371_v5, %s1454_s4  ;;  %v1385_v34 = vpop.eup %1384  ;;  %1386 = vpow2.f32 %v553_v28 }
 0x105   : > { %v1192_v45 = vadd.f32 -1.0, %v1385_v34  ;;  %1388 = vpow2.f32 %v501_v38 }
 0x106   : > { %1390 = vpow2.f32 %v523_v50 }
 0x107   : > { %v614_v46 = vsel %vm486_vm4, %v1566_v52, %v1192_v45  ;;  %1392 = vpow2.f32 %v549_v51  ;;  %v509_v52 = vmul.f32 1.442695, %v1604_v42  ;;  %vm483_vm4 = vcmp.gt.f32.partialorder %v1644_v60, 0.0 }
 0x108   : > { %1394 = vpow2.f32 %v533_v61 }
 0x109   : > { %879 = vrot.lane.b32.xlu2 %v1375_v13, %s1454_s4  ;;  %1396 = vpow2.f32 %v509_v52 }
 0x10a   : > { %881 = vrot.lane.b32.xlu0 %v1377_v14, %s1454_s4  ;;  %v1387_v55 = vpop.eup %1386  ;;  %1398 = vpow2.f32 %v503_v4 }
 0x10b   : > { %v1389_v58 = vpop.eup %1388  ;;  %v1201_v24 = vadd.f32 -1.0, %v1387_v55 }
 0x10c   : > { %835 = vrot.lane.b32.xlu1 %v1381_v21, %s1454_s4  ;;  %v1175_v62 = vadd.f32 -1.0, %v1389_v58  ;;  %v1391_v5 = vpop.eup %1390  ;;  %v551_v21 = vmul.f32 1.442695, %v1569_v53 }
 0x10d   : > { %v623_v0 = vsel %vm495_vm5, %v1585_v10, %v1201_v24  ;;  %v1393_v14 = vpop.eup %1392  ;;  %v1186_v10 = vadd.f32 -1.0, %v1391_v5  ;;  %vm496_vm5 = vcmp.gt.f32.partialorder %v1600_v41, 0.0 }
 0x10e   : > { %v597_v13 = vsel %vm469_vm6, %v1546_v27, %v1175_v62  ;;  %v1395_v23 = vpop.eup %1394  ;;  %1400 = vpow2.f32 %v551_v21  ;;  %v541_v27 = vmul.f32 1.442695, %v1615_v1  ;;  %v511_v62 = vmul.f32 1.442695, %v1629_v26 }
 0x10f   : > { %v1397_v34 = vpop.eup %1396  ;;  %vm472_vm6 = vcmp.gt.f32.partialorder %v1607_v44, 0.0 }
 0x110   : > { %1402 = vpow2.f32 %v541_v27 }
 0x112   : > { %v838_v25 = vpop.permute.xlu2 %837 }
 0x113   : > { %v925_v31 = vmul.f32 %v838_v25, %v605_v29  ;;  %v1199_v25 = vadd.f32 -1.0, %v1393_v14  ;;  %v1191_v29 = vadd.f32 -1.0, %v1395_v23 }
 0x114   : > { %883 = vrot.lane.b32.xlu1 %v1383_v30, %s1454_s4  ;;  %v608_v30 = vsel %vm480_vm7, %v1593_v16, %v1186_v10  ;;  %v505_v16 = vmul.f32 1.442695, %v1577_v59  ;;  %vm481_vm7 = vcmp.gt.f32.partialorder %v1618_v3, 0.0 }
 0x115   : > { %v957_v33 = vpack.c.bf16 %v925_v31, %v925_v31  ;;  %v621_v38 = vsel %vm493_vm8, %v1557_v36, %v1199_v25  ;;  %v613_v51 = vsel %vm485_vm9, %v1554_v35, %v1191_v29  ;;  %v529_v29 = vmul.f32 1.442695, %v1644_v60 }
 0x116   : > { %vm492_vm8 = vcmp.gt.f32.partialorder %v1660_v12, 0.0  ;;  %vm488_vm9 = vcmp.gt.f32.partialorder %v1625_v18, 0.0 }
 0x117   : > { %990 = vst.msk [vmem:[%s1714_s7 + $0x20] sm:$0xf] %vm981_vm3, %v957_v33  ;;  %v519_v33 = vmul.f32 1.442695, %v1572_v56 }
 0x119   : > { %1404 = vpow2.f32 %v519_v33  ;;  %v555_v33 = vmul.f32 1.442695, %v1600_v41 }
 0x11a   : > { %1406 = vpow2.f32 %v505_v16 }
 0x11b   : > { %1408 = vpow2.f32 %v511_v62 }
 0x121   : > { %v856_v47 = vpop.permute.xlu2 %855 }
 0x122   : > { %v934_v49 = vmul.f32 %v856_v47, %v614_v46  ;;  %v1399_v46 = vpop.eup %1398 }
 0x123   : > { %v1401_v58 = vpop.eup %1400  ;;  %v1176_v36 = vadd.f32 -1.0, %v1399_v46 }
 0x124   : > { %v966_v57 = vpack.c.bf16 %v934_v49, %v934_v49  ;;  %v1200_v52 = vadd.f32 -1.0, %v1401_v58  ;;  %v1403_v4 = vpop.eup %1402 }
 0x125   : > { %v1195_v10 = vadd.f32 -1.0, %v1403_v4 }
 0x126   : > { %999 = vst.msk [vmem:[%s1714_s7 + $0x44] sm:$0xf] %vm981_vm3, %v966_v57  ;;  %v1179_v57 = vadd.f32 -1.0, %v1397_v34 }
 0x128   : > { %v601_v35 = vsel %vm473_vm10, %v1604_v42, %v1179_v57  ;;  %v521_v42 = vmul.f32 1.442695, %v1589_v15  ;;  %vm498_vm10 = vcmp.gt.f32.partialorder %v1675_v54, 0.0 }
 0x12b   : > { %v874_v2 = vpop.permute.xlu2 %873 }
 0x12c   : > { %v943_v8 = vmul.f32 %v874_v2, %v623_v0  ;;  %v822_v11 = vpop.permute.xlu0 %821  ;;  %v537_v2 = vmul.f32 1.442695, %v1582_v9 }
 0x12d   : > { %v917_v19 = vmul.f32 %v822_v11, %v597_v13  ;;  %v1405_v13 = vpop.eup %1404 }
 0x12e   : > { %v975_v20 = vpack.c.bf16 %v943_v8, %v943_v8  ;;  %v598_v8 = vsel %vm470_vm11, %v1560_v39, %v1176_v36  ;;  %1410 = vpow2.f32 %v537_v2  ;;  %v1407_v23 = vpop.eup %1406  ;;  %v1184_v39 = vadd.f32 -1.0, %v1405_v13 }
 0x12f   : > { %v949_v22 = vpack.c.bf16 %v917_v19, %v917_v19  ;;  %1412 = vpow2.f32 %v521_v42  ;;  %v1409_v34 = vpop.eup %1408  ;;  %v547_v36 = vmul.f32 1.442695, %v1660_v12  ;;  %vm490_vm11 = vcmp.gt.f32.partialorder %v1635_v32, 0.0 }
 0x130   : > { %1008 = vst.msk [vmem:[%s1714_s7 + $0x68] sm:$0xf] %vm981_vm3, %v975_v20  ;;  %v622_v20 = vsel %vm494_vm12, %v1569_v53, %v1200_v52  ;;  %v617_v53 = vsel %vm489_vm13, %v1615_v1, %v1195_v10  ;;  %1414 = vpow2.f32 %v529_v29  ;;  %v507_v1 = vmul.f32 1.442695, %v1607_v44 }
 0x131   : > { %982 = vst.msk [vmem:[%s1714_s7] sm:$0xf] %vm981_vm3, %v949_v22  ;;  %1416 = vpow2.f32 %v555_v33  ;;  %v525_v52 = vmul.f32 1.442695, %v1618_v3  ;;  %v559_v10 = vmul.f32 1.442695, %v1675_v54 }
 0x132   : > { %1418 = vpow2.f32 %v507_v1  ;;  %vm497_vm12 = vcmp.gt.f32.partialorder %v1638_v40, 0.0  ;;  %vm475_vm13 = vcmp.gt.f32.partialorder %v1648_v63, 0.0 }
 0x133   : > { %v844_v31 = vpop.permute.xlu2 %843  ;;  %1420 = vpow2.f32 %v547_v36 }
 0x134   : > { %v928_v28 = vmul.f32 %v844_v31, %v608_v30  ;;  %v870_v45 = vpop.permute.xlu0 %869  ;;  %v1177_v31 = vadd.f32 -1.0, %v1407_v23  ;;  %v1411_v46 = vpop.eup %1410  ;;  %1422 = vpow2.f32 %v525_v52 }
 0x135   : > { %v941_v47 = vmul.f32 %v870_v45, %v621_v38  ;;  %v606_v38 = vsel %vm478_vm14, %v1572_v56, %v1184_v39  ;;  %v1413_v57 = vpop.eup %1412  ;;  %v1193_v58 = vadd.f32 -1.0, %v1411_v46  ;;  %v543_v39 = vmul.f32 1.442695, %v1635_v32 }
 0x136   : > { %v960_v49 = vpack.c.bf16 %v928_v28, %v928_v28  ;;  %v854_v50 = vpop.permute.xlu1 %853  ;;  %v1185_v62 = vadd.f32 -1.0, %v1413_v57  ;;  %vm482_vm14 = vcmp.gt.f32.partialorder %v1654_v7, 0.0 }
 0x137   : > { %v973_v55 = vpack.c.bf16 %v941_v47, %v941_v47  ;;  %v933_v61 = vmul.f32 %v854_v50, %v613_v51  ;;  %v599_v50 = vsel %vm471_vm15, %v1577_v59, %v1177_v31  ;;  %v615_v2 = vsel %vm487_vm1, %v1582_v9, %v1193_v58 }
 0x138   : > { %993 = vst.msk [vmem:[%s1714_s7 + $0x2c] sm:$0xf] %vm981_vm3, %v960_v49  ;;  %v607_v13 = vsel %vm479_vm2, %v1589_v15, %v1185_v62  ;;  %vm484_vm15 = vcmp.gt.f32.partialorder %v1665_v37, 0.0  ;;  %vm499_vm1 = vcmp.gt.f32.partialorder %v1680_v6, 0.0  ;;  %vm476_vm2 = vcmp.gt.f32.partialorder %v1685_v17, 0.0 }
 0x139   : > { %1006 = vst.msk [vmem:[%s1714_s7 + $0x60] sm:$0xf] %vm981_vm3, %v973_v55  ;;  %v965_v24 = vpack.c.bf16 %v933_v61, %v933_v61  ;;  %v1180_v55 = vadd.f32 -1.0, %v1409_v34 }
 0x13b   : > { %v830_v0 = vpop.permute.xlu2 %829  ;;  %998 = vst.msk [vmem:[%s1714_s7 + $0x40] sm:$0xf] %vm981_vm3, %v965_v24  ;;  %v602_v59 = vsel %vm474_vm0, %v1629_v26, %v1180_v55  ;;  %v539_v26 = vmul.f32 1.442695, %v1625_v18  ;;  %vm491_vm0 = vcmp.gt.f32.partialorder %v1668_v43, 0.0 }
 0x13c   : > { %v921_v5 = vmul.f32 %v830_v0, %v601_v35  ;;  %v824_v11 = vpop.permute.xlu0 %823  ;;  %v1415_v0 = vpop.eup %1414 }
 0x13d   : > { %v918_v14 = vmul.f32 %v824_v11, %v598_v8  ;;  %v1189_v42 = vadd.f32 -1.0, %v1415_v0  ;;  %1424 = vpow2.f32 %v539_v26 }
 0x13e   : > { %v953_v19 = vpack.c.bf16 %v921_v5, %v921_v5  ;;  %v872_v21 = vpop.permute.xlu1 %871  ;;  %v1417_v5 = vpop.eup %1416  ;;  %1426 = vpow2.f32 %v559_v10 }
 0x13f   : > { %v950_v22 = vpack.c.bf16 %v918_v14, %v918_v14  ;;  %v942_v25 = vmul.f32 %v872_v21, %v622_v20  ;;  %v1419_v20 = vpop.eup %1418  ;;  %v1202_v9 = vadd.f32 -1.0, %v1417_v5  ;;  %v611_v15 = vsel %vm483_vm4, %v1644_v60, %v1189_v42 }
 0x140   : > { %986 = vst.msk [vmem:[%s1714_s7 + $0x10] sm:$0xf] %vm981_vm3, %v953_v19  ;;  %v557_v60 = vmul.f32 1.442695, %v1638_v40  ;;  %1428 = vpow2.f32 %v543_v39  ;;  %v561_v39 = vmul.f32 1.442695, %v1680_v6 }
 0x141   : > { %983 = vst.msk [vmem:[%s1714_s7 + $0x4] sm:$0xf] %vm981_vm3, %v950_v22  ;;  %v974_v27 = vpack.c.bf16 %v942_v25, %v942_v25  ;;  %v1178_v25 = vadd.f32 -1.0, %v1419_v20  ;;  %vm500_vm4 = vcmp.gt.f32.partialorder %v1692_v48, 0.0 }
 0x142   : > { %1430 = vpow2.f32 %v557_v60 }
 0x143   : > { %v862_v30 = vpop.permute.xlu2 %861  ;;  %1007 = vst.msk [vmem:[%s1714_s7 + $0x64] sm:$0xf] %vm981_vm3, %v974_v27  ;;  %v1421_v27 = vpop.eup %1420 }
 0x144   : > { %v937_v28 = vmul.f32 %v862_v30, %v617_v53  ;;  %v840_v45 = vpop.permute.xlu0 %839  ;;  %v624_v53 = vsel %vm496_vm5, %v1600_v41, %v1202_v9  ;;  %v1423_v31 = vpop.eup %1422  ;;  %v1198_v46 = vadd.f32 -1.0, %v1421_v27 }
 0x145   : > { %v926_v47 = vmul.f32 %v840_v45, %v606_v38 }
 0x146   : > { %v969_v49 = vpack.c.bf16 %v937_v28, %v937_v28  ;;  %v826_v16 = vpop.permute.xlu1 %825  ;;  %v600_v28 = vsel %vm472_vm6, %v1607_v44, %v1178_v25  ;;  %v620_v44 = vsel %vm492_vm8, %v1660_v12, %v1198_v46  ;;  %v527_v12 = vmul.f32 1.442695, %v1654_v7 }
 0x147   : > { %v958_v51 = vpack.c.bf16 %v926_v47, %v926_v47  ;;  %v919_v56 = vmul.f32 %v826_v16, %v599_v50  ;;  %v1425_v47 = vpop.eup %1424 }
 0x148   : > { %1002 = vst.msk [vmem:[%s1714_s7 + $0x50] sm:$0xf] %vm981_vm3, %v969_v49  ;;  %v1187_v49 = vadd.f32 -1.0, %v1423_v31  ;;  %v1194_v50 = vadd.f32 -1.0, %v1425_v47  ;;  %v1427_v55 = vpop.eup %1426 }
 0x149   : > { %991 = vst.msk [vmem:[%s1714_s7 + $0x24] sm:$0xf] %vm981_vm3, %v958_v51  ;;  %v951_v61 = vpack.c.bf16 %v919_v56, %v919_v56  ;;  %v513_v51 = vmul.f32 1.442695, %v1648_v63  ;;  %v1204_v0 = vadd.f32 -1.0, %v1427_v55 }
 0x14a   : > { %v609_v56 = vsel %vm481_vm7, %v1618_v3, %v1187_v49  ;;  %v563_v49 = vmul.f32 1.442695, %v1692_v48 }
 0x14b   : > { %v832_v24 = vpop.permute.xlu2 %831  ;;  %984 = vst.msk [vmem:[%s1714_s7 + $0x8] sm:$0xf] %vm981_vm3, %v951_v61  ;;  %v1429_v61 = vpop.eup %1428  ;;  %1432 = vpow2.f32 %v513_v51  ;;  %v626_v5 = vsel %vm498_vm10, %v1675_v54, %v1204_v0  ;;  %v545_v54 = vmul.f32 1.442695, %v1668_v43 }
 0x14c   : > { %v922_v35 = vmul.f32 %v832_v24, %v602_v59  ;;  %v858_v4 = vpop.permute.xlu0 %857  ;;  %v616_v24 = vsel %vm488_vm9, %v1625_v18, %v1194_v50  ;;  %1434 = vpow2.f32 %v527_v12 }
 0x14d   : > { %v935_v8 = vmul.f32 %v858_v4, %v615_v2  ;;  %v1196_v2 = vadd.f32 -1.0, %v1429_v61 }
 0x14e   : > { %v954_v11 = vpack.c.bf16 %v922_v35, %v922_v35  ;;  %v842_v14 = vpop.permute.xlu1 %841  ;;  %v1431_v35 = vpop.eup %1430 }
 0x14f   : > { %v967_v19 = vpack.c.bf16 %v935_v8, %v935_v8  ;;  %v927_v21 = vmul.f32 %v842_v14, %v607_v13  ;;  %v1203_v18 = vadd.f32 -1.0, %v1431_v35  ;;  %v618_v13 = vsel %vm490_vm11, %v1635_v32, %v1196_v2 }
 0x150   : > { %987 = vst.msk [vmem:[%s1714_s7 + $0x14] sm:$0xf] %vm981_vm3, %v954_v11  ;;  %v531_v11 = vmul.f32 1.442695, %v1665_v37 }
 0x151   : > { %1000 = vst.msk [vmem:[%s1714_s7 + $0x48] sm:$0xf] %vm981_vm3, %v967_v19  ;;  %v959_v22 = vpack.c.bf16 %v927_v21, %v927_v21  ;;  %v1433_v19 = vpop.eup %1432  ;;  %v625_v21 = vsel %vm497_vm12, %v1638_v40, %v1203_v18 }
 0x152   : > { %1436 = vpow2.f32 %v531_v11  ;;  %v1435_v10 = vpop.eup %1434 }
 0x153   : > { %v850_v23 = vpop.permute.xlu2 %849  ;;  %992 = vst.msk [vmem:[%s1714_s7 + $0x28] sm:$0xf] %vm981_vm3, %v959_v22  ;;  %1438 = vpow2.f32 %v545_v54  ;;  %v1188_v25 = vadd.f32 -1.0, %v1435_v10 }
 0x154   : > { %v931_v29 = vmul.f32 %v850_v23, %v611_v15  ;;  %v876_v30 = vpop.permute.xlu0 %875  ;;  %v1181_v23 = vadd.f32 -1.0, %v1433_v19  ;;  %1440 = vpow2.f32 %v561_v39 }
 0x155   : > { %v944_v33 = vmul.f32 %v876_v30, %v624_v53  ;;  %v515_v30 = vmul.f32 1.442695, %v1685_v17  ;;  %v610_v31 = vsel %vm482_vm14, %v1654_v7, %v1188_v25 }
 0x156   : > { %v963_v34 = vpack.c.bf16 %v931_v29, %v931_v29  ;;  %v828_v38 = vpop.permute.xlu1 %827  ;;  %v603_v40 = vsel %vm475_vm13, %v1648_v63, %v1181_v23 }
 0x157   : > { %v976_v45 = vpack.c.bf16 %v944_v33, %v944_v33  ;;  %v920_v41 = vmul.f32 %v828_v38, %v600_v28  ;;  %1442 = vpow2.f32 %v515_v30 }
 0x158   : > { %996 = vst.msk [vmem:[%s1714_s7 + $0x38] sm:$0xf] %vm981_vm3, %v963_v34  ;;  %v1437_v29 = vpop.eup %1436  ;;  %1444 = vpow2.f32 %v563_v49 }
 0x159   : > { %1009 = vst.msk [vmem:[%s1714_s7 + $0x6c] sm:$0xf] %vm981_vm3, %v976_v45  ;;  %v952_v1 = vpack.c.bf16 %v920_v41, %v920_v41  ;;  %v1439_v60 = vpop.eup %1438  ;;  %v1190_v38 = vadd.f32 -1.0, %v1437_v29 }
 0x15a   : > { %v1197_v63 = vadd.f32 -1.0, %v1439_v60  ;;  %v1441_v47 = vpop.eup %1440 }
 0x15b   : > { %v868_v16 = vpop.permute.xlu2 %867  ;;  %985 = vst.msk [vmem:[%s1714_s7 + $0xc] sm:$0xf] %vm981_vm3, %v952_v1  ;;  %v612_v7 = vsel %vm484_vm15, %v1665_v37, %v1190_v38  ;;  %v1205_v55 = vadd.f32 -1.0, %v1441_v47 }
 0x15c   : > { %v940_v57 = vmul.f32 %v868_v16, %v620_v44  ;;  %v846_v58 = vpop.permute.xlu0 %845  ;;  %v619_v1 = vsel %vm491_vm0, %v1668_v43, %v1197_v63 }
 0x15d   : > { %v929_v36 = vmul.f32 %v846_v58, %v609_v56  ;;  %v1443_v50 = vpop.eup %1442  ;;  %v627_v43 = vsel %vm499_vm1, %v1680_v6, %v1205_v55 }
 0x15e   : > { %v972_v59 = vpack.c.bf16 %v940_v57, %v940_v57  ;;  %v860_v62 = vpop.permute.xlu1 %859  ;;  %v1182_v37 = vadd.f32 -1.0, %v1443_v50  ;;  %v1445_v12 = vpop.eup %1444 }
 0x15f   : > { %v961_v52 = vpack.c.bf16 %v929_v36, %v929_v36  ;;  %v936_v3 = vmul.f32 %v860_v62, %v616_v24 }
 0x160   : > { %1005 = vst.msk [vmem:[%s1714_s7 + $0x5c] sm:$0xf] %vm981_vm3, %v972_v59  ;;  %v604_v61 = vsel %vm476_vm2, %v1685_v17, %v1182_v37 }
 0x161   : > { %994 = vst.msk [vmem:[%s1714_s7 + $0x30] sm:$0xf] %vm981_vm3, %v961_v52  ;;  %v968_v4 = vpack.c.bf16 %v936_v3, %v936_v3  ;;  %v1206_v52 = vadd.f32 -1.0, %v1445_v12 }
 0x163   : > { %v880_v8 = vpop.permute.xlu2 %879  ;;  %1001 = vst.msk [vmem:[%s1714_s7 + $0x4c] sm:$0xf] %vm981_vm3, %v968_v4  ;;  %v628_v0 = vsel %vm500_vm4, %v1692_v48, %v1206_v52 }
 0x164   : > { %v946_v26 = vmul.f32 %v880_v8, %v626_v5  ;;  %v864_v14 = vpop.permute.xlu0 %863 }
 0x165   : > { %v938_v42 = vmul.f32 %v864_v14, %v618_v13 }
 0x166   : > { %v978_v20 = vpack.c.bf16 %v946_v26, %v946_v26  ;;  %v878_v9 = vpop.permute.xlu1 %877 }
 0x167   : > { %v970_v22 = vpack.c.bf16 %v938_v42, %v938_v42  ;;  %v945_v15 = vmul.f32 %v878_v9, %v625_v21 }
 0x168   : > { %1011 = vst.msk [vmem:[%s1714_s7 + $0x74] sm:$0xf] %vm981_vm3, %v978_v20 }
 0x169   : > { %1003 = vst.msk [vmem:[%s1714_s7 + $0x54] sm:$0xf] %vm981_vm3, %v970_v22  ;;  %v977_v32 = vpack.c.bf16 %v945_v15, %v945_v15 }
 0x16b   : > { %1010 = vst.msk [vmem:[%s1714_s7 + $0x70] sm:$0xf] %vm981_vm3, %v977_v32 }
 0x16c   : > { %v834_v27 = vpop.permute.xlu0 %833 }
 0x16d   : > { %v923_v53 = vmul.f32 %v834_v27, %v603_v40 }
 0x16e   : > { %v848_v33 = vpop.permute.xlu1 %847 }
 0x16f   : > { %v955_v34 = vpack.c.bf16 %v923_v53, %v923_v53  ;;  %v930_v28 = vmul.f32 %v848_v33, %v610_v31 }
 0x171   : > { %988 = vst.msk [vmem:[%s1714_s7 + $0x18] sm:$0xf] %vm981_vm3, %v955_v34  ;;  %v962_v45 = vpack.c.bf16 %v930_v28, %v930_v28 }
 0x173   : > { %995 = vst.msk [vmem:[%s1714_s7 + $0x34] sm:$0xf] %vm981_vm3, %v962_v45 }
 0x174   : > { %v852_v46 = vpop.permute.xlu0 %851 }
 0x175   : > { %v932_v41 = vmul.f32 %v852_v46, %v612_v7 }
 0x176   : > { %v866_v44 = vpop.permute.xlu1 %865 }
 0x177   : > { %v964_v16 = vpack.c.bf16 %v932_v41, %v932_v41  ;;  %v939_v51 = vmul.f32 %v866_v44, %v619_v1 }
 0x179   : > { %997 = vst.msk [vmem:[%s1714_s7 + $0x3c] sm:$0xf] %vm981_vm3, %v964_v16  ;;  %v971_v57 = vpack.c.bf16 %v939_v51, %v939_v51 }
 0x17b   : > { %1004 = vst.msk [vmem:[%s1714_s7 + $0x58] sm:$0xf] %vm981_vm3, %v971_v57 }
 0x17c   : > { %v882_v56 = vpop.permute.xlu0 %881 }
 0x17d   : > { %v947_v58 = vmul.f32 %v882_v56, %v627_v43 }
 0x17e   : > { %v836_v36 = vpop.permute.xlu1 %835 }
 0x17f   : > { %v979_v59 = vpack.c.bf16 %v947_v58, %v947_v58  ;;  %v924_v24 = vmul.f32 %v836_v36, %v604_v61 }
 0x181   : > { %1012 = vst.msk [vmem:[%s1714_s7 + $0x78] sm:$0xf] %vm981_vm3, %v979_v59  ;;  %v956_v62 = vpack.c.bf16 %v924_v24, %v924_v24 }
 0x183   : > { %989 = vst.msk [vmem:[%s1714_s7 + $0x1c] sm:$0xf] %vm981_vm3, %v956_v62 }
 0x186   : > { %v884_v6 = vpop.permute.xlu1 %883 }
 0x187   : > { %v948_v35 = vmul.f32 %v884_v6, %v628_v0 }
 0x189   : > { %v980_v3 = vpack.c.bf16 %v948_v35, %v948_v35 }
 0x18b   : > { %1013 = vst.msk [vmem:[%s1714_s7 + $0x7c] sm:$0xf] %vm981_vm3, %v980_v3 }
 0x18c PF: > { %s13_s12 = sadd.s32 1, %s1452_s12  }
 0x18d   : > { %p10_p4 = scmp.ge.s32.totalorder %s13_s12, 4  }
 0x18f   :  { %12 = sbr.rel (!%p10_p4) target bundleno = 1 (0x1), region = 62 }

// kernel: generator_forward.59
= control target key start
LH: loop header
LB: loop body
LE: loop exit
PB: predicated region body
PF: predicated region fallthrough
CT: control target
= control target key end

     0   :  { %s801_s12 = smov 0   ;;  %s968_s0 = inlined_call_operand.vmem [shape: bf16[512,36], index: 0, kind: input, shape index: {}]   ;;  %s969_s1 = inlined_call_operand.vmem [shape: bf16[36,3], index: 1, kind: input, shape index: {}]   ;;  %s970_s2 = inlined_call_operand.vmem [shape: f32[1,3], index: 2, kind: input, shape index: {}]   ;;  %s971_s3 = inlined_call_operand.vmem [shape: f32[512,3], index: 3, kind: output, shape index: {}]  }
   0x1 LB: > { %s574_s13 = sadd.s32 4294967295, %s779_s12   ;;  %p578_p0 = scmp.ge.s32.totalorder %s779_s12, 1  ;;  %s779_s12 = sphi %s801_s12, %s13_s12  }
   0x2   : > { %p138_p1 = scmp.lt.s32.totalorder %s779_s12, 3 }
   0x4   : > { %p139_p2 = pnand %p578_p0, %p138_p1 }
   0x5   : > { %s579_s16 = sshll.u32 (!%p139_p2), %s574_s13, 5 }
   0x6   : > { %142 = sbr.rel (%p139_p2) target bundleno = 228 (0xe4), region = 32  ;;  %p163_p3 = scmp.lt.s32.totalorder (!%p139_p2), %s579_s16, 63 }
   0xb   : > { %v211_v0 = vld [vmem:[%s969_s1 + $0x10] sm:$0x3]  ;;  %vm360_vm0 = vcmask 1041408   ;;  %s973_s16 = smov (!%p163_p3, %s579_s16), 63  ;;  %v690_v4 = vld [vmem:[%s969_s1 + $0x8] sm:$0xff]  ;;  %v689_v5 = vld [vmem:[%s969_s1] sm:$0xff] }
   0xc   : > { %v305_v1 = vunpack.c.l.b16 %v211_v0  ;;  %s580_s19 = sshll.u32 %s973_s16, 2  ;;  %vm311_vm1 = vcmask 293888   ;;  %v861_v22 = vld [vmem:[%s970_s2] ss:$0 sm:$0xff]  ;;  %s582_s27 = sshll.u32 %s973_s16, 3  ;;  %vm485_vm2 = vcmask 23552  }
   0xd   : > { %s824_s24 = scalar_lea.vmem %s968_s0, %s580_s19  ;;  %s869_s30 = scalar_lea.vmem %s971_s3, %s582_s27 }
   0xe   : > { %v308_v2 = vpack.c.b16 %v305_v1, %v305_v1  ;;  %v673_v6 = vld [vmem:[%s824_s24] sm:$0xff]  ;;  %v674_v10 = vld [vmem:[%s824_s24 + $0x8] sm:$0xff]  ;;  %v675_v14 = vld [vmem:[%s824_s24 + $0x10] sm:$0xff] }
   0xf   : > { %v677_v7 = vld [vmem:[%s824_s24 + $0x20] sm:$0xff]  ;;  %v678_v11 = vld [vmem:[%s824_s24 + $0x28] sm:$0xff]  ;;  %v679_v15 = vld [vmem:[%s824_s24 + $0x30] sm:$0xff] }
  0x10   : > { %v362_v3 = vsel %vm360_vm0, %v308_v2, 0  ;;  %v681_v8 = vld [vmem:[%s824_s24 + $0x40] sm:$0xff]  ;;  %v682_v12 = vld [vmem:[%s824_s24 + $0x48] sm:$0xff]  ;;  %v683_v16 = vld [vmem:[%s824_s24 + $0x50] sm:$0xff] }
  0x11   : > { %369 = vmatpush.bf16.msra.mxu0 %v362_v3  ;;  %691 = vmatpush.bf16.msra.mxu1 %v362_v3  ;;  %v685_v9 = vld [vmem:[%s824_s24 + $0x60] sm:$0xff]  ;;  %v686_v13 = vld [vmem:[%s824_s24 + $0x68] sm:$0xff]  ;;  %v687_v17 = vld [vmem:[%s824_s24 + $0x70] sm:$0xff] }
  0x12   : > { %692 = vmatpush.bf16.msra.mxu2 %v362_v3  ;;  %693 = vmatpush.bf16.msra.mxu3 %v362_v3  ;;  %v676_v18 = vld [vmem:[%s824_s24 + $0x18] sm:$0xff] }
  0x13   : > { %v680_v19 = vld [vmem:[%s824_s24 + $0x38] sm:$0xff] }
  0x14   : > { %v684_v20 = vld [vmem:[%s824_s24 + $0x58] sm:$0xff] }
  0x15   : > { %370 = vmatpush.bf16.msra.mxu0 %v690_v4  ;;  %694 = vmatpush.bf16.msra.mxu1 %v690_v4  ;;  %v688_v21 = vld [vmem:[%s824_s24 + $0x78] sm:$0xff] }
  0x16   : > { %695 = vmatpush.bf16.msra.mxu2 %v690_v4  ;;  %696 = vmatpush.bf16.msra.mxu3 %v690_v4 }
  0x19   : > { %371 = vmatpush.bf16.msra.mxu0 %v689_v5  ;;  %697 = vmatpush.bf16.msra.mxu1 %v689_v5 }
  0x1a   : > { %698 = vmatpush.bf16.msra.mxu2 %v689_v5  ;;  %699 = vmatpush.bf16.msra.mxu3 %v689_v5 }
  0x1c   : > { %655 = vmatmul.msk.bf16.vlgmr.msra.gmra.mxu0 %vm311_vm1, %v673_v6  ;;  %659 = vmatmul.msk.bf16.vlgmr.msra.gmra.mxu1 %vm311_vm1, %v677_v7 }
  0x1d   : > { %663 = vmatmul.msk.bf16.vlgmr.msra.gmra.mxu2 %vm311_vm1, %v681_v8  ;;  %667 = vmatmul.msk.bf16.vlgmr.msra.gmra.mxu3 %vm311_vm1, %v685_v9 }
  0x2c   : > { %656 = vmatmul.msk.bf16.gmra.mxu0 %vm311_vm1, %v674_v10  ;;  %660 = vmatmul.msk.bf16.gmra.mxu1 %vm311_vm1, %v678_v11 }
  0x2d   : > { %664 = vmatmul.msk.bf16.gmra.mxu2 %vm311_vm1, %v682_v12  ;;  %668 = vmatmul.msk.bf16.gmra.mxu3 %vm311_vm1, %v686_v13 }
  0x3c   : > { %657 = vmatmul.msk.bf16.gmra.mxu0 %vm311_vm1, %v675_v14  ;;  %661 = vmatmul.msk.bf16.gmra.mxu1 %vm311_vm1, %v679_v15 }
  0x3d   : > { %665 = vmatmul.msk.bf16.gmra.mxu2 %vm311_vm1, %v683_v16  ;;  %669 = vmatmul.msk.bf16.gmra.mxu3 %vm311_vm1, %v687_v17 }
  0x4c   : > { %658 = vmatmul.msk.bf16.gmra.mxu0 %vm311_vm1, %v676_v18  ;;  %662 = vmatmul.msk.bf16.gmra.mxu1 %vm311_vm1, %v680_v19 }
  0x4d   : > { %666 = vmatmul.msk.bf16.gmra.mxu2 %vm311_vm1, %v684_v20  ;;  %670 = vmatmul.msk.bf16.gmra.mxu3 %vm311_vm1, %v688_v21 }
  0x99   : > { %v373_v23 = vpop.f32.mrf.mxu0  ;;  %v393_v24 = vpop.f32.mrf.mxu1 }
  0x9a   : > { %v374_v25 = vadd.f32 %v861_v22, %v373_v23  ;;  %v394_v26 = vadd.f32 %v861_v22, %v393_v24 }
  0x9c   : > { %709 = vtanh.f32 %v374_v25 }
  0x9d   : > { %711 = vtanh.f32 %v394_v26 }
  0xa0   : > { %v413_v27 = vpop.f32.mrf.mxu2  ;;  %v433_v28 = vpop.f32.mrf.mxu3 }
  0xa1   : > { %v414_v29 = vadd.f32 %v861_v22, %v413_v27  ;;  %v434_v30 = vadd.f32 %v861_v22, %v433_v28  ;;  %v375_v31 = vpop.f32.mrf.mxu0  ;;  %v395_v32 = vpop.f32.mrf.mxu1 }
  0xa2   : > { %v710_v33 = vpop.eup %709  ;;  %v376_v34 = vadd.f32 %v861_v22, %v375_v31  ;;  %v396_v35 = vadd.f32 %v861_v22, %v395_v32 }
  0xa3   : > { %v712_v36 = vpop.eup %711  ;;  %486 = vst.msk [vmem:[%s869_s30] sm:$0xff] %vm485_vm2, %v710_v33  ;;  %713 = vtanh.f32 %v414_v29 }
  0xa4   : > { %494 = vst.msk [vmem:[%s869_s30 + $0x40] sm:$0xff] %vm485_vm2, %v712_v36  ;;  %715 = vtanh.f32 %v434_v30 }
  0xa5   : > { %717 = vtanh.f32 %v376_v34 }
  0xa6   : > { %719 = vtanh.f32 %v396_v35 }
  0xa8   : > { %v415_v37 = vpop.f32.mrf.mxu2  ;;  %v435_v38 = vpop.f32.mrf.mxu3 }
  0xa9   : > { %v714_v39 = vpop.eup %713  ;;  %v416_v40 = vadd.f32 %v861_v22, %v415_v37  ;;  %v436_v41 = vadd.f32 %v861_v22, %v435_v38  ;;  %v378_v42 = vpop.f32.mrf.mxu0 }
  0xaa   : > { %v398_v43 = vpop.f32.mrf.mxu1  ;;  %v716_v44 = vpop.eup %715  ;;  %502 = vst.msk [vmem:[%s869_s30 + $0x80] sm:$0xff] %vm485_vm2, %v714_v39  ;;  %v379_v45 = vadd.f32 %v861_v22, %v378_v42 }
  0xab   : > { %v399_v46 = vadd.f32 %v861_v22, %v398_v43  ;;  %v718_v47 = vpop.eup %717  ;;  %510 = vst.msk [vmem:[%s869_s30 + $0xc0] sm:$0xff] %vm485_vm2, %v716_v44  ;;  %721 = vtanh.f32 %v416_v40 }
  0xac   : > { %v720_v48 = vpop.eup %719  ;;  %487 = vst.msk [vmem:[%s869_s30 + $0x8] sm:$0xff] %vm485_vm2, %v718_v47  ;;  %723 = vtanh.f32 %v436_v41 }
  0xad   : > { %495 = vst.msk [vmem:[%s869_s30 + $0x48] sm:$0xff] %vm485_vm2, %v720_v48  ;;  %725 = vtanh.f32 %v379_v45 }
  0xae   : > { %727 = vtanh.f32 %v399_v46 }
  0xb0   : > { %v418_v49 = vpop.f32.mrf.mxu2  ;;  %v438_v50 = vpop.f32.mrf.mxu3 }
  0xb1   : > { %v722_v51 = vpop.eup %721  ;;  %v419_v52 = vadd.f32 %v861_v22, %v418_v49  ;;  %v439_v53 = vadd.f32 %v861_v22, %v438_v50  ;;  %v380_v54 = vpop.f32.mrf.mxu0 }
  0xb2   : > { %v400_v55 = vpop.f32.mrf.mxu1  ;;  %v724_v56 = vpop.eup %723  ;;  %503 = vst.msk [vmem:[%s869_s30 + $0x88] sm:$0xff] %vm485_vm2, %v722_v51  ;;  %v381_v57 = vadd.f32 %v861_v22, %v380_v54 }
  0xb3   : > { %v401_v58 = vadd.f32 %v861_v22, %v400_v55  ;;  %v726_v59 = vpop.eup %725  ;;  %511 = vst.msk [vmem:[%s869_s30 + $0xc8] sm:$0xff] %vm485_vm2, %v724_v56  ;;  %729 = vtanh.f32 %v419_v52 }
  0xb4   : > { %v728_v60 = vpop.eup %727  ;;  %488 = vst.msk [vmem:[%s869_s30 + $0x10] sm:$0xff] %vm485_vm2, %v726_v59  ;;  %731 = vtanh.f32 %v439_v53 }
  0xb5   : > { %496 = vst.msk [vmem:[%s869_s30 + $0x50] sm:$0xff] %vm485_vm2, %v728_v60  ;;  %733 = vtanh.f32 %v381_v57 }
  0xb6   : > { %735 = vtanh.f32 %v401_v58 }
  0xb8   : > { %v420_v61 = vpop.f32.mrf.mxu2  ;;  %v440_v62 = vpop.f32.mrf.mxu3 }
  0xb9   : > { %v730_v63 = vpop.eup %729  ;;  %v421_v0 = vadd.f32 %v861_v22, %v420_v61  ;;  %v441_v1 = vadd.f32 %v861_v22, %v440_v62  ;;  %v383_v2 = vpop.f32.mrf.mxu0 }
  0xba   : > { %v403_v3 = vpop.f32.mrf.mxu1  ;;  %v732_v4 = vpop.eup %731  ;;  %504 = vst.msk [vmem:[%s869_s30 + $0x90] sm:$0xff] %vm485_vm2, %v730_v63  ;;  %v384_v5 = vadd.f32 %v861_v22, %v383_v2 }
  0xbb   : > { %v404_v6 = vadd.f32 %v861_v22, %v403_v3  ;;  %v734_v7 = vpop.eup %733  ;;  %512 = vst.msk [vmem:[%s869_s30 + $0xd0] sm:$0xff] %vm485_vm2, %v732_v4  ;;  %737 = vtanh.f32 %v421_v0 }
  0xbc   : > { %v736_v8 = vpop.eup %735  ;;  %489 = vst.msk [vmem:[%s869_s30 + $0x18] sm:$0xff] %vm485_vm2, %v734_v7  ;;  %739 = vtanh.f32 %v441_v1 }
  0xbd   : > { %497 = vst.msk [vmem:[%s869_s30 + $0x58] sm:$0xff] %vm485_vm2, %v736_v8  ;;  %741 = vtanh.f32 %v384_v5 }
  0xbe   : > { %743 = vtanh.f32 %v404_v6 }
  0xc0   : > { %v423_v9 = vpop.f32.mrf.mxu2  ;;  %v443_v10 = vpop.f32.mrf.mxu3 }
  0xc1   : > { %v738_v11 = vpop.eup %737  ;;  %v424_v12 = vadd.f32 %v861_v22, %v423_v9  ;;  %v444_v13 = vadd.f32 %v861_v22, %v443_v10  ;;  %v385_v14 = vpop.f32.mrf.mxu0 }
  0xc2   : > { %v405_v15 = vpop.f32.mrf.mxu1  ;;  %v740_v16 = vpop.eup %739  ;;  %505 = vst.msk [vmem:[%s869_s30 + $0x98] sm:$0xff] %vm485_vm2, %v738_v11  ;;  %v386_v17 = vadd.f32 %v861_v22, %v385_v14 }
  0xc3   : > { %v406_v18 = vadd.f32 %v861_v22, %v405_v15  ;;  %v742_v19 = vpop.eup %741  ;;  %513 = vst.msk [vmem:[%s869_s30 + $0xd8] sm:$0xff] %vm485_vm2, %v740_v16  ;;  %745 = vtanh.f32 %v424_v12 }
  0xc4   : > { %v744_v20 = vpop.eup %743  ;;  %490 = vst.msk [vmem:[%s869_s30 + $0x20] sm:$0xff] %vm485_vm2, %v742_v19  ;;  %747 = vtanh.f32 %v444_v13 }
  0xc5   : > { %498 = vst.msk [vmem:[%s869_s30 + $0x60] sm:$0xff] %vm485_vm2, %v744_v20  ;;  %749 = vtanh.f32 %v386_v17 }
  0xc6   : > { %751 = vtanh.f32 %v406_v18 }
  0xc8   : > { %v425_v21 = vpop.f32.mrf.mxu2  ;;  %v445_v23 = vpop.f32.mrf.mxu3 }
  0xc9   : > { %v746_v24 = vpop.eup %745  ;;  %v426_v25 = vadd.f32 %v861_v22, %v425_v21  ;;  %v446_v26 = vadd.f32 %v861_v22, %v445_v23  ;;  %v388_v27 = vpop.f32.mrf.mxu0 }
  0xca   : > { %v408_v28 = vpop.f32.mrf.mxu1  ;;  %v748_v29 = vpop.eup %747  ;;  %506 = vst.msk [vmem:[%s869_s30 + $0xa0] sm:$0xff] %vm485_vm2, %v746_v24  ;;  %v389_v30 = vadd.f32 %v861_v22, %v388_v27 }
  0xcb   : > { %v409_v31 = vadd.f32 %v861_v22, %v408_v28  ;;  %v750_v32 = vpop.eup %749  ;;  %514 = vst.msk [vmem:[%s869_s30 + $0xe0] sm:$0xff] %vm485_vm2, %v748_v29  ;;  %753 = vtanh.f32 %v426_v25 }
  0xcc   : > { %v752_v33 = vpop.eup %751  ;;  %491 = vst.msk [vmem:[%s869_s30 + $0x28] sm:$0xff] %vm485_vm2, %v750_v32  ;;  %755 = vtanh.f32 %v446_v26 }
  0xcd   : > { %499 = vst.msk [vmem:[%s869_s30 + $0x68] sm:$0xff] %vm485_vm2, %v752_v33  ;;  %757 = vtanh.f32 %v389_v30 }
  0xce   : > { %759 = vtanh.f32 %v409_v31 }
  0xd0   : > { %v428_v34 = vpop.f32.mrf.mxu2  ;;  %v448_v35 = vpop.f32.mrf.mxu3 }
  0xd1   : > { %v754_v36 = vpop.eup %753  ;;  %v429_v37 = vadd.f32 %v861_v22, %v428_v34  ;;  %v449_v38 = vadd.f32 %v861_v22, %v448_v35  ;;  %v390_v39 = vpop.f32.mrf.mxu0 }
  0xd2   : > { %v410_v40 = vpop.f32.mrf.mxu1  ;;  %v756_v41 = vpop.eup %755  ;;  %507 = vst.msk [vmem:[%s869_s30 + $0xa8] sm:$0xff] %vm485_vm2, %v754_v36  ;;  %v391_v42 = vadd.f32 %v861_v22, %v390_v39 }
  0xd3   : > { %v411_v43 = vadd.f32 %v861_v22, %v410_v40  ;;  %v758_v44 = vpop.eup %757  ;;  %515 = vst.msk [vmem:[%s869_s30 + $0xe8] sm:$0xff] %vm485_vm2, %v756_v41  ;;  %761 = vtanh.f32 %v429_v37 }
  0xd4   : > { %v760_v45 = vpop.eup %759  ;;  %492 = vst.msk [vmem:[%s869_s30 + $0x30] sm:$0xff] %vm485_vm2, %v758_v44  ;;  %763 = vtanh.f32 %v449_v38 }
  0xd5   : > { %500 = vst.msk [vmem:[%s869_s30 + $0x70] sm:$0xff] %vm485_vm2, %v760_v45  ;;  %765 = vtanh.f32 %v391_v42 }
  0xd6   : > { %767 = vtanh.f32 %v411_v43 }
  0xd8   : > { %v430_v46 = vpop.f32.mrf.mxu2  ;;  %v450_v47 = vpop.f32.mrf.mxu3 }
  0xd9   : > { %v762_v48 = vpop.eup %761  ;;  %v431_v49 = vadd.f32 %v861_v22, %v430_v46  ;;  %v451_v50 = vadd.f32 %v861_v22, %v450_v47 }
  0xda   : > { %v764_v51 = vpop.eup %763  ;;  %508 = vst.msk [vmem:[%s869_s30 + $0xb0] sm:$0xff] %vm485_vm2, %v762_v48 }
  0xdb   : > { %v766_v52 = vpop.eup %765  ;;  %516 = vst.msk [vmem:[%s869_s30 + $0xf0] sm:$0xff] %vm485_vm2, %v764_v51  ;;  %769 = vtanh.f32 %v431_v49 }
  0xdc   : > { %v768_v53 = vpop.eup %767  ;;  %493 = vst.msk [vmem:[%s869_s30 + $0x38] sm:$0xff] %vm485_vm2, %v766_v52  ;;  %771 = vtanh.f32 %v451_v50 }
  0xdd   : > { %501 = vst.msk [vmem:[%s869_s30 + $0x78] sm:$0xff] %vm485_vm2, %v768_v53 }
  0xe1   : > { %v770_v54 = vpop.eup %769 }
  0xe2   : > { %v772_v55 = vpop.eup %771  ;;  %509 = vst.msk [vmem:[%s869_s30 + $0xb8] sm:$0xff] %vm485_vm2, %v770_v54 }
  0xe3   : > { %517 = vst.msk [vmem:[%s869_s30 + $0xf8] sm:$0xff] %vm485_vm2, %v772_v55 }
  0xe4 PF: > { %s13_s12 = sadd.s32 1, %s779_s12  }
  0xe5   : > { %p10_p4 = scmp.ge.s32.totalorder %s13_s12, 4  }
  0xe7   :  { %12 = sbr.rel (!%p10_p4) target bundleno = 1 (0x1), region = 62 }

// kernel: generator_forward.61
= control target key start
LH: loop header
LB: loop body
LE: loop exit
PB: predicated region body
PF: predicated region fallthrough
CT: control target
= control target key end

     0   :  { %s647_s12 = smov 0   ;;  %s755_s0 = inlined_call_operand.vmem [shape: bf16[128,72], index: 0, kind: input, shape index: {}]   ;;  %s756_s1 = inlined_call_operand.vmem [shape: bf16[72,16], index: 1, kind: input, shape index: {}]   ;;  %s757_s2 = inlined_call_operand.vmem [shape: f32[1,16], index: 2, kind: input, shape index: {}]   ;;  %s758_s3 = inlined_call_operand.vmem [shape: bf16[128,8], index: 3, kind: output, shape index: {}]  }
   0x1 LB: > { %s482_s13 = sadd.s32 4294967295, %s624_s12   ;;  %p486_p0 = scmp.ge.s32.totalorder %s624_s12, 1  ;;  %s624_s12 = sphi %s647_s12, %s13_s12  }
   0x2   : > { %p138_p1 = scmp.lt.s32.totalorder %s624_s12, 3 }
   0x4   : > { %p139_p2 = pnand %p486_p0, %p138_p1 }
   0x5   : > { %s487_s16 = sshll.u32 (!%p139_p2), %s482_s13, 3  ;;  %s626_s4 = smov (!%p139_p2), 120  }
   0x6   : > { %142 = sbr.rel (%p139_p2) target bundleno = 323 (0x143), region = 32  ;;  %p163_p3 = scmp.lt.s32.totalorder (!%p139_p2), %s487_s16, 15 }
   0xb   : > { %v191_v0 = vld [vmem:[%s756_s1 + $0x20] sm:$0xf]  ;;  %vm256_vm0 = vcmask 1043456   ;;  %v544_v4 = vld [vmem:[%s756_s1 + $0x18] sm:$0xff]  ;;  %v543_v5 = vld [vmem:[%s756_s1 + $0x10] sm:$0xff]  ;;  %s760_s16 = smov (!%p163_p3, %s487_s16), 15 }
   0xc   : > { %v233_v1 = vunpack.c.l.b16 %v191_v0  ;;  %v542_v6 = vld [vmem:[%s756_s1 + $0x8] sm:$0xff]  ;;  %s488_s23 = sshll.u32 %s760_s16, 2  ;;  %v541_v7 = vld [vmem:[%s756_s1] sm:$0xff]  ;;  %vm243_vm1 = vcmask 588800   ;;  %vm417_vm3 = vcmask 60416  }
   0xd   : > { %s166_s28 = scalar_lea.vmem %s755_s0, %s488_s23  ;;  %v569_v12 = vld [vmem:[%s757_s2] ss:$0 sm:$0xff]  ;;  %s716_s7 = scalar_lea.vmem %s758_s3, %s488_s23 }
   0xe   : > { %v238_v2 = vpack.c.b16 %v233_v1, %v233_v1  ;;  %v537_v8 = vld [vmem:[%s166_s28] sm:$0xff]  ;;  %v538_v9 = vld [vmem:[%s166_s28 + $0x8] sm:$0xff]  ;;  %v539_v10 = vld [vmem:[%s166_s28 + $0x10] sm:$0xff] }
   0xf   : > { %v540_v11 = vld [vmem:[%s166_s28 + $0x18] sm:$0xff] }
  0x10   : > { %v258_v3 = vsel %vm256_vm0, %v238_v2, 0 }
  0x11   : > { %263 = vmatpush.bf16.msra.mxu0 %v258_v3  ;;  %545 = vmatpush.bf16.msra.mxu1 %v258_v3 }
  0x12   : > { %546 = vmatpush.bf16.msra.mxu2 %v258_v3  ;;  %547 = vmatpush.bf16.msra.mxu3 %v258_v3 }
  0x15   : > { %264 = vmatpush.bf16.msra.mxu0 %v544_v4  ;;  %548 = vmatpush.bf16.msra.mxu1 %v544_v4 }
  0x16   : > { %549 = vmatpush.bf16.msra.mxu2 %v544_v4  ;;  %550 = vmatpush.bf16.msra.mxu3 %v544_v4 }
  0x19   : > { %265 = vmatpush.bf16.msra.mxu0 %v543_v5  ;;  %551 = vmatpush.bf16.msra.mxu1 %v543_v5 }
  0x1a   : > { %552 = vmatpush.bf16.msra.mxu2 %v543_v5  ;;  %553 = vmatpush.bf16.msra.mxu3 %v543_v5 }
  0x1d   : > { %266 = vmatpush.bf16.msra.mxu0 %v542_v6  ;;  %554 = vmatpush.bf16.msra.mxu1 %v542_v6 }
  0x1e   : > { %555 = vmatpush.bf16.msra.mxu2 %v542_v6  ;;  %556 = vmatpush.bf16.msra.mxu3 %v542_v6 }
  0x21   : > { %267 = vmatpush.bf16.msra.mxu0 %v541_v7  ;;  %557 = vmatpush.bf16.msra.mxu1 %v541_v7 }
  0x22   : > { %558 = vmatpush.bf16.msra.mxu2 %v541_v7  ;;  %559 = vmatpush.bf16.msra.mxu3 %v541_v7 }
  0x24   : > { %523 = vmatmul.msk.bf16.vlgmr.msra.gmra.mxu0 %vm243_vm1, %v537_v8  ;;  %524 = vmatmul.msk.bf16.vlgmr.msra.gmra.mxu1 %vm243_vm1, %v538_v9 }
  0x25   : > { %525 = vmatmul.msk.bf16.vlgmr.msra.gmra.mxu2 %vm243_vm1, %v539_v10  ;;  %526 = vmatmul.msk.bf16.vlgmr.msra.gmra.mxu3 %vm243_vm1, %v540_v11 }
  0xa1   : > { %v269_v13 = vpop.f32.mrf.mxu0  ;;  %v274_v14 = vpop.f32.mrf.mxu1 }
  0xa2   : > { %v681_v15 = vadd.f32 %v569_v12, %v269_v13  ;;  %v683_v16 = vadd.f32 %v569_v12, %v274_v14 }
  0xa4   : > { %v329_v17 = vsub.f32 0.0, %v681_v15  ;;  %v331_v18 = vsub.f32 0.0, %v683_v16  ;;  %v301_v9 = vmul.f32 1.442695, %v683_v16  ;;  %v297_v10 = vmul.f32 1.442695, %v681_v15 }
  0xa5   : > { %vm291_vm5 = vcmp.gt.f32.partialorder %v683_v16, 0.0  ;;  %vm289_vm6 = vcmp.gt.f32.partialorder %v681_v15, 0.0 }
  0xa6   : > { %v337_v19 = vmul.f32 1.442695, %v329_v17  ;;  %v341_v20 = vmul.f32 1.442695, %v331_v18 }
  0xa8   : > { %v279_v21 = vpop.f32.mrf.mxu2  ;;  %v284_v22 = vpop.f32.mrf.mxu3  ;;  %570 = vpow2.f32 %v341_v20 }
  0xa9   : > { %v687_v23 = vadd.f32 %v569_v12, %v279_v21  ;;  %v271_v24 = vpop.f32.mrf.mxu0  ;;  %v276_v25 = vpop.f32.mrf.mxu1  ;;  %572 = vpow2.f32 %v337_v19  ;;  %v693_v28 = vadd.f32 %v569_v12, %v284_v22 }
  0xaa   : > { %v689_v26 = vadd.f32 %v569_v12, %v271_v24  ;;  %v691_v27 = vadd.f32 %v569_v12, %v276_v25 }
  0xab   : > { %v333_v29 = vsub.f32 0.0, %v687_v23  ;;  %v335_v32 = vsub.f32 0.0, %v693_v28  ;;  %v305_v5 = vmul.f32 1.442695, %v687_v23  ;;  %vm293_vm2 = vcmp.gt.f32.partialorder %v687_v23, 0.0 }
  0xac   : > { %v330_v30 = vsub.f32 0.0, %v689_v26  ;;  %v332_v31 = vsub.f32 0.0, %v691_v27  ;;  %v303_v19 = vmul.f32 1.442695, %v691_v27  ;;  %v299_v20 = vmul.f32 1.442695, %v689_v26 }
  0xad   : > { %v345_v38 = vmul.f32 1.442695, %v333_v29  ;;  %v349_v42 = vmul.f32 1.442695, %v335_v32  ;;  %vm292_vm7 = vcmp.gt.f32.partialorder %v691_v27, 0.0  ;;  %vm290_vm8 = vcmp.gt.f32.partialorder %v689_v26, 0.0 }
  0xae   : > { %v571_v33 = vpop.eup %570  ;;  %v339_v34 = vmul.f32 1.442695, %v330_v30  ;;  %v343_v35 = vmul.f32 1.442695, %v332_v31  ;;  %vm295_vm9 = vcmp.gt.f32.partialorder %v693_v28, 0.0 }
  0xaf   : > { %v573_v36 = vpop.eup %572  ;;  %v355_v37 = vadd.f32 1.0, %v571_v33 }
  0xb0   : > { %574 = vpow2.f32 %v339_v34  ;;  %v281_v39 = vpop.f32.mrf.mxu2  ;;  %v286_v40 = vpop.f32.mrf.mxu3  ;;  %v353_v41 = vadd.f32 1.0, %v573_v36  ;;  %v309_v34 = vmul.f32 1.442695, %v693_v28 }
  0xb1   : > { %576 = vpow2.f32 %v343_v35  ;;  %v699_v43 = vadd.f32 %v569_v12, %v281_v39  ;;  %v701_v44 = vadd.f32 %v569_v12, %v286_v40 }
  0xb2   : > { %578 = vrcp.f32 %v355_v37 }
  0xb3   : > { %v334_v45 = vsub.f32 0.0, %v699_v43  ;;  %v336_v46 = vsub.f32 0.0, %v701_v44  ;;  %580 = vrcp.f32 %v353_v41  ;;  %v307_v6 = vmul.f32 1.442695, %v699_v43 }
  0xb4   : > { %582 = vpow2.f32 %v345_v38  ;;  %vm294_vm4 = vcmp.gt.f32.partialorder %v699_v43, 0.0  ;;  %v311_v39 = vmul.f32 1.442695, %v701_v44  ;;  %vm296_vm10 = vcmp.gt.f32.partialorder %v701_v44, 0.0 }
  0xb5   : > { %584 = vpow2.f32 %v349_v42  ;;  %v347_v47 = vmul.f32 1.442695, %v334_v45  ;;  %v351_v51 = vmul.f32 1.442695, %v336_v46 }
  0xb6   : > { %v575_v48 = vpop.eup %574 }
  0xb7   : > { %v577_v49 = vpop.eup %576  ;;  %v354_v50 = vadd.f32 1.0, %v575_v48  ;;  %586 = vpow2.f32 %v347_v47 }
  0xb8   : > { %v579_v52 = vpop.eup %578  ;;  %v356_v53 = vadd.f32 1.0, %v577_v49 }
  0xb9   : > { %v581_v54 = vpop.eup %580  ;;  %588 = vrcp.f32 %v354_v50  ;;  %381 = vrot.lane.b32.xlu1 %v579_v52, %s626_s4 }
  0xba   : > { %v583_v55 = vpop.eup %582  ;;  %590 = vrcp.f32 %v356_v53  ;;  %377 = vrot.lane.b32.xlu0 %v581_v54, %s626_s4 }
  0xbb   : > { %v585_v56 = vpop.eup %584  ;;  %592 = vpow2.f32 %v351_v51  ;;  %v357_v57 = vadd.f32 1.0, %v583_v55 }
  0xbc   : > { %v359_v59 = vadd.f32 1.0, %v585_v56 }
  0xbd   : > { %v587_v58 = vpop.eup %586  ;;  %594 = vrcp.f32 %v357_v57 }
  0xbe   : > { %v358_v61 = vadd.f32 1.0, %v587_v58  ;;  %596 = vrcp.f32 %v359_v59 }
  0xbf   : > { %v589_v60 = vpop.eup %588 }
  0xc0   : > { %v591_v62 = vpop.eup %590  ;;  %598 = vrcp.f32 %v358_v61 }
  0xc1   : > { %v593_v63 = vpop.eup %592  ;;  %383 = vrot.lane.b32.xlu1 %v591_v62, %s626_s4 }
  0xc2   : > { %v360_v0 = vadd.f32 1.0, %v593_v63  ;;  %379 = vrot.lane.b32.xlu0 %v589_v60, %s626_s4 }
  0xc3   : > { %v595_v1 = vpop.eup %594 }
  0xc4   : > { %600 = vrcp.f32 %v360_v0  ;;  %385 = vrot.lane.b32.xlu2 %v595_v1, %s626_s4  ;;  %v597_v2 = vpop.eup %596 }
  0xc5   : > { %602 = vpow2.f32 %v305_v5 }
  0xc6   : > { %v599_v3 = vpop.eup %598  ;;  %604 = vpow2.f32 %v307_v6 }
  0xc7   : > { %606 = vpow2.f32 %v301_v9 }
  0xc8   : > { %608 = vpow2.f32 %v297_v10 }
  0xc9   : > { %610 = vpow2.f32 %v303_v19 }
  0xca   : > { %v601_v4 = vpop.eup %600  ;;  %389 = vrot.lane.b32.xlu0 %v597_v2, %s626_s4  ;;  %612 = vpow2.f32 %v299_v20 }
  0xcb   : > { %391 = vrot.lane.b32.xlu1 %v601_v4, %s626_s4  ;;  %v603_v7 = vpop.eup %602  ;;  %614 = vpow2.f32 %v309_v34 }
  0xcc   : > { %387 = vrot.lane.b32.xlu2 %v599_v3, %s626_s4  ;;  %v531_v8 = vadd.f32 -1.0, %v603_v7  ;;  %v605_v13 = vpop.eup %604  ;;  %616 = vpow2.f32 %v311_v39 }
  0xcd   : > { %v532_v18 = vadd.f32 -1.0, %v605_v13  ;;  %v607_v21 = vpop.eup %606 }
  0xce   : > { %v325_v12 = vsel %vm293_vm2, %v687_v23, %v531_v8  ;;  %v609_v22 = vpop.eup %608  ;;  %v529_v29 = vadd.f32 -1.0, %v607_v21 }
  0xcf   : > { %v326_v23 = vsel %vm294_vm4, %v699_v43, %v532_v18  ;;  %v527_v30 = vadd.f32 -1.0, %v609_v22  ;;  %v611_v35 = vpop.eup %610 }
  0xd0   : > { %v323_v33 = vsel %vm291_vm5, %v683_v16, %v529_v29  ;;  %v613_v40 = vpop.eup %612  ;;  %v530_v45 = vadd.f32 -1.0, %v611_v35 }
  0xd1   : > { %v321_v38 = vsel %vm289_vm6, %v681_v15, %v527_v30  ;;  %v528_v16 = vadd.f32 -1.0, %v613_v40  ;;  %v615_v50 = vpop.eup %614 }
  0xd2   : > { %v324_v15 = vsel %vm292_vm7, %v691_v27, %v530_v45  ;;  %v617_v52 = vpop.eup %616  ;;  %v533_v55 = vadd.f32 -1.0, %v615_v50 }
  0xd3   : > { %v322_v48 = vsel %vm290_vm8, %v689_v26, %v528_v16  ;;  %v534_v27 = vadd.f32 -1.0, %v617_v52 }
  0xd4   : > { %v327_v26 = vsel %vm295_vm9, %v693_v28, %v533_v55 }
  0xd5   : > { %v328_v57 = vsel %vm296_vm10, %v701_v44, %v534_v27 }
 0x11e   : > { %v386_v11 = vpop.permute.xlu2 %385 }
 0x11f   : > { %v405_v14 = vmul.f32 %v386_v11, %v325_v12 }
 0x121   : > { %v413_v17 = vpack.c.bf16 %v405_v14, %v405_v14 }
 0x123   : > { %422 = vst.msk [vmem:[%s716_s7 + $0x10] sm:$0xf] %vm417_vm3, %v413_v17 }
 0x126   : > { %v388_v24 = vpop.permute.xlu2 %387 }
 0x127   : > { %v406_v25 = vmul.f32 %v388_v24, %v326_v23 }
 0x129   : > { %v414_v31 = vpack.c.bf16 %v406_v25, %v406_v25 }
 0x12b   : > { %423 = vst.msk [vmem:[%s716_s7 + $0x14] sm:$0xf] %vm417_vm3, %v414_v31  ;;  %v382_v32 = vpop.permute.xlu1 %381 }
 0x12c   : > { %v403_v36 = vmul.f32 %v382_v32, %v323_v33  ;;  %v378_v37 = vpop.permute.xlu0 %377 }
 0x12d   : > { %v401_v41 = vmul.f32 %v378_v37, %v321_v38 }
 0x12e   : > { %v411_v42 = vpack.c.bf16 %v403_v36, %v403_v36 }
 0x12f   : > { %v409_v43 = vpack.c.bf16 %v401_v41, %v401_v41 }
 0x130   : > { %420 = vst.msk [vmem:[%s716_s7 + $0x8] sm:$0xf] %vm417_vm3, %v411_v42 }
 0x131   : > { %418 = vst.msk [vmem:[%s716_s7] sm:$0xf] %vm417_vm3, %v409_v43 }
 0x133   : > { %v384_v46 = vpop.permute.xlu1 %383 }
 0x134   : > { %v404_v47 = vmul.f32 %v384_v46, %v324_v15  ;;  %v380_v49 = vpop.permute.xlu0 %379 }
 0x135   : > { %v402_v51 = vmul.f32 %v380_v49, %v322_v48 }
 0x136   : > { %v412_v53 = vpack.c.bf16 %v404_v47, %v404_v47 }
 0x137   : > { %v410_v54 = vpack.c.bf16 %v402_v51, %v402_v51 }
 0x138   : > { %421 = vst.msk [vmem:[%s716_s7 + $0xc] sm:$0xf] %vm417_vm3, %v412_v53 }
 0x139   : > { %419 = vst.msk [vmem:[%s716_s7 + $0x4] sm:$0xf] %vm417_vm3, %v410_v54 }
 0x13c   : > { %v390_v56 = vpop.permute.xlu0 %389 }
 0x13d   : > { %v392_v58 = vpop.permute.xlu1 %391  ;;  %v407_v59 = vmul.f32 %v390_v56, %v327_v26 }
 0x13e   : > { %v408_v60 = vmul.f32 %v392_v58, %v328_v57 }
 0x13f   : > { %v415_v61 = vpack.c.bf16 %v407_v59, %v407_v59 }
 0x140   : > { %v416_v62 = vpack.c.bf16 %v408_v60, %v408_v60 }
 0x141   : > { %424 = vst.msk [vmem:[%s716_s7 + $0x18] sm:$0xf] %vm417_vm3, %v415_v61 }
 0x142   : > { %425 = vst.msk [vmem:[%s716_s7 + $0x1c] sm:$0xf] %vm417_vm3, %v416_v62 }
 0x143 PF: > { %s13_s12 = sadd.s32 1, %s624_s12  }
 0x144   : > { %p10_p4 = scmp.ge.s32.totalorder %s13_s12, 4  }
 0x146   :  { %12 = sbr.rel (!%p10_p4) target bundleno = 1 (0x1), region = 62 }

// kernel: generator_forward.60
= control target key start
LH: loop header
LB: loop body
LE: loop exit
PB: predicated region body
PF: predicated region fallthrough
CT: control target
= control target key end

     0   :  { %s1488_s12 = smov 0   ;;  %s1891_s0 = inlined_call_operand.vmem [shape: bf16[512,75], index: 0, kind: input, shape index: {}]   ;;  %s1892_s1 = inlined_call_operand.vmem [shape: bf16[75,16], index: 1, kind: input, shape index: {}]   ;;  %s1893_s2 = inlined_call_operand.vmem [shape: f32[1,16], index: 2, kind: input, shape index: {}]   ;;  %s1894_s3 = inlined_call_operand.vmem [shape: bf16[512,8], index: 3, kind: output, shape index: {}]  }
   0x1 LB: > { %s1076_s13 = sadd.s32 4294967295, %s1464_s12   ;;  %p1080_p0 = scmp.ge.s32.totalorder %s1464_s12, 1  ;;  %s1464_s12 = sphi %s1488_s12, %s13_s12  }
   0x2   : > { %p138_p1 = scmp.lt.s32.totalorder %s1464_s12, 3 }
   0x4   : > { %p139_p2 = pnand %p1080_p0, %p138_p1 }
   0x5   : > { %s1081_s18 = sshll.u32 (!%p139_p2), %s1076_s13, 5  ;;  %s1467_s6 = smov (!%p139_p2), 120  }
   0x6   : > { %142 = sbr.rel (%p139_p2) target bundleno = 396 (0x18c), region = 32  ;;  %p163_p3 = scmp.lt.s32.totalorder (!%p139_p2), %s1081_s18, 63 }
   0xb   : > { %v1167_v0 = vld [vmem:[%s1892_s1 + $0x20] sm:$0xf]  ;;  %v1239_v1 = vld [vmem:[%s1892_s1 + $0x20] sm:$0x30]  ;;  %vm379_vm0 = vcmask 1044480   ;;  %vm380_vm1 = vcmask 1045504  }
   0xc   : > { %v1168_v2 = vor.u32 %v1239_v1, %v1167_v0  ;;  %v1466_v3 = vmov 65535   ;;  %v1238_v7 = vld [vmem:[%s1892_s1 + $0x18] sm:$0xff]  ;;  %v1237_v8 = vld [vmem:[%s1892_s1 + $0x10] sm:$0xff]  ;;  %s1896_s18 = smov (!%p163_p3, %s1081_s18), 63  ;;  %v1236_v9 = vld [vmem:[%s1892_s1 + $0x8] sm:$0xff]  ;;  %vm330_vm2 = vcmask 613376  }
   0xd   : > { %v381_v4 = vsel %vm379_vm0, 4294967295, %v1466_v3  ;;  %s1082_s25 = sshll.u32 %s1896_s18, 2  ;;  %v1235_v10 = vld [vmem:[%s1892_s1] sm:$0xff]  ;;  %vm987_vm4 = vcmask 60416  }
   0xe   : > { %v382_v5 = vsel %vm380_vm1, %v381_v4, 0  ;;  %s1522_s30 = scalar_lea.vmem %s1891_s0, %s1082_s25  ;;  %v1559_v27 = vld [vmem:[%s1893_s2] ss:$0 sm:$0xff]  ;;  %s1730_s9 = scalar_lea.vmem %s1894_s3, %s1082_s25 }
   0xf   : > { %v384_v6 = vand.u32 %v1168_v2, %v382_v5  ;;  %v1219_v11 = vld [vmem:[%s1522_s30] sm:$0xff]  ;;  %v1220_v15 = vld [vmem:[%s1522_s30 + $0x8] sm:$0xff]  ;;  %v1221_v19 = vld [vmem:[%s1522_s30 + $0x10] sm:$0xff] }
  0x10   : > { %v1223_v12 = vld [vmem:[%s1522_s30 + $0x20] sm:$0xff]  ;;  %v1224_v16 = vld [vmem:[%s1522_s30 + $0x28] sm:$0xff]  ;;  %v1225_v20 = vld [vmem:[%s1522_s30 + $0x30] sm:$0xff] }
  0x11   : > { %389 = vmatpush.bf16.msra.mxu0 %v384_v6  ;;  %1240 = vmatpush.bf16.msra.mxu1 %v384_v6  ;;  %v1227_v13 = vld [vmem:[%s1522_s30 + $0x40] sm:$0xff]  ;;  %v1228_v17 = vld [vmem:[%s1522_s30 + $0x48] sm:$0xff]  ;;  %v1229_v21 = vld [vmem:[%s1522_s30 + $0x50] sm:$0xff] }
  0x12   : > { %1241 = vmatpush.bf16.msra.mxu2 %v384_v6  ;;  %1242 = vmatpush.bf16.msra.mxu3 %v384_v6  ;;  %v1231_v14 = vld [vmem:[%s1522_s30 + $0x60] sm:$0xff]  ;;  %v1232_v18 = vld [vmem:[%s1522_s30 + $0x68] sm:$0xff]  ;;  %v1233_v22 = vld [vmem:[%s1522_s30 + $0x70] sm:$0xff] }
  0x13   : > { %v1222_v23 = vld [vmem:[%s1522_s30 + $0x18] sm:$0xff] }
  0x14   : > { %v1226_v24 = vld [vmem:[%s1522_s30 + $0x38] sm:$0xff] }
  0x15   : > { %390 = vmatpush.bf16.msra.mxu0 %v1238_v7  ;;  %1243 = vmatpush.bf16.msra.mxu1 %v1238_v7  ;;  %v1230_v25 = vld [vmem:[%s1522_s30 + $0x58] sm:$0xff] }
  0x16   : > { %1244 = vmatpush.bf16.msra.mxu2 %v1238_v7  ;;  %1245 = vmatpush.bf16.msra.mxu3 %v1238_v7  ;;  %v1234_v26 = vld [vmem:[%s1522_s30 + $0x78] sm:$0xff] }
  0x19   : > { %391 = vmatpush.bf16.msra.mxu0 %v1237_v8  ;;  %1246 = vmatpush.bf16.msra.mxu1 %v1237_v8 }
  0x1a   : > { %1247 = vmatpush.bf16.msra.mxu2 %v1237_v8  ;;  %1248 = vmatpush.bf16.msra.mxu3 %v1237_v8 }
  0x1d   : > { %392 = vmatpush.bf16.msra.mxu0 %v1236_v9  ;;  %1249 = vmatpush.bf16.msra.mxu1 %v1236_v9 }
  0x1e   : > { %1250 = vmatpush.bf16.msra.mxu2 %v1236_v9  ;;  %1251 = vmatpush.bf16.msra.mxu3 %v1236_v9 }
  0x21   : > { %393 = vmatpush.bf16.msra.mxu0 %v1235_v10  ;;  %1252 = vmatpush.bf16.msra.mxu1 %v1235_v10 }
  0x22   : > { %1253 = vmatpush.bf16.msra.mxu2 %v1235_v10  ;;  %1254 = vmatpush.bf16.msra.mxu3 %v1235_v10 }
  0x24   : > { %1169 = vmatmul.msk.bf16.vlgmr.msra.gmra.mxu0 %vm330_vm2, %v1219_v11  ;;  %1173 = vmatmul.msk.bf16.vlgmr.msra.gmra.mxu1 %vm330_vm2, %v1223_v12 }
  0x25   : > { %1177 = vmatmul.msk.bf16.vlgmr.msra.gmra.mxu2 %vm330_vm2, %v1227_v13  ;;  %1181 = vmatmul.msk.bf16.vlgmr.msra.gmra.mxu3 %vm330_vm2, %v1231_v14 }
  0x34   : > { %1170 = vmatmul.msk.bf16.gmra.mxu0 %vm330_vm2, %v1220_v15  ;;  %1174 = vmatmul.msk.bf16.gmra.mxu1 %vm330_vm2, %v1224_v16 }
  0x35   : > { %1178 = vmatmul.msk.bf16.gmra.mxu2 %vm330_vm2, %v1228_v17  ;;  %1182 = vmatmul.msk.bf16.gmra.mxu3 %vm330_vm2, %v1232_v18 }
  0x44   : > { %1171 = vmatmul.msk.bf16.gmra.mxu0 %vm330_vm2, %v1221_v19  ;;  %1175 = vmatmul.msk.bf16.gmra.mxu1 %vm330_vm2, %v1225_v20 }
  0x45   : > { %1179 = vmatmul.msk.bf16.gmra.mxu2 %vm330_vm2, %v1229_v21  ;;  %1183 = vmatmul.msk.bf16.gmra.mxu3 %vm330_vm2, %v1233_v22 }
  0x54   : > { %1172 = vmatmul.msk.bf16.gmra.mxu0 %vm330_vm2, %v1222_v23  ;;  %1176 = vmatmul.msk.bf16.gmra.mxu1 %vm330_vm2, %v1226_v24 }
  0x55   : > { %1180 = vmatmul.msk.bf16.gmra.mxu2 %vm330_vm2, %v1230_v25  ;;  %1184 = vmatmul.msk.bf16.gmra.mxu3 %vm330_vm2, %v1234_v26 }
  0xa1   : > { %v395_v28 = vpop.f32.mrf.mxu0  ;;  %v415_v29 = vpop.f32.mrf.mxu1 }
  0xa2   : > { %v1562_v30 = vadd.f32 %v1559_v27, %v395_v28  ;;  %v1565_v31 = vadd.f32 %v1559_v27, %v415_v29 }
  0xa4   : > { %v635_v32 = vsub.f32 0.0, %v1562_v30  ;;  %v643_v33 = vsub.f32 0.0, %v1565_v31  ;;  %vm483_vm3 = vcmp.gt.f32.partialorder %v1565_v31, 0.0  ;;  %vm475_vm7 = vcmp.gt.f32.partialorder %v1562_v30, 0.0 }
  0xa6   : > { %v667_v34 = vmul.f32 1.442695, %v635_v32  ;;  %v683_v35 = vmul.f32 1.442695, %v643_v33 }
  0xa8   : > { %v435_v36 = vpop.f32.mrf.mxu2  ;;  %v455_v37 = vpop.f32.mrf.mxu3  ;;  %1266 = vpow2.f32 %v683_v35 }
  0xa9   : > { %v1570_v38 = vadd.f32 %v1559_v27, %v435_v36  ;;  %v1573_v39 = vadd.f32 %v1559_v27, %v455_v37  ;;  %v397_v40 = vpop.f32.mrf.mxu0  ;;  %v417_v41 = vpop.f32.mrf.mxu1  ;;  %1268 = vpow2.f32 %v667_v34 }
  0xaa   : > { %v1576_v42 = vadd.f32 %v1559_v27, %v397_v40  ;;  %v1588_v59 = vadd.f32 %v1559_v27, %v417_v41 }
  0xab   : > { %v659_v43 = vsub.f32 0.0, %v1573_v39  ;;  %v651_v44 = vsub.f32 0.0, %v1570_v38  ;;  %vm499_vm9 = vcmp.gt.f32.partialorder %v1573_v39, 0.0  ;;  %vm491_vm10 = vcmp.gt.f32.partialorder %v1570_v38, 0.0 }
  0xac   : > { %v636_v45 = vsub.f32 0.0, %v1576_v42  ;;  %v644_v63 = vsub.f32 0.0, %v1588_v59  ;;  %vm476_vm12 = vcmp.gt.f32.partialorder %v1576_v42, 0.0  ;;  %vm484_vm15 = vcmp.gt.f32.partialorder %v1588_v59, 0.0 }
  0xad   : > { %v715_v46 = vmul.f32 1.442695, %v659_v43  ;;  %v699_v51 = vmul.f32 1.442695, %v651_v44 }
  0xae   : > { %v1267_v47 = vpop.eup %1266  ;;  %v669_v48 = vmul.f32 1.442695, %v636_v45  ;;  %v685_v7 = vmul.f32 1.442695, %v644_v63 }
  0xaf   : > { %v1269_v49 = vpop.eup %1268  ;;  %1270 = vpow2.f32 %v715_v46  ;;  %v739_v50 = vadd.f32 1.0, %v1267_v47 }
  0xb0   : > { %v437_v52 = vpop.f32.mrf.mxu2  ;;  %v457_v53 = vpop.f32.mrf.mxu3  ;;  %v731_v54 = vadd.f32 1.0, %v1269_v49  ;;  %1272 = vpow2.f32 %v669_v48 }
  0xb1   : > { %v1582_v55 = vadd.f32 %v1559_v27, %v437_v52  ;;  %v1585_v56 = vadd.f32 %v1559_v27, %v457_v53  ;;  %v400_v57 = vpop.f32.mrf.mxu0  ;;  %v420_v58 = vpop.f32.mrf.mxu1  ;;  %1274 = vrcp.f32 %v739_v50 }
  0xb2   : > { %v1593_v62 = vadd.f32 %v1559_v27, %v400_v57  ;;  %1276 = vrcp.f32 %v731_v54  ;;  %v1605_v18 = vadd.f32 %v1559_v27, %v420_v58 }
  0xb3   : > { %v652_v60 = vsub.f32 0.0, %v1582_v55  ;;  %v660_v61 = vsub.f32 0.0, %v1585_v56  ;;  %1278 = vpow2.f32 %v699_v51  ;;  %vm492_vm5 = vcmp.gt.f32.partialorder %v1582_v55, 0.0 }
  0xb4   : > { %v637_v2 = vsub.f32 0.0, %v1593_v62  ;;  %v645_v25 = vsub.f32 0.0, %v1605_v18  ;;  %vm500_vm13 = vcmp.gt.f32.partialorder %v1585_v56, 0.0  ;;  %vm477_vm0 = vcmp.gt.f32.partialorder %v1593_v62, 0.0 }
  0xb5   : > { %v1271_v0 = vpop.eup %1270  ;;  %v701_v1 = vmul.f32 1.442695, %v652_v60  ;;  %v717_v5 = vmul.f32 1.442695, %v660_v61 }
  0xb6   : > { %v755_v3 = vadd.f32 1.0, %v1271_v0  ;;  %v1273_v4 = vpop.eup %1272  ;;  %v671_v11 = vmul.f32 1.442695, %v637_v2  ;;  %v687_v37 = vmul.f32 1.442695, %v645_v25 }
  0xb7   : > { %1280 = vpow2.f32 %v701_v1  ;;  %v1275_v6 = vpop.eup %1274  ;;  %v732_v17 = vadd.f32 1.0, %v1273_v4 }
  0xb8   : > { %v440_v8 = vpop.f32.mrf.mxu2  ;;  %v460_v9 = vpop.f32.mrf.mxu3  ;;  %843 = vrot.lane.b32.xlu2 %v1275_v6, %s1467_s6  ;;  %1282 = vrcp.f32 %v755_v3 }
  0xb9   : > { %v1277_v10 = vpop.eup %1276  ;;  %v1598_v12 = vadd.f32 %v1559_v27, %v440_v8  ;;  %v1601_v13 = vadd.f32 %v1559_v27, %v460_v9  ;;  %v402_v14 = vpop.f32.mrf.mxu0  ;;  %1284 = vpow2.f32 %v717_v5 }
  0xba   : > { %v422_v15 = vpop.f32.mrf.mxu1  ;;  %v1279_v16 = vpop.eup %1278  ;;  %827 = vrot.lane.b32.xlu0 %v1277_v10, %s1467_s6  ;;  %1286 = vpow2.f32 %v685_v7  ;;  %v1623_v47 = vadd.f32 %v1559_v27, %v402_v14 }
  0xbb   : > { %v1609_v19 = vadd.f32 %v1559_v27, %v422_v15  ;;  %v653_v20 = vsub.f32 0.0, %v1598_v12  ;;  %v661_v21 = vsub.f32 0.0, %v1601_v13  ;;  %v747_v22 = vadd.f32 1.0, %v1279_v16 }
  0xbc   : > { %1288 = vpow2.f32 %v671_v11  ;;  %v638_v60 = vsub.f32 0.0, %v1623_v47  ;;  %vm501_vm6 = vcmp.gt.f32.partialorder %v1601_v13, 0.0  ;;  %vm493_vm2 = vcmp.gt.f32.partialorder %v1598_v12, 0.0 }
  0xbd   : > { %v646_v23 = vsub.f32 0.0, %v1609_v19  ;;  %v1281_v24 = vpop.eup %1280  ;;  %v719_v26 = vmul.f32 1.442695, %v661_v21  ;;  %v703_v29 = vmul.f32 1.442695, %v653_v20  ;;  %1290 = vrcp.f32 %v747_v22 }
  0xbe   : > { %v748_v28 = vadd.f32 1.0, %v1281_v24  ;;  %1292 = vrcp.f32 %v732_v17  ;;  %v1283_v33 = vpop.eup %1282  ;;  %v673_v8 = vmul.f32 1.442695, %v638_v60  ;;  %vm486_vm8 = vcmp.gt.f32.partialorder %v1609_v19, 0.0 }
  0xbf   : > { %v689_v32 = vmul.f32 1.442695, %v646_v23  ;;  %v1285_v36 = vpop.eup %1284 }
  0xc0   : > { %1294 = vrcp.f32 %v748_v28  ;;  %v442_v34 = vpop.f32.mrf.mxu2  ;;  %v462_v35 = vpop.f32.mrf.mxu3  ;;  %v756_v43 = vadd.f32 1.0, %v1285_v36 }
  0xc1   : > { %1296 = vpow2.f32 %v719_v26  ;;  %v405_v40 = vpop.f32.mrf.mxu0  ;;  %v1287_v41 = vpop.eup %1286  ;;  %v1616_v44 = vadd.f32 %v1559_v27, %v462_v35  ;;  %v1641_v21 = vadd.f32 %v1559_v27, %v442_v34 }
  0xc2   : > { %1298 = vpow2.f32 %v703_v29  ;;  %875 = vrot.lane.b32.xlu0 %v1283_v33, %s1467_s6  ;;  %v1620_v45 = vadd.f32 %v1559_v27, %v405_v40  ;;  %v1289_v46 = vpop.eup %1288  ;;  %v425_v48 = vpop.f32.mrf.mxu1  ;;  %v740_v52 = vadd.f32 1.0, %v1287_v41 }
  0xc3   : > { %1300 = vpow2.f32 %v689_v32  ;;  %v1291_v49 = vpop.eup %1290  ;;  %v662_v50 = vsub.f32 0.0, %v1616_v44  ;;  %v733_v58 = vadd.f32 1.0, %v1289_v46  ;;  %v1634_v6 = vadd.f32 %v1559_v27, %v425_v48 }
  0xc4   : > { %1302 = vrcp.f32 %v756_v43  ;;  %v1293_v51 = vpop.eup %1292  ;;  %859 = vrot.lane.b32.xlu1 %v1291_v49, %s1467_s6  ;;  %v639_v53 = vsub.f32 0.0, %v1620_v45  ;;  %v654_v28 = vsub.f32 0.0, %v1641_v21  ;;  %vm479_vm11 = vcmp.gt.f32.partialorder %v1620_v45, 0.0 }
  0xc5   : > { %1304 = vpow2.f32 %v687_v37  ;;  %v721_v0 = vmul.f32 1.442695, %v662_v50  ;;  %v647_v11 = vsub.f32 0.0, %v1634_v6 }
  0xc6   : > { %v1295_v54 = vpop.eup %1294  ;;  %1306 = vrcp.f32 %v740_v52  ;;  %v675_v3 = vmul.f32 1.442695, %v639_v53  ;;  %v705_v41 = vmul.f32 1.442695, %v654_v28 }
  0xc7   : > { %v1297_v57 = vpop.eup %1296  ;;  %861 = vrot.lane.b32.xlu2 %v1295_v54, %s1467_s6  ;;  %v691_v24 = vmul.f32 1.442695, %v647_v11 }
  0xc8   : > { %v1299_v61 = vpop.eup %1298  ;;  %v757_v63 = vadd.f32 1.0, %v1297_v57  ;;  %v445_v1 = vpop.f32.mrf.mxu2 }
  0xc9   : > { %v1301_v2 = vpop.eup %1300  ;;  %v1631_v4 = vadd.f32 %v1559_v27, %v445_v1  ;;  %v749_v14 = vadd.f32 1.0, %v1299_v61  ;;  %v407_v17 = vpop.f32.mrf.mxu0 }
  0xca   : > { %v1303_v5 = vpop.eup %1302  ;;  %1308 = vrcp.f32 %v757_v63  ;;  %829 = vrot.lane.b32.xlu0 %v1293_v51, %s1467_s6  ;;  %v742_v10 = vadd.f32 1.0, %v1301_v2  ;;  %v427_v15 = vpop.f32.mrf.mxu1  ;;  %v1645_v29 = vadd.f32 %v1559_v27, %v407_v17 }
  0xcb   : > { %v1305_v7 = vpop.eup %1304  ;;  %1310 = vrcp.f32 %v733_v58  ;;  %v655_v9 = vsub.f32 0.0, %v1631_v4  ;;  %v465_v37 = vpop.f32.mrf.mxu3  ;;  %vm495_vm14 = vcmp.gt.f32.partialorder %v1631_v4, 0.0 }
  0xcc   : > { %1312 = vpow2.f32 %v721_v0  ;;  %877 = vrot.lane.b32.xlu1 %v1303_v5, %s1467_s6  ;;  %v741_v16 = vadd.f32 1.0, %v1305_v7  ;;  %v1307_v20 = vpop.eup %1306  ;;  %v640_v34 = vsub.f32 0.0, %v1645_v29  ;;  %v1654_v43 = vadd.f32 %v1559_v27, %v465_v37 }
  0xcd   : > { %1314 = vpow2.f32 %v675_v3  ;;  %v707_v22 = vmul.f32 1.442695, %v655_v9  ;;  %vm480_vm1 = vcmp.gt.f32.partialorder %v1645_v29, 0.0 }
  0xce   : > { %1316 = vpow2.f32 %v673_v8  ;;  %v663_v51 = vsub.f32 0.0, %v1654_v43  ;;  %v677_v52 = vmul.f32 1.442695, %v640_v34 }
  0xcf   : > { %1318 = vrcp.f32 %v742_v10  ;;  %v1670_v10 = vadd.f32 %v1559_v27, %v427_v15 }
  0xd0   : > { %v1309_v23 = vpop.eup %1308  ;;  %v447_v25 = vpop.f32.mrf.mxu2  ;;  %1320 = vrcp.f32 %v749_v14  ;;  %v723_v3 = vmul.f32 1.442695, %v663_v51 }
  0xd1   : > { %v1311_v26 = vpop.eup %1310  ;;  %879 = vrot.lane.b32.xlu2 %v1309_v23, %s1467_s6  ;;  %1322 = vrcp.f32 %v741_v16  ;;  %v1651_v35 = vadd.f32 %v1559_v27, %v447_v25  ;;  %v410_v61 = vpop.f32.mrf.mxu0  ;;  %v648_v16 = vsub.f32 0.0, %v1670_v10 }
  0xd2   : > { %v1313_v32 = vpop.eup %1312  ;;  %845 = vrot.lane.b32.xlu0 %v1307_v20, %s1467_s6  ;;  %1324 = vpow2.f32 %v707_v22  ;;  %v430_v53 = vpop.f32.mrf.mxu1  ;;  %v1664_v2 = vadd.f32 %v1559_v27, %v410_v61 }
  0xd3   : > { %v1315_v33 = vpop.eup %1314  ;;  %1326 = vpow2.f32 %v691_v24  ;;  %v656_v46 = vsub.f32 0.0, %v1651_v35  ;;  %v758_v49 = vadd.f32 1.0, %v1313_v32  ;;  %v1660_v63 = vadd.f32 %v1559_v27, %v430_v53  ;;  %v467_v28 = vpop.f32.mrf.mxu3 }
  0xd4   : > { %v735_v36 = vadd.f32 1.0, %v1315_v33  ;;  %v1317_v40 = vpop.eup %1316  ;;  %831 = vrot.lane.b32.xlu1 %v1311_v26, %s1467_s6  ;;  %v641_v8 = vsub.f32 0.0, %v1664_v2  ;;  %v693_v33 = vmul.f32 1.442695, %v648_v16 }
  0xd5   : > { %v1319_v48 = vpop.eup %1318  ;;  %v709_v60 = vmul.f32 1.442695, %v656_v46  ;;  %v734_v1 = vadd.f32 1.0, %v1317_v40  ;;  %v649_v5 = vsub.f32 0.0, %v1660_v63 }
  0xd6   : > { %v1321_v50 = vpop.eup %1320  ;;  %1328 = vrcp.f32 %v735_v36  ;;  %v679_v22 = vmul.f32 1.442695, %v641_v8 }
  0xd7   : > { %v1323_v54 = vpop.eup %1322  ;;  %1330 = vpow2.f32 %v705_v41  ;;  %v695_v17 = vmul.f32 1.442695, %v649_v5 }
  0xd8   : > { %v450_v57 = vpop.f32.mrf.mxu2  ;;  %v1325_v58 = vpop.eup %1324  ;;  %1332 = vrcp.f32 %v758_v49 }
  0xd9   : > { %849 = vrot.lane.b32.xlu2 %v1319_v48, %s1467_s6  ;;  %v1327_v0 = vpop.eup %1326  ;;  %1334 = vpow2.f32 %v677_v52  ;;  %v751_v7 = vadd.f32 1.0, %v1325_v58  ;;  %v1684_v46 = vadd.f32 %v1559_v27, %v450_v57  ;;  %v1691_v57 = vadd.f32 %v1559_v27, %v467_v28  ;;  %v412_v8 = vpop.f32.mrf.mxu0 }
  0xda   : > { %863 = vrot.lane.b32.xlu0 %v1321_v50, %s1467_s6  ;;  %v743_v9 = vadd.f32 1.0, %v1327_v0  ;;  %1336 = vpow2.f32 %v709_v60  ;;  %v432_v25 = vpop.f32.mrf.mxu1 }
  0xdb   : > { %1338 = vrcp.f32 %v734_v1  ;;  %v1681_v40 = vadd.f32 %v1559_v27, %v432_v25  ;;  %v657_v52 = vsub.f32 0.0, %v1684_v46  ;;  %v470_v0 = vpop.f32.mrf.mxu3  ;;  %v664_v5 = vsub.f32 0.0, %v1691_v57 }
  0xdc   : > { %847 = vrot.lane.b32.xlu1 %v1323_v54, %s1467_s6  ;;  %v1329_v11 = vpop.eup %1328  ;;  %1340 = vpow2.f32 %v723_v3 }
  0xdd   : > { %v1331_v14 = vpop.eup %1330  ;;  %1342 = vrcp.f32 %v751_v7  ;;  %v650_v50 = vsub.f32 0.0, %v1681_v40  ;;  %v711_v1 = vmul.f32 1.442695, %v657_v52 }
  0xde   : > { %v1333_v20 = vpop.eup %1332  ;;  %1344 = vrcp.f32 %v743_v9  ;;  %v750_v26 = vadd.f32 1.0, %v1331_v14  ;;  %v1696_v9 = vadd.f32 %v1559_v27, %v470_v0 }
  0xdf   : > { %v1335_v24 = vpop.eup %1334  ;;  %1346 = vpow2.f32 %v695_v17  ;;  %v697_v61 = vmul.f32 1.442695, %v650_v50 }
  0xe0   : > { %v452_v23 = vpop.f32.mrf.mxu2  ;;  %v1337_v32 = vpop.eup %1336  ;;  %v736_v37 = vadd.f32 1.0, %v1335_v24  ;;  %1348 = vpow2.f32 %v679_v22  ;;  %v665_v17 = vsub.f32 0.0, %v1696_v9 }
  0xe1   : > { %835 = vrot.lane.b32.xlu2 %v1329_v11, %s1467_s6  ;;  %v1676_v15 = vadd.f32 %v1559_v27, %v452_v23  ;;  %v1339_v36 = vpop.eup %1338  ;;  %1350 = vrcp.f32 %v750_v26  ;;  %v752_v49 = vadd.f32 1.0, %v1337_v32  ;;  %v725_v23 = vmul.f32 1.442695, %v664_v5 }
  0xe2   : > { %881 = vrot.lane.b32.xlu0 %v1333_v20, %s1467_s6  ;;  %v1341_v41 = vpop.eup %1340  ;;  %1352 = vpow2.f32 %v693_v33  ;;  %v1701_v20 = vadd.f32 %v1559_v27, %v412_v8  ;;  %v727_v32 = vmul.f32 1.442695, %v665_v17 }
  0xe3   : > { %v658_v34 = vsub.f32 0.0, %v1676_v15  ;;  %v1343_v48 = vpop.eup %1342  ;;  %v759_v54 = vadd.f32 1.0, %v1341_v41  ;;  %1354 = vrcp.f32 %v736_v37 }
  0xe4   : > { %833 = vrot.lane.b32.xlu1 %v1339_v36, %s1467_s6  ;;  %v1345_v51 = vpop.eup %1344  ;;  %1356 = vrcp.f32 %v752_v49  ;;  %v642_v26 = vsub.f32 0.0, %v1701_v20  ;;  %v472_v36 = vpop.f32.mrf.mxu3 }
  0xe5   : > { %v713_v53 = vmul.f32 1.442695, %v658_v34  ;;  %v1347_v58 = vpop.eup %1346 }
  0xe6   : > { %v1349_v60 = vpop.eup %1348  ;;  %v745_v7 = vadd.f32 1.0, %v1347_v58  ;;  %v681_v41 = vmul.f32 1.442695, %v642_v26  ;;  %v541_v26 = vmul.f32 1.442695, %v1582_v55 }
  0xe7   : > { %1358 = vpow2.f32 %v713_v53  ;;  %v1351_v3 = vpop.eup %1350  ;;  %v737_v14 = vadd.f32 1.0, %v1349_v60 }
  0xe8   : > { %1360 = vrcp.f32 %v759_v54  ;;  %v1353_v11 = vpop.eup %1352 }
  0xe9   : > { %867 = vrot.lane.b32.xlu2 %v1343_v48, %s1467_s6  ;;  %v1355_v16 = vpop.eup %1354  ;;  %1362 = vpow2.f32 %v697_v61  ;;  %v744_v25 = vadd.f32 1.0, %v1353_v11 }
  0xea   : > { %851 = vrot.lane.b32.xlu0 %v1345_v51, %s1467_s6  ;;  %1364 = vpow2.f32 %v711_v1  ;;  %v1357_v22 = vpop.eup %1356  ;;  %v1708_v51 = vadd.f32 %v1559_v27, %v472_v36 }
  0xeb   : > { %1366 = vrcp.f32 %v745_v7  ;;  %v523_v7 = vmul.f32 1.442695, %v1565_v31 }
  0xec   : > { %865 = vrot.lane.b32.xlu1 %v1351_v3, %s1467_s6  ;;  %1368 = vrcp.f32 %v737_v14  ;;  %v666_v53 = vsub.f32 0.0, %v1708_v51 }
  0xed   : > { %v1359_v24 = vpop.eup %1358  ;;  %1370 = vpow2.f32 %v725_v23 }
  0xee   : > { %v1361_v28 = vpop.eup %1360  ;;  %v754_v34 = vadd.f32 1.0, %v1359_v24  ;;  %1372 = vrcp.f32 %v744_v25  ;;  %v729_v61 = vmul.f32 1.442695, %v666_v53  ;;  %v529_v53 = vmul.f32 1.442695, %v1609_v19 }
  0xef   : > { %v1363_v33 = vpop.eup %1362  ;;  %1374 = vpow2.f32 %v727_v32 }
  0xf0   : > { %v1365_v37 = vpop.eup %1364  ;;  %v746_v50 = vadd.f32 1.0, %v1363_v33  ;;  %1376 = vrcp.f32 %v754_v34 }
  0xf1   : > { %837 = vrot.lane.b32.xlu2 %v1355_v16, %s1467_s6  ;;  %v1367_v48 = vpop.eup %1366  ;;  %v753_v52 = vadd.f32 1.0, %v1365_v37  ;;  %1378 = vpow2.f32 %v681_v41  ;;  %v507_v41 = vmul.f32 1.442695, %v1562_v30 }
  0xf2   : > { %869 = vrot.lane.b32.xlu0 %v1357_v22, %s1467_s6  ;;  %v1369_v49 = vpop.eup %1368  ;;  %1380 = vrcp.f32 %v746_v50 }
  0xf3   : > { %v1371_v54 = vpop.eup %1370  ;;  %1382 = vrcp.f32 %v753_v52 }
  0xf4   : > { %883 = vrot.lane.b32.xlu1 %v1361_v28, %s1467_s6  ;;  %v1373_v58 = vpop.eup %1372  ;;  %v760_v27 = vadd.f32 1.0, %v1371_v54  ;;  %1384 = vpow2.f32 %v729_v61  ;;  %v555_v54 = vmul.f32 1.442695, %v1573_v39 }
  0xf5   : > { %v1375_v60 = vpop.eup %1374 }
  0xf6   : > { %v1377_v0 = vpop.eup %1376  ;;  %v761_v3 = vadd.f32 1.0, %v1375_v60  ;;  %1386 = vrcp.f32 %v760_v27 }
  0xf7   : > { %v1379_v1 = vpop.eup %1378 }
  0xf8   : > { %v1381_v5 = vpop.eup %1380  ;;  %v738_v11 = vadd.f32 1.0, %v1379_v1  ;;  %1388 = vrcp.f32 %v761_v3 }
  0xf9   : > { %855 = vrot.lane.b32.xlu2 %v1367_v48, %s1467_s6  ;;  %v1383_v8 = vpop.eup %1382  ;;  %1390 = vpow2.f32 %v523_v7  ;;  %v509_v7 = vmul.f32 1.442695, %v1576_v42 }
  0xfa   : > { %839 = vrot.lane.b32.xlu0 %v1369_v49, %s1467_s6  ;;  %1392 = vrcp.f32 %v738_v11  ;;  %v1385_v14 = vpop.eup %1384 }
  0xfb   : > { %v762_v22 = vadd.f32 1.0, %v1385_v14 }
  0xfc   : > { %853 = vrot.lane.b32.xlu1 %v1373_v58, %s1467_s6  ;;  %v1387_v16 = vpop.eup %1386 }
  0xfd   : > { %1394 = vrcp.f32 %v762_v22 }
  0xfe   : > { %v1389_v17 = vpop.eup %1388  ;;  %1396 = vpow2.f32 %v541_v26 }
  0xff   : > { %v1391_v23 = vpop.eup %1390 }
 0x100   : > { %v1393_v24 = vpop.eup %1392  ;;  %v1193_v25 = vadd.f32 -1.0, %v1391_v23 }
 0x101   : > { %873 = vrot.lane.b32.xlu2 %v1377_v0, %s1467_s6  ;;  %v539_v0 = vmul.f32 1.442695, %v1570_v38 }
 0x102   : > { %857 = vrot.lane.b32.xlu0 %v1381_v5, %s1467_s6  ;;  %v611_v32 = vsel %vm483_vm3, %v1565_v31, %v1193_v25  ;;  %v559_v31 = vmul.f32 1.442695, %v1601_v13  ;;  %vm485_vm3 = vcmp.gt.f32.partialorder %v1605_v18, 0.0 }
 0x103   : > { %v1395_v33 = vpop.eup %1394 }
 0x104   : > { %871 = vrot.lane.b32.xlu1 %v1383_v8, %s1467_s6  ;;  %v1397_v37 = vpop.eup %1396  ;;  %1398 = vpow2.f32 %v559_v31 }
 0x105   : > { %v1202_v48 = vadd.f32 -1.0, %v1397_v37  ;;  %1400 = vpow2.f32 %v507_v41 }
 0x106   : > { %1402 = vpow2.f32 %v529_v53 }
 0x107   : > { %v620_v49 = vsel %vm492_vm5, %v1582_v55, %v1202_v48  ;;  %1404 = vpow2.f32 %v555_v54  ;;  %v515_v55 = vmul.f32 1.442695, %v1620_v45  ;;  %vm489_vm5 = vcmp.gt.f32.partialorder %v1660_v63, 0.0 }
 0x108   : > { %1406 = vpow2.f32 %v539_v0 }
 0x109   : > { %885 = vrot.lane.b32.xlu2 %v1387_v16, %s1467_s6  ;;  %1408 = vpow2.f32 %v515_v55 }
 0x10a   : > { %887 = vrot.lane.b32.xlu0 %v1389_v17, %s1467_s6  ;;  %v1399_v58 = vpop.eup %1398  ;;  %1410 = vpow2.f32 %v509_v7 }
 0x10b   : > { %v1401_v61 = vpop.eup %1400  ;;  %v1211_v27 = vadd.f32 -1.0, %v1399_v58 }
 0x10c   : > { %841 = vrot.lane.b32.xlu1 %v1393_v24, %s1467_s6  ;;  %v1185_v1 = vadd.f32 -1.0, %v1401_v61  ;;  %v1403_v8 = vpop.eup %1402  ;;  %v557_v24 = vmul.f32 1.442695, %v1585_v56 }
 0x10d   : > { %v629_v3 = vsel %vm501_vm6, %v1601_v13, %v1211_v27  ;;  %v1405_v17 = vpop.eup %1404  ;;  %v1196_v13 = vadd.f32 -1.0, %v1403_v8  ;;  %vm502_vm6 = vcmp.gt.f32.partialorder %v1616_v44, 0.0 }
 0x10e   : > { %v603_v16 = vsel %vm475_vm7, %v1562_v30, %v1185_v1  ;;  %v1407_v26 = vpop.eup %1406  ;;  %1412 = vpow2.f32 %v557_v24  ;;  %v547_v30 = vmul.f32 1.442695, %v1631_v4  ;;  %v517_v1 = vmul.f32 1.442695, %v1645_v29 }
 0x10f   : > { %v1409_v37 = vpop.eup %1408  ;;  %vm478_vm7 = vcmp.gt.f32.partialorder %v1623_v47, 0.0 }
 0x110   : > { %1414 = vpow2.f32 %v547_v30 }
 0x112   : > { %v844_v28 = vpop.permute.xlu2 %843 }
 0x113   : > { %v931_v34 = vmul.f32 %v844_v28, %v611_v32  ;;  %v1209_v28 = vadd.f32 -1.0, %v1405_v17  ;;  %v1201_v32 = vadd.f32 -1.0, %v1407_v26 }
 0x114   : > { %889 = vrot.lane.b32.xlu1 %v1395_v33, %s1467_s6  ;;  %v614_v33 = vsel %vm486_vm8, %v1609_v19, %v1196_v13  ;;  %v511_v19 = vmul.f32 1.442695, %v1593_v62  ;;  %vm487_vm8 = vcmp.gt.f32.partialorder %v1634_v6, 0.0 }
 0x115   : > { %v963_v36 = vpack.c.bf16 %v931_v34, %v931_v34  ;;  %v627_v41 = vsel %vm499_vm9, %v1573_v39, %v1209_v28  ;;  %v619_v54 = vsel %vm491_vm10, %v1570_v38, %v1201_v32  ;;  %v535_v32 = vmul.f32 1.442695, %v1660_v63 }
 0x116   : > { %vm498_vm9 = vcmp.gt.f32.partialorder %v1676_v15, 0.0  ;;  %vm494_vm10 = vcmp.gt.f32.partialorder %v1641_v21, 0.0 }
 0x117   : > { %996 = vst.msk [vmem:[%s1730_s9 + $0x20] sm:$0xf] %vm987_vm4, %v963_v36  ;;  %v525_v36 = vmul.f32 1.442695, %v1588_v59 }
 0x119   : > { %1416 = vpow2.f32 %v525_v36  ;;  %v561_v36 = vmul.f32 1.442695, %v1616_v44 }
 0x11a   : > { %1418 = vpow2.f32 %v511_v19 }
 0x11b   : > { %1420 = vpow2.f32 %v517_v1 }
 0x121   : > { %v862_v50 = vpop.permute.xlu2 %861 }
 0x122   : > { %v940_v52 = vmul.f32 %v862_v50, %v620_v49  ;;  %v1411_v49 = vpop.eup %1410 }
 0x123   : > { %v1413_v61 = vpop.eup %1412  ;;  %v1186_v39 = vadd.f32 -1.0, %v1411_v49 }
 0x124   : > { %v972_v60 = vpack.c.bf16 %v940_v52, %v940_v52  ;;  %v1210_v55 = vadd.f32 -1.0, %v1413_v61  ;;  %v1415_v7 = vpop.eup %1414 }
 0x125   : > { %v1205_v13 = vadd.f32 -1.0, %v1415_v7 }
 0x126   : > { %1005 = vst.msk [vmem:[%s1730_s9 + $0x44] sm:$0xf] %vm987_vm4, %v972_v60  ;;  %v1189_v60 = vadd.f32 -1.0, %v1409_v37 }
 0x128   : > { %v607_v38 = vsel %vm479_vm11, %v1620_v45, %v1189_v60  ;;  %v527_v45 = vmul.f32 1.442695, %v1605_v18  ;;  %vm504_vm11 = vcmp.gt.f32.partialorder %v1691_v57, 0.0 }
 0x12b   : > { %v880_v5 = vpop.permute.xlu2 %879 }
 0x12c   : > { %v949_v11 = vmul.f32 %v880_v5, %v629_v3  ;;  %v828_v14 = vpop.permute.xlu0 %827  ;;  %v543_v5 = vmul.f32 1.442695, %v1598_v12 }
 0x12d   : > { %v923_v22 = vmul.f32 %v828_v14, %v603_v16  ;;  %v1417_v16 = vpop.eup %1416 }
 0x12e   : > { %v981_v23 = vpack.c.bf16 %v949_v11, %v949_v11  ;;  %v604_v11 = vsel %vm476_vm12, %v1576_v42, %v1186_v39  ;;  %1422 = vpow2.f32 %v543_v5  ;;  %v1419_v26 = vpop.eup %1418  ;;  %v1194_v42 = vadd.f32 -1.0, %v1417_v16 }
 0x12f   : > { %v955_v25 = vpack.c.bf16 %v923_v22, %v923_v22  ;;  %1424 = vpow2.f32 %v527_v45  ;;  %v1421_v37 = vpop.eup %1420  ;;  %v553_v39 = vmul.f32 1.442695, %v1676_v15  ;;  %vm496_vm12 = vcmp.gt.f32.partialorder %v1651_v35, 0.0 }
 0x130   : > { %1014 = vst.msk [vmem:[%s1730_s9 + $0x68] sm:$0xf] %vm987_vm4, %v981_v23  ;;  %v628_v23 = vsel %vm500_vm13, %v1585_v56, %v1210_v55  ;;  %v623_v56 = vsel %vm495_vm14, %v1631_v4, %v1205_v13  ;;  %1426 = vpow2.f32 %v535_v32  ;;  %v513_v4 = vmul.f32 1.442695, %v1623_v47 }
 0x131   : > { %988 = vst.msk [vmem:[%s1730_s9] sm:$0xf] %vm987_vm4, %v955_v25  ;;  %1428 = vpow2.f32 %v561_v36  ;;  %v531_v55 = vmul.f32 1.442695, %v1634_v6  ;;  %v565_v13 = vmul.f32 1.442695, %v1691_v57 }
 0x132   : > { %1430 = vpow2.f32 %v513_v4  ;;  %vm503_vm13 = vcmp.gt.f32.partialorder %v1654_v43, 0.0  ;;  %vm481_vm14 = vcmp.gt.f32.partialorder %v1664_v2, 0.0 }
 0x133   : > { %v850_v34 = vpop.permute.xlu2 %849  ;;  %1432 = vpow2.f32 %v553_v39 }
 0x134   : > { %v934_v31 = vmul.f32 %v850_v34, %v614_v33  ;;  %v876_v48 = vpop.permute.xlu0 %875  ;;  %v1187_v34 = vadd.f32 -1.0, %v1419_v26  ;;  %v1423_v49 = vpop.eup %1422  ;;  %1434 = vpow2.f32 %v531_v55 }
 0x135   : > { %v947_v50 = vmul.f32 %v876_v48, %v627_v41  ;;  %v612_v41 = vsel %vm484_vm15, %v1588_v59, %v1194_v42  ;;  %v1425_v60 = vpop.eup %1424  ;;  %v1203_v61 = vadd.f32 -1.0, %v1423_v49  ;;  %v549_v42 = vmul.f32 1.442695, %v1651_v35 }
 0x136   : > { %v966_v52 = vpack.c.bf16 %v934_v31, %v934_v31  ;;  %v860_v53 = vpop.permute.xlu1 %859  ;;  %v1195_v1 = vadd.f32 -1.0, %v1425_v60  ;;  %vm488_vm15 = vcmp.gt.f32.partialorder %v1670_v10, 0.0 }
 0x137   : > { %v979_v58 = vpack.c.bf16 %v947_v50, %v947_v50  ;;  %v939_v0 = vmul.f32 %v860_v53, %v619_v54  ;;  %v605_v53 = vsel %vm477_vm0, %v1593_v62, %v1187_v34  ;;  %v621_v5 = vsel %vm493_vm2, %v1598_v12, %v1203_v61 }
 0x138   : > { %999 = vst.msk [vmem:[%s1730_s9 + $0x2c] sm:$0xf] %vm987_vm4, %v966_v52  ;;  %v613_v16 = vsel %vm485_vm3, %v1605_v18, %v1195_v1  ;;  %vm490_vm0 = vcmp.gt.f32.partialorder %v1681_v40, 0.0  ;;  %vm505_vm2 = vcmp.gt.f32.partialorder %v1696_v9, 0.0  ;;  %vm482_vm3 = vcmp.gt.f32.partialorder %v1701_v20, 0.0 }
 0x139   : > { %1012 = vst.msk [vmem:[%s1730_s9 + $0x60] sm:$0xf] %vm987_vm4, %v979_v58  ;;  %v971_v27 = vpack.c.bf16 %v939_v0, %v939_v0  ;;  %v1190_v58 = vadd.f32 -1.0, %v1421_v37 }
 0x13b   : > { %v836_v3 = vpop.permute.xlu2 %835  ;;  %1004 = vst.msk [vmem:[%s1730_s9 + $0x40] sm:$0xf] %vm987_vm4, %v971_v27  ;;  %v608_v62 = vsel %vm480_vm1, %v1645_v29, %v1190_v58  ;;  %v545_v29 = vmul.f32 1.442695, %v1641_v21  ;;  %vm497_vm1 = vcmp.gt.f32.partialorder %v1684_v46, 0.0 }
 0x13c   : > { %v927_v8 = vmul.f32 %v836_v3, %v607_v38  ;;  %v830_v14 = vpop.permute.xlu0 %829  ;;  %v1427_v3 = vpop.eup %1426 }
 0x13d   : > { %v924_v17 = vmul.f32 %v830_v14, %v604_v11  ;;  %v1199_v45 = vadd.f32 -1.0, %v1427_v3  ;;  %1436 = vpow2.f32 %v545_v29 }
 0x13e   : > { %v959_v22 = vpack.c.bf16 %v927_v8, %v927_v8  ;;  %v878_v24 = vpop.permute.xlu1 %877  ;;  %v1429_v8 = vpop.eup %1428  ;;  %1438 = vpow2.f32 %v565_v13 }
 0x13f   : > { %v956_v25 = vpack.c.bf16 %v924_v17, %v924_v17  ;;  %v948_v28 = vmul.f32 %v878_v24, %v628_v23  ;;  %v1431_v23 = vpop.eup %1430  ;;  %v1212_v12 = vadd.f32 -1.0, %v1429_v8  ;;  %v617_v18 = vsel %vm489_vm5, %v1660_v63, %v1199_v45 }
 0x140   : > { %992 = vst.msk [vmem:[%s1730_s9 + $0x10] sm:$0xf] %vm987_vm4, %v959_v22  ;;  %v563_v63 = vmul.f32 1.442695, %v1654_v43  ;;  %1440 = vpow2.f32 %v549_v42  ;;  %v567_v42 = vmul.f32 1.442695, %v1696_v9 }
 0x141   : > { %989 = vst.msk [vmem:[%s1730_s9 + $0x4] sm:$0xf] %vm987_vm4, %v956_v25  ;;  %v980_v30 = vpack.c.bf16 %v948_v28, %v948_v28  ;;  %v1188_v28 = vadd.f32 -1.0, %v1431_v23  ;;  %vm506_vm5 = vcmp.gt.f32.partialorder %v1708_v51, 0.0 }
 0x142   : > { %1442 = vpow2.f32 %v563_v63 }
 0x143   : > { %v868_v33 = vpop.permute.xlu2 %867  ;;  %1013 = vst.msk [vmem:[%s1730_s9 + $0x64] sm:$0xf] %vm987_vm4, %v980_v30  ;;  %v1433_v30 = vpop.eup %1432 }
 0x144   : > { %v943_v31 = vmul.f32 %v868_v33, %v623_v56  ;;  %v846_v48 = vpop.permute.xlu0 %845  ;;  %v630_v56 = vsel %vm502_vm6, %v1616_v44, %v1212_v12  ;;  %v1435_v34 = vpop.eup %1434  ;;  %v1208_v49 = vadd.f32 -1.0, %v1433_v30 }
 0x145   : > { %v932_v50 = vmul.f32 %v846_v48, %v612_v41 }
 0x146   : > { %v975_v52 = vpack.c.bf16 %v943_v31, %v943_v31  ;;  %v832_v19 = vpop.permute.xlu1 %831  ;;  %v606_v31 = vsel %vm478_vm7, %v1623_v47, %v1188_v28  ;;  %v626_v47 = vsel %vm498_vm9, %v1676_v15, %v1208_v49  ;;  %v533_v15 = vmul.f32 1.442695, %v1670_v10 }
 0x147   : > { %v964_v54 = vpack.c.bf16 %v932_v50, %v932_v50  ;;  %v925_v59 = vmul.f32 %v832_v19, %v605_v53  ;;  %v1437_v50 = vpop.eup %1436 }
 0x148   : > { %1008 = vst.msk [vmem:[%s1730_s9 + $0x50] sm:$0xf] %vm987_vm4, %v975_v52  ;;  %v1197_v52 = vadd.f32 -1.0, %v1435_v34  ;;  %v1204_v53 = vadd.f32 -1.0, %v1437_v50  ;;  %v1439_v58 = vpop.eup %1438 }
 0x149   : > { %997 = vst.msk [vmem:[%s1730_s9 + $0x24] sm:$0xf] %vm987_vm4, %v964_v54  ;;  %v957_v0 = vpack.c.bf16 %v925_v59, %v925_v59  ;;  %v519_v54 = vmul.f32 1.442695, %v1664_v2  ;;  %v1214_v3 = vadd.f32 -1.0, %v1439_v58 }
 0x14a   : > { %v615_v59 = vsel %vm487_vm8, %v1634_v6, %v1197_v52  ;;  %v569_v52 = vmul.f32 1.442695, %v1708_v51 }
 0x14b   : > { %v838_v27 = vpop.permute.xlu2 %837  ;;  %990 = vst.msk [vmem:[%s1730_s9 + $0x8] sm:$0xf] %vm987_vm4, %v957_v0  ;;  %v1441_v0 = vpop.eup %1440  ;;  %1444 = vpow2.f32 %v519_v54  ;;  %v632_v8 = vsel %vm504_vm11, %v1691_v57, %v1214_v3  ;;  %v551_v57 = vmul.f32 1.442695, %v1684_v46 }
 0x14c   : > { %v928_v38 = vmul.f32 %v838_v27, %v608_v62  ;;  %v864_v7 = vpop.permute.xlu0 %863  ;;  %v622_v27 = vsel %vm494_vm10, %v1641_v21, %v1204_v53  ;;  %1446 = vpow2.f32 %v533_v15 }
 0x14d   : > { %v941_v11 = vmul.f32 %v864_v7, %v621_v5  ;;  %v1206_v5 = vadd.f32 -1.0, %v1441_v0 }
 0x14e   : > { %v960_v14 = vpack.c.bf16 %v928_v38, %v928_v38  ;;  %v848_v17 = vpop.permute.xlu1 %847  ;;  %v1443_v38 = vpop.eup %1442 }
 0x14f   : > { %v973_v22 = vpack.c.bf16 %v941_v11, %v941_v11  ;;  %v933_v24 = vmul.f32 %v848_v17, %v613_v16  ;;  %v1213_v21 = vadd.f32 -1.0, %v1443_v38  ;;  %v624_v16 = vsel %vm496_vm12, %v1651_v35, %v1206_v5 }
 0x150   : > { %993 = vst.msk [vmem:[%s1730_s9 + $0x14] sm:$0xf] %vm987_vm4, %v960_v14  ;;  %v537_v14 = vmul.f32 1.442695, %v1681_v40 }
 0x151   : > { %1006 = vst.msk [vmem:[%s1730_s9 + $0x48] sm:$0xf] %vm987_vm4, %v973_v22  ;;  %v965_v25 = vpack.c.bf16 %v933_v24, %v933_v24  ;;  %v1445_v22 = vpop.eup %1444  ;;  %v631_v24 = vsel %vm503_vm13, %v1654_v43, %v1213_v21 }
 0x152   : > { %1448 = vpow2.f32 %v537_v14  ;;  %v1447_v13 = vpop.eup %1446 }
 0x153   : > { %v856_v26 = vpop.permute.xlu2 %855  ;;  %998 = vst.msk [vmem:[%s1730_s9 + $0x28] sm:$0xf] %vm987_vm4, %v965_v25  ;;  %1450 = vpow2.f32 %v551_v57  ;;  %v1198_v28 = vadd.f32 -1.0, %v1447_v13 }
 0x154   : > { %v937_v32 = vmul.f32 %v856_v26, %v617_v18  ;;  %v882_v33 = vpop.permute.xlu0 %881  ;;  %v1191_v26 = vadd.f32 -1.0, %v1445_v22  ;;  %1452 = vpow2.f32 %v567_v42 }
 0x155   : > { %v950_v36 = vmul.f32 %v882_v33, %v630_v56  ;;  %v521_v33 = vmul.f32 1.442695, %v1701_v20  ;;  %v616_v34 = vsel %vm488_vm15, %v1670_v10, %v1198_v28 }
 0x156   : > { %v969_v37 = vpack.c.bf16 %v937_v32, %v937_v32  ;;  %v834_v41 = vpop.permute.xlu1 %833  ;;  %v609_v43 = vsel %vm481_vm14, %v1664_v2, %v1191_v26 }
 0x157   : > { %v982_v48 = vpack.c.bf16 %v950_v36, %v950_v36  ;;  %v926_v44 = vmul.f32 %v834_v41, %v606_v31  ;;  %1454 = vpow2.f32 %v521_v33 }
 0x158   : > { %1002 = vst.msk [vmem:[%s1730_s9 + $0x38] sm:$0xf] %vm987_vm4, %v969_v37  ;;  %v1449_v32 = vpop.eup %1448  ;;  %1456 = vpow2.f32 %v569_v52 }
 0x159   : > { %1015 = vst.msk [vmem:[%s1730_s9 + $0x6c] sm:$0xf] %vm987_vm4, %v982_v48  ;;  %v958_v4 = vpack.c.bf16 %v926_v44, %v926_v44  ;;  %v1451_v63 = vpop.eup %1450  ;;  %v1200_v41 = vadd.f32 -1.0, %v1449_v32 }
 0x15a   : > { %v1207_v2 = vadd.f32 -1.0, %v1451_v63  ;;  %v1453_v50 = vpop.eup %1452 }
 0x15b   : > { %v874_v19 = vpop.permute.xlu2 %873  ;;  %991 = vst.msk [vmem:[%s1730_s9 + $0xc] sm:$0xf] %vm987_vm4, %v958_v4  ;;  %v618_v10 = vsel %vm490_vm0, %v1681_v40, %v1200_v41  ;;  %v1215_v58 = vadd.f32 -1.0, %v1453_v50 }
 0x15c   : > { %v946_v60 = vmul.f32 %v874_v19, %v626_v47  ;;  %v852_v61 = vpop.permute.xlu0 %851  ;;  %v625_v4 = vsel %vm497_vm1, %v1684_v46, %v1207_v2 }
 0x15d   : > { %v935_v39 = vmul.f32 %v852_v61, %v615_v59  ;;  %v1455_v53 = vpop.eup %1454  ;;  %v633_v46 = vsel %vm505_vm2, %v1696_v9, %v1215_v58 }
 0x15e   : > { %v978_v62 = vpack.c.bf16 %v946_v60, %v946_v60  ;;  %v866_v1 = vpop.permute.xlu1 %865  ;;  %v1192_v40 = vadd.f32 -1.0, %v1455_v53  ;;  %v1457_v15 = vpop.eup %1456 }
 0x15f   : > { %v967_v55 = vpack.c.bf16 %v935_v39, %v935_v39  ;;  %v942_v6 = vmul.f32 %v866_v1, %v622_v27 }
 0x160   : > { %1011 = vst.msk [vmem:[%s1730_s9 + $0x5c] sm:$0xf] %vm987_vm4, %v978_v62  ;;  %v610_v0 = vsel %vm482_vm3, %v1701_v20, %v1192_v40 }
 0x161   : > { %1000 = vst.msk [vmem:[%s1730_s9 + $0x30] sm:$0xf] %vm987_vm4, %v967_v55  ;;  %v974_v7 = vpack.c.bf16 %v942_v6, %v942_v6  ;;  %v1216_v55 = vadd.f32 -1.0, %v1457_v15 }
 0x163   : > { %v886_v11 = vpop.permute.xlu2 %885  ;;  %1007 = vst.msk [vmem:[%s1730_s9 + $0x4c] sm:$0xf] %vm987_vm4, %v974_v7  ;;  %v634_v3 = vsel %vm506_vm5, %v1708_v51, %v1216_v55 }
 0x164   : > { %v952_v29 = vmul.f32 %v886_v11, %v632_v8  ;;  %v870_v17 = vpop.permute.xlu0 %869 }
 0x165   : > { %v944_v45 = vmul.f32 %v870_v17, %v624_v16 }
 0x166   : > { %v984_v23 = vpack.c.bf16 %v952_v29, %v952_v29  ;;  %v884_v12 = vpop.permute.xlu1 %883 }
 0x167   : > { %v976_v25 = vpack.c.bf16 %v944_v45, %v944_v45  ;;  %v951_v18 = vmul.f32 %v884_v12, %v631_v24 }
 0x168   : > { %1017 = vst.msk [vmem:[%s1730_s9 + $0x74] sm:$0xf] %vm987_vm4, %v984_v23 }
 0x169   : > { %1009 = vst.msk [vmem:[%s1730_s9 + $0x54] sm:$0xf] %vm987_vm4, %v976_v25  ;;  %v983_v35 = vpack.c.bf16 %v951_v18, %v951_v18 }
 0x16b   : > { %1016 = vst.msk [vmem:[%s1730_s9 + $0x70] sm:$0xf] %vm987_vm4, %v983_v35 }
 0x16c   : > { %v840_v30 = vpop.permute.xlu0 %839 }
 0x16d   : > { %v929_v56 = vmul.f32 %v840_v30, %v609_v43 }
 0x16e   : > { %v854_v36 = vpop.permute.xlu1 %853 }
 0x16f   : > { %v961_v37 = vpack.c.bf16 %v929_v56, %v929_v56  ;;  %v936_v31 = vmul.f32 %v854_v36, %v616_v34 }
 0x171   : > { %994 = vst.msk [vmem:[%s1730_s9 + $0x18] sm:$0xf] %vm987_vm4, %v961_v37  ;;  %v968_v48 = vpack.c.bf16 %v936_v31, %v936_v31 }
 0x173   : > { %1001 = vst.msk [vmem:[%s1730_s9 + $0x34] sm:$0xf] %vm987_vm4, %v968_v48 }
 0x174   : > { %v858_v49 = vpop.permute.xlu0 %857 }
 0x175   : > { %v938_v44 = vmul.f32 %v858_v49, %v618_v10 }
 0x176   : > { %v872_v47 = vpop.permute.xlu1 %871 }
 0x177   : > { %v970_v19 = vpack.c.bf16 %v938_v44, %v938_v44  ;;  %v945_v54 = vmul.f32 %v872_v47, %v625_v4 }
 0x179   : > { %1003 = vst.msk [vmem:[%s1730_s9 + $0x3c] sm:$0xf] %vm987_vm4, %v970_v19  ;;  %v977_v60 = vpack.c.bf16 %v945_v54, %v945_v54 }
 0x17b   : > { %1010 = vst.msk [vmem:[%s1730_s9 + $0x58] sm:$0xf] %vm987_vm4, %v977_v60 }
 0x17c   : > { %v888_v59 = vpop.permute.xlu0 %887 }
 0x17d   : > { %v953_v61 = vmul.f32 %v888_v59, %v633_v46 }
 0x17e   : > { %v842_v39 = vpop.permute.xlu1 %841 }
 0x17f   : > { %v985_v62 = vpack.c.bf16 %v953_v61, %v953_v61  ;;  %v930_v27 = vmul.f32 %v842_v39, %v610_v0 }
 0x181   : > { %1018 = vst.msk [vmem:[%s1730_s9 + $0x78] sm:$0xf] %vm987_vm4, %v985_v62  ;;  %v962_v1 = vpack.c.bf16 %v930_v27, %v930_v27 }
 0x183   : > { %995 = vst.msk [vmem:[%s1730_s9 + $0x1c] sm:$0xf] %vm987_vm4, %v962_v1 }
 0x186   : > { %v890_v9 = vpop.permute.xlu1 %889 }
 0x187   : > { %v954_v38 = vmul.f32 %v890_v9, %v634_v3 }
 0x189   : > { %v986_v6 = vpack.c.bf16 %v954_v38, %v954_v38 }
 0x18b   : > { %1019 = vst.msk [vmem:[%s1730_s9 + $0x7c] sm:$0xf] %vm987_vm4, %v986_v6 }
 0x18c PF: > { %s13_s12 = sadd.s32 1, %s1464_s12  }
 0x18d   : > { %p10_p4 = scmp.ge.s32.totalorder %s13_s12, 4  }
 0x18f   :  { %12 = sbr.rel (!%p10_p4) target bundleno = 1 (0x1), region = 62 }

// kernel: generator_forward.63
= control target key start
LH: loop header
LB: loop body
LE: loop exit
PB: predicated region body
PF: predicated region fallthrough
CT: control target
= control target key end

     0   :  { %s510_s12 = smov 0   ;;  %s561_s0 = inlined_call_operand.vmem [shape: bf16[32,144], index: 0, kind: input, shape index: {}]   ;;  %s562_s1 = inlined_call_operand.vmem [shape: bf16[144,32], index: 1, kind: input, shape index: {}]   ;;  %s563_s2 = inlined_call_operand.vmem [shape: f32[1,32], index: 2, kind: input, shape index: {}]   ;;  %s564_s3 = inlined_call_operand.vmem [shape: bf16[32,16], index: 3, kind: output, shape index: {}]  }
   0x1 LB: > { %s388_s13 = sadd.s32 4294967295, %s487_s12   ;;  %p392_p0 = scmp.ge.s32.totalorder %s487_s12, 1  ;;  %s487_s12 = sphi %s510_s12, %s13_s12  }
   0x2   : > { %p139_p1 = scmp.lt.s32.totalorder %s487_s12, 3 }
   0x4   : > { %p140_p2 = pnand %p392_p0, %p139_p1 }
   0x5   : > { %s393_s16 = sshll.u32 (!%p140_p2), %s388_s13, 1  ;;  %s489_s13 = smov (!%p140_p2), 112  }
   0x6   : > { %143 = sbr.rel (%p140_p2) target bundleno = 321 (0x141), region = 32  ;;  %p165_p3 = scmp.lt.s32.totalorder (!%p140_p2), %s393_s16, 3 }
   0xb   : > { %v457_v0 = vld [vmem:[%s562_s1 + $0x38] sm:$0xff]  ;;  %v456_v1 = vld [vmem:[%s562_s1 + $0x30] sm:$0xff]  ;;  %v458_v2 = vld [vmem:[%s562_s1 + $0x40] sm:$0xff]  ;;  %s566_s16 = smov (!%p165_p3, %s393_s16), 3  ;;  %vm265_vm0 = vcmask 130048   ;;  %vm329_vm2 = vcmask 125952  }
   0xc   : > { %269 = vmatpush.bf16.msra.mxu0 %v457_v0  ;;  %290 = vmatpush.bf16.msra.mxu1 %v458_v2  ;;  %s447_s21 = sshll.u32 %s566_s16, 3  ;;  %v455_v3 = vld [vmem:[%s562_s1 + $0x28] sm:$0xff]  ;;  %v454_v7 = vld [vmem:[%s562_s1 + $0x20] sm:$0xff]  ;;  %v453_v8 = vld [vmem:[%s562_s1 + $0x18] sm:$0xff]  ;;  %s397_s14 = sshll.u32 %s566_s16, 2 }
   0xd   : > { %s169_s26 = scalar_lea.vmem %s561_s0, %s447_s21  ;;  %v452_v9 = vld [vmem:[%s562_s1 + $0x10] sm:$0xff]  ;;  %v451_v10 = vld [vmem:[%s562_s1 + $0x8] sm:$0xff]  ;;  %v450_v11 = vld [vmem:[%s562_s1] sm:$0xff]  ;;  %s175_s18 = scalar_lea.vmem %s564_s3, %s397_s14 }
   0xe   : > { %v448_v4 = vld [vmem:[%s169_s26 + $0x4] sm:$0xf]  ;;  %v402_v5 = vld [vmem:[%s169_s26 + $0x8] sm:$0xf0]  ;;  %v400_v12 = vld [vmem:[%s169_s26] sm:$0xf] }
   0xf   : > { %v405_v6 = vor.u32 %v448_v4, %v402_v5  ;;  %v449_v13 = vld [vmem:[%s169_s26 + $0x4] sm:$0xf0]  ;;  %v468_v15 = vld [vmem:[%s563_s2] ss:$0 sm:$0xff] }
  0x10   : > { %270 = vmatpush.bf16.msra.mxu0 %v456_v1  ;;  %v401_v14 = vor.u32 %v449_v13, %v400_v12 }
  0x11   : > { %442 = vmatmul.msk.bf16.vlgmr.msra.gmra.mxu1 %vm265_vm0, %v405_v6 }
  0x14   : > { %271 = vmatpush.bf16.msra.mxu0 %v455_v3 }
  0x18   : > { %272 = vmatpush.bf16.msra.mxu0 %v454_v7 }
  0x1c   : > { %273 = vmatpush.bf16.msra.mxu0 %v453_v8 }
  0x20   : > { %274 = vmatpush.bf16.msra.mxu0 %v452_v9 }
  0x24   : > { %275 = vmatpush.bf16.msra.mxu0 %v451_v10 }
  0x28   : > { %276 = vmatpush.bf16.msra.mxu0 %v450_v11 }
  0x2b   : > { %277 = vmatmul.bf16.vlgmr.msra.gmra.mxu0 %v401_v14 }
  0x8e   : > { %v292_v16 = vpop.f32.mrf.mxu1 }
  0x96   : > { %v294_v24 = vpop.f32.mrf.mxu1 }
  0xa8   : > { %v278_v17 = vpop.f32.mrf.mxu0 }
  0xa9   : > { %v279_v18 = vadd.f32 %v468_v15, %v278_v17 }
  0xab   : > { %v293_v19 = vadd.f32 %v292_v16, %v279_v18 }
  0xad   : > { %v307_v20 = vsub.f32 0.0, %v293_v19  ;;  %v299_v34 = vmul.f32 1.442695, %v293_v19  ;;  %vm297_vm1 = vcmp.gt.f32.partialorder %v293_v19, 0.0 }
  0xaf   : > { %v309_v21 = vmul.f32 1.442695, %v307_v20 }
  0xb0   : > { %v280_v22 = vpop.f32.mrf.mxu0 }
  0xb1   : > { %v281_v23 = vadd.f32 %v468_v15, %v280_v22  ;;  %469 = vpow2.f32 %v309_v21 }
  0xb3   : > { %v295_v25 = vadd.f32 %v294_v24, %v281_v23 }
  0xb5   : > { %v308_v26 = vsub.f32 0.0, %v295_v25  ;;  %v301_v35 = vmul.f32 1.442695, %v295_v25  ;;  %vm298_vm3 = vcmp.gt.f32.partialorder %v295_v25, 0.0 }
  0xb7   : > { %v470_v27 = vpop.eup %469  ;;  %v311_v28 = vmul.f32 1.442695, %v308_v26 }
  0xb8   : > { %v313_v29 = vadd.f32 1.0, %v470_v27 }
  0xb9   : > { %471 = vpow2.f32 %v311_v28 }
  0xba   : > { %473 = vrcp.f32 %v313_v29 }
  0xbf   : > { %v472_v30 = vpop.eup %471 }
  0xc0   : > { %v474_v31 = vpop.eup %473  ;;  %v314_v32 = vadd.f32 1.0, %v472_v30 }
  0xc1   : > { %319 = vrot.lane.b32.xlu0 %v474_v31, %s489_s13 }
  0xc2   : > { %475 = vrcp.f32 %v314_v32 }
  0xc3   : > { %477 = vpow2.f32 %v299_v34 }
  0xc4   : > { %479 = vpow2.f32 %v301_v35 }
  0xc8   : > { %v476_v33 = vpop.eup %475 }
  0xc9   : > { %321 = vrot.lane.b32.xlu0 %v476_v33, %s489_s13  ;;  %v478_v36 = vpop.eup %477 }
  0xca   : > { %v443_v37 = vadd.f32 -1.0, %v478_v36  ;;  %v480_v40 = vpop.eup %479 }
  0xcb   : > { %v444_v43 = vadd.f32 -1.0, %v480_v40 }
  0xcc   : > { %v305_v39 = vsel %vm297_vm1, %v293_v19, %v443_v37 }
  0xcd   : > { %v306_v44 = vsel %vm298_vm3, %v295_v25, %v444_v43 }
 0x133   : > { %v320_v38 = vpop.permute.xlu0 %319 }
 0x134   : > { %v325_v41 = vmul.f32 %v320_v38, %v305_v39 }
 0x136   : > { %v327_v42 = vpack.c.bf16 %v325_v41, %v325_v41 }
 0x138   : > { %330 = vst.msk [vmem:[%s175_s18] sm:$0xf] %vm329_vm2, %v327_v42 }
 0x13b   : > { %v322_v45 = vpop.permute.xlu0 %321 }
 0x13c   : > { %v326_v46 = vmul.f32 %v322_v45, %v306_v44 }
 0x13e   : > { %v328_v47 = vpack.c.bf16 %v326_v46, %v326_v46 }
 0x140   : > { %331 = vst.msk [vmem:[%s175_s18 + $0x4] sm:$0xf] %vm329_vm2, %v328_v47 }
 0x141 PF: > { %s13_s12 = sadd.s32 1, %s487_s12  }
 0x142   : > { %p10_p4 = scmp.ge.s32.totalorder %s13_s12, 4  }
 0x144   :  { %12 = sbr.rel (!%p10_p4) target bundleno = 1 (0x1), region = 62 }

// kernel: generator_forward.75
= control target key start
LH: loop header
LB: loop body
LE: loop exit
PB: predicated region body
PF: predicated region fallthrough
CT: control target
= control target key end

     0   :  { %s639_s12 = smov 0   ;;  %s717_s0 = inlined_call_operand.vmem [shape: bf16[32,288], index: 0, kind: input, shape index: {}]   ;;  %s718_s1 = inlined_call_operand.vmem [shape: bf16[288,64], index: 1, kind: input, shape index: {}]   ;;  %s719_s2 = inlined_call_operand.vmem [shape: f32[1,64], index: 2, kind: input, shape index: {}]   ;;  %s720_s3 = inlined_call_operand.vmem [shape: bf16[32,32], index: 3, kind: output, shape index: {}]  }
   0x1 LB: > { %s474_s13 = sadd.s32 4294967295, %s616_s12   ;;  %p478_p0 = scmp.ge.s32.totalorder %s616_s12, 1  ;;  %s616_s12 = sphi %s639_s12, %s13_s12  }
   0x2   : > { %p139_p1 = scmp.lt.s32.totalorder %s616_s12, 3 }
   0x4   : > { %p140_p2 = pnand %p478_p0, %p139_p1 }
   0x5   : > { %s479_s18 = sshll.u32 (!%p140_p2), %s474_s13, 1  ;;  %s618_s5 = smov (!%p140_p2), 96  }
   0x6   : > { %143 = sbr.rel (%p140_p2) target bundleno = 323 (0x143), region = 32  ;;  %p165_p3 = scmp.lt.s32.totalorder (!%p140_p2), %s479_s18, 3 }
   0xb   : > { %v580_v0 = vld [vmem:[%s718_s1 + $0x38] sm:$0xff]  ;;  %v579_v2 = vld [vmem:[%s718_s1 + $0x30] sm:$0xff]  ;;  %v590_v4 = vld [vmem:[%s718_s1 + $0x88] sm:$0xff]  ;;  %s722_s18 = smov (!%p165_p3, %s479_s18), 3  ;;  %vm345_vm0 = vcmask 261120   ;;  %vm415_vm1 = vcmask 257024  }
   0xc   : > { %v588_v1 = vld [vmem:[%s718_s1 + $0x78] sm:$0xff]  ;;  %349 = vmatpush.bf16.msra.mxu0 %v580_v0  ;;  %v587_v3 = vld [vmem:[%s718_s1 + $0x70] sm:$0xff]  ;;  %383 = vmatpush.bf16.msra.mxu2 %v590_v4  ;;  %v589_v5 = vld [vmem:[%s718_s1 + $0x80] sm:$0xff]  ;;  %s591_s27 = smul.u32 12, %s722_s18  ;;  %s482_s6 = sshll.u32 %s722_s18, 2 }
   0xd   : > { %363 = vmatpush.bf16.msra.mxu1 %v588_v1  ;;  %v578_v6 = vld [vmem:[%s718_s1 + $0x28] sm:$0xff]  ;;  %v577_v11 = vld [vmem:[%s718_s1 + $0x20] sm:$0xff]  ;;  %v576_v13 = vld [vmem:[%s718_s1 + $0x18] sm:$0xff]  ;;  %s175_s9 = scalar_lea.vmem %s720_s3, %s482_s6 }
   0xe   : > { %v586_v7 = vld [vmem:[%s718_s1 + $0x68] sm:$0xff]  ;;  %s169_s7 = scalar_lea.vmem %s717_s0, %s591_s27  ;;  %v585_v12 = vld [vmem:[%s718_s1 + $0x60] sm:$0xff]  ;;  %v584_v14 = vld [vmem:[%s718_s1 + $0x58] sm:$0xff] }
   0xf   : > { %v493_v8 = vld [vmem:[%s169_s7 + $0x8] sm:$0xf]  ;;  %v572_v9 = vld [vmem:[%s169_s7 + $0x10] sm:$0xf0]  ;;  %v573_v19 = vld [vmem:[%s718_s1] sm:$0xff] }
  0x10   : > { %350 = vmatpush.bf16.msra.mxu0 %v579_v2  ;;  %384 = vmatpush.bf16.msra.mxu2 %v589_v5  ;;  %v494_v10 = vor.u32 %v572_v9, %v493_v8  ;;  %v575_v15 = vld [vmem:[%s718_s1 + $0x10] sm:$0xff]  ;;  %v574_v17 = vld [vmem:[%s718_s1 + $0x8] sm:$0xff]  ;;  %v581_v20 = vld [vmem:[%s718_s1 + $0x40] sm:$0xff] }
  0x11   : > { %364 = vmatpush.bf16.msra.mxu1 %v587_v3  ;;  %v583_v16 = vld [vmem:[%s718_s1 + $0x50] sm:$0xff]  ;;  %v582_v18 = vld [vmem:[%s718_s1 + $0x48] sm:$0xff]  ;;  %v485_v21 = vld [vmem:[%s169_s7] sm:$0xf] }
  0x12   : > { %v571_v22 = vld [vmem:[%s169_s7 + $0x8] sm:$0xf0]  ;;  %v570_v23 = vld [vmem:[%s169_s7 + $0x4] sm:$0xf]  ;;  %v487_v24 = vld [vmem:[%s169_s7 + $0xc] sm:$0xf0] }
  0x13   : > { %567 = vmatmul.msk.bf16.vlgmr.msra.gmra.mxu2 %vm345_vm0, %v494_v10  ;;  %v486_v25 = vor.u32 %v571_v22, %v485_v21  ;;  %v490_v26 = vor.u32 %v570_v23, %v487_v24  ;;  %v601_v27 = vld [vmem:[%s719_s2] ss:$0 sm:$0xff] }
  0x14   : > { %351 = vmatpush.bf16.msra.mxu0 %v578_v6 }
  0x15   : > { %365 = vmatpush.bf16.msra.mxu1 %v586_v7 }
  0x18   : > { %352 = vmatpush.bf16.msra.mxu0 %v577_v11 }
  0x19   : > { %366 = vmatpush.bf16.msra.mxu1 %v585_v12 }
  0x1c   : > { %353 = vmatpush.bf16.msra.mxu0 %v576_v13 }
  0x1d   : > { %367 = vmatpush.bf16.msra.mxu1 %v584_v14 }
  0x20   : > { %354 = vmatpush.bf16.msra.mxu0 %v575_v15 }
  0x21   : > { %368 = vmatpush.bf16.msra.mxu1 %v583_v16 }
  0x24   : > { %355 = vmatpush.bf16.msra.mxu0 %v574_v17 }
  0x25   : > { %369 = vmatpush.bf16.msra.mxu1 %v582_v18 }
  0x28   : > { %356 = vmatpush.bf16.msra.mxu0 %v573_v19 }
  0x29   : > { %370 = vmatpush.bf16.msra.mxu1 %v581_v20 }
  0x2b   : > { %357 = vmatmul.bf16.vlgmr.msra.gmra.mxu0 %v486_v25 }
  0x2c   : > { %371 = vmatmul.bf16.vlgmr.msra.gmra.mxu1 %v490_v26 }
  0x96   : > { %v386_v31 = vpop.f32.mrf.mxu2 }
  0x9e   : > { %v388_v40 = vpop.f32.mrf.mxu2 }
  0xa8   : > { %v358_v28 = vpop.f32.mrf.mxu0 }
  0xa9   : > { %v372_v29 = vpop.f32.mrf.mxu1  ;;  %v359_v30 = vadd.f32 %v601_v27, %v358_v28 }
  0xab   : > { %v373_v32 = vadd.f32 %v372_v29, %v359_v30 }
  0xad   : > { %v387_v33 = vadd.f32 %v386_v31, %v373_v32 }
  0xaf   : > { %v393_v34 = vsub.f32 0.0, %v387_v33  ;;  %v391_v50 = vmax.f32 %v387_v33, 0.0 }
  0xb0   : > { %v360_v35 = vpop.f32.mrf.mxu0 }
  0xb1   : > { %v395_v36 = vmul.f32 1.442695, %v393_v34  ;;  %v361_v37 = vadd.f32 %v601_v27, %v360_v35  ;;  %v374_v38 = vpop.f32.mrf.mxu1 }
  0xb3   : > { %602 = vpow2.f32 %v395_v36  ;;  %v375_v39 = vadd.f32 %v374_v38, %v361_v37 }
  0xb5   : > { %v389_v41 = vadd.f32 %v388_v40, %v375_v39 }
  0xb7   : > { %v394_v42 = vsub.f32 0.0, %v389_v41  ;;  %v392_v54 = vmax.f32 %v389_v41, 0.0 }
  0xb9   : > { %v603_v43 = vpop.eup %602  ;;  %v397_v44 = vmul.f32 1.442695, %v394_v42 }
  0xba   : > { %v399_v45 = vadd.f32 1.0, %v603_v43 }
  0xbb   : > { %604 = vpow2.f32 %v397_v44 }
  0xbc   : > { %606 = vrcp.f32 %v399_v45 }
  0xc1   : > { %v605_v46 = vpop.eup %604 }
  0xc2   : > { %v607_v47 = vpop.eup %606  ;;  %v400_v48 = vadd.f32 1.0, %v605_v46 }
  0xc3   : > { %405 = vrot.lane.b32.xlu0 %v607_v47, %s618_s5 }
  0xc4   : > { %608 = vrcp.f32 %v400_v48 }
  0xca   : > { %v609_v49 = vpop.eup %608 }
  0xcb   : > { %407 = vrot.lane.b32.xlu0 %v609_v49, %s618_s5 }
 0x135   : > { %v406_v51 = vpop.permute.xlu0 %405 }
 0x136   : > { %v411_v52 = vmul.f32 %v406_v51, %v391_v50 }
 0x138   : > { %v413_v53 = vpack.c.bf16 %v411_v52, %v411_v52 }
 0x13a   : > { %416 = vst.msk [vmem:[%s175_s9] sm:$0xf] %vm415_vm1, %v413_v53 }
 0x13d   : > { %v408_v55 = vpop.permute.xlu0 %407 }
 0x13e   : > { %v412_v56 = vmul.f32 %v408_v55, %v392_v54 }
 0x140   : > { %v414_v57 = vpack.c.bf16 %v412_v56, %v412_v56 }
 0x142   : > { %417 = vst.msk [vmem:[%s175_s9 + $0x4] sm:$0xf] %vm415_vm1, %v414_v57 }
 0x143 PF: > { %s13_s12 = sadd.s32 1, %s616_s12  }
 0x144   : > { %p10_p4 = scmp.ge.s32.totalorder %s13_s12, 4  }
 0x146   :  { %12 = sbr.rel (!%p10_p4) target bundleno = 1 (0x1), region = 62 }

// kernel: generator_forward.76
= control target key start
LH: loop header
LB: loop body
LE: loop exit
PB: predicated region body
PF: predicated region fallthrough
CT: control target
= control target key end

     0   :  { %s1052_s15 = smov 0   ;;  %s1054_s16 = smov 0   ;;  %s1147_s0 = inlined_call_operand.vmem [shape: bf16[2,4,288], index: 0, kind: input, shape index: {}]   ;;  %s1148_s1 = inlined_call_operand.vmem [shape: bf16[2,288,4], index: 1, kind: input, shape index: {}]   ;;  %s1149_s2 = inlined_call_operand.vmem [shape: bf16[2,4,512], index: 2, kind: input, shape index: {}]   ;;  %s1150_s3 = inlined_call_operand.vmem [shape: f32[2,4], index: 3, kind: input, shape index: {}]   ;;  %s1151_s4 = inlined_call_operand.vmem [shape: f32[2,4,512], index: 4, kind: output, shape index: {}]  }
   0x1   :  { %s1056_s17 = smov 0  }
   0x2 LB: > { %s33_s18 = sadd.s32 1, %s1017_s16  ;;  %p852_p0 = scmp.ge.s32.totalorder %s1021_s17, 1  ;;  %s1021_s17 = sphi %s1056_s17, %s14_s17   ;;  %s1017_s16 = sphi %s1054_s16, %s1153_s16   ;;  %s1013_s15 = sphi %s1052_s15, %s1152_s15  }
   0x3   : > { %p35_p1 = scmp.ge.s32.totalorder %s33_s18, 2  ;;  %p229_p2 = scmp.lt.s32.totalorder %s1021_s17, 3 }
   0x5   : > { %s1155_s18 = smov (%p35_p1, %s33_s18), 0  ;;  %p230_p3 = pnand %p852_p0, %p229_p2 }
   0x6   : > { %p284_p4 = scmp.lt.s32.totalorder (!%p230_p3), %s1013_s15, 1 }
   0x7   : > { %233 = sbr.rel (%p230_p3) target bundleno = 663 (0x297), region = 36 }
   0xc   : > { %vm328_vm0 = vcmask 3072   ;;  %v1023_v0 = vmov 0.0   ;;  %s1157_s15 = smov (!%p284_p4, %s1013_s15), 1  ;;  %vm485_vm1 = vcmask 261120   ;;  %v1024_v28 = vmov -inf  }
   0xd   : > { %330 = vst.msk [vmem:[#allocation3] sm:$0xf] %vm328_vm0, %v1023_v0  ;;  %s959_s19 = smul.u32 144, %s1157_s15  ;;  %s938_s27 = sshll.u32 %s1157_s15, 3  ;;  %v991_v34 = vld [vmem:[%s1150_s3] ss:$0 sm:$0xff] }
   0xe   : > { %s958_s20 = smul.u32 6, %s1157_s15  ;;  %s309_s30 = scalar_lea.vmem %s1149_s2, %s938_s27  ;;  %329 = vst.msk [vmem:[#allocation2] sm:$0xf] %vm328_vm0, %v1024_v28  ;;  %v992_v37 = vld [vmem:[%s1150_s3 + $0x1] ss:$0 sm:$0xff]  ;;  %vm535_vm2 = vcmask 27648  }
   0xf   : > { %s1078_s23 = scalar_lea.vmem %s1148_s1, %s959_s19  ;;  %v585_v19 = vld [vmem:[%s309_s30] sm:$0xff]  ;;  %v1025_v43 = vmov 0   ;;  %vm596_vm3 = vcmask 1041408   ;;  %vm592_vm4 = vcmask 31744   ;;  %vm667_vm5 = vcmask 1043456   ;;  %s939_s9 = sshll.u32 %s1157_s15, 4 }
  0x10   : > { %v947_v1 = vld [vmem:[%s1078_s23 + $0x38] sm:$0xff]  ;;  %s292_s26 = scalar_lea.vmem %s1147_s0, %s958_s20  ;;  %v946_v3 = vld [vmem:[%s1078_s23 + $0x30] sm:$0xff]  ;;  %v957_v5 = vld [vmem:[%s1078_s23 + $0x88] sm:$0xff]  ;;  %988 = vset.pattern.permute.xlu0 %v1025_v43  ;;  %989 = vset.pattern.permute.xlu1 %v1025_v43  ;;  %s322_s12 = scalar_lea.vmem %s1151_s4, %s939_s9 }
  0x11   : > { %v955_v2 = vld [vmem:[%s1078_s23 + $0x78] sm:$0xff]  ;;  %488 = vmatpush.bf16.msra.mxu0 %v947_v1  ;;  %v954_v4 = vld [vmem:[%s1078_s23 + $0x70] sm:$0xff]  ;;  %520 = vmatpush.bf16.msra.mxu2 %v957_v5  ;;  %v956_v6 = vld [vmem:[%s1078_s23 + $0x80] sm:$0xff] }
  0x12   : > { %501 = vmatpush.bf16.msra.mxu1 %v955_v2  ;;  %v333_v7 = vld [vmem:[%s292_s26] sm:$0x3f]  ;;  %v945_v8 = vld [vmem:[%s1078_s23 + $0x28] sm:$0xff]  ;;  %v943_v15 = vld [vmem:[%s1078_s23 + $0x18] sm:$0xff]  ;;  %990 = vset.pattern.permute.xlu2 %v1025_v43 }
  0x13   : > { %371 = vst [vmem:[#allocation1] ss:$4 sm:$0xff] %v333_v7  ;;  %v953_v9 = vld [vmem:[%s1078_s23 + $0x68] sm:$0xff]  ;;  %v944_v10 = vld [vmem:[%s1078_s23 + $0x20] sm:$0xff]  ;;  %v951_v16 = vld [vmem:[%s1078_s23 + $0x58] sm:$0xff] }
  0x14   : > { %v952_v11 = vld [vmem:[%s1078_s23 + $0x60] sm:$0xff]  ;;  %v942_v17 = vld [vmem:[%s1078_s23 + $0x10] sm:$0xff]  ;;  %v941_v24 = vld [vmem:[%s1078_s23 + $0x8] sm:$0xff] }
  0x15   : > { %489 = vmatpush.bf16.msra.mxu0 %v946_v3  ;;  %521 = vmatpush.bf16.msra.mxu2 %v956_v6  ;;  %v950_v18 = vld [vmem:[%s1078_s23 + $0x50] sm:$0xff]  ;;  %v949_v25 = vld [vmem:[%s1078_s23 + $0x48] sm:$0xff]  ;;  %v940_v26 = vld [vmem:[%s1078_s23] sm:$0xff] }
  0x16   : > { %502 = vmatpush.bf16.msra.mxu1 %v954_v4  ;;  %v948_v27 = vld [vmem:[%s1078_s23 + $0x40] sm:$0xff]  ;;  %v534_v44 = vld [vmem:[#allocation2] sm:$0xf]  ;;  %v551_v1 = vld [vmem:[#allocation3] sm:$0xf] }
  0x19   : > { %490 = vmatpush.bf16.msra.mxu0 %v945_v8 }
  0x1a   : > { %503 = vmatpush.bf16.msra.mxu1 %v953_v9  ;;  %v374_v12 = vld.sshfl [vmem:[#allocation1 + $0x10] sm:$0xff pattern:$0x73625140]  ;;  %v372_v13 = vld.sshfl [vmem:[#allocation1] sm:$0xff pattern:$0x73625140] }
  0x1b   : > { %931 = vmatmul.msk.bf16.vlgmr.msra.gmra.mxu2 %vm485_vm1, %v374_v12  ;;  %572 = vst [vmem:[#allocation1 + $0x10] ss:$2 sm:$0xff] %v1023_v0  ;;  %v373_v14 = vld.sshfl [vmem:[#allocation1 + $0x8] sm:$0xff pattern:$0x73625140] }
  0x1c   : > { %570 = vst [vmem:[#allocation1] ss:$2 sm:$0xff] %v1023_v0 }
  0x1d   : > { %491 = vmatpush.bf16.msra.mxu0 %v944_v10 }
  0x1e   : > { %504 = vmatpush.bf16.msra.mxu1 %v952_v11 }
  0x21   : > { %492 = vmatpush.bf16.msra.mxu0 %v943_v15 }
  0x22   : > { %505 = vmatpush.bf16.msra.mxu1 %v951_v16  ;;  %v1101_v20 = vld.sshfl [vmem:[#allocation1 + $0x10] sm:$0xff pattern:$0x75316420]  ;;  %v1103_v21 = vld.sshfl [vmem:[#allocation1 + $0x18] sm:$0xff pattern:$0x75316420] }
  0x23   : > { %v1105_v22 = vld.sshfl [vmem:[#allocation1] sm:$0xff pattern:$0x75316420]  ;;  %v1107_v23 = vld.sshfl [vmem:[#allocation1 + $0x8] sm:$0xff pattern:$0x75316420] }
  0x24   : > { %587 = vst [vmem:[#allocation1] ss:$4 sm:$0xff] %v585_v19 }
  0x25   : > { %493 = vmatpush.bf16.msra.mxu0 %v942_v17 }
  0x26   : > { %506 = vmatpush.bf16.msra.mxu1 %v950_v18 }
  0x29   : > { %494 = vmatpush.bf16.msra.mxu0 %v941_v24 }
  0x2a   : > { %507 = vmatpush.bf16.msra.mxu1 %v949_v25 }
  0x2b   : > { %v588_v48 = vld.sshfl [vmem:[#allocation1] sm:$0xff pattern:$0x73625140]  ;;  %v590_v50 = vld.sshfl [vmem:[#allocation1 + $0x10] sm:$0xff pattern:$0x73625140] }
  0x2c   : > { %v597_v49 = vsel %vm596_vm3, %v588_v48, 0  ;;  %v601_v51 = vsel %vm596_vm3, %v590_v50, 0  ;;  %v589_v52 = vld.sshfl [vmem:[#allocation1 + $0x8] sm:$0xff pattern:$0x73625140] }
  0x2d   : > { %495 = vmatpush.bf16.msra.mxu0 %v940_v26  ;;  %612 = vmatpush.bf16.msra.mxu3 %v597_v49  ;;  %v599_v53 = vsel %vm596_vm3, %v589_v52, 0  ;;  %v591_v58 = vld.sshfl [vmem:[#allocation1 + $0x18] sm:$0xff pattern:$0x73625140] }
  0x2e   : > { %508 = vmatpush.bf16.msra.mxu1 %v948_v27  ;;  %638 = vmatpush.bf16.msrb.mxu2 %v601_v51  ;;  %v603_v62 = vsel %vm596_vm3, %v591_v58, 0  ;;  %v1026_v27 = vmov 839922192  }
  0x2f   : > { %v687_v28 = vunpack.c.l.s4 %v1026_v27 }
  0x30   : > { %496 = vmatmul.bf16.vlgmr.msra.gmra.mxu0 %v372_v13 }
  0x31   : > { %509 = vmatmul.bf16.vlgmr.msra.gmra.mxu1 %v373_v14  ;;  %625 = vmatpush.bf16.msrb.mxu3 %v599_v53 }
  0x9e   : > { %v523_v29 = vpop.f32.mrf.mxu2 }
  0xa6   : > { %v525_v30 = vpop.f32.mrf.mxu2 }
  0xa7   : > { %v688_v30 = vunpack.c.0.s8 %v687_v28 }
  0xad   : > { %v497_v31 = vpop.f32.mrf.mxu0 }
  0xae   : > { %v510_v32 = vpop.f32.mrf.mxu1 }
  0xaf   : > { %v511_v33 = vadd.f32 %v510_v32, %v497_v31 }
  0xb1   : > { %v524_v35 = vadd.f32 %v523_v29, %v511_v33 }
  0xb3   : > { %v530_v36 = vmul.f32 %v991_v34, %v524_v35 }
  0xb5   : > { %v531_v38 = vmul.f32 10.0, %v530_v36  ;;  %v499_v39 = vpop.f32.mrf.mxu0 }
  0xb6   : > { %v512_v40 = vpop.f32.mrf.mxu1 }
  0xb7   : > { %v533_v41 = vadd.f32 %v992_v37, %v531_v38 }
  0xb9   : > { %v536_v42 = vsel %vm535_vm2, %v533_v41, -inf }
  0xba   : > { %537 = vmax.xlane.f32.xlu0 %v536_v42 }
 0x12d   : > { %v538_v45 = vpop.xlane.xlu0 %537 }
 0x12e   : > { %v539_v46 = vmax.f32 %v534_v44, %v538_v45 }
 0x130   : > { %v540_v47 = vsub.f32 %v534_v44, %v539_v46  ;;  %674 = vst.msk [vmem:[#allocation2] sm:$0xf] %vm328_vm0, %v539_v46  ;;  %545 = vperm.xlu0 %988, %v539_v46  }
 0x132   : > { %v541_v63 = vmul.f32 1.442695, %v540_v47 }
 0x1a2   : > { %v546_v54 = vpop.permute.xlu0 %545 }
 0x1a3   : > { %v548_v55 = vsub.f32 %v533_v41, %v546_v54 }
 0x1a5   : > { %v549_v56 = vmul.f32 1.442695, %v548_v55 }
 0x1a7   : > { %993 = vpow2.f32 %v549_v56 }
 0x1a8   : > { %995 = vpow2.f32 %v541_v63 }
 0x1ad   : > { %v994_v57 = vpop.eup %993 }
 0x1ae   : > { %v553_v59 = vsel %vm535_vm2, %v994_v57, 0.0  ;;  %v559_v60 = vmul.f32 %v994_v57, %v991_v34  ;;  %v996_v0 = vpop.eup %995 }
 0x1af   : > { %554 = vadd.xlane.f32.xlu1 %v553_v59  ;;  %v552_v2 = vmul.f32 %v996_v0, %v551_v1 }
 0x1b0   : > { %v560_v61 = vpack.c.bf16 %v559_v60, %v559_v60 }
 0x1b2   : > { %932 = vmatmul.msk.bf16.vlgmr.msra.gmra.mxu3 %vm592_vm4, %v560_v61  ;;  %934 = vmatmul.msk.bf16.vlgmr.msrb.gmra.mxu2 %vm592_vm4, %v560_v61 }
 0x1b3   : > { %651 = vmatpush.bf16.msra.mxu3 %v603_v62 }
 0x1c2   : > { %933 = vmatmul.msk.bf16.vlgmr.msrb.gmra.mxu3 %vm592_vm4, %v560_v61 }
 0x1c8   : > { %565 = vperm.xlu1 %989, %v996_v0  }
 0x1d2   : > { %935 = vmatmul.msk.bf16.vlgmr.msra.gmra.mxu3 %vm592_vm4, %v560_v61 }
 0x222   : > { %v555_v3 = vpop.xlane.xlu1 %554 }
 0x223   : > { %v556_v4 = vadd.f32 %v555_v3, %v552_v2 }
 0x225   : > { %558 = vst.msk [vmem:[#allocation3] sm:$0xf] %vm328_vm0, %v556_v4 }
 0x22c   : > { %v678_v5 = vld [vmem:[#allocation3] sm:$0xf] }
 0x22d   : > { %997 = vrcp.f32 %v678_v5 }
 0x233   : > { %v998_v6 = vpop.eup %997 }
 0x234   : > { %684 = vperm.xlu2 %990, %v998_v6  }
 0x235   : > { %v614_v7 = vpop.f32.mrf.mxu3  ;;  %v640_v8 = vpop.f32.mrf.mxu2 }
 0x23a   : > { %v566_v11 = vpop.permute.xlu1 %565 }
 0x23b   : > { %v581_v12 = vmul.f32 %v1105_v22, %v566_v11  ;;  %v582_v13 = vmul.f32 %v1107_v23, %v566_v11  ;;  %v584_v26 = vmul.f32 %v1103_v21, %v566_v11  ;;  %v583_v22 = vmul.f32 %v1101_v20, %v566_v11 }
 0x23d   : > { %v616_v9 = vpop.f32.mrf.mxu3  ;;  %v642_v10 = vpop.f32.mrf.mxu2  ;;  %v657_v16 = vadd.f32 %v614_v7, %v581_v12  ;;  %v659_v31 = vadd.f32 %v640_v8, %v583_v22 }
 0x245   : > { %v627_v14 = vpop.f32.mrf.mxu3 }
 0x246   : > { %v658_v15 = vadd.f32 %v627_v14, %v582_v13 }
 0x248   : > { %v665_v17 = vrot.slane %v658_v15, 4 }
 0x24a   : > { %v668_v18 = vsel %vm667_vm5, %v657_v16, %v665_v17 }
 0x24d   : > { %v629_v19 = vpop.f32.mrf.mxu3 }
 0x255   : > { %v653_v24 = vpop.f32.mrf.mxu3 }
 0x256   : > { %v660_v29 = vadd.f32 %v653_v24, %v584_v26 }
 0x258   : > { %v666_v23 = vrot.slane %v660_v29, 4 }
 0x25a   : > { %v669_v34 = vsel %vm667_vm5, %v659_v31, %v666_v23 }
 0x25d   : > { %v655_v25 = vpop.f32.mrf.mxu3 }
 0x28e   : > { %v685_v32 = vpop.permute.xlu2 %684 }
 0x28f   : > { %v689_v33 = vperm.slane %v685_v32, %v688_v30 }
 0x291   : > { %v691_v35 = vmul.f32 %v689_v33, %v668_v18  ;;  %v692_v36 = vmul.f32 %v689_v33, %v669_v34 }
 0x293   : > { %v693_v21 = vmul.f32 0.25, %v691_v35  ;;  %v694_v37 = vmul.f32 0.25, %v692_v36 }
 0x295   : > { %695 = vst [vmem:[%s322_s12] sm:$0xff] %v693_v21 }
 0x296   : > { %696 = vst [vmem:[%s322_s12 + $0x8] sm:$0xff] %v694_v37 }
 0x297 PF: > { %s14_s17 = sadd.s32 1, %s1021_s17   ;;  %s1152_s15 = smov %s1017_s16 }
 0x298   : > { %p11_p5 = scmp.ge.s32.totalorder %s14_s17, 4   ;;  %s1153_s16 = smov %s1155_s18 }
 0x29a   :  { %13 = sbr.rel (!%p11_p5) target bundleno = 2 (0x2), region = 84 }

// kernel: generator_forward.79
= control target key start
LH: loop header
LB: loop body
LE: loop exit
PB: predicated region body
PF: predicated region fallthrough
CT: control target
= control target key end

     0   :  { %s937_s12 = smov 0   ;;  %s1081_s0 = inlined_call_operand.vmem [shape: bf16[32,576], index: 0, kind: input, shape index: {}]   ;;  %s1082_s1 = inlined_call_operand.vmem [shape: bf16[576,64], index: 1, kind: input, shape index: {}]   ;;  %s1083_s2 = inlined_call_operand.vmem [shape: f32[1,64], index: 2, kind: input, shape index: {}]   ;;  %s1084_s3 = inlined_call_operand.vmem [shape: bf16[32,32], index: 3, kind: output, shape index: {}]  }
   0x1 LB: > { %s666_s13 = sadd.s32 4294967295, %s914_s12   ;;  %p670_p0 = scmp.ge.s32.totalorder %s914_s12, 1  ;;  %s914_s12 = sphi %s937_s12, %s13_s12  }
   0x2   : > { %p139_p1 = scmp.lt.s32.totalorder %s914_s12, 3 }
   0x4   : > { %p140_p2 = pnand %p670_p0, %p139_p1 }
   0x5   : > { %s671_s11 = sshll.u32 (!%p140_p2), %s666_s13, 1  ;;  %s916_s18 = smov (!%p140_p2), 96  }
   0x6   : > { %143 = sbr.rel (%p140_p2) target bundleno = 335 (0x14f), region = 32  ;;  %p165_p3 = scmp.lt.s32.totalorder (!%p140_p2), %s671_s11, 3 }
   0xb   : > { %v856_v0 = vld [vmem:[%s1082_s1 + $0x38] sm:$0xff]  ;;  %v855_v4 = vld [vmem:[%s1082_s1 + $0x30] sm:$0xff]  ;;  %v854_v8 = vld [vmem:[%s1082_s1 + $0x28] sm:$0xff]  ;;  %s1086_s11 = smov (!%p165_p3, %s671_s11), 3  ;;  %vm501_vm0 = vcmask 523264   ;;  %vm607_vm2 = vcmask 257024  }
   0xc   : > { %v872_v1 = vld [vmem:[%s1082_s1 + $0xb8] sm:$0xff]  ;;  %505 = vmatpush.bf16.msra.mxu0 %v856_v0  ;;  %v871_v5 = vld [vmem:[%s1082_s1 + $0xb0] sm:$0xff]  ;;  %v870_v9 = vld [vmem:[%s1082_s1 + $0xa8] sm:$0xff]  ;;  %s885_s6 = smul.u32 20, %s1086_s11  ;;  %s674_s19 = sshll.u32 %s1086_s11, 2 }
   0xd   : > { %v880_v2 = vld [vmem:[%s1082_s1 + $0xf8] sm:$0xff]  ;;  %533 = vmatpush.bf16.msra.mxu2 %v872_v1  ;;  %v879_v6 = vld [vmem:[%s1082_s1 + $0xf0] sm:$0xff]  ;;  %v878_v10 = vld [vmem:[%s1082_s1 + $0xe8] sm:$0xff]  ;;  %s175_s13 = scalar_lea.vmem %s1084_s3, %s674_s19 }
   0xe   : > { %v864_v3 = vld [vmem:[%s1082_s1 + $0x78] sm:$0xff]  ;;  %547 = vmatpush.bf16.msra.mxu3 %v880_v2  ;;  %v863_v7 = vld [vmem:[%s1082_s1 + $0x70] sm:$0xff]  ;;  %v862_v11 = vld [vmem:[%s1082_s1 + $0x68] sm:$0xff]  ;;  %s1029_s20 = scalar_lea.vmem %s1081_s0, %s885_s6 }
   0xf   : > { %519 = vmatpush.bf16.msra.mxu1 %v864_v3  ;;  %v853_v12 = vld [vmem:[%s1082_s1 + $0x20] sm:$0xff]  ;;  %v852_v16 = vld [vmem:[%s1082_s1 + $0x18] sm:$0xff]  ;;  %v851_v20 = vld [vmem:[%s1082_s1 + $0x10] sm:$0xff] }
  0x10   : > { %506 = vmatpush.bf16.msra.mxu0 %v855_v4  ;;  %v869_v13 = vld [vmem:[%s1082_s1 + $0xa0] sm:$0xff]  ;;  %v868_v17 = vld [vmem:[%s1082_s1 + $0x98] sm:$0xff]  ;;  %v867_v21 = vld [vmem:[%s1082_s1 + $0x90] sm:$0xff] }
  0x11   : > { %534 = vmatpush.bf16.msra.mxu2 %v871_v5  ;;  %v877_v14 = vld [vmem:[%s1082_s1 + $0xe0] sm:$0xff]  ;;  %v876_v18 = vld [vmem:[%s1082_s1 + $0xd8] sm:$0xff]  ;;  %v875_v22 = vld [vmem:[%s1082_s1 + $0xd0] sm:$0xff] }
  0x12   : > { %548 = vmatpush.bf16.msra.mxu3 %v879_v6  ;;  %v861_v15 = vld [vmem:[%s1082_s1 + $0x60] sm:$0xff]  ;;  %v860_v19 = vld [vmem:[%s1082_s1 + $0x58] sm:$0xff]  ;;  %v859_v23 = vld [vmem:[%s1082_s1 + $0x50] sm:$0xff] }
  0x13   : > { %520 = vmatpush.bf16.msra.mxu1 %v863_v7  ;;  %v850_v24 = vld [vmem:[%s1082_s1 + $0x8] sm:$0xff]  ;;  %v849_v28 = vld [vmem:[%s1082_s1] sm:$0xff]  ;;  %v846_v33 = vld [vmem:[%s1029_s20 + $0x10] sm:$0xf0] }
  0x14   : > { %507 = vmatpush.bf16.msra.mxu0 %v854_v8  ;;  %v866_v25 = vld [vmem:[%s1082_s1 + $0x88] sm:$0xff]  ;;  %v865_v29 = vld [vmem:[%s1082_s1 + $0x80] sm:$0xff]  ;;  %v847_v35 = vld [vmem:[%s1029_s20 + $0x18] sm:$0xf0] }
  0x15   : > { %535 = vmatpush.bf16.msra.mxu2 %v870_v9  ;;  %v874_v26 = vld [vmem:[%s1082_s1 + $0xc8] sm:$0xff]  ;;  %v873_v30 = vld [vmem:[%s1082_s1 + $0xc0] sm:$0xff]  ;;  %v679_v39 = vld [vmem:[%s1029_s20 + $0x14] sm:$0xf0] }
  0x16   : > { %549 = vmatpush.bf16.msra.mxu3 %v878_v10  ;;  %v858_v27 = vld [vmem:[%s1082_s1 + $0x48] sm:$0xff]  ;;  %v857_v31 = vld [vmem:[%s1082_s1 + $0x40] sm:$0xff]  ;;  %v884_v40 = vld [vmem:[%s1082_s1 + $0x118] sm:$0xff] }
  0x17   : > { %521 = vmatpush.bf16.msra.mxu1 %v862_v11  ;;  %v677_v32 = vld [vmem:[%s1029_s20] sm:$0xf]  ;;  %v685_v34 = vld [vmem:[%s1029_s20 + $0x8] sm:$0xf]  ;;  %v845_v36 = vld [vmem:[%s1029_s20 + $0xc] sm:$0xf] }
  0x18   : > { %508 = vmatpush.bf16.msra.mxu0 %v853_v12  ;;  %v687_v37 = vld [vmem:[%s1029_s20 + $0x1c] sm:$0xf0]  ;;  %v844_v38 = vld [vmem:[%s1029_s20 + $0x4] sm:$0xf]  ;;  %v678_v41 = vor.u32 %v846_v33, %v677_v32  ;;  %v686_v42 = vor.u32 %v847_v35, %v685_v34  ;;  %v883_v45 = vld [vmem:[%s1082_s1 + $0x110] sm:$0xff] }
  0x19   : > { %536 = vmatpush.bf16.msra.mxu2 %v869_v13  ;;  %v690_v43 = vor.u32 %v845_v36, %v687_v37  ;;  %v682_v44 = vor.u32 %v844_v38, %v679_v39  ;;  %v882_v46 = vld [vmem:[%s1082_s1 + $0x108] sm:$0xff]  ;;  %v881_v47 = vld [vmem:[%s1082_s1 + $0x100] sm:$0xff]  ;;  %v693_v48 = vld [vmem:[%s1029_s20 + $0x10] sm:$0xf] }
  0x1a   : > { %550 = vmatpush.bf16.msra.mxu3 %v877_v14  ;;  %v848_v49 = vld [vmem:[%s1029_s20 + $0x20] sm:$0xf0]  ;;  %v895_v52 = vld [vmem:[%s1083_s2] ss:$0 sm:$0xff] }
  0x1b   : > { %522 = vmatpush.bf16.msra.mxu1 %v861_v15  ;;  %v694_v50 = vor.u32 %v848_v49, %v693_v48 }
  0x1c   : > { %509 = vmatpush.bf16.msra.mxu0 %v852_v16 }
  0x1d   : > { %537 = vmatpush.bf16.msra.mxu2 %v868_v17 }
  0x1e   : > { %551 = vmatpush.bf16.msra.mxu3 %v876_v18 }
  0x1f   : > { %523 = vmatpush.bf16.msra.mxu1 %v860_v19 }
  0x20   : > { %510 = vmatpush.bf16.msra.mxu0 %v851_v20 }
  0x21   : > { %538 = vmatpush.bf16.msra.mxu2 %v867_v21 }
  0x22   : > { %552 = vmatpush.bf16.msra.mxu3 %v875_v22 }
  0x23   : > { %524 = vmatpush.bf16.msra.mxu1 %v859_v23 }
  0x24   : > { %511 = vmatpush.bf16.msra.mxu0 %v850_v24 }
  0x25   : > { %539 = vmatpush.bf16.msra.mxu2 %v866_v25 }
  0x26   : > { %553 = vmatpush.bf16.msra.mxu3 %v874_v26 }
  0x27   : > { %525 = vmatpush.bf16.msra.mxu1 %v858_v27 }
  0x28   : > { %512 = vmatpush.bf16.msra.mxu0 %v849_v28 }
  0x29   : > { %540 = vmatpush.bf16.msra.mxu2 %v865_v29 }
  0x2a   : > { %554 = vmatpush.bf16.msra.mxu3 %v873_v30 }
  0x2b   : > { %526 = vmatpush.bf16.msra.mxu1 %v857_v31  ;;  %513 = vmatmul.bf16.vlgmr.msra.gmra.mxu0 %v678_v41 }
  0x2c   : > { %565 = vmatpush.bf16.msrb.mxu0 %v884_v40  ;;  %541 = vmatmul.bf16.vlgmr.msra.gmra.mxu2 %v686_v42 }
  0x2d   : > { %555 = vmatmul.bf16.vlgmr.msra.gmra.mxu3 %v690_v43 }
  0x2e   : > { %527 = vmatmul.bf16.vlgmr.msra.gmra.mxu1 %v682_v44 }
  0x30   : > { %566 = vmatpush.bf16.msrb.mxu0 %v883_v45 }
  0x34   : > { %567 = vmatpush.bf16.msrb.mxu0 %v882_v46 }
  0x38   : > { %568 = vmatpush.bf16.msrb.mxu0 %v881_v47 }
  0x3b   : > { %839 = vmatmul.msk.bf16.vlgmr.msrb.gmra.mxu0 %vm501_vm0, %v694_v50 }
  0xa8   : > { %v514_v51 = vpop.f32.mrf.mxu0 }
  0xa9   : > { %v515_v54 = vadd.f32 %v895_v52, %v514_v51 }
  0xab   : > { %v528_v53 = vpop.f32.mrf.mxu1 }
  0xac   : > { %v529_v57 = vadd.f32 %v528_v53, %v515_v54 }
  0xaf   : > { %v542_v55 = vpop.f32.mrf.mxu2 }
  0xb0   : > { %v516_v56 = vpop.f32.mrf.mxu0  ;;  %v543_v58 = vadd.f32 %v542_v55, %v529_v57  ;;  %v556_v59 = vpop.f32.mrf.mxu3 }
  0xb1   : > { %v517_v60 = vadd.f32 %v895_v52, %v516_v56 }
  0xb2   : > { %v557_v62 = vadd.f32 %v556_v59, %v543_v58 }
  0xb3   : > { %v530_v61 = vpop.f32.mrf.mxu1 }
  0xb4   : > { %v531_v1 = vadd.f32 %v530_v61, %v517_v60 }
  0xb7   : > { %v544_v63 = vpop.f32.mrf.mxu2 }
  0xb8   : > { %v570_v0 = vpop.f32.mrf.mxu0  ;;  %v545_v3 = vadd.f32 %v544_v63, %v531_v1  ;;  %v558_v6 = vpop.f32.mrf.mxu3 }
  0xb9   : > { %v571_v2 = vadd.f32 %v570_v0, %v557_v62 }
  0xba   : > { %v559_v7 = vadd.f32 %v558_v6, %v545_v3 }
  0xbb   : > { %v585_v4 = vsub.f32 0.0, %v571_v2  ;;  %v577_v18 = vmul.f32 1.442695, %v571_v2  ;;  %vm575_vm1 = vcmp.gt.f32.partialorder %v571_v2, 0.0 }
  0xbd   : > { %v587_v5 = vmul.f32 1.442695, %v585_v4 }
  0xbf   : > { %896 = vpow2.f32 %v587_v5 }
  0xc0   : > { %v572_v8 = vpop.f32.mrf.mxu0 }
  0xc1   : > { %v573_v9 = vadd.f32 %v572_v8, %v559_v7 }
  0xc3   : > { %v586_v10 = vsub.f32 0.0, %v573_v9  ;;  %v579_v19 = vmul.f32 1.442695, %v573_v9  ;;  %vm576_vm3 = vcmp.gt.f32.partialorder %v573_v9, 0.0 }
  0xc5   : > { %v897_v11 = vpop.eup %896  ;;  %v589_v12 = vmul.f32 1.442695, %v586_v10 }
  0xc6   : > { %v591_v13 = vadd.f32 1.0, %v897_v11 }
  0xc7   : > { %898 = vpow2.f32 %v589_v12 }
  0xc8   : > { %900 = vrcp.f32 %v591_v13 }
  0xcd   : > { %v899_v14 = vpop.eup %898 }
  0xce   : > { %v901_v15 = vpop.eup %900  ;;  %v592_v16 = vadd.f32 1.0, %v899_v14 }
  0xcf   : > { %597 = vrot.lane.b32.xlu0 %v901_v15, %s916_s18 }
  0xd0   : > { %902 = vrcp.f32 %v592_v16 }
  0xd1   : > { %904 = vpow2.f32 %v577_v18 }
  0xd2   : > { %906 = vpow2.f32 %v579_v19 }
  0xd6   : > { %v903_v17 = vpop.eup %902 }
  0xd7   : > { %599 = vrot.lane.b32.xlu0 %v903_v17, %s916_s18  ;;  %v905_v20 = vpop.eup %904 }
  0xd8   : > { %v840_v21 = vadd.f32 -1.0, %v905_v20  ;;  %v907_v24 = vpop.eup %906 }
  0xd9   : > { %v841_v27 = vadd.f32 -1.0, %v907_v24 }
  0xda   : > { %v583_v23 = vsel %vm575_vm1, %v571_v2, %v840_v21 }
  0xdb   : > { %v584_v28 = vsel %vm576_vm3, %v573_v9, %v841_v27 }
 0x141   : > { %v598_v22 = vpop.permute.xlu0 %597 }
 0x142   : > { %v603_v25 = vmul.f32 %v598_v22, %v583_v23 }
 0x144   : > { %v605_v26 = vpack.c.bf16 %v603_v25, %v603_v25 }
 0x146   : > { %608 = vst.msk [vmem:[%s175_s13] sm:$0xf] %vm607_vm2, %v605_v26 }
 0x149   : > { %v600_v29 = vpop.permute.xlu0 %599 }
 0x14a   : > { %v604_v30 = vmul.f32 %v600_v29, %v584_v28 }
 0x14c   : > { %v606_v31 = vpack.c.bf16 %v604_v30, %v604_v30 }
 0x14e   : > { %609 = vst.msk [vmem:[%s175_s13 + $0x4] sm:$0xf] %vm607_vm2, %v606_v31 }
 0x14f PF: > { %s13_s12 = sadd.s32 1, %s914_s12  }
 0x150   : > { %p10_p4 = scmp.ge.s32.totalorder %s13_s12, 4  }
 0x152   :  { %12 = sbr.rel (!%p10_p4) target bundleno = 1 (0x1), region = 62 }

</bundles_post_ra>
